<compile_context>
chip_gen: v5e
topology: v5e:2x2
jax: 0.10.0
libtpu: 0.0.40
codegen_flags: <defaults>
</compile_context>

<pallas_src>
import jax
import jax.numpy as jnp
import numpy as np
from jax.experimental import pallas as pl
from jax.experimental.pallas import tpu as pltpu

NEG_SLOPE = 0.05


# ---------------------------------------------------------------------------
# Host-side constant builders (pure numpy; run once in the factory)
# ---------------------------------------------------------------------------
def _shift_mat(L, s):
    # (x @ S)[l] = x[l + s] with zero fill outside [0, L)
    m = np.arange(L)[:, None]
    l = np.arange(L)[None, :]
    j = l + s
    return ((m == j) & (j >= 0) & (j < L)).astype(np.float32)


def _fused_up_shift(l_in, l_out, k, pad_left):
    # A[m, l] = 1 iff tap-k of the conv (on the x2-upsampled, zero-padded signal)
    # at output position l reads element m of the PRE-upsample signal (length l_in):
    # j = l + k - pad_left; valid iff 0 <= j < 2*l_in; pre-upsample index = j // 2.
    m = np.arange(l_in)[:, None]
    l = np.arange(l_out)[None, :]
    j = l + k - pad_left
    valid = (j >= 0) & (j < 2 * l_in)
    return (((j // 2) == m) & valid).astype(np.float32)


def _build_constants(params, b_tile):
    """All kernel constants, built once on host, returned as device arrays."""
    (w_dense, b_dense, w_lin, b_lin,
     cw1, cb1, cw2, cb2, cw3, cb3, cw4, cb4) = [np.asarray(p, np.float32)
                                                for p in params]
    bf, f32 = jnp.bfloat16, jnp.float32
    eye = np.eye(b_tile, dtype=np.float32)

    def kron_taps_cat(w):
        # (Co, Ci, K) -> (b_tile*Co, K*b_tile*Ci): taps stacked on the contraction axis
        return np.concatenate(
            [np.kron(eye, w[:, :, k]) for k in range(w.shape[2])], axis=1)

    def bias_rows(b):
        # (Co,) -> (b_tile*Co, 1), batch-major rows
        return np.tile(b, b_tile)[:, None]

    # conv1: no preceding upsample; tap0 = identity (no matmul), tap1 = shift-by-1
    s16 = _shift_mat(16, 1)
    # conv2: upsample 16->32 fused, k=2, 'same' => pad (0, 1)
    a2 = np.stack([_fused_up_shift(16, 32, k, 0) for k in range(2)])
    # conv3: upsample 32->64 fused, k=3, 'same' => pad (1, 1)
    a3 = np.stack([_fused_up_shift(32, 64, k, 1) for k in range(3)])
    # conv4: upsample 64->128 fused, k=4, 'valid'
    a4 = np.stack([_fused_up_shift(64, 128, k, 0) for k in range(4)])

    return (
        jnp.asarray(w_dense.T, bf), jnp.asarray(b_dense[None, :], f32),
        jnp.asarray(w_lin.T, bf), jnp.asarray(b_lin[None, :], f32),
        jnp.asarray(s16, bf),
        jnp.asarray(kron_taps_cat(cw1), bf), jnp.asarray(bias_rows(cb1), f32),
        jnp.asarray(a2, bf),
        jnp.asarray(kron_taps_cat(cw2), bf), jnp.asarray(bias_rows(cb2), f32),
        jnp.asarray(a3, bf),
        jnp.asarray(kron_taps_cat(cw3), bf), jnp.asarray(bias_rows(cb3), f32),
        jnp.asarray(a4, bf),
        jnp.asarray(kron_taps_cat(cw4), bf), jnp.asarray(bias_rows(cb4), f32),
    )


# ---------------------------------------------------------------------------
# Pallas kernel: one batch tile (b_tile samples) per grid step.
# Activations live in (b_tile * channels, length) layout throughout.
# ---------------------------------------------------------------------------
def _leaky(x):
    return jnp.where(x >= 0, x, NEG_SLOPE * x)


def str_model_kernel(x_ref, w1t_ref, b1_ref, w2t_ref, b2_ref,
                     s16_ref, q1_ref, cb1_ref,
                     a2_ref, q2_ref, cb2_ref,
                     a3_ref, q3_ref, cb3_ref,
                     a4_ref, q4_ref, cb4_ref,
                     o_ref):
    bf = jnp.bfloat16

    def mm(a, b):
        return jnp.dot(a, b, preferred_element_type=jnp.float32)

    # Dense(13 -> 16) + LeakyReLU, Linear(16 -> 16) + LeakyReLU (batched over tile)
    h = _leaky(mm(x_ref[...].astype(bf), w1t_ref[...]) + b1_ref[...])     # (Bt, 16) f32
    h = _leaky(mm(h.astype(bf), w2t_ref[...]) + b2_ref[...])              # (Bt, 16) f32

    # Conv1d(1 -> 8, k=2, 'same'): tap0 = identity, tap1 = precomputed shift.
    # Taps stacked along the contraction axis -> one channel matmul.
    t0 = h.astype(bf)
    z1 = jnp.concatenate([h, mm(t0, s16_ref[...])], axis=0).astype(bf)    # (2*Bt, 16)
    t1 = _leaky(mm(q1_ref[...], z1) + cb1_ref[...])                       # (Bt*8, 16) f32

    # Upsample x2 fused into Conv1d(8 -> 16, k=2, 'same'); taps K-stacked.
    t1b = t1.astype(bf)
    z2 = jnp.concatenate([mm(t1b, a2_ref[k]) for k in range(2)],
                         axis=0).astype(bf)                               # (2*Bt*8, 32)
    t2 = _leaky(mm(q2_ref[...], z2) + cb2_ref[...])                       # (Bt*16, 32) f32

    # Upsample x2 fused into Conv1d(16 -> 32, k=3, 'same'); taps K-stacked.
    t2b = t2.astype(bf)
    z3 = jnp.concatenate([mm(t2b, a3_ref[k]) for k in range(3)],
                         axis=0).astype(bf)                               # (3*Bt*16, 64)
    t3 = _leaky(mm(q3_ref[...], z3) + cb3_ref[...])                       # (Bt*32, 64) f32

    # Upsample x2 fused into Conv1d(32 -> 64, k=4, 'valid'); taps K-stacked.
    # One channel matmul with K = 4*Bt*32; lanes 125..127 hold partial-tap values
    # and are sliced off outside the kernel (never inside -> no masked stores).
    t3b = t3.astype(bf)
    z4 = jnp.concatenate([mm(t3b, a4_ref[k]) for k in range(4)],
                         axis=0).astype(bf)                               # (4*Bt*32, 128)
    h4 = _leaky(mm(q4_ref[...], z4) + cb4_ref[...])                       # (Bt*64, 128) f32

    # Lane-dense bf16 store; (Bt*64,128) -> (Bt,64,128) is tile-aligned (free).
    o_ref[...] = h4.astype(o_ref.dtype).reshape(o_ref.shape)


# ---------------------------------------------------------------------------
# Factory: build constants once, return jitted forward functions
# ---------------------------------------------------------------------------
def _tile_flops(bt):
    f = 2 * bt * 13 * 16                       # dense
    f += 2 * bt * 16 * 16                      # linear
    f += 2 * bt * 16 * 16                      # conv1 shift
    f += 2 * (bt * 8) * (2 * bt) * 16          # conv1 channel
    f += 2 * 2 * (bt * 8) * 16 * 32            # conv2 lane (2 taps)
    f += 2 * (bt * 16) * (2 * bt * 8) * 32     # conv2 channel
    f += 3 * 2 * (bt * 16) * 32 * 64           # conv3 lane (3 taps)
    f += 2 * (bt * 32) * (3 * bt * 16) * 64    # conv3 channel
    f += 4 * 2 * (bt * 32) * 64 * 128          # conv4 lane (4 taps)
    f += 2 * (bt * 64) * (4 * bt * 32) * 128   # conv4 channel
    return int(f)


def _pick_b_tile(batch, max_tile=16):
    # Larger tiles amortize per-step overhead and fatten the kron'd matmuls, but
    # keep >= 2 grid steps so the "parallel" axis can shard across v7x's 2 TCs.
    bt = max_tile
    while bt > 8 and pl.cdiv(batch, bt) < 2:
        bt //= 2
    return bt


def make_str_model_forward(params, b_tile=16):
    consts = _build_constants(params, b_tile)          # built ONCE, reused per call
    const_bytes = sum(int(c.size) * c.dtype.itemsize for c in consts)
    # Inputs are double-buffered by the pipeline; leave headroom for activations,
    # the output block and compiler scratch. Stays within v7x's 64 MiB VMEM.
    vmem_limit = int(min(2 * const_bytes + (16 << 20), 64 << 20))

    def _const_spec(a):
        zeros = (0,) * a.ndim
        return pl.BlockSpec(a.shape, lambda i, _z=zeros: _z)

    def _padded(x):
        B = x.shape[0]
        n_tiles = pl.cdiv(B, b_tile)
        Bp = n_tiles * b_tile
        xp = x.astype(jnp.float32)
        if Bp != B:
            xp = jnp.pad(xp, ((0, Bp - B), (0, 0)))

        in_specs = [pl.BlockSpec((b_tile, 13), lambda i: (i, 0))]
        in_specs += [_const_spec(c) for c in consts]
        out_specs = pl.BlockSpec((b_tile, 64, 128), lambda i: (i, 0, 0))

        bytes_accessed = int(xp.size) * 4 + const_bytes + Bp * 64 * 128 * 2
        cost = pl.CostEstimate(flops=_tile_flops(b_tile) * n_tiles,
                               transcendentals=0,
                               bytes_accessed=int(bytes_accessed))

        return pl.pallas_call(
            str_model_kernel,
            out_shape=jax.ShapeDtypeStruct((Bp, 64, 128), jnp.bfloat16),
            grid=(n_tiles,),
            in_specs=in_specs,
            out_specs=out_specs,
            compiler_params=pltpu.CompilerParams(
                dimension_semantics=("parallel",),
                vmem_limit_bytes=vmem_limit),
            cost_estimate=cost,
        )(xp, *consts)

    # Fast path: padded, lane-dense bf16 output (consumer must ignore lanes 125..127).
    forward_padded = jax.jit(_padded)

    # Drop-in path with the PyTorch module's semantics: (B, 64, 125) float32.
    forward = jax.jit(
        lambda x: _padded(x)[:x.shape[0], :, :125].astype(jnp.float32))

    return forward, forward_padded


# ---------------------------------------------------------------------------
# Deterministic parameter init (PyTorch layouts & uniform bounds; synthetic)
# ---------------------------------------------------------------------------
def init_params(key):
    ks = jax.random.split(key, 12)

    def uni(k, shape, fan_in):
        b = 1.0 / (fan_in ** 0.5)
        return jax.random.uniform(k, shape, jnp.float32, -b, b)

    w_dense = uni(ks[0], (16, 13), 13);      b_dense = uni(ks[1], (16,), 13)
    w_lin = uni(ks[2], (16, 16), 16);        b_lin = uni(ks[3], (16,), 16)
    cw1 = uni(ks[4], (8, 1, 2), 1 * 2);      cb1 = uni(ks[5], (8,), 1 * 2)
    cw2 = uni(ks[6], (16, 8, 2), 8 * 2);     cb2 = uni(ks[7], (16,), 8 * 2)
    cw3 = uni(ks[8], (32, 16, 3), 16 * 3);   cb3 = uni(ks[9], (32,), 16 * 3)
    cw4 = uni(ks[10], (64, 32, 4), 32 * 4);  cb4 = uni(ks[11], (64,), 32 * 4)
    return (w_dense, b_dense, w_lin, b_lin,
            cw1, cb1, cw2, cb2, cw3, cb3, cw4, cb4)


# ---------------------------------------------------------------------------
# Pure-JAX f32 reference mirroring the PyTorch module
# ---------------------------------------------------------------------------
def reference_forward(x, params):
    (w_dense, b_dense, w_lin, b_lin,
     cw1, cb1, cw2, cb2, cw3, cb3, cw4, cb4) = params

    def leaky(v):
        return jnp.where(v >= 0, v, NEG_SLOPE * v)

    def conv1d(h, w, b, pad_left, pad_right):
        # h: (B, Ci, L); w: (Co, Ci, K) -- PyTorch cross-correlation
        K = w.shape[2]
        hp = jnp.pad(h, ((0, 0), (0, 0), (pad_left, pad_right)))
        Lout = hp.shape[-1] - K + 1
        out = jnp.zeros((h.shape[0], w.shape[0], Lout), jnp.float32)
        for k in range(K):
            out = out + jnp.einsum('bcl,oc->bol', hp[:, :, k:k + Lout], w[:, :, k])
        return out + b.reshape(1, -1, 1)

    def up2(h):
        return jnp.repeat(h, 2, axis=-1)

    h = leaky(x @ w_dense.T + b_dense)                 # (B, 16)
    h = h[:, None, :]                                  # (B, 1, 16)
    h = leaky(h @ w_lin.T + b_lin)                     # (B, 1, 16)
    h = conv1d(h, cw1, cb1, 0, 1); h = leaky(up2(h))   # (B, 8, 32)
    h = conv1d(h, cw2, cb2, 0, 1); h = leaky(up2(h))   # (B, 16, 64)
    h = conv1d(h, cw3, cb3, 1, 1); h = leaky(up2(h))   # (B, 32, 128)
    h = conv1d(h, cw4, cb4, 0, 0); h = leaky(h)        # (B, 64, 125)
    return h


if __name__ == "__main__":
    key = jax.random.PRNGKey(0)
    kx, kp = jax.random.split(key)
    B = 16
    x = jax.random.normal(kx, (B, 13), jnp.float32)
    params = init_params(kp)

    b_tile = _pick_b_tile(B)   # 8 for B=16 -> 2 grid steps (v7x megacore friendly)
    forward, forward_padded = make_str_model_forward(params, b_tile=b_tile)

    out = forward(x)
    out = jax.block_until_ready(out)
    assert out.shape == (B, 64, 125), out.shape

    ref = reference_forward(x, params)
    err = float(jnp.max(jnp.abs(out - ref)))
    assert err < 5e-2, f"max abs err {err}"
    print("KERNEL_OK")
</pallas_src>

<mosaic_0001>
module attributes {stable_mosaic.version = 11 : i64} {
  func.func @str_model_kernel(%arg0: i32, %arg1: memref<8x13xf32, #tpu.memory_space<vmem>>, %arg2: memref<13x16xbf16, #tpu.memory_space<vmem>>, %arg3: memref<1x16xf32, #tpu.memory_space<vmem>>, %arg4: memref<16x16xbf16, #tpu.memory_space<vmem>>, %arg5: memref<1x16xf32, #tpu.memory_space<vmem>>, %arg6: memref<16x16xbf16, #tpu.memory_space<vmem>>, %arg7: memref<64x16xbf16, #tpu.memory_space<vmem>>, %arg8: memref<64x1xf32, #tpu.memory_space<vmem>>, %arg9: memref<2x16x32xbf16, #tpu.memory_space<vmem>>, %arg10: memref<128x128xbf16, #tpu.memory_space<vmem>>, %arg11: memref<128x1xf32, #tpu.memory_space<vmem>>, %arg12: memref<3x32x64xbf16, #tpu.memory_space<vmem>>, %arg13: memref<256x384xbf16, #tpu.memory_space<vmem>>, %arg14: memref<256x1xf32, #tpu.memory_space<vmem>>, %arg15: memref<4x64x128xbf16, #tpu.memory_space<vmem>>, %arg16: memref<512x1024xbf16, #tpu.memory_space<vmem>>, %arg17: memref<512x1xf32, #tpu.memory_space<vmem>>, %arg18: memref<8x64x128xbf16, #tpu.memory_space<vmem>>) attributes {dimension_semantics = [#tpu.dimension_semantics<parallel>], iteration_bounds = array<i64: 2>, scalar_prefetch = 0 : i64, scratch_operands = 0 : i64, tpu.core_type = #tpu.core_type<tc>, window_params = [{transform_indices = @transform_0, window_bounds = array<i64: 8, 13>}, {pipeline_mode = #tpu.pipeline_mode<synchronous>, transform_indices = @transform_1, window_bounds = array<i64: 13, 16>}, {pipeline_mode = #tpu.pipeline_mode<synchronous>, transform_indices = @transform_2, window_bounds = array<i64: 1, 16>}, {pipeline_mode = #tpu.pipeline_mode<synchronous>, transform_indices = @transform_3, window_bounds = array<i64: 16, 16>}, {pipeline_mode = #tpu.pipeline_mode<synchronous>, transform_indices = @transform_4, window_bounds = array<i64: 1, 16>}, {pipeline_mode = #tpu.pipeline_mode<synchronous>, transform_indices = @transform_5, window_bounds = array<i64: 16, 16>}, {pipeline_mode = #tpu.pipeline_mode<synchronous>, transform_indices = @transform_6, window_bounds = array<i64: 64, 16>}, {pipeline_mode = #tpu.pipeline_mode<synchronous>, transform_indices = @transform_7, window_bounds = array<i64: 64, 1>}, {pipeline_mode = #tpu.pipeline_mode<synchronous>, transform_indices = @transform_8, window_bounds = array<i64: 2, 16, 32>}, {pipeline_mode = #tpu.pipeline_mode<synchronous>, transform_indices = @transform_9, window_bounds = array<i64: 128, 128>}, {pipeline_mode = #tpu.pipeline_mode<synchronous>, transform_indices = @transform_10, window_bounds = array<i64: 128, 1>}, {pipeline_mode = #tpu.pipeline_mode<synchronous>, transform_indices = @transform_11, window_bounds = array<i64: 3, 32, 64>}, {pipeline_mode = #tpu.pipeline_mode<synchronous>, transform_indices = @transform_12, window_bounds = array<i64: 256, 384>}, {pipeline_mode = #tpu.pipeline_mode<synchronous>, transform_indices = @transform_13, window_bounds = array<i64: 256, 1>}, {pipeline_mode = #tpu.pipeline_mode<synchronous>, transform_indices = @transform_14, window_bounds = array<i64: 4, 64, 128>}, {pipeline_mode = #tpu.pipeline_mode<synchronous>, transform_indices = @transform_15, window_bounds = array<i64: 512, 1024>}, {pipeline_mode = #tpu.pipeline_mode<synchronous>, transform_indices = @transform_16, window_bounds = array<i64: 512, 1>}, {transform_indices = @transform_17, window_bounds = array<i64: 8, 64, 128>}]} {
    %c0 = arith.constant 0 : index
    %c0_0 = arith.constant 0 : index
    %0 = vector.load %arg1[%c0, %c0_0] : memref<8x13xf32, #tpu.memory_space<vmem>>, vector<8x13xf32>
    %1 = arith.truncf %0 : vector<8x13xf32> to vector<8x13xbf16>
    %c0_1 = arith.constant 0 : index
    %c0_2 = arith.constant 0 : index
    %2 = vector.load %arg2[%c0_1, %c0_2] : memref<13x16xbf16, #tpu.memory_space<vmem>>, vector<13x16xbf16>
    %cst = arith.constant dense<0.000000e+00> : vector<8x16xf32>
    %3 = tpu.matmul %1, %2, %cst {dimension_numbers = #tpu.dot_dimension_numbers<[1], [0], [0], [1], [0, 0, 1, 1], [], []>} : vector<8x13xbf16>, vector<13x16xbf16>, vector<8x16xf32> -> vector<8x16xf32>
    %c0_3 = arith.constant 0 : index
    %c0_4 = arith.constant 0 : index
    %4 = vector.load %arg3[%c0_3, %c0_4] : memref<1x16xf32, #tpu.memory_space<vmem>>, vector<1x16xf32>
    %5 = vector.broadcast %4 : vector<1x16xf32> to vector<8x16xf32>
    %6 = arith.addf %3, %5 : vector<8x16xf32>
    %cst_5 = arith.constant 0.000000e+00 : f32
    %7 = vector.broadcast %cst_5 : f32 to vector<8x16xf32>
    %8 = arith.cmpf oge, %6, %7 : vector<8x16xf32>
    %cst_6 = arith.constant 5.000000e-02 : f32
    %9 = vector.broadcast %cst_6 : f32 to vector<8x16xf32>
    %10 = arith.mulf %9, %6 : vector<8x16xf32>
    %11 = arith.select %8, %6, %10 : vector<8x16xi1>, vector<8x16xf32>
    %12 = arith.truncf %11 : vector<8x16xf32> to vector<8x16xbf16>
    %c0_7 = arith.constant 0 : index
    %c0_8 = arith.constant 0 : index
    %13 = vector.load %arg4[%c0_7, %c0_8] : memref<16x16xbf16, #tpu.memory_space<vmem>>, vector<16x16xbf16>
    %cst_9 = arith.constant dense<0.000000e+00> : vector<8x16xf32>
    %14 = tpu.matmul %12, %13, %cst_9 {dimension_numbers = #tpu.dot_dimension_numbers<[1], [0], [0], [1], [0, 0, 1, 1], [], []>} : vector<8x16xbf16>, vector<16x16xbf16>, vector<8x16xf32> -> vector<8x16xf32>
    %c0_10 = arith.constant 0 : index
    %c0_11 = arith.constant 0 : index
    %15 = vector.load %arg5[%c0_10, %c0_11] : memref<1x16xf32, #tpu.memory_space<vmem>>, vector<1x16xf32>
    %16 = vector.broadcast %15 : vector<1x16xf32> to vector<8x16xf32>
    %17 = arith.addf %14, %16 : vector<8x16xf32>
    %cst_12 = arith.constant 0.000000e+00 : f32
    %18 = vector.broadcast %cst_12 : f32 to vector<8x16xf32>
    %19 = arith.cmpf oge, %17, %18 : vector<8x16xf32>
    %cst_13 = arith.constant 5.000000e-02 : f32
    %20 = vector.broadcast %cst_13 : f32 to vector<8x16xf32>
    %21 = arith.mulf %20, %17 : vector<8x16xf32>
    %22 = arith.select %19, %17, %21 : vector<8x16xi1>, vector<8x16xf32>
    %23 = arith.truncf %22 : vector<8x16xf32> to vector<8x16xbf16>
    %c0_14 = arith.constant 0 : index
    %c0_15 = arith.constant 0 : index
    %24 = vector.load %arg6[%c0_14, %c0_15] : memref<16x16xbf16, #tpu.memory_space<vmem>>, vector<16x16xbf16>
    %cst_16 = arith.constant dense<0.000000e+00> : vector<8x16xf32>
    %25 = tpu.matmul %23, %24, %cst_16 {dimension_numbers = #tpu.dot_dimension_numbers<[1], [0], [0], [1], [0, 0, 1, 1], [], []>} : vector<8x16xbf16>, vector<16x16xbf16>, vector<8x16xf32> -> vector<8x16xf32>
    %26 = tpu.concatenate %22, %25 in 0 : vector<8x16xf32>, vector<8x16xf32> -> vector<16x16xf32>
    %27 = arith.truncf %26 : vector<16x16xf32> to vector<16x16xbf16>
    %c0_17 = arith.constant 0 : index
    %c0_18 = arith.constant 0 : index
    %28 = vector.load %arg7[%c0_17, %c0_18] : memref<64x16xbf16, #tpu.memory_space<vmem>>, vector<64x16xbf16>
    %cst_19 = arith.constant dense<0.000000e+00> : vector<64x16xf32>
    %29 = tpu.matmul %28, %27, %cst_19 {dimension_numbers = #tpu.dot_dimension_numbers<[1], [0], [0], [1], [0, 0, 1, 1], [], []>} : vector<64x16xbf16>, vector<16x16xbf16>, vector<64x16xf32> -> vector<64x16xf32>
    %c0_20 = arith.constant 0 : index
    %c0_21 = arith.constant 0 : index
    %30 = vector.load %arg8[%c0_20, %c0_21] : memref<64x1xf32, #tpu.memory_space<vmem>>, vector<64x1xf32>
    %31 = vector.broadcast %30 : vector<64x1xf32> to vector<64x16xf32>
    %32 = arith.addf %29, %31 : vector<64x16xf32>
    %cst_22 = arith.constant 0.000000e+00 : f32
    %33 = vector.broadcast %cst_22 : f32 to vector<64x16xf32>
    %34 = arith.cmpf oge, %32, %33 : vector<64x16xf32>
    %cst_23 = arith.constant 5.000000e-02 : f32
    %35 = vector.broadcast %cst_23 : f32 to vector<64x16xf32>
    %36 = arith.mulf %35, %32 : vector<64x16xf32>
    %37 = arith.select %34, %32, %36 : vector<64x16xi1>, vector<64x16xf32>
    %38 = arith.truncf %37 : vector<64x16xf32> to vector<64x16xbf16>
    %c0_24 = arith.constant 0 : index
    %c0_25 = arith.constant 0 : index
    %c0_26 = arith.constant 0 : index
    %39 = vector.load %arg9[%c0_24, %c0_25, %c0_26] : memref<2x16x32xbf16, #tpu.memory_space<vmem>>, vector<1x16x32xbf16>
    %40 = vector.shape_cast %39 : vector<1x16x32xbf16> to vector<16x32xbf16>
    %cst_27 = arith.constant dense<0.000000e+00> : vector<64x32xf32>
    %41 = tpu.matmul %38, %40, %cst_27 {dimension_numbers = #tpu.dot_dimension_numbers<[1], [0], [0], [1], [0, 0, 1, 1], [], []>} : vector<64x16xbf16>, vector<16x32xbf16>, vector<64x32xf32> -> vector<64x32xf32>
    %c1 = arith.constant 1 : index
    %c0_28 = arith.constant 0 : index
    %c0_29 = arith.constant 0 : index
    %42 = vector.load %arg9[%c1, %c0_28, %c0_29] : memref<2x16x32xbf16, #tpu.memory_space<vmem>>, vector<1x16x32xbf16>
    %43 = vector.shape_cast %42 : vector<1x16x32xbf16> to vector<16x32xbf16>
    %cst_30 = arith.constant dense<0.000000e+00> : vector<64x32xf32>
    %44 = tpu.matmul %38, %43, %cst_30 {dimension_numbers = #tpu.dot_dimension_numbers<[1], [0], [0], [1], [0, 0, 1, 1], [], []>} : vector<64x16xbf16>, vector<16x32xbf16>, vector<64x32xf32> -> vector<64x32xf32>
    %45 = tpu.concatenate %41, %44 in 0 : vector<64x32xf32>, vector<64x32xf32> -> vector<128x32xf32>
    %46 = arith.truncf %45 : vector<128x32xf32> to vector<128x32xbf16>
    %c0_31 = arith.constant 0 : index
    %c0_32 = arith.constant 0 : index
    %47 = vector.load %arg10[%c0_31, %c0_32] : memref<128x128xbf16, #tpu.memory_space<vmem>>, vector<128x128xbf16>
    %cst_33 = arith.constant dense<0.000000e+00> : vector<128x32xf32>
    %48 = tpu.matmul %47, %46, %cst_33 {dimension_numbers = #tpu.dot_dimension_numbers<[1], [0], [0], [1], [0, 0, 1, 1], [], []>} : vector<128x128xbf16>, vector<128x32xbf16>, vector<128x32xf32> -> vector<128x32xf32>
    %c0_34 = arith.constant 0 : index
    %c0_35 = arith.constant 0 : index
    %49 = vector.load %arg11[%c0_34, %c0_35] : memref<128x1xf32, #tpu.memory_space<vmem>>, vector<128x1xf32>
    %50 = vector.broadcast %49 : vector<128x1xf32> to vector<128x32xf32>
    %51 = arith.addf %48, %50 : vector<128x32xf32>
    %cst_36 = arith.constant 0.000000e+00 : f32
    %52 = vector.broadcast %cst_36 : f32 to vector<128x32xf32>
    %53 = arith.cmpf oge, %51, %52 : vector<128x32xf32>
    %cst_37 = arith.constant 5.000000e-02 : f32
    %54 = vector.broadcast %cst_37 : f32 to vector<128x32xf32>
    %55 = arith.mulf %54, %51 : vector<128x32xf32>
    %56 = arith.select %53, %51, %55 : vector<128x32xi1>, vector<128x32xf32>
    %57 = arith.truncf %56 : vector<128x32xf32> to vector<128x32xbf16>
    %c0_38 = arith.constant 0 : index
    %c0_39 = arith.constant 0 : index
    %c0_40 = arith.constant 0 : index
    %58 = vector.load %arg12[%c0_38, %c0_39, %c0_40] : memref<3x32x64xbf16, #tpu.memory_space<vmem>>, vector<1x32x64xbf16>
    %59 = vector.shape_cast %58 : vector<1x32x64xbf16> to vector<32x64xbf16>
    %cst_41 = arith.constant dense<0.000000e+00> : vector<128x64xf32>
    %60 = tpu.matmul %57, %59, %cst_41 {dimension_numbers = #tpu.dot_dimension_numbers<[1], [0], [0], [1], [0, 0, 1, 1], [], []>} : vector<128x32xbf16>, vector<32x64xbf16>, vector<128x64xf32> -> vector<128x64xf32>
    %c1_42 = arith.constant 1 : index
    %c0_43 = arith.constant 0 : index
    %c0_44 = arith.constant 0 : index
    %61 = vector.load %arg12[%c1_42, %c0_43, %c0_44] : memref<3x32x64xbf16, #tpu.memory_space<vmem>>, vector<1x32x64xbf16>
    %62 = vector.shape_cast %61 : vector<1x32x64xbf16> to vector<32x64xbf16>
    %cst_45 = arith.constant dense<0.000000e+00> : vector<128x64xf32>
    %63 = tpu.matmul %57, %62, %cst_45 {dimension_numbers = #tpu.dot_dimension_numbers<[1], [0], [0], [1], [0, 0, 1, 1], [], []>} : vector<128x32xbf16>, vector<32x64xbf16>, vector<128x64xf32> -> vector<128x64xf32>
    %c2 = arith.constant 2 : index
    %c0_46 = arith.constant 0 : index
    %c0_47 = arith.constant 0 : index
    %64 = vector.load %arg12[%c2, %c0_46, %c0_47] : memref<3x32x64xbf16, #tpu.memory_space<vmem>>, vector<1x32x64xbf16>
    %65 = vector.shape_cast %64 : vector<1x32x64xbf16> to vector<32x64xbf16>
    %cst_48 = arith.constant dense<0.000000e+00> : vector<128x64xf32>
    %66 = tpu.matmul %57, %65, %cst_48 {dimension_numbers = #tpu.dot_dimension_numbers<[1], [0], [0], [1], [0, 0, 1, 1], [], []>} : vector<128x32xbf16>, vector<32x64xbf16>, vector<128x64xf32> -> vector<128x64xf32>
    %67 = tpu.concatenate %60, %63, %66 in 0 : vector<128x64xf32>, vector<128x64xf32>, vector<128x64xf32> -> vector<384x64xf32>
    %68 = arith.truncf %67 : vector<384x64xf32> to vector<384x64xbf16>
    %c0_49 = arith.constant 0 : index
    %c0_50 = arith.constant 0 : index
    %69 = vector.load %arg13[%c0_49, %c0_50] : memref<256x384xbf16, #tpu.memory_space<vmem>>, vector<256x384xbf16>
    %cst_51 = arith.constant dense<0.000000e+00> : vector<256x64xf32>
    %70 = tpu.matmul %69, %68, %cst_51 {dimension_numbers = #tpu.dot_dimension_numbers<[1], [0], [0], [1], [0, 0, 1, 1], [], []>} : vector<256x384xbf16>, vector<384x64xbf16>, vector<256x64xf32> -> vector<256x64xf32>
    %c0_52 = arith.constant 0 : index
    %c0_53 = arith.constant 0 : index
    %71 = vector.load %arg14[%c0_52, %c0_53] : memref<256x1xf32, #tpu.memory_space<vmem>>, vector<256x1xf32>
    %72 = vector.broadcast %71 : vector<256x1xf32> to vector<256x64xf32>
    %73 = arith.addf %70, %72 : vector<256x64xf32>
    %cst_54 = arith.constant 0.000000e+00 : f32
    %74 = vector.broadcast %cst_54 : f32 to vector<256x64xf32>
    %75 = arith.cmpf oge, %73, %74 : vector<256x64xf32>
    %cst_55 = arith.constant 5.000000e-02 : f32
    %76 = vector.broadcast %cst_55 : f32 to vector<256x64xf32>
    %77 = arith.mulf %76, %73 : vector<256x64xf32>
    %78 = arith.select %75, %73, %77 : vector<256x64xi1>, vector<256x64xf32>
    %79 = arith.truncf %78 : vector<256x64xf32> to vector<256x64xbf16>
    %c0_56 = arith.constant 0 : index
    %c0_57 = arith.constant 0 : index
    %c0_58 = arith.constant 0 : index
    %80 = vector.load %arg15[%c0_56, %c0_57, %c0_58] : memref<4x64x128xbf16, #tpu.memory_space<vmem>>, vector<1x64x128xbf16>
    %81 = vector.shape_cast %80 : vector<1x64x128xbf16> to vector<64x128xbf16>
    %cst_59 = arith.constant dense<0.000000e+00> : vector<256x128xf32>
    %82 = tpu.matmul %79, %81, %cst_59 {dimension_numbers = #tpu.dot_dimension_numbers<[1], [0], [0], [1], [0, 0, 1, 1], [], []>} : vector<256x64xbf16>, vector<64x128xbf16>, vector<256x128xf32> -> vector<256x128xf32>
    %c1_60 = arith.constant 1 : index
    %c0_61 = arith.constant 0 : index
    %c0_62 = arith.constant 0 : index
    %83 = vector.load %arg15[%c1_60, %c0_61, %c0_62] : memref<4x64x128xbf16, #tpu.memory_space<vmem>>, vector<1x64x128xbf16>
    %84 = vector.shape_cast %83 : vector<1x64x128xbf16> to vector<64x128xbf16>
    %cst_63 = arith.constant dense<0.000000e+00> : vector<256x128xf32>
    %85 = tpu.matmul %79, %84, %cst_63 {dimension_numbers = #tpu.dot_dimension_numbers<[1], [0], [0], [1], [0, 0, 1, 1], [], []>} : vector<256x64xbf16>, vector<64x128xbf16>, vector<256x128xf32> -> vector<256x128xf32>
    %c2_64 = arith.constant 2 : index
    %c0_65 = arith.constant 0 : index
    %c0_66 = arith.constant 0 : index
    %86 = vector.load %arg15[%c2_64, %c0_65, %c0_66] : memref<4x64x128xbf16, #tpu.memory_space<vmem>>, vector<1x64x128xbf16>
    %87 = vector.shape_cast %86 : vector<1x64x128xbf16> to vector<64x128xbf16>
    %cst_67 = arith.constant dense<0.000000e+00> : vector<256x128xf32>
    %88 = tpu.matmul %79, %87, %cst_67 {dimension_numbers = #tpu.dot_dimension_numbers<[1], [0], [0], [1], [0, 0, 1, 1], [], []>} : vector<256x64xbf16>, vector<64x128xbf16>, vector<256x128xf32> -> vector<256x128xf32>
    %c3 = arith.constant 3 : index
    %c0_68 = arith.constant 0 : index
    %c0_69 = arith.constant 0 : index
    %89 = vector.load %arg15[%c3, %c0_68, %c0_69] : memref<4x64x128xbf16, #tpu.memory_space<vmem>>, vector<1x64x128xbf16>
    %90 = vector.shape_cast %89 : vector<1x64x128xbf16> to vector<64x128xbf16>
    %cst_70 = arith.constant dense<0.000000e+00> : vector<256x128xf32>
    %91 = tpu.matmul %79, %90, %cst_70 {dimension_numbers = #tpu.dot_dimension_numbers<[1], [0], [0], [1], [0, 0, 1, 1], [], []>} : vector<256x64xbf16>, vector<64x128xbf16>, vector<256x128xf32> -> vector<256x128xf32>
    %92 = tpu.concatenate %82, %85, %88, %91 in 0 : vector<256x128xf32>, vector<256x128xf32>, vector<256x128xf32>, vector<256x128xf32> -> vector<1024x128xf32>
    %93 = arith.truncf %92 : vector<1024x128xf32> to vector<1024x128xbf16>
    %c0_71 = arith.constant 0 : index
    %c0_72 = arith.constant 0 : index
    %94 = vector.load %arg16[%c0_71, %c0_72] : memref<512x1024xbf16, #tpu.memory_space<vmem>>, vector<512x1024xbf16>
    %cst_73 = arith.constant dense<0.000000e+00> : vector<512x128xf32>
    %95 = tpu.matmul %94, %93, %cst_73 {dimension_numbers = #tpu.dot_dimension_numbers<[1], [0], [0], [1], [0, 0, 1, 1], [], []>} : vector<512x1024xbf16>, vector<1024x128xbf16>, vector<512x128xf32> -> vector<512x128xf32>
    %c0_74 = arith.constant 0 : index
    %c0_75 = arith.constant 0 : index
    %96 = vector.load %arg17[%c0_74, %c0_75] : memref<512x1xf32, #tpu.memory_space<vmem>>, vector<512x1xf32>
    %97 = vector.broadcast %96 : vector<512x1xf32> to vector<512x128xf32>
    %98 = arith.addf %95, %97 : vector<512x128xf32>
    %cst_76 = arith.constant 0.000000e+00 : f32
    %99 = vector.broadcast %cst_76 : f32 to vector<512x128xf32>
    %100 = arith.cmpf oge, %98, %99 : vector<512x128xf32>
    %cst_77 = arith.constant 5.000000e-02 : f32
    %101 = vector.broadcast %cst_77 : f32 to vector<512x128xf32>
    %102 = arith.mulf %101, %98 : vector<512x128xf32>
    %103 = arith.select %100, %98, %102 : vector<512x128xi1>, vector<512x128xf32>
    %104 = arith.truncf %103 : vector<512x128xf32> to vector<512x128xbf16>
    %105 = vector.shape_cast %104 : vector<512x128xbf16> to vector<8x64x128xbf16>
    %c0_78 = arith.constant 0 : index
    %c0_79 = arith.constant 0 : index
    %c0_80 = arith.constant 0 : index
    %106 = vector.load %arg18[%c0_78, %c0_79, %c0_80] : memref<8x64x128xbf16, #tpu.memory_space<vmem>>, vector<8x64x128xbf16>
    tpu.vector_store %arg18[%c0_78, %c0_79, %c0_80], %105 {strides = array<i32>} : memref<8x64x128xbf16, #tpu.memory_space<vmem>>, vector<8x64x128xbf16>,
    return
  }
  func.func @transform_0(%arg0: i32) -> (i32, i32) {
    %c0_i32 = arith.constant 0 : i32
    %c0_i32_0 = arith.constant 0 : i32
    return %arg0, %c0_i32 : i32, i32
  }
  func.func @transform_1(%arg0: i32) -> (i32, i32) {
    %c0_i32 = arith.constant 0 : i32
    %c0_i32_0 = arith.constant 0 : i32
    %c0_i32_1 = arith.constant 0 : i32
    return %c0_i32, %c0_i32_0 : i32, i32
  }
  func.func @transform_2(%arg0: i32) -> (i32, i32) {
    %c0_i32 = arith.constant 0 : i32
    %c0_i32_0 = arith.constant 0 : i32
    %c0_i32_1 = arith.constant 0 : i32
    return %c0_i32, %c0_i32_0 : i32, i32
  }
  func.func @transform_3(%arg0: i32) -> (i32, i32) {
    %c0_i32 = arith.constant 0 : i32
    %c0_i32_0 = arith.constant 0 : i32
    %c0_i32_1 = arith.constant 0 : i32
    return %c0_i32, %c0_i32_0 : i32, i32
  }
  func.func @transform_4(%arg0: i32) -> (i32, i32) {
    %c0_i32 = arith.constant 0 : i32
    %c0_i32_0 = arith.constant 0 : i32
    %c0_i32_1 = arith.constant 0 : i32
    return %c0_i32, %c0_i32_0 : i32, i32
  }
  func.func @transform_5(%arg0: i32) -> (i32, i32) {
    %c0_i32 = arith.constant 0 : i32
    %c0_i32_0 = arith.constant 0 : i32
    %c0_i32_1 = arith.constant 0 : i32
    return %c0_i32, %c0_i32_0 : i32, i32
  }
  func.func @transform_6(%arg0: i32) -> (i32, i32) {
    %c0_i32 = arith.constant 0 : i32
    %c0_i32_0 = arith.constant 0 : i32
    %c0_i32_1 = arith.constant 0 : i32
    return %c0_i32, %c0_i32_0 : i32, i32
  }
  func.func @transform_7(%arg0: i32) -> (i32, i32) {
    %c0_i32 = arith.constant 0 : i32
    %c0_i32_0 = arith.constant 0 : i32
    %c0_i32_1 = arith.constant 0 : i32
    return %c0_i32, %c0_i32_0 : i32, i32
  }
  func.func @transform_8(%arg0: i32) -> (i32, i32, i32) {
    %c0_i32 = arith.constant 0 : i32
    %c0_i32_0 = arith.constant 0 : i32
    %c0_i32_1 = arith.constant 0 : i32
    %c0_i32_2 = arith.constant 0 : i32
    return %c0_i32, %c0_i32_0, %c0_i32_1 : i32, i32, i32
  }
  func.func @transform_9(%arg0: i32) -> (i32, i32) {
    %c0_i32 = arith.constant 0 : i32
    %c0_i32_0 = arith.constant 0 : i32
    %c0_i32_1 = arith.constant 0 : i32
    return %c0_i32, %c0_i32_0 : i32, i32
  }
  func.func @transform_10(%arg0: i32) -> (i32, i32) {
    %c0_i32 = arith.constant 0 : i32
    %c0_i32_0 = arith.constant 0 : i32
    %c0_i32_1 = arith.constant 0 : i32
    return %c0_i32, %c0_i32_0 : i32, i32
  }
  func.func @transform_11(%arg0: i32) -> (i32, i32, i32) {
    %c0_i32 = arith.constant 0 : i32
    %c0_i32_0 = arith.constant 0 : i32
    %c0_i32_1 = arith.constant 0 : i32
    %c0_i32_2 = arith.constant 0 : i32
    return %c0_i32, %c0_i32_0, %c0_i32_1 : i32, i32, i32
  }
  func.func @transform_12(%arg0: i32) -> (i32, i32) {
    %c0_i32 = arith.constant 0 : i32
    %c0_i32_0 = arith.constant 0 : i32
    %c0_i32_1 = arith.constant 0 : i32
    return %c0_i32, %c0_i32_0 : i32, i32
  }
  func.func @transform_13(%arg0: i32) -> (i32, i32) {
    %c0_i32 = arith.constant 0 : i32
    %c0_i32_0 = arith.constant 0 : i32
    %c0_i32_1 = arith.constant 0 : i32
    return %c0_i32, %c0_i32_0 : i32, i32
  }
  func.func @transform_14(%arg0: i32) -> (i32, i32, i32) {
    %c0_i32 = arith.constant 0 : i32
    %c0_i32_0 = arith.constant 0 : i32
    %c0_i32_1 = arith.constant 0 : i32
    %c0_i32_2 = arith.constant 0 : i32
    return %c0_i32, %c0_i32_0, %c0_i32_1 : i32, i32, i32
  }
  func.func @transform_15(%arg0: i32) -> (i32, i32) {
    %c0_i32 = arith.constant 0 : i32
    %c0_i32_0 = arith.constant 0 : i32
    %c0_i32_1 = arith.constant 0 : i32
    return %c0_i32, %c0_i32_0 : i32, i32
  }
  func.func @transform_16(%arg0: i32) -> (i32, i32) {
    %c0_i32 = arith.constant 0 : i32
    %c0_i32_0 = arith.constant 0 : i32
    %c0_i32_1 = arith.constant 0 : i32
    return %c0_i32, %c0_i32_0 : i32, i32
  }
  func.func @transform_17(%arg0: i32) -> (i32, i32, i32) {
    %c0_i32 = arith.constant 0 : i32
    %c0_i32_0 = arith.constant 0 : i32
    %c0_i32_1 = arith.constant 0 : i32
    return %arg0, %c0_i32, %c0_i32_0 : i32, i32, i32
  }
}

</mosaic_0001>

<bundles_post_ra>
// kernel: _lambda_.1
= control target key start
LH: loop header
LB: loop body
LE: loop exit
PB: predicated region body
PF: predicated region fallthrough
CT: control target
= control target key end

     0   :  { %s11737_s0 = inlined_call_operand.hbm [shape: f32[16,13], index: 0, kind: input, shape index: {}]   ;;  %s11738_s1 = inlined_call_operand.hbm [shape: bf16[13,16], index: 1, kind: input, shape index: {}]   ;;  %s11739_s2 = inlined_call_operand.hbm [shape: f32[1,16], index: 2, kind: input, shape index: {}]   ;;  %s11740_s3 = inlined_call_operand.hbm [shape: bf16[16,16], index: 3, kind: input, shape index: {}]   ;;  %s11741_s4 = inlined_call_operand.vmem [shape: f32[1,16], index: 4, kind: input, shape index: {}]   ;;  %s11742_s5 = inlined_call_operand.hbm [shape: bf16[16,16], index: 5, kind: input, shape index: {}]   ;;  %s11743_s6 = inlined_call_operand.hbm [shape: bf16[64,16], index: 6, kind: input, shape index: {}]   ;;  %s11744_s7 = inlined_call_operand.hbm [shape: f32[64,1], index: 7, kind: input, shape index: {}]   ;;  %s11745_s8 = inlined_call_operand.hbm [shape: bf16[2,16,32], index: 8, kind: input, shape index: {}]   ;;  %s11746_s9 = inlined_call_operand.hbm [shape: bf16[128,128], index: 9, kind: input, shape index: {}]   ;;  %s11747_s10 = inlined_call_operand.hbm [shape: f32[128,1], index: 10, kind: input, shape index: {}]   ;;  %s11748_s11 = inlined_call_operand.hbm [shape: bf16[3,32,64], index: 11, kind: input, shape index: {}]   ;;  %s11749_s12 = inlined_call_operand.hbm [shape: bf16[256,384], index: 12, kind: input, shape index: {}]   ;;  %s11750_s13 = inlined_call_operand.hbm [shape: f32[256,1], index: 13, kind: input, shape index: {}]   ;;  %s11751_s14 = inlined_call_operand.hbm [shape: bf16[4,64,128], index: 14, kind: input, shape index: {}]   ;;  %s11752_s15 = inlined_call_operand.hbm [shape: bf16[512,1024], index: 15, kind: input, shape index: {}]   ;;  %s11753_s16 = inlined_call_operand.hbm [shape: f32[512,1], index: 16, kind: input, shape index: {}]   ;;  %s11754_s17 = inlined_call_operand.vmem [shape: bf16[16,64,128], index: 17, kind: output, shape index: {}]  }
   0x1   :  { %11767 = sst [smem:[#allocation63_spill]] %s11737_s0 }
   0x2   :  { %11768 = sst [smem:[#allocation64_spill]] %s11738_s1 }
   0x3   :  { %11769 = sst [smem:[#allocation65_spill]] %s11739_s2 }
   0x4   :  { %11770 = sst [smem:[#allocation66_spill]] %s11740_s3 }
   0x5   :  { %11771 = sst [smem:[#allocation67_spill]] %s11741_s4 }
   0x6   :  { %11772 = sst [smem:[#allocation68_spill]] %s11743_s6 }
   0x7   :  { %11773 = sst [smem:[#allocation69_spill]] %s11745_s8 }
   0x8   :  { %11774 = sst [smem:[#allocation70_spill]] %s11753_s16 }
   0x9   :  { %11775 = sst [smem:[#allocation71_spill]] %s11754_s17 }
   0xa   :  { %22 = vsyncpa [#allocation3], 0 }
   0xb   :  { %24 = vsyncpa [#allocation3 + $0x1], 0 }
   0xc   :  { %25 = vsyncpa [#allocation5], 0 }
   0xd   :  { %26 = vsyncpa [#allocation8], 0 }
   0xe   :  { %27 = vsyncpa [#allocation11], 0 }
   0xf   :  { %28 = vsyncpa [#allocation14], 0 }
  0x10   :  { %29 = vsyncpa [#allocation17], 0 }
  0x11   :  { %30 = vsyncpa [#allocation20], 0 }
  0x12   :  { %31 = vsyncpa [#allocation23], 0 }
  0x13   :  { %32 = vsyncpa [#allocation26], 0  ;;  %s9892_s24 = smov 0   ;;  %s9894_s25 = smov 0  }
  0x14   :  { %s9896_s26 = smov 0   ;;  %s9898_s27 = smov 0  }
  0x15 LB: > { %s11776_s0 = sld [smem:[#allocation64_spill]]  ;;  %s11756_s18 = sadd.s32 4294967295, %s9775_s27   ;;  %s9775_s27 = sphi %s9898_s27, %s11880_s27   ;;  %s9771_s26 = sphi %s9896_s26, %s11879_s26   ;;  %s9767_s25 = sphi %s9894_s25, %s11878_s25   ;;  %s9763_s24 = sphi %s9892_s24, %s11877_s24  }
  0x16   : > { %p6965_p0 = scmp.ge.s32.totalorder %s9775_s27, 1  ;;  %p9919_p1 = scmp.eq.s32.totalorder %s11756_s18, 0 }
  0x17   : > { %p431_p2 = scmp.lt.s32.totalorder %s9775_s27, 3  ;;  %s9777_s20 = smov [#allocation4]  }
  0x18   : > { %s444_s21 = sshll.u32 %s9777_s20, 4  ;;  %s11780_s3 = sld [smem:[#allocation66_spill]]  ;;  %s445_s21 = int_to_ptr.vmem [resolvable:$true] %s444_s21 }
  0x19   : > { %p9924_p3 = pnand %p6965_p0, %p431_p2  ;;  %s11782_s6 = sld [smem:[#allocation68_spill]] }
  0x1a   : > { %s9778_s17 = smov [#allocation7]   ;;  %s11760_s16 = smov 4  }
  0x1b   : > { %s442_s30 = sshll.u32 %s11776_s0, 4  ;;  %p9086_p4 = pneg %p9924_p3  ;;  %s443_s30 = int_to_ptr.hbm [resolvable:$true] %s442_s30 }
  0x1c   : > { %s11778_s1 = scalar_select %p9924_p3, 1, 0 }
  0x1d   : > { %p9935_p5 = pnand %p9086_p4, %p9919_p1  ;;  %s470_s4 = sshll.u32 %s9778_s17, 4  ;;  %s471_s4 = int_to_ptr.vmem [resolvable:$true] %s470_s4 }
  0x1e   : > { %11779 = sst [smem:[#allocation36_spill]] %s11778_s1  ;;  %s468_s28 = sshll.u32 %s11780_s3, 4  ;;  %s469_s28 = int_to_ptr.hbm [resolvable:$true] %s468_s28 }
  0x1f   : > { %s499_s20 = sshll.u32 %s11782_s6, 4  ;;  %s11758_s1 = smov 64   ;;  %s500_s20 = int_to_ptr.hbm [resolvable:$true] %s499_s20 }
  0x20   : > { %9089 = dma.hbm_to_vmem [thread:$0]  (!%p9935_p5), %s443_s30, 128, %s445_s21, [#allocation5], %s11758_s1, %s11758_s1, %s11760_s16  }
  0x21   : > { %9095 = dma.hbm_to_vmem [thread:$0]  (!%p9935_p5), %s469_s28, 128, %s471_s4, [#allocation8], %s11758_s1, %s11758_s1, %s11760_s16  }
  0x22   : > { %s11783_s8 = sld [smem:[#allocation69_spill]]  ;;  %s9781_s17 = smov [#allocation10]  }
  0x23   : > { %s501_s0 = sshll.u32 %s9781_s17, 4  ;;  %s9782_s30 = smov [#allocation13]   ;;  %s502_s0 = int_to_ptr.vmem [resolvable:$true] %s501_s0 }
  0x24   : > { %9101 = dma.hbm_to_vmem [thread:$0]  (!%p9935_p5), %s500_s20, 512, %s502_s0, [#allocation11], %s11758_s1, %s11758_s1, %s11760_s16  }
  0x25   : > { %s529_s21 = sshll.u32 %s9782_s30, 4  ;;  %s555_s22 = sshll.u32 %s11747_s10, 4  ;;  %s530_s21 = int_to_ptr.vmem [resolvable:$true] %s529_s21  ;;  %s556_s22 = int_to_ptr.hbm [resolvable:$true] %s555_s22 }
  0x26   : > { %s9783_s18 = smov [#allocation16]   ;;  %s583_s20 = sshll.u32 %s11749_s12, 4  ;;  %s584_s20 = int_to_ptr.hbm [resolvable:$true] %s583_s20 }
  0x27   : > { %s557_s17 = sshll.u32 %s9783_s18, 4  ;;  %s11762_s0 = smov 128   ;;  %s558_s17 = int_to_ptr.vmem [resolvable:$true] %s557_s17 }
  0x28   : > { %s527_s23 = sshll.u32 %s11783_s8, 4  ;;  %s11764_s30 = smov 8   ;;  %s528_s23 = int_to_ptr.hbm [resolvable:$true] %s527_s23 }
  0x29   : > { %9107 = dma.hbm_to_vmem [thread:$0]  (!%p9935_p5), %s528_s23, 256, %s530_s21, [#allocation14], %s11758_s1, %s11758_s1, %s11760_s16  }
  0x2a   : > { %9113 = dma.hbm_to_vmem [thread:$0]  (!%p9935_p5), %s556_s22, 2048, %s558_s17, [#allocation17], %s11762_s0, %s11762_s0, %s11764_s30  }
  0x2b   : > { %s9786_s23 = smov [#allocation19]   ;;  %s9787_s4 = smov 192  }
  0x2c   : > { %s585_s21 = sshll.u32 %s9786_s23, 4  ;;  %s9788_s28 = smov 12   ;;  %s586_s21 = int_to_ptr.vmem [resolvable:$true] %s585_s21 }
  0x2d   : > { %9119 = dma.hbm_to_vmem [thread:$0]  (!%p9935_p5), %s584_s20, 6144, %s586_s21, [#allocation20], %s9787_s4, %s9787_s4, %s9788_s28  }
  0x2e   : > { %s611_s6 = sshll.u32 %s11751_s14, 4  ;;  %s9789_s1 = smov [#allocation22]   ;;  %s612_s6 = int_to_ptr.hbm [resolvable:$true] %s611_s6 }
  0x2f   : > { %s613_s16 = sshll.u32 %s9789_s1, 4  ;;  %s11784_s2 = sld [smem:[#allocation65_spill]]  ;;  %s614_s16 = int_to_ptr.vmem [resolvable:$true] %s613_s16 }
  0x30   : > { %s11785_s23 = smov 4   ;;  %s11786_s0 = smov 64  }
  0x31   : > { %9125 = dma.hbm_to_vmem [thread:$0]  (!%p9935_p5), %s612_s6, 2048, %s614_s16, [#allocation23], %s11786_s0, %s11786_s0, %s11785_s23  }
  0x32   : > { %s9790_s20 = smov [#allocation6]   ;;  %s485_s18 = sshll.u32 %s11742_s5, 4  ;;  %s486_s18 = int_to_ptr.hbm [resolvable:$true] %s485_s18 }
  0x33   : > { %s459_s21 = sshll.u32 %s9790_s20, 4  ;;  %s513_s3 = sshll.u32 %s11744_s7, 4  ;;  %s460_s21 = int_to_ptr.vmem [resolvable:$true] %s459_s21  ;;  %s514_s3 = int_to_ptr.hbm [resolvable:$true] %s513_s3 }
  0x34   : > { %s9791_s22 = smov [#allocation9]   ;;  %s9792_s16 = smov [#allocation12]  }
  0x35   : > { %s457_s17 = sshll.u32 %s11784_s2, 4  ;;  %s487_s30 = sshll.u32 %s9791_s22, 4  ;;  %s458_s17 = int_to_ptr.hbm [resolvable:$true] %s457_s17  ;;  %s488_s30 = int_to_ptr.vmem [resolvable:$true] %s487_s30 }
  0x36   : > { %9092 = dma.hbm_to_vmem [thread:$0]  (!%p9935_p5), %s458_s17, 16, %s460_s21, [#allocation5]  }
  0x37   : > { %9098 = dma.hbm_to_vmem [thread:$0]  (!%p9935_p5), %s486_s18, 128, %s488_s30, [#allocation8], %s11786_s0, %s11786_s0, %s11785_s23  }
  0x38   : > { %s515_s6 = sshll.u32 %s9792_s16, 4  ;;  %s541_s17 = sshll.u32 %s11746_s9, 4  ;;  %s516_s6 = int_to_ptr.vmem [resolvable:$true] %s515_s6  ;;  %s542_s17 = int_to_ptr.hbm [resolvable:$true] %s541_s17 }
  0x39   : > { %s11787_s21 = smov 8   ;;  %s11788_s28 = smov 128  }
  0x3a   : > { %9104 = dma.hbm_to_vmem [thread:$0]  (!%p9935_p5), %s514_s3, 1024, %s516_s6, [#allocation11], %s11788_s28, %s11788_s28, %s11787_s21  }
  0x3b   : > { %s569_s22 = sshll.u32 %s11748_s11, 4  ;;  %s9793_s2 = smov [#allocation15]   ;;  %s570_s22 = int_to_ptr.hbm [resolvable:$true] %s569_s22 }
  0x3c   : > { %s543_s30 = sshll.u32 %s9793_s2, 4  ;;  %s9794_s18 = smov [#allocation18]   ;;  %s544_s30 = int_to_ptr.vmem [resolvable:$true] %s543_s30 }
  0x3d   : > { %9110 = dma.hbm_to_vmem [thread:$0]  (!%p9935_p5), %s542_s17, 1024, %s544_s30, [#allocation14], %s11786_s0, %s11786_s0, %s11785_s23  }
  0x3e   : > { %s571_s16 = sshll.u32 %s9794_s18, 4  ;;  %s597_s3 = sshll.u32 %s11750_s13, 4  ;;  %s572_s16 = int_to_ptr.vmem [resolvable:$true] %s571_s16  ;;  %s598_s3 = int_to_ptr.hbm [resolvable:$true] %s597_s3 }
  0x3f   : > { %9116 = dma.hbm_to_vmem [thread:$0]  (!%p9935_p5), %s570_s22, 768, %s572_s16, [#allocation17], %s11786_s0, %s11786_s0, %s11785_s23  }
  0x40   : > { %s625_s1 = sshll.u32 %s11752_s15, 4  ;;  %s9795_s8 = smov [#allocation21]   ;;  %s626_s1 = int_to_ptr.hbm [resolvable:$true] %s625_s1 }
  0x41   : > { %s599_s17 = sshll.u32 %s9795_s8, 4  ;;  %s9796_s30 = smov [#allocation24]   ;;  %s600_s17 = int_to_ptr.vmem [resolvable:$true] %s599_s17 }
  0x42   : > { %9122 = dma.hbm_to_vmem [thread:$0]  (!%p9935_p5), %s598_s3, 4096, %s600_s17, [#allocation20], %s11788_s28, %s11788_s28, %s11787_s21  }
  0x43   : > { %s627_s0 = sshll.u32 %s9796_s30, 4  ;;  %s9797_s23 = smov 512   ;;  %s628_s0 = int_to_ptr.vmem [resolvable:$true] %s627_s0 }
  0x44   : > { %s9798_s22 = smov 32   ;;  %s11789_s20 = sld [smem:[#allocation70_spill]] }
  0x45   : > { %9128 = dma.hbm_to_vmem [thread:$0]  (!%p9935_p5), %s626_s1, 32768, %s628_s0, [#allocation23], %s9797_s23, %s9797_s23, %s9798_s22  }
  0x46   : > { %s9799_s3 = smov [#allocation25]   ;;  %s10045_s6 = sadd.s32 1, %s9775_s27  }
  0x47   : > { %s641_s2 = sshll.u32 %s9799_s3, 4  ;;  %s42_s1 = ssub.s32 %s9775_s27, %s10045_s6  ;;  %s642_s2 = int_to_ptr.vmem [resolvable:$true] %s641_s2 }
  0x48   : > { %s45_s8 = sadd.s32 1, %s9771_s26  ;;  %p43_p6 = scmp.eq.s32.totalorder %s42_s1, 0 }
  0x49   : > { %p52_p7 = scmp.ne.s32.totalorder %s9771_s26, %s9767_s25  ;;  %p53_p8 = scmp.eq.s32.totalorder %s9775_s27, 0 }
  0x4a   : > { %s639_s4 = sshll.u32 %s11789_s20, 4  ;;  %p58_p9 = scmp.ne.s32.totalorder %s9767_s25, %s9763_s24  ;;  %s640_s4 = int_to_ptr.hbm [resolvable:$true] %s639_s4 }
  0x4b   : > { %9131 = dma.hbm_to_vmem [thread:$0]  (!%p9935_p5), %s640_s4, 8192, %s642_s2, [#allocation26], %s11788_s28, %s11788_s28, %s11787_s21  }
  0x4c   : > { %s10056_s17 = scalar_select %p43_p6, %s9771_s26, %s45_s8  }
  0x4d   : > { %p54_p10 = por %p53_p8, %p52_p7  ;;  %p10060_p11 = por %p9919_p1, %p58_p9 }
  0x4e   : > { %p9151_p12 = scmp.lt.s32.totalorder %s9775_s27, 2  ;;  %s655_s29 = sand.u32 1, %s9771_s26  }
  0x4f   : > { %s6982_s21 = sshll.u32 %s655_s29, 3  ;;  %s6983_s28 = sshll.u32 %s9775_s27, 3 }
  0x50   : > { %s11791_s22 = sld [smem:[#allocation63_spill]]  ;;  %s659_s16 = scalar_lea.vmem [#allocation2], %s6982_s21 }
  0x51   : > { %s667_s20 = sshll.u32 %s659_s16, 4  ;;  %p10070_p13 = pnand %p9151_p12, %p54_p10  ;;  %s668_s20 = int_to_ptr.vmem [resolvable:$true] %s667_s20 }
  0x52   : > { %s656_s3 = scalar_lea.sflag [#allocation3], %s655_s29 }
  0x53   : > { %p9683_p2 = pneg %p10070_p13 }
  0x56   : > { %s663_s18 = scalar_lea.hbm %s11791_s22, %s6983_s28  ;;  %s9686_s28 = scalar_lea.hbm %s11791_s22, 16 }
  0x57   : > { %s665_s4 = sshll.u32 %s663_s18, 4  ;;  %s666_s4 = int_to_ptr.hbm [resolvable:$true] %s665_s4 }
  0x58   : > { %s9679_s2 = sshra.s32 %s666_s4, 4  ;;  %s9680_s2 = int_to_ptr.hbm [resolvable:$true] %s9679_s2 }
  0x59   : > { %s9681_s1 = scalar_lea.hbm %s9680_s2, 8  ;;  %p9687_p6 = scmp.lt.s32.totalorder %s9680_s2, %s11791_s22 }
  0x5a   : > { %p9682_p0 = scmp.ne.s32.totalorder %s9680_s2, %s9681_s1  ;;  %p9688_p7 = scmp.lt.s32.totalorder %s9686_s28, %s9681_s1 }
  0x5c   : > { %p9684_p4 = pnand %p9683_p2, %p9682_p0  ;;  %p9689_p8 = por %p9688_p7, %p9687_p6 }
  0x5e   : > { %p9685_p5 = pneg %p9684_p4 }
  0x60   : > { %p9690_p9 = pnand %p9689_p8, %p9685_p5 }
  0x62   : > { %9693 = shalt.err (!%p9690_p9)
}
  0x63   : > { %9135 = dma.hbm_to_vmem [thread:$0]  (!%p10070_p13), %s666_s4, 128, %s668_s20, %s656_s3  }
  0x64   : > { %676 = sbr.rel (%p9924_p3) target bundleno = 3143 (0xc47), region = 88 }
  0x69   : > { %s678_s18 = sand.u32 1, %s9767_s25  }
  0x6a   : > { %s10087_s16 = sshll.u32 %s678_s18, 3  ;;  %s679_s8 = scalar_lea.sflag [#allocation3], %s678_s18 }
  0x6b   : > { %s682_s21 = scalar_lea.vmem [#allocation2], %s10087_s16 }
  0x6c   : > { %9726 = dma.done.wait (%p10060_p11), %s679_s8, 128  }
  0x6d   : > { %9728 = vsyncadd (%p10060_p11), %s679_s8, 4294967168 }
  0x6e   : > { %9730 = dma.done.wait (%p9919_p1), [#allocation5], 144  }
  0x6f   : > { %9732 = vsyncadd (%p9919_p1), [#allocation5], 4294967152 }
  0x70   : > { %9734 = dma.done.wait (%p9919_p1), [#allocation8], 256  }
  0x71   : > { %9736 = vsyncadd (%p9919_p1), [#allocation8], 4294967040 }
  0x72   : > { %9738 = dma.done.wait (%p9919_p1), [#allocation11], 1536  }
  0x73   : > { %9740 = vsyncadd (%p9919_p1), [#allocation11], 4294965760 }
  0x74   : > { %9742 = dma.done.wait (%p9919_p1), [#allocation14], 1280  }
  0x75   : > { %9744 = vsyncadd (%p9919_p1), [#allocation14], 4294966016 }
  0x76   : > { %9746 = dma.done.wait (%p9919_p1), [#allocation17], 2816  }
  0x77   : > { %9748 = vsyncadd (%p9919_p1), [#allocation17], 4294964480 }
  0x78   : > { %9750 = dma.done.wait (%p9919_p1), [#allocation20], 10240  }
  0x79   : > { %9752 = vsyncadd (%p9919_p1), [#allocation20], 4294957056 }
  0x7a   : > { %9754 = dma.done.wait (%p9919_p1), [#allocation23], 34816  }
  0x7b   : > { %9756 = vsyncadd (%p9919_p1), [#allocation23], 4294932480 }
  0x7c   : > { %9758 = dma.done.wait (%p9919_p1), [#allocation26], 8192  }
  0x7d   : > { %9760 = vsyncadd (%p9919_p1), [#allocation26], 4294959104  ;;  %vm835_vm0 = vcmask 1045504   ;;  %v9800_v0 = vmov 0   ;;  %vm836_vm1 = vcmask 1046528   ;;  %v9801_v1 = vmov 65535  }
  0x7e   : > { %9224 = vset.pattern.permute.xlu0 %v9800_v0  ;;  %9225 = vset.pattern.permute.xlu1 %v9800_v0  ;;  %v837_v2 = vsel %vm835_vm0, 4294967295, %v9801_v1  ;;  %v7006_v3 = vld [vmem:[#allocation4] sm:$0xf]  ;;  %v8482_v4 = vld [vmem:[#allocation4] sm:$0x70]  ;;  %v818_v7 = vld [vmem:[%s682_s21] sm:$0xff] }
  0x7f   : > { %9226 = vset.pattern.permute.xlu2 %v9800_v0  ;;  %v838_v5 = vsel %vm836_vm1, %v837_v2, 0  ;;  %v7007_v6 = vor.u32 %v8482_v4, %v7006_v3  ;;  %v925_v8 = vld [vmem:[#allocation12] sm:$0xff]  ;;  %v927_v9 = vld [vmem:[#allocation12 + $0x10] sm:$0xff]  ;;  %v819_v11 = vpack.c.bf16 %v818_v7, %v818_v7  ;;  %vm831_vm2 = vcmask 105472   ;;  %v926_v12 = vld [vmem:[#allocation12 + $0x8] sm:$0xff]  ;;  %s11794_s20 = sld [smem:[#allocation67_spill]] }
  0x80   : > { %935 = vperm.xlu0 %9224, %v925_v8   ;;  %945 = vperm.xlu1 %9225, %v927_v9   ;;  %v928_v13 = vld [vmem:[#allocation12 + $0x18] sm:$0xff]  ;;  %v931_v14 = vld [vmem:[#allocation12 + $0x30] sm:$0xff]  ;;  %v1175_v19 = vld [vmem:[#allocation16 + $0x10] sm:$0xff]  ;;  %vm871_vm4 = vcmask 130048   ;;  %vm1438_vm0 = vcmask 261120   ;;  %s11849_s4 = sadd.s32 4294967295, %s9775_s27  }
  0x81   : > { %v840_v10 = vand.u32 %v7007_v6, %v838_v5  ;;  %v1174_v15 = vld [vmem:[#allocation16 + $0x8] sm:$0xff]  ;;  %v1177_v17 = vld [vmem:[#allocation16 + $0x20] sm:$0xff]  ;;  %v1180_v20 = vld [vmem:[#allocation16 + $0x38] sm:$0xff]  ;;  %s7001_s24 = sshll.u32 %s11849_s4, 3  ;;  %s11850_s1 = sld [smem:[#allocation71_spill]] }
  0x82   : > { %v932_v16 = vld [vmem:[#allocation12 + $0x38] sm:$0xff]  ;;  %v8483_v18 = vld [vmem:[#allocation7] sm:$0xff]  ;;  %v929_v21 = vld [vmem:[#allocation12 + $0x20] sm:$0xff]  ;;  %p811_p1 = scmp.lt.s32.totalorder %s7001_s24, 15 }
  0x83   : > { %849 = vmatpush.bf16.msra.mxu1 %v840_v10  ;;  %955 = vperm.xlu2 %9226, %v929_v21   ;;  %v930_v22 = vld [vmem:[#allocation12 + $0x28] sm:$0xff]  ;;  %v1178_v23 = vld [vmem:[#allocation16 + $0x28] sm:$0xff]  ;;  %v1183_v24 = vld [vmem:[#allocation16 + $0x50] sm:$0xff] }
  0x84   : > { %v1173_v25 = vld [vmem:[#allocation16] sm:$0xff]  ;;  %v1186_v27 = vld [vmem:[#allocation16 + $0x68] sm:$0xff]  ;;  %v9227_v28 = vld [vmem:[#allocation6] ss:$0 sm:$0xff]  ;;  %s11882_s24 = smov (!%p811_p1, %s7001_s24), 15 }
  0x85   : > { %v1181_v26 = vld [vmem:[#allocation16 + $0x40] sm:$0xff]  ;;  %v1176_v29 = vld [vmem:[#allocation16 + $0x18] sm:$0xff]  ;;  %v1732_v32 = vld [vmem:[#allocation21] sm:$0xff]  ;;  %s8481_s27 = sshll.u32 %s11882_s24, 5 }
  0x86   : > { %7008 = vmatmul.msk.bf16.vlgmr.msra.gmra.mxu1 %vm831_vm2, %v819_v11  ;;  %v1184_v31 = vld [vmem:[#allocation16 + $0x58] sm:$0xff]  ;;  %v1179_v37 = vld [vmem:[#allocation16 + $0x30] sm:$0xff]  ;;  %v1735_v40 = vld [vmem:[#allocation21 + $0x18] sm:$0xff] }
  0x87   : > { %882 = vmatpush.bf16.msrb.mxu1 %v8483_v18  ;;  %v1187_v39 = vld [vmem:[#allocation16 + $0x70] sm:$0xff]  ;;  %v1182_v41 = vld [vmem:[#allocation16 + $0x48] sm:$0xff]  ;;  %v1733_v42 = vld [vmem:[#allocation21 + $0x8] sm:$0xff]  ;;  %s11416_s28 = scalar_lea.vmem %s11850_s1, %s8481_s27 }
  0x88   : > { %940 = vperm.xlu0 %9224, %v926_v12   ;;  %950 = vperm.xlu1 %9225, %v928_v13   ;;  %v1738_v43 = vld [vmem:[#allocation21 + $0x30] sm:$0xff]  ;;  %v1736_v45 = vld [vmem:[#allocation21 + $0x20] sm:$0xff]  ;;  %v1741_v46 = vld [vmem:[#allocation21 + $0x48] sm:$0xff] }
  0x89   : > { %v1185_v44 = vld [vmem:[#allocation16 + $0x60] sm:$0xff]  ;;  %v1188_v47 = vld [vmem:[#allocation16 + $0x78] sm:$0xff]  ;;  %v1739_v48 = vld [vmem:[#allocation21 + $0x38] sm:$0xff] }
  0x8a   : > { %v1744_v49 = vld [vmem:[#allocation21 + $0x60] sm:$0xff]  ;;  %v1734_v50 = vld [vmem:[#allocation21 + $0x10] sm:$0xff]  ;;  %v1747_v52 = vld [vmem:[#allocation21 + $0x78] sm:$0xff] }
  0x8b   : > { %960 = vperm.xlu2 %9226, %v930_v22   ;;  %v1742_v51 = vld [vmem:[#allocation21 + $0x50] sm:$0xff]  ;;  %v1737_v53 = vld [vmem:[#allocation21 + $0x28] sm:$0xff]  ;;  %v1740_v56 = vld [vmem:[#allocation21 + $0x40] sm:$0xff] }
  0x8c   : > { %v1745_v54 = vld [vmem:[#allocation21 + $0x68] sm:$0xff]  ;;  %v1750_v55 = vld [vmem:[#allocation21 + $0x90] sm:$0xff]  ;;  %v1748_v57 = vld [vmem:[#allocation21 + $0x80] sm:$0xff] }
  0x8d   : > { %v1753_v58 = vld [vmem:[#allocation21 + $0xa8] sm:$0xff]  ;;  %v1743_v59 = vld [vmem:[#allocation21 + $0x58] sm:$0xff]  ;;  %v1756_v61 = vld [vmem:[#allocation21 + $0xc0] sm:$0xff] }
  0x8e   : > { %v1751_v60 = vld [vmem:[#allocation21 + $0x98] sm:$0xff]  ;;  %v1746_v62 = vld [vmem:[#allocation21 + $0x70] sm:$0xff]  ;;  %v1749_v1 = vld [vmem:[#allocation21 + $0x88] sm:$0xff] }
  0x8f   : > { %v1754_v63 = vld [vmem:[#allocation21 + $0xb0] sm:$0xff]  ;;  %v1759_v0 = vld [vmem:[#allocation21 + $0xd8] sm:$0xff]  ;;  %v1757_v2 = vld [vmem:[#allocation21 + $0xc8] sm:$0xff] }
  0x90   : > { %965 = vperm.xlu0 %9224, %v931_v14   ;;  %970 = vperm.xlu1 %9225, %v932_v16   ;;  %v1762_v3 = vld [vmem:[#allocation21 + $0xf0] sm:$0xff]  ;;  %v1760_v4 = vld [vmem:[#allocation21 + $0xe0] sm:$0xff]  ;;  %v3416_v5 = vld [vmem:[#allocation25 + $0x8] sm:$0xff] }
  0x91   : > { %v1763_v6 = vld [vmem:[#allocation21 + $0xf8] sm:$0xff]  ;;  %v3419_v7 = vld [vmem:[#allocation25 + $0x20] sm:$0xff]  ;;  %v3417_v10 = vld [vmem:[#allocation25 + $0x10] sm:$0xff] }
  0x92   : > { %v8484_v8 = vld [vmem:[#allocation9] sm:$0xff]  ;;  %v1752_v9 = vld [vmem:[#allocation21 + $0xa0] sm:$0xff]  ;;  %v3420_v13 = vld [vmem:[#allocation25 + $0x28] sm:$0xff] }
  0x93   : > { %1191 = vperm.xlu2 %9226, %v1173_v25   ;;  %910 = vmatpush.bf16.msra.mxu1 %v8484_v8  ;;  %v3422_v11 = vld [vmem:[#allocation25 + $0x38] sm:$0xff]  ;;  %v3425_v14 = vld [vmem:[#allocation25 + $0x50] sm:$0xff]  ;;  %v3423_v16 = vld [vmem:[#allocation25 + $0x40] sm:$0xff] }
  0x94   : > { %v1755_v12 = vld [vmem:[#allocation21 + $0xb8] sm:$0xff]  ;;  %v1761_v18 = vld [vmem:[#allocation21 + $0xe8] sm:$0xff]  ;;  %v9228_v21 = vld [vmem:[%s11794_s20] ss:$0 sm:$0xff] }
  0x95   : > { %v3415_v25 = vld [vmem:[#allocation25] sm:$0xff]  ;;  %v3476_v8 = vld [vmem:[#allocation25 + $0x1e8] sm:$0xff] }
  0x98   : > { %1196 = vperm.xlu0 %9224, %v1174_v15   ;;  %1201 = vperm.xlu1 %9225, %v1175_v19   ;;  %v1758_v15 = vld [vmem:[#allocation21 + $0xd0] sm:$0xff]  ;;  %v3426_v19 = vld [vmem:[#allocation25 + $0x58] sm:$0xff] }
  0x9b   : > { %1206 = vperm.xlu2 %9226, %v1176_v29  }
  0xa0   : > { %1211 = vperm.xlu0 %9224, %v1177_v17   ;;  %1216 = vperm.xlu1 %9225, %v1178_v23   ;;  %v3428_v17 = vld [vmem:[#allocation25 + $0x68] sm:$0xff] }
  0xa3   : > { %1221 = vperm.xlu2 %9226, %v1179_v37   ;;  %v3424_v37 = vld [vmem:[#allocation25 + $0x48] sm:$0xff] }
  0xa8   : > { %1226 = vperm.xlu0 %9224, %v1180_v20   ;;  %1231 = vperm.xlu1 %9225, %v1181_v26   ;;  %v3431_v20 = vld [vmem:[#allocation25 + $0x80] sm:$0xff]  ;;  %v3429_v26 = vld [vmem:[#allocation25 + $0x70] sm:$0xff] }
  0xab   : > { %1236 = vperm.xlu2 %9226, %v1182_v41   ;;  %v3441_v41 = vld [vmem:[#allocation25 + $0xd0] sm:$0xff] }
  0xb0   : > { %1241 = vperm.xlu0 %9224, %v1183_v24   ;;  %1246 = vperm.xlu1 %9225, %v1184_v31   ;;  %v3418_v31 = vld [vmem:[#allocation25 + $0x18] sm:$0xff] }
  0xb3   : > { %1251 = vperm.xlu2 %9226, %v1185_v44   ;;  %v3444_v44 = vld [vmem:[#allocation25 + $0xe8] sm:$0xff] }
  0xb8   : > { %1256 = vperm.xlu0 %9224, %v1186_v27   ;;  %1261 = vperm.xlu1 %9225, %v1187_v39   ;;  %v3434_v27 = vld [vmem:[#allocation25 + $0x98] sm:$0xff]  ;;  %v3443_v39 = vld [vmem:[#allocation25 + $0xe0] sm:$0xff] }
  0xbb   : > { %1266 = vperm.xlu2 %9226, %v1188_v47   ;;  %v3447_v47 = vld [vmem:[#allocation25 + $0x100] sm:$0xff] }
  0xc0   : > { %1766 = vperm.xlu0 %9224, %v1732_v32   ;;  %1771 = vperm.xlu1 %9225, %v1733_v42   ;;  %v3432_v32 = vld [vmem:[#allocation25 + $0x88] sm:$0xff]  ;;  %v3446_v42 = vld [vmem:[#allocation25 + $0xf8] sm:$0xff] }
  0xc3   : > { %1776 = vperm.xlu2 %9226, %v1734_v50   ;;  %v3450_v50 = vld [vmem:[#allocation25 + $0x118] sm:$0xff] }
  0xc8   : > { %1781 = vperm.xlu0 %9224, %v1735_v40   ;;  %1786 = vperm.xlu1 %9225, %v1736_v45   ;;  %v3427_v40 = vld [vmem:[#allocation25 + $0x60] sm:$0xff]  ;;  %v3449_v45 = vld [vmem:[#allocation25 + $0x110] sm:$0xff] }
  0xcb   : > { %1791 = vperm.xlu2 %9226, %v1737_v53   ;;  %v3453_v53 = vld [vmem:[#allocation25 + $0x130] sm:$0xff] }
  0xd0   : > { %1796 = vperm.xlu0 %9224, %v1738_v43   ;;  %1801 = vperm.xlu1 %9225, %v1739_v48   ;;  %v3430_v43 = vld [vmem:[#allocation25 + $0x78] sm:$0xff]  ;;  %v3452_v48 = vld [vmem:[#allocation25 + $0x128] sm:$0xff] }
  0xd3   : > { %1806 = vperm.xlu2 %9226, %v1740_v56   ;;  %v3456_v56 = vld [vmem:[#allocation25 + $0x148] sm:$0xff] }
  0xd8   : > { %1811 = vperm.xlu0 %9224, %v1741_v46   ;;  %1816 = vperm.xlu1 %9225, %v1742_v51   ;;  %v3433_v46 = vld [vmem:[#allocation25 + $0x90] sm:$0xff]  ;;  %v3455_v51 = vld [vmem:[#allocation25 + $0x140] sm:$0xff] }
  0xdb   : > { %1821 = vperm.xlu2 %9226, %v1743_v59   ;;  %v3459_v59 = vld [vmem:[#allocation25 + $0x160] sm:$0xff] }
  0xe0   : > { %1826 = vperm.xlu0 %9224, %v1744_v49   ;;  %1831 = vperm.xlu1 %9225, %v1745_v54   ;;  %v3436_v49 = vld [vmem:[#allocation25 + $0xa8] sm:$0xff]  ;;  %v3458_v54 = vld [vmem:[#allocation25 + $0x158] sm:$0xff] }
  0xe3   : > { %1836 = vperm.xlu2 %9226, %v1746_v62   ;;  %v3462_v62 = vld [vmem:[#allocation25 + $0x178] sm:$0xff] }
  0xe8   : > { %1841 = vperm.xlu0 %9224, %v1747_v52   ;;  %1846 = vperm.xlu1 %9225, %v1748_v57   ;;  %v3439_v52 = vld [vmem:[#allocation25 + $0xc0] sm:$0xff]  ;;  %v3461_v57 = vld [vmem:[#allocation25 + $0x170] sm:$0xff] }
  0xeb   : > { %1851 = vperm.xlu2 %9226, %v1749_v1   ;;  %v3465_v1 = vld [vmem:[#allocation25 + $0x190] sm:$0xff] }
  0xf0   : > { %1856 = vperm.xlu0 %9224, %v1750_v55   ;;  %1861 = vperm.xlu1 %9225, %v1751_v60   ;;  %v3442_v55 = vld [vmem:[#allocation25 + $0xd8] sm:$0xff]  ;;  %v3464_v60 = vld [vmem:[#allocation25 + $0x188] sm:$0xff] }
  0xf3   : > { %1866 = vperm.xlu2 %9226, %v1752_v9   ;;  %v3460_v9 = vld [vmem:[#allocation25 + $0x168] sm:$0xff] }
  0xf8   : > { %1871 = vperm.xlu0 %9224, %v1753_v58   ;;  %1876 = vperm.xlu1 %9225, %v1754_v63   ;;  %v3445_v58 = vld [vmem:[#allocation25 + $0xf0] sm:$0xff]  ;;  %v3467_v63 = vld [vmem:[#allocation25 + $0x1a0] sm:$0xff] }
  0xfb   : > { %1881 = vperm.xlu2 %9226, %v1755_v12   ;;  %v3477_v12 = vld [vmem:[#allocation25 + $0x1f0] sm:$0xff] }
 0x100   : > { %1886 = vperm.xlu0 %9224, %v1756_v61   ;;  %1891 = vperm.xlu1 %9225, %v1757_v2   ;;  %v3448_v61 = vld [vmem:[#allocation25 + $0x108] sm:$0xff]  ;;  %v3470_v2 = vld [vmem:[#allocation25 + $0x1b8] sm:$0xff] }
 0x103   : > { %v851_v30 = vpop.f32.mrf.mxu1  ;;  %1896 = vperm.xlu2 %9226, %v1758_v15   ;;  %v8485_v15 = vld [vmem:[#allocation10] sm:$0xff] }
 0x104   : > { %v852_v33 = vadd.f32 %v9227_v28, %v851_v30 }
 0x106   : > { %vm855_vm3 = vcmp.ge.f32.partialorder %v852_v33, 0.0  ;;  %v856_v34 = vmul.f32 0.05, %v852_v33 }
 0x108   : > { %v857_v35 = vsel %vm855_vm3, %v852_v33, %v856_v34  ;;  %1901 = vperm.xlu0 %9224, %v1759_v0   ;;  %1906 = vperm.xlu1 %9225, %v1760_v4   ;;  %v3437_v33 = vld [vmem:[#allocation25 + $0xb0] sm:$0xff]  ;;  %v3451_v0 = vld [vmem:[#allocation25 + $0x120] sm:$0xff]  ;;  %v3468_v4 = vld [vmem:[#allocation25 + $0x1a8] sm:$0xff] }
 0x109   : > { %v858_v36 = vpack.c.bf16 %v857_v35, %v857_v35  ;;  %v3421_v34 = vld [vmem:[#allocation25 + $0x30] sm:$0xff]  ;;  %v3435_v35 = vld [vmem:[#allocation25 + $0xa0] sm:$0xff] }
 0x10b   : > { %v853_v38 = vpop.f32.mrf.mxu1  ;;  %7013 = vmatmul.msk.bf16.vlgmr.msrb.gmra.mxu1 %vm871_vm4, %v858_v36  ;;  %1911 = vperm.xlu2 %9226, %v1761_v18   ;;  %v3440_v36 = vld [vmem:[#allocation25 + $0xc8] sm:$0xff]  ;;  %v3469_v18 = vld [vmem:[#allocation25 + $0x1b0] sm:$0xff] }
 0x10c   : > { %v3438_v38 = vld [vmem:[#allocation25 + $0xb8] sm:$0xff] }
 0x110   : > { %1916 = vperm.xlu0 %9224, %v1762_v3   ;;  %1921 = vperm.xlu1 %9225, %v1763_v6   ;;  %v3454_v3 = vld [vmem:[#allocation25 + $0x138] sm:$0xff]  ;;  %v3457_v6 = vld [vmem:[#allocation25 + $0x150] sm:$0xff] }
 0x113   : > { %3481 = vperm.xlu2 %9226, %v3415_v25   ;;  %v8489_v25 = vld [vmem:[#allocation13] sm:$0xff] }
 0x118   : > { %3486 = vperm.xlu0 %9224, %v3416_v5   ;;  %3491 = vperm.xlu1 %9225, %v3417_v10   ;;  %v3473_v5 = vld [vmem:[#allocation25 + $0x1d0] sm:$0xff]  ;;  %v3474_v10 = vld [vmem:[#allocation25 + $0x1d8] sm:$0xff] }
 0x11b   : > { %3496 = vperm.xlu2 %9226, %v3418_v31  }
 0x120   : > { %3501 = vperm.xlu0 %9224, %v3419_v7   ;;  %3506 = vperm.xlu1 %9225, %v3420_v13   ;;  %v3471_v7 = vld [vmem:[#allocation25 + $0x1c0] sm:$0xff] }
 0x123   : > { %3511 = vperm.xlu2 %9226, %v3421_v34  }
 0x128   : > { %3516 = vperm.xlu0 %9224, %v3422_v11   ;;  %3521 = vperm.xlu1 %9225, %v3423_v16   ;;  %v3463_v11 = vld [vmem:[#allocation25 + $0x180] sm:$0xff]  ;;  %v3466_v16 = vld [vmem:[#allocation25 + $0x198] sm:$0xff] }
 0x12b   : > { %3526 = vperm.xlu2 %9226, %v3424_v37   ;;  %v946_v37 = vpop.permute.xlu1 %945 }
 0x130   : > { %3531 = vperm.xlu0 %9224, %v3425_v14   ;;  %3536 = vperm.xlu1 %9225, %v3426_v19   ;;  %v8486_v19 = vld [vmem:[#allocation10 + $0x8] sm:$0xff] }
 0x133   : > { %3541 = vperm.xlu2 %9226, %v3427_v40  }
 0x138   : > { %3546 = vperm.xlu0 %9224, %v3428_v17   ;;  %3551 = vperm.xlu1 %9225, %v3429_v26   ;;  %v8490_v26 = vld [vmem:[#allocation13 + $0x8] sm:$0xff] }
 0x139   : > { %1127 = vmatpush.bf16.msrb.mxu1 %v8490_v26 }
 0x13b   : > { %3556 = vperm.xlu2 %9226, %v3430_v43  }
 0x140   : > { %3561 = vperm.xlu0 %9224, %v3431_v20   ;;  %3566 = vperm.xlu1 %9225, %v3432_v32   ;;  %v3472_v20 = vld [vmem:[#allocation25 + $0x1c8] sm:$0xff] }
 0x143   : > { %3571 = vperm.xlu2 %9226, %v3433_v46  }
 0x148   : > { %3576 = vperm.xlu0 %9224, %v3434_v27   ;;  %3581 = vperm.xlu1 %9225, %v3435_v35   ;;  %v936_v27 = vpop.permute.xlu0 %935 }
 0x14b   : > { %3586 = vperm.xlu2 %9226, %v3436_v49  }
 0x150   : > { %3591 = vperm.xlu0 %9224, %v3437_v33   ;;  %3596 = vperm.xlu1 %9225, %v3438_v38  }
 0x153   : > { %3601 = vperm.xlu2 %9226, %v3439_v52  }
 0x158   : > { %3606 = vperm.xlu0 %9224, %v3440_v36   ;;  %3611 = vperm.xlu1 %9225, %v3441_v41   ;;  %v951_v41 = vpop.permute.xlu1 %950 }
 0x15b   : > { %3616 = vperm.xlu2 %9226, %v3442_v55  }
 0x160   : > { %3621 = vperm.xlu0 %9224, %v3443_v39   ;;  %3626 = vperm.xlu1 %9225, %v3444_v44  }
 0x163   : > { %3631 = vperm.xlu2 %9226, %v3445_v58  }
 0x168   : > { %3636 = vperm.xlu0 %9224, %v3446_v42   ;;  %3641 = vperm.xlu1 %9225, %v3447_v47  }
 0x16b   : > { %3646 = vperm.xlu2 %9226, %v3448_v61  }
 0x170   : > { %3651 = vperm.xlu0 %9224, %v3449_v45   ;;  %3656 = vperm.xlu1 %9225, %v3450_v50  }
 0x173   : > { %3661 = vperm.xlu2 %9226, %v3451_v0  }
 0x178   : > { %3666 = vperm.xlu0 %9224, %v3452_v48   ;;  %3671 = vperm.xlu1 %9225, %v3453_v53   ;;  %v956_v48 = vpop.permute.xlu2 %955 }
 0x17b   : > { %3676 = vperm.xlu2 %9226, %v3454_v3  }
 0x180   : > { %3681 = vperm.xlu0 %9224, %v3455_v51   ;;  %3686 = vperm.xlu1 %9225, %v3456_v56   ;;  %v961_v52 = vpop.permute.xlu2 %960 }
 0x183   : > { %3691 = vperm.xlu2 %9226, %v3457_v6  }
 0x188   : > { %v884_v22 = vpop.f32.mrf.mxu1  ;;  %3696 = vperm.xlu0 %9224, %v3458_v54   ;;  %3701 = vperm.xlu1 %9225, %v3459_v59  }
 0x189   : > { %v885_v23 = vadd.f32 %v9228_v21, %v884_v22  ;;  %v3475_v21 = vld [vmem:[#allocation25 + $0x1e0] sm:$0xff]  ;;  %v8487_v22 = vld [vmem:[#allocation10 + $0x10] sm:$0xff] }
 0x18b   : > { %vm888_vm5 = vcmp.ge.f32.partialorder %v885_v23, 0.0  ;;  %v889_v24 = vmul.f32 0.05, %v885_v23  ;;  %3706 = vperm.xlu2 %9226, %v3460_v9  }
 0x18d   : > { %v10132_v28 = vsel %vm888_vm5, %v885_v23, %v889_v24  ;;  %v3478_v23 = vld [vmem:[#allocation25 + $0x1f8] sm:$0xff] }
 0x18e   : > { %v891_v29 = vpack.c.bf16 %v10132_v28, %v10132_v28  ;;  %v8488_v24 = vld [vmem:[#allocation10 + $0x18] sm:$0xff] }
 0x190   : > { %v886_v30 = vpop.f32.mrf.mxu1  ;;  %7018 = vmatmul.msk.bf16.vlgmr.msra.gmra.mxu1 %vm871_vm4, %v891_v29  ;;  %3711 = vperm.xlu0 %9224, %v3461_v57  }
 0x191   : > { %3716 = vperm.xlu1 %9225, %v3462_v62   ;;  %v941_v30 = vpop.permute.xlu0 %940 }
 0x193   : > { %3721 = vperm.xlu2 %9226, %v3463_v11  }
 0x198   : > { %3726 = vperm.xlu0 %9224, %v3464_v60  }
 0x199   : > { %3731 = vperm.xlu1 %9225, %v3465_v1   ;;  %v966_v61 = vpop.permute.xlu0 %965 }
 0x19b   : > { %3736 = vperm.xlu2 %9226, %v3466_v16  }
 0x1a0   : > { %3741 = vperm.xlu0 %9224, %v3467_v63   ;;  %v971_v63 = vpop.permute.xlu1 %970 }
 0x1a1   : > { %3746 = vperm.xlu1 %9225, %v3468_v4  }
 0x1a3   : > { %3751 = vperm.xlu2 %9226, %v3469_v18  }
 0x1a8   : > { %3756 = vperm.xlu0 %9224, %v3470_v2  }
 0x1a9   : > { %3761 = vperm.xlu1 %9225, %v3471_v7  }
 0x1ab   : > { %3766 = vperm.xlu2 %9226, %v3472_v20  }
 0x1b0   : > { %3771 = vperm.xlu0 %9224, %v3473_v5  }
 0x1b1   : > { %3776 = vperm.xlu1 %9225, %v3474_v10  }
 0x1b3   : > { %3781 = vperm.xlu2 %9226, %v3475_v21  }
 0x1b8   : > { %3786 = vperm.xlu0 %9224, %v3476_v8  }
 0x1b9   : > { %3791 = vperm.xlu1 %9225, %v3477_v12  }
 0x1bb   : > { %3796 = vperm.xlu2 %9226, %v3478_v23  }
 0x20d   : > { %v912_v13 = vpop.f32.mrf.mxu1 }
 0x20e   : > { %v916_v14 = vpack.c.bf16 %v912_v13, %v10132_v28 }
 0x210   : > { %1012 = vmatpush.bf16.msra.mxu0 %v916_v14 }
 0x213   : > { %7035 = vmatmul.msk.bf16.vlgmr.msra.gmra.mxu0 %vm871_vm4, %v8485_v15 }
 0x214   : > { %1089 = vmatpush.bf16.msrb.mxu0 %v8489_v25 }
 0x215   : > { %v914_v17 = vpop.f32.mrf.mxu1 }
 0x223   : > { %7036 = vmatmul.msk.bf16.gmra.mxu0 %vm871_vm4, %v8486_v19 }
 0x233   : > { %7037 = vmatmul.msk.bf16.gmra.mxu0 %vm871_vm4, %v8487_v22 }
 0x243   : > { %7038 = vmatmul.msk.bf16.gmra.mxu0 %vm871_vm4, %v8488_v24 }
 0x290   : > { %v1014_v28 = vpop.f32.mrf.mxu0 }
 0x291   : > { %v1015_v29 = vadd.f32 %v1014_v28, %v936_v27 }
 0x293   : > { %v1042_v32 = vmul.f32 0.05, %v1015_v29  ;;  %vm1034_vm6 = vcmp.ge.f32.partialorder %v1015_v29, 0.0 }
 0x295   : > { %v1050_v35 = vsel %vm1034_vm6, %v1015_v29, %v1042_v32  ;;  %v8492_v32 = vld [vmem:[#allocation15 + $0x8] sm:$0xff] }
 0x298   : > { %v1016_v31 = vpop.f32.mrf.mxu0 }
 0x299   : > { %v1017_v33 = vadd.f32 %v1016_v31, %v941_v30  ;;  %v8491_v31 = vld [vmem:[#allocation15] sm:$0xff] }
 0x29b   : > { %vm1035_vm7 = vcmp.ge.f32.partialorder %v1017_v33, 0.0  ;;  %v1043_v34 = vmul.f32 0.05, %v1017_v33 }
 0x29d   : > { %v1051_v36 = vsel %vm1035_vm7, %v1017_v33, %v1043_v34  ;;  %v8493_v33 = vld [vmem:[#allocation15 + $0x10] sm:$0xff]  ;;  %v8494_v34 = vld [vmem:[#allocation15 + $0x18] sm:$0xff] }
 0x29e   : > { %v1058_v38 = vpack.c.bf16 %v1051_v36, %v1050_v35  ;;  %v8495_v35 = vld [vmem:[#allocation15 + $0x20] sm:$0xff]  ;;  %v8496_v36 = vld [vmem:[#allocation15 + $0x28] sm:$0xff] }
 0x2a0   : > { %v1019_v39 = vpop.f32.mrf.mxu0  ;;  %7043 = vmatmul.msk.bf16.vlgmr.msrb.gmra.mxu0 %vm871_vm4, %v1058_v38  ;;  %7051 = vmatmul.msk.bf16.vlgmr.msrb.gmra.mxu1 %vm871_vm4, %v1058_v38  ;;  %v8498_v38 = vld [vmem:[#allocation15 + $0x38] sm:$0xff] }
 0x2a1   : > { %v1020_v40 = vadd.f32 %v1019_v39, %v946_v37  ;;  %v8497_v37 = vld [vmem:[#allocation15 + $0x30] sm:$0xff]  ;;  %v8500_v39 = vld [vmem:[#allocation18 + $0x8] sm:$0xff] }
 0x2a2   : > { %1469 = vmatpush.bf16.msra.mxu3 %v8500_v39 }
 0x2a3   : > { %v1044_v43 = vmul.f32 0.05, %v1020_v40  ;;  %vm1036_vm8 = vcmp.ge.f32.partialorder %v1020_v40, 0.0 }
 0x2a5   : > { %v1052_v46 = vsel %vm1036_vm8, %v1020_v40, %v1044_v43  ;;  %v8502_v40 = vld [vmem:[#allocation18 + $0x18] sm:$0xff] }
 0x2a8   : > { %v1021_v42 = vpop.f32.mrf.mxu0 }
 0x2a9   : > { %v1022_v44 = vadd.f32 %v1021_v42, %v951_v41  ;;  %v8499_v41 = vld [vmem:[#allocation18] sm:$0xff]  ;;  %v8501_v42 = vld [vmem:[#allocation18 + $0x10] sm:$0xff] }
 0x2aa   : > { %1470 = vmatpush.bf16.msra.mxu3 %v8499_v41 }
 0x2ab   : > { %vm1037_vm9 = vcmp.ge.f32.partialorder %v1022_v44, 0.0  ;;  %v1045_v45 = vmul.f32 0.05, %v1022_v44 }
 0x2ad   : > { %v1053_v47 = vsel %vm1037_vm9, %v1022_v44, %v1045_v45  ;;  %v1192_v44 = vpop.permute.xlu2 %1191 }
 0x2ae   : > { %v1059_v49 = vpack.c.bf16 %v1053_v47, %v1052_v46  ;;  %v1197_v47 = vpop.permute.xlu0 %1196 }
 0x2b0   : > { %v1024_v50 = vpop.f32.mrf.mxu0  ;;  %7044 = vmatmul.msk.bf16.gmra.mxu0 %vm871_vm4, %v1059_v49  ;;  %7052 = vmatmul.msk.bf16.gmra.mxu1 %vm871_vm4, %v1059_v49 }
 0x2b1   : > { %v1025_v51 = vadd.f32 %v1024_v50, %v956_v48 }
 0x2b3   : > { %v1046_v54 = vmul.f32 0.05, %v1025_v51  ;;  %vm1038_vm10 = vcmp.ge.f32.partialorder %v1025_v51, 0.0 }
 0x2b5   : > { %v1054_v57 = vsel %vm1038_vm10, %v1025_v51, %v1046_v54 }
 0x2b8   : > { %v1026_v53 = vpop.f32.mrf.mxu0 }
 0x2b9   : > { %v1027_v55 = vadd.f32 %v1026_v53, %v961_v52 }
 0x2bb   : > { %vm1039_vm11 = vcmp.ge.f32.partialorder %v1027_v55, 0.0  ;;  %v1047_v56 = vmul.f32 0.05, %v1027_v55 }
 0x2bd   : > { %v1055_v58 = vsel %vm1039_vm11, %v1027_v55, %v1047_v56  ;;  %v1207_v56 = vpop.permute.xlu2 %1206 }
 0x2be   : > { %v1060_v59 = vpack.c.bf16 %v1055_v58, %v1054_v57  ;;  %v1202_v58 = vpop.permute.xlu1 %1201 }
 0x2c0   : > { %v1029_v60 = vpop.f32.mrf.mxu0  ;;  %7045 = vmatmul.msk.bf16.gmra.mxu0 %vm871_vm4, %v1060_v59  ;;  %7053 = vmatmul.msk.bf16.gmra.mxu1 %vm871_vm4, %v1060_v59 }
 0x2c1   : > { %v1030_v62 = vadd.f32 %v1029_v60, %v966_v61 }
 0x2c3   : > { %v1048_v1 = vmul.f32 0.05, %v1030_v62  ;;  %vm1040_vm12 = vcmp.ge.f32.partialorder %v1030_v62, 0.0 }
 0x2c5   : > { %v1056_v4 = vsel %vm1040_vm12, %v1030_v62, %v1048_v1 }
 0x2c8   : > { %v1031_v0 = vpop.f32.mrf.mxu0 }
 0x2c9   : > { %v1032_v2 = vadd.f32 %v1031_v0, %v971_v63 }
 0x2cb   : > { %vm1041_vm13 = vcmp.ge.f32.partialorder %v1032_v2, 0.0  ;;  %v1049_v3 = vmul.f32 0.05, %v1032_v2 }
 0x2cd   : > { %v1057_v5 = vsel %vm1041_vm13, %v1032_v2, %v1049_v3  ;;  %v1217_v3 = vpop.permute.xlu1 %1216 }
 0x2ce   : > { %v1061_v6 = vpack.c.bf16 %v1057_v5, %v1056_v4  ;;  %v1212_v5 = vpop.permute.xlu0 %1211 }
 0x2d0   : > { %7046 = vmatmul.msk.bf16.gmra.mxu0 %vm871_vm4, %v1061_v6  ;;  %7054 = vmatmul.msk.bf16.gmra.mxu1 %vm871_vm4, %v1061_v6 }
 0x31d   : > { %v1091_v7 = vpop.f32.mrf.mxu0  ;;  %v1129_v8 = vpop.f32.mrf.mxu1 }
 0x325   : > { %v1131_v9 = vpop.f32.mrf.mxu1  ;;  %v1093_v10 = vpop.f32.mrf.mxu0 }
 0x326   : > { %v1153_v25 = vpack.c.bf16 %v1131_v9, %v1129_v8  ;;  %v1149_v30 = vpack.c.bf16 %v1093_v10, %v1091_v7 }
 0x32d   : > { %v1134_v11 = vpop.f32.mrf.mxu1  ;;  %v1096_v12 = vpop.f32.mrf.mxu0 }
 0x335   : > { %v1136_v13 = vpop.f32.mrf.mxu1  ;;  %v1098_v14 = vpop.f32.mrf.mxu0 }
 0x336   : > { %v1154_v24 = vpack.c.bf16 %v1136_v13, %v1134_v11  ;;  %v1150_v29 = vpack.c.bf16 %v1098_v14, %v1096_v12  ;;  %v1227_v14 = vpop.permute.xlu0 %1226 }
 0x33d   : > { %v1139_v15 = vpop.f32.mrf.mxu1  ;;  %v1101_v16 = vpop.f32.mrf.mxu0 }
 0x345   : > { %v1141_v17 = vpop.f32.mrf.mxu1  ;;  %v1103_v19 = vpop.f32.mrf.mxu0 }
 0x346   : > { %v1155_v23 = vpack.c.bf16 %v1141_v17, %v1139_v15  ;;  %v1151_v28 = vpack.c.bf16 %v1103_v19, %v1101_v16  ;;  %v1222_v16 = vpop.permute.xlu2 %1221 }
 0x34d   : > { %v1144_v18 = vpop.f32.mrf.mxu1  ;;  %v1106_v22 = vpop.f32.mrf.mxu0 }
 0x355   : > { %v1146_v20 = vpop.f32.mrf.mxu1  ;;  %v1108_v26 = vpop.f32.mrf.mxu0 }
 0x356   : > { %v1156_v21 = vpack.c.bf16 %v1146_v20, %v1144_v18  ;;  %v1152_v27 = vpack.c.bf16 %v1108_v26, %v1106_v22 }
 0x358   : > { %1317 = vmatpush.bf16.msra.mxu1 %v1156_v21  ;;  %9016 = vmatpush.bf16.msra.mxu2 %v1156_v21 }
 0x35c   : > { %1318 = vmatpush.bf16.msra.mxu1 %v1155_v23  ;;  %9017 = vmatpush.bf16.msra.mxu2 %v1155_v23 }
 0x360   : > { %1319 = vmatpush.bf16.msra.mxu1 %v1154_v24  ;;  %9018 = vmatpush.bf16.msra.mxu2 %v1154_v24 }
 0x364   : > { %1320 = vmatpush.bf16.msra.mxu1 %v1153_v25  ;;  %9019 = vmatpush.bf16.msra.mxu2 %v1153_v25  ;;  %v1237_v25 = vpop.permute.xlu2 %1236 }
 0x368   : > { %1321 = vmatpush.bf16.msra.mxu1 %v1152_v27  ;;  %9020 = vmatpush.bf16.msra.mxu2 %v1152_v27  ;;  %v1232_v27 = vpop.permute.xlu1 %1231 }
 0x36c   : > { %1322 = vmatpush.bf16.msra.mxu1 %v1151_v28  ;;  %9021 = vmatpush.bf16.msra.mxu2 %v1151_v28 }
 0x370   : > { %1323 = vmatpush.bf16.msra.mxu1 %v1150_v29  ;;  %9022 = vmatpush.bf16.msra.mxu2 %v1150_v29 }
 0x374   : > { %1324 = vmatpush.bf16.msra.mxu1 %v1149_v30  ;;  %9023 = vmatpush.bf16.msra.mxu2 %v1149_v30 }
 0x377   : > { %1325 = vmatmul.bf16.vlgmr.msra.gmra.mxu1 %v8491_v31  ;;  %1330 = vmatmul.bf16.vlgmr.msra.gmra.mxu2 %v8492_v32 }
 0x378   : > { %1535 = vmatpush.bf16.msrb.mxu1 %v8502_v40 }
 0x37c   : > { %1536 = vmatpush.bf16.msrb.mxu1 %v8501_v42 }
 0x387   : > { %1335 = vmatmul.bf16.gmra.mxu2 %v8493_v33 }
 0x397   : > { %1340 = vmatmul.bf16.gmra.mxu2 %v8494_v34 }
 0x3a7   : > { %1345 = vmatmul.bf16.gmra.mxu2 %v8495_v35 }
 0x3b7   : > { %1350 = vmatmul.bf16.gmra.mxu2 %v8496_v36  ;;  %v1247_v36 = vpop.permute.xlu1 %1246 }
 0x3c7   : > { %1355 = vmatmul.bf16.gmra.mxu2 %v8497_v37 }
 0x3d7   : > { %1360 = vmatmul.bf16.gmra.mxu2 %v8498_v38  ;;  %v1242_v38 = vpop.permute.xlu0 %1241 }
 0x3f4   : > { %v1326_v43 = vpop.f32.mrf.mxu1 }
 0x3f5   : > { %v1327_v45 = vadd.f32 %v1326_v43, %v1192_v44 }
 0x3f7   : > { %v1382_v49 = vmul.f32 0.05, %v1327_v45  ;;  %vm1366_vm14 = vcmp.ge.f32.partialorder %v1327_v45, 0.0 }
 0x3f9   : > { %v1398_v52 = vsel %vm1366_vm14, %v1327_v45, %v1382_v49 }
 0x3fa   : > { %v1331_v46 = vpop.f32.mrf.mxu2 }
 0x3fb   : > { %v1332_v59 = vadd.f32 %v1331_v46, %v1202_v58 }
 0x3fc   : > { %v1328_v48 = vpop.f32.mrf.mxu1 }
 0x3fd   : > { %v1329_v50 = vadd.f32 %v1328_v48, %v1197_v47  ;;  %v1384_v62 = vmul.f32 0.05, %v1332_v59  ;;  %vm1368_vm2 = vcmp.ge.f32.partialorder %v1332_v59, 0.0  ;;  %v8504_v47 = vld [vmem:[#allocation18 + $0x28] sm:$0xff]  ;;  %v1257_v48 = vpop.permute.xlu0 %1256 }
 0x3fe   : > { %1601 = vmatpush.bf16.msra.mxu1 %v8504_v47 }
 0x3ff   : > { %vm1367_vm15 = vcmp.ge.f32.partialorder %v1329_v50, 0.0  ;;  %v1383_v51 = vmul.f32 0.05, %v1329_v50  ;;  %v1400_v0 = vsel %vm1368_vm2, %v1332_v59, %v1384_v62 }
 0x401   : > { %v1399_v53 = vsel %vm1367_vm15, %v1329_v50, %v1383_v51  ;;  %v1252_v50 = vpop.permute.xlu2 %1251 }
 0x402   : > { %v1333_v54 = vpop.f32.mrf.mxu2  ;;  %v10150_v55 = vpack.c.bf16 %v1399_v53, %v1398_v52 }
 0x403   : > { %v1334_v57 = vadd.f32 %v1333_v54, %v1207_v56 }
 0x404   : > { %7095 = vmatmul.msk.bf16.vlgmr.msra.gmra.mxu3 %vm1438_vm0, %v10150_v55  ;;  %7111 = vmatmul.msk.bf16.vlgmr.msrb.gmra.mxu1 %vm1438_vm0, %v10150_v55 }
 0x405   : > { %v1385_v61 = vmul.f32 0.05, %v1334_v57  ;;  %vm1369_vm1 = vcmp.ge.f32.partialorder %v1334_v57, 0.0 }
 0x407   : > { %v1401_v63 = vsel %vm1369_vm1, %v1334_v57, %v1385_v61  ;;  %v8503_v57 = vld [vmem:[#allocation18 + $0x20] sm:$0xff]  ;;  %vm2591_vm1 = vcmask 523264  }
 0x408   : > { %v10156_v2 = vpack.c.bf16 %v1401_v63, %v1400_v0  ;;  %1602 = vmatpush.bf16.msra.mxu1 %v8503_v57  ;;  %v1262_v63 = vpop.permute.xlu1 %1261 }
 0x409   : > { %v1267_v61 = vpop.permute.xlu2 %1266 }
 0x40a   : > { %v1336_v60 = vpop.f32.mrf.mxu2 }
 0x40b   : > { %v1337_v6 = vadd.f32 %v1336_v60, %v1212_v5 }
 0x40d   : > { %v1386_v9 = vmul.f32 0.05, %v1337_v6  ;;  %vm1370_vm4 = vcmp.ge.f32.partialorder %v1337_v6, 0.0 }
 0x40f   : > { %v1402_v11 = vsel %vm1370_vm4, %v1337_v6, %v1386_v9 }
 0x412   : > { %v1338_v1 = vpop.f32.mrf.mxu2 }
 0x413   : > { %v1339_v4 = vadd.f32 %v1338_v1, %v1217_v3 }
 0x414   : > { %7096 = vmatmul.msk.bf16.gmra.mxu3 %vm1438_vm0, %v10156_v2  ;;  %7112 = vmatmul.msk.bf16.gmra.mxu1 %vm1438_vm0, %v10156_v2 }
 0x415   : > { %v1387_v8 = vmul.f32 0.05, %v1339_v4  ;;  %vm1371_vm3 = vcmp.ge.f32.partialorder %v1339_v4, 0.0 }
 0x417   : > { %v1403_v10 = vsel %vm1371_vm3, %v1339_v4, %v1387_v8 }
 0x418   : > { %v10162_v13 = vpack.c.bf16 %v1403_v10, %v1402_v11 }
 0x41a   : > { %v1341_v7 = vpop.f32.mrf.mxu2 }
 0x41b   : > { %v1342_v17 = vadd.f32 %v1341_v7, %v1222_v16 }
 0x41d   : > { %v1388_v20 = vmul.f32 0.05, %v1342_v17  ;;  %vm1372_vm6 = vcmp.ge.f32.partialorder %v1342_v17, 0.0 }
 0x41f   : > { %v1404_v22 = vsel %vm1372_vm6, %v1342_v17, %v1388_v20 }
 0x422   : > { %v1343_v12 = vpop.f32.mrf.mxu2 }
 0x423   : > { %v1344_v15 = vadd.f32 %v1343_v12, %v1227_v14 }
 0x424   : > { %7097 = vmatmul.msk.bf16.gmra.mxu3 %vm1438_vm0, %v10162_v13  ;;  %7113 = vmatmul.msk.bf16.gmra.mxu1 %vm1438_vm0, %v10162_v13 }
 0x425   : > { %v1389_v19 = vmul.f32 0.05, %v1344_v15  ;;  %vm1373_vm5 = vcmp.ge.f32.partialorder %v1344_v15, 0.0 }
 0x427   : > { %v1405_v21 = vsel %vm1373_vm5, %v1344_v15, %v1389_v19 }
 0x428   : > { %v10168_v24 = vpack.c.bf16 %v1405_v21, %v1404_v22 }
 0x42a   : > { %v1346_v18 = vpop.f32.mrf.mxu2 }
 0x42b   : > { %v1347_v28 = vadd.f32 %v1346_v18, %v1232_v27 }
 0x42d   : > { %v1390_v31 = vmul.f32 0.05, %v1347_v28  ;;  %vm1374_vm8 = vcmp.ge.f32.partialorder %v1347_v28, 0.0 }
 0x42f   : > { %v1406_v33 = vsel %vm1374_vm8, %v1347_v28, %v1390_v31 }
 0x432   : > { %v1348_v23 = vpop.f32.mrf.mxu2 }
 0x433   : > { %v1349_v26 = vadd.f32 %v1348_v23, %v1237_v25 }
 0x434   : > { %7098 = vmatmul.msk.bf16.gmra.mxu3 %vm1438_vm0, %v10168_v24  ;;  %7114 = vmatmul.msk.bf16.gmra.mxu1 %vm1438_vm0, %v10168_v24 }
 0x435   : > { %v1391_v30 = vmul.f32 0.05, %v1349_v26  ;;  %vm1375_vm7 = vcmp.ge.f32.partialorder %v1349_v26, 0.0 }
 0x437   : > { %v1407_v32 = vsel %vm1375_vm7, %v1349_v26, %v1391_v30 }
 0x438   : > { %v10174_v35 = vpack.c.bf16 %v1407_v32, %v1406_v33 }
 0x43a   : > { %v1351_v29 = vpop.f32.mrf.mxu2 }
 0x43b   : > { %v1352_v39 = vadd.f32 %v1351_v29, %v1242_v38 }
 0x43d   : > { %v1392_v42 = vmul.f32 0.05, %v1352_v39  ;;  %vm1376_vm10 = vcmp.ge.f32.partialorder %v1352_v39, 0.0 }
 0x43f   : > { %v1408_v44 = vsel %vm1376_vm10, %v1352_v39, %v1392_v42 }
 0x442   : > { %v1353_v34 = vpop.f32.mrf.mxu2 }
 0x443   : > { %v1354_v37 = vadd.f32 %v1353_v34, %v1247_v36 }
 0x444   : > { %7099 = vmatmul.msk.bf16.gmra.mxu3 %vm1438_vm0, %v10174_v35  ;;  %7115 = vmatmul.msk.bf16.gmra.mxu1 %vm1438_vm0, %v10174_v35 }
 0x445   : > { %v1393_v41 = vmul.f32 0.05, %v1354_v37  ;;  %vm1377_vm9 = vcmp.ge.f32.partialorder %v1354_v37, 0.0 }
 0x447   : > { %v1409_v43 = vsel %vm1377_vm9, %v1354_v37, %v1393_v41 }
 0x448   : > { %v10180_v46 = vpack.c.bf16 %v1409_v43, %v1408_v44 }
 0x44a   : > { %v1356_v40 = vpop.f32.mrf.mxu2 }
 0x44b   : > { %v1357_v51 = vadd.f32 %v1356_v40, %v1252_v50 }
 0x44d   : > { %v1394_v54 = vmul.f32 0.05, %v1357_v51  ;;  %vm1378_vm12 = vcmp.ge.f32.partialorder %v1357_v51, 0.0 }
 0x44f   : > { %v1410_v58 = vsel %vm1378_vm12, %v1357_v51, %v1394_v54  ;;  %v8505_v54 = vld [vmem:[#allocation19 + $0x4] sm:$0xf] }
 0x452   : > { %v1358_v45 = vpop.f32.mrf.mxu2 }
 0x453   : > { %v1359_v49 = vadd.f32 %v1358_v45, %v1257_v48 }
 0x454   : > { %7100 = vmatmul.msk.bf16.gmra.mxu3 %vm1438_vm0, %v10180_v46  ;;  %7116 = vmatmul.msk.bf16.gmra.mxu1 %vm1438_vm0, %v10180_v46 }
 0x455   : > { %v1395_v53 = vmul.f32 0.05, %v1359_v49  ;;  %vm1379_vm11 = vcmp.ge.f32.partialorder %v1359_v49, 0.0 }
 0x457   : > { %v1411_v56 = vsel %vm1379_vm11, %v1359_v49, %v1395_v53 }
 0x458   : > { %v1420_v59 = vpack.c.bf16 %v1411_v56, %v1410_v58  ;;  %v7139_v56 = vld [vmem:[#allocation19 + $0xc] sm:$0xf0] }
 0x459   : > { %v7142_v57 = vor.u32 %v8505_v54, %v7139_v56  ;;  %v7223_v54 = vld [vmem:[#allocation19 + $0xb4] sm:$0xf0] }
 0x45a   : > { %v1361_v52 = vpop.f32.mrf.mxu2 }
 0x45b   : > { %v1362_v0 = vadd.f32 %v1361_v52, %v1262_v63 }
 0x45d   : > { %v1396_v3 = vmul.f32 0.05, %v1362_v0  ;;  %vm1380_vm14 = vcmp.ge.f32.partialorder %v1362_v0, 0.0 }
 0x45f   : > { %v1412_v5 = vsel %vm1380_vm14, %v1362_v0, %v1396_v3  ;;  %v7151_v3 = vld [vmem:[#allocation19 + $0x24] sm:$0xf0] }
 0x462   : > { %v1363_v60 = vpop.f32.mrf.mxu2 }
 0x463   : > { %v1364_v62 = vadd.f32 %v1363_v60, %v1267_v61  ;;  %v7137_v60 = vld [vmem:[#allocation19] sm:$0xf]  ;;  %v8506_v61 = vld [vmem:[#allocation19 + $0x8] sm:$0xf0] }
 0x464   : > { %7101 = vmatmul.msk.bf16.gmra.mxu3 %vm1438_vm0, %v1420_v59  ;;  %7117 = vmatmul.msk.bf16.gmra.mxu1 %vm1438_vm0, %v1420_v59  ;;  %v7138_v63 = vor.u32 %v8506_v61, %v7137_v60  ;;  %v7221_v60 = vld [vmem:[#allocation19 + $0xa8] sm:$0xf]  ;;  %v8527_v61 = vld [vmem:[#allocation19 + $0xb0] sm:$0xf0] }
 0x465   : > { %v1397_v1 = vmul.f32 0.05, %v1364_v62  ;;  %vm1381_vm13 = vcmp.ge.f32.partialorder %v1364_v62, 0.0 }
 0x467   : > { %v1413_v4 = vsel %vm1381_vm13, %v1364_v62, %v1397_v1  ;;  %v8508_v1 = vld [vmem:[#allocation19 + $0x1c] sm:$0xf] }
 0x468   : > { %v1421_v6 = vpack.c.bf16 %v1413_v4, %v1412_v5  ;;  %v7154_v4 = vor.u32 %v8508_v1, %v7151_v3  ;;  %v7145_v3 = vld [vmem:[#allocation19 + $0x8] sm:$0xf] }
 0x474   : > { %7102 = vmatmul.msk.bf16.gmra.mxu3 %vm1438_vm0, %v1421_v6  ;;  %7118 = vmatmul.msk.bf16.gmra.mxu1 %vm1438_vm0, %v1421_v6 }
 0x481   : > { %v10190_v7 = vpop.f32.mrf.mxu1 }
 0x484   : > { %7127 = vmatmul.msk.bf16.vlgmr.msra.gmra.mxu1 %vm1438_vm0, %v10150_v55 }
 0x487   : > { %v10194_v8 = vpop.f32.mrf.mxu3 }
 0x489   : > { %v10196_v9 = vpop.f32.mrf.mxu1 }
 0x48a   : > { %v1652_v10 = vpack.c.bf16 %v10196_v9, %v10190_v7  ;;  %v8509_v7 = vld [vmem:[#allocation19 + $0x20] sm:$0xf0] }
 0x48f   : > { %v10200_v11 = vpop.f32.mrf.mxu3 }
 0x490   : > { %v1644_v62 = vpack.c.bf16 %v10200_v11, %v10194_v8 }
 0x491   : > { %v1543_v12 = vpop.f32.mrf.mxu1 }
 0x494   : > { %7128 = vmatmul.msk.bf16.gmra.mxu1 %vm1438_vm0, %v10156_v2 }
 0x497   : > { %v10204_v14 = vpop.f32.mrf.mxu3 }
 0x499   : > { %v1545_v15 = vpop.f32.mrf.mxu1 }
 0x49a   : > { %v1653_v16 = vpack.c.bf16 %v1545_v15, %v1543_v12  ;;  %v8511_v12 = vld [vmem:[#allocation19 + $0x34] sm:$0xf]  ;;  %v7161_v15 = vld [vmem:[#allocation19 + $0x30] sm:$0xf] }
 0x49f   : > { %v10206_v17 = vpop.f32.mrf.mxu3 }
 0x4a0   : > { %v1645_v58 = vpack.c.bf16 %v10206_v17, %v10204_v14  ;;  %v7163_v14 = vld [vmem:[#allocation19 + $0x3c] sm:$0xf0] }
 0x4a1   : > { %v1548_v55 = vpop.f32.mrf.mxu1  ;;  %v7166_v8 = vor.u32 %v8511_v12, %v7163_v14  ;;  %v7233_v14 = vld [vmem:[#allocation19 + $0xc0] sm:$0xf] }
 0x4a4   : > { %7129 = vmatmul.msk.bf16.gmra.mxu1 %vm1438_vm0, %v10162_v13 }
 0x4a7   : > { %v1482_v18 = vpop.f32.mrf.mxu3 }
 0x4a9   : > { %v1550_v19 = vpop.f32.mrf.mxu1 }
 0x4aa   : > { %v1654_v20 = vpack.c.bf16 %v1550_v19, %v1548_v55  ;;  %v7175_v19 = vld [vmem:[#allocation19 + $0x54] sm:$0xf0] }
 0x4af   : > { %v1484_v21 = vpop.f32.mrf.mxu3 }
 0x4b0   : > { %v1646_v53 = vpack.c.bf16 %v1484_v21, %v1482_v18  ;;  %v8514_v18 = vld [vmem:[#allocation19 + $0x4c] sm:$0xf] }
 0x4b1   : > { %v1553_v22 = vpop.f32.mrf.mxu1 }
 0x4b4   : > { %7130 = vmatmul.msk.bf16.gmra.mxu1 %vm1438_vm0, %v10168_v24 }
 0x4b7   : > { %v1487_v23 = vpop.f32.mrf.mxu3 }
 0x4b9   : > { %v1555_v2 = vpop.f32.mrf.mxu1 }
 0x4ba   : > { %v1655_v25 = vpack.c.bf16 %v1555_v2, %v1553_v22  ;;  %v7173_v22 = vld [vmem:[#allocation19 + $0x48] sm:$0xf] }
 0x4bf   : > { %v1489_v26 = vpop.f32.mrf.mxu3 }
 0x4c0   : > { %v1647_v51 = vpack.c.bf16 %v1489_v26, %v1487_v23  ;;  %v8515_v23 = vld [vmem:[#allocation19 + $0x50] sm:$0xf0]  ;;  %v8517_v26 = vld [vmem:[#allocation19 + $0x64] sm:$0xf] }
 0x4c1   : > { %v1558_v27 = vpop.f32.mrf.mxu1  ;;  %v7174_v2 = vor.u32 %v8515_v23, %v7173_v22  ;;  %v1772_v22 = vpop.permute.xlu1 %1771 }
 0x4c4   : > { %7131 = vmatmul.msk.bf16.gmra.mxu1 %vm1438_vm0, %v10174_v35 }
 0x4c7   : > { %v1492_v28 = vpop.f32.mrf.mxu3 }
 0x4c9   : > { %v1560_v29 = vpop.f32.mrf.mxu1 }
 0x4ca   : > { %v1656_v47 = vpack.c.bf16 %v1560_v29, %v1558_v27  ;;  %v7187_v27 = vld [vmem:[#allocation19 + $0x6c] sm:$0xf0] }
 0x4cf   : > { %v1494_v30 = vpop.f32.mrf.mxu3 }
 0x4d0   : > { %v1648_v50 = vpack.c.bf16 %v1494_v30, %v1492_v28  ;;  %v7190_v28 = vor.u32 %v8517_v26, %v7187_v27  ;;  %v7185_v30 = vld [vmem:[#allocation19 + $0x60] sm:$0xf] }
 0x4d1   : > { %v1563_v13 = vpop.f32.mrf.mxu1 }
 0x4d4   : > { %7132 = vmatmul.msk.bf16.gmra.mxu1 %vm1438_vm0, %v10180_v46 }
 0x4d7   : > { %v1497_v31 = vpop.f32.mrf.mxu3 }
 0x4d9   : > { %v1565_v32 = vpop.f32.mrf.mxu1 }
 0x4da   : > { %v1657_v45 = vpack.c.bf16 %v1565_v32, %v1563_v13  ;;  %v8518_v13 = vld [vmem:[#allocation19 + $0x68] sm:$0xf0] }
 0x4df   : > { %v1499_v33 = vpop.f32.mrf.mxu3 }
 0x4e0   : > { %v1649_v48 = vpack.c.bf16 %v1499_v33, %v1497_v31  ;;  %v7186_v31 = vor.u32 %v8518_v13, %v7185_v30  ;;  %v8520_v33 = vld [vmem:[#allocation19 + $0x7c] sm:$0xf]  ;;  %v8513_v13 = vld [vmem:[#allocation19 + $0x40] sm:$0xf0] }
 0x4e1   : > { %v1568_v34 = vpop.f32.mrf.mxu1 }
 0x4e4   : > { %7133 = vmatmul.msk.bf16.gmra.mxu1 %vm1438_vm0, %v1420_v59 }
 0x4e7   : > { %v1502_v24 = vpop.f32.mrf.mxu3 }
 0x4e9   : > { %v1570_v36 = vpop.f32.mrf.mxu1 }
 0x4ea   : > { %v1658_v41 = vpack.c.bf16 %v1570_v36, %v1568_v34  ;;  %v7199_v34 = vld [vmem:[#allocation19 + $0x84] sm:$0xf0] }
 0x4ef   : > { %v1504_v37 = vpop.f32.mrf.mxu3 }
 0x4f0   : > { %v1650_v46 = vpack.c.bf16 %v1504_v37, %v1502_v24  ;;  %v7202_v24 = vor.u32 %v8520_v33, %v7199_v34  ;;  %v7197_v37 = vld [vmem:[#allocation19 + $0x78] sm:$0xf] }
 0x4f1   : > { %v1573_v38 = vpop.f32.mrf.mxu1 }
 0x4f4   : > { %7134 = vmatmul.msk.bf16.gmra.mxu1 %vm1438_vm0, %v1421_v6  ;;  %v7149_v6 = vld [vmem:[#allocation19 + $0x18] sm:$0xf] }
 0x4f5   : > { %v7150_v9 = vor.u32 %v8509_v7, %v7149_v6  ;;  %v8529_v6 = vld [vmem:[#allocation19 + $0xc4] sm:$0xf]  ;;  %v7235_v7 = vld [vmem:[#allocation19 + $0xcc] sm:$0xf0] }
 0x4f6   : > { %v7238_v12 = vor.u32 %v8529_v6, %v7235_v7 }
 0x4f7   : > { %v1507_v35 = vpop.f32.mrf.mxu3 }
 0x4f9   : > { %v1575_v39 = vpop.f32.mrf.mxu1 }
 0x4fa   : > { %v1659_v40 = vpack.c.bf16 %v1575_v39, %v1573_v38  ;;  %v8521_v38 = vld [vmem:[#allocation19 + $0x80] sm:$0xf0] }
 0x4fc   : > { %2269 = vmatpush.bf16.msrb.mxu3 %v1659_v40  ;;  %v8523_v40 = vld [vmem:[#allocation19 + $0x94] sm:$0xf] }
 0x4ff   : > { %v1509_v42 = vpop.f32.mrf.mxu3 }
 0x500   : > { %2270 = vmatpush.bf16.msrb.mxu3 %v1658_v41  ;;  %v1651_v43 = vpack.c.bf16 %v1509_v42, %v1507_v35  ;;  %v7198_v35 = vor.u32 %v8521_v38, %v7197_v37  ;;  %v7211_v41 = vld [vmem:[#allocation19 + $0x9c] sm:$0xf0]  ;;  %v7257_v38 = vld [vmem:[#allocation19 + $0xf0] sm:$0xf] }
 0x501   : > { %v10218_v44 = vpop.f32.mrf.mxu1  ;;  %v7214_v42 = vor.u32 %v8523_v40, %v7211_v41 }
 0x502   : > { %2180 = vmatpush.bf16.msrb.mxu2 %v1651_v43 }
 0x504   : > { %2271 = vmatpush.bf16.msrb.mxu3 %v1657_v45 }
 0x506   : > { %2181 = vmatpush.bf16.msrb.mxu2 %v1650_v46  ;;  %v7209_v46 = vld [vmem:[#allocation19 + $0x90] sm:$0xf] }
 0x508   : > { %2272 = vmatpush.bf16.msrb.mxu3 %v1656_v47  ;;  %v8524_v47 = vld [vmem:[#allocation19 + $0x98] sm:$0xf0] }
 0x509   : > { %v10220_v49 = vpop.f32.mrf.mxu1 }
 0x50a   : > { %2182 = vmatpush.bf16.msrb.mxu2 %v1649_v48  ;;  %v7210_v48 = vor.u32 %v8524_v47, %v7209_v46  ;;  %v7181_v46 = vld [vmem:[#allocation19 + $0x50] sm:$0xf]  ;;  %v1787_v47 = vpop.permute.xlu1 %1786 }
 0x50c   : > { %2273 = vmatpush.bf16.msrb.mxu3 %v1655_v25 }
 0x50e   : > { %2183 = vmatpush.bf16.msrb.mxu2 %v1648_v50 }
 0x510   : > { %2274 = vmatpush.bf16.msrb.mxu3 %v1654_v20  ;;  %v7178_v20 = vor.u32 %v8514_v18, %v7175_v19 }
 0x511   : > { %v10222_v52 = vpop.f32.mrf.mxu1 }
 0x512   : > { %2184 = vmatpush.bf16.msrb.mxu2 %v1647_v51 }
 0x514   : > { %2275 = vmatpush.bf16.msrb.mxu3 %v1653_v16  ;;  %v8512_v16 = vld [vmem:[#allocation19 + $0x38] sm:$0xf0] }
 0x515   : > { %v7162_v17 = vor.u32 %v8512_v16, %v7161_v15  ;;  %v8510_v15 = vld [vmem:[#allocation19 + $0x28] sm:$0xf0]  ;;  %v8532_v16 = vld [vmem:[#allocation19 + $0xdc] sm:$0xf] }
 0x516   : > { %2185 = vmatpush.bf16.msrb.mxu2 %v1646_v53  ;;  %v8526_v53 = vld [vmem:[#allocation19 + $0xac] sm:$0xf] }
 0x518   : > { %2276 = vmatpush.bf16.msrb.mxu3 %v1652_v10 }
 0x519   : > { %v10229_v59 = vpop.f32.mrf.mxu1 }
 0x51a   : > { %2186 = vmatpush.bf16.msrb.mxu2 %v1645_v58  ;;  %v1661_v1 = vpack.c.bf16 %v10229_v59, %v10222_v52  ;;  %v1767_v52 = vpop.permute.xlu0 %1766 }
 0x51b   : > { %2277 = vmatmul.bf16.vlgmr.msrb.gmra.mxu3 %v7142_v57  ;;  %v7226_v57 = vor.u32 %v8526_v53, %v7223_v54  ;;  %v7271_v53 = vld [vmem:[#allocation19 + $0x114] sm:$0xf0] }
 0x51e   : > { %2187 = vmatpush.bf16.msrb.mxu2 %v1644_v62  ;;  %v7222_v62 = vor.u32 %v8527_v61, %v7221_v60  ;;  %v7269_v61 = vld [vmem:[#allocation19 + $0x108] sm:$0xf] }
 0x521   : > { %v10233_v0 = vpop.f32.mrf.mxu1  ;;  %2188 = vmatmul.bf16.vlgmr.msrb.gmra.mxu2 %v7138_v63 }
 0x529   : > { %v10235_v5 = vpop.f32.mrf.mxu1 }
 0x52a   : > { %v1662_v63 = vpack.c.bf16 %v10235_v5, %v10233_v0 }
 0x52b   : > { %2282 = vmatmul.bf16.gmra.mxu3 %v7154_v4  ;;  %v8507_v4 = vld [vmem:[#allocation19 + $0x10] sm:$0xf0] }
 0x531   : > { %v10237_v10 = vpop.f32.mrf.mxu1  ;;  %2193 = vmatmul.bf16.gmra.mxu2 %v7150_v9  ;;  %v1660_v9 = vpack.c.bf16 %v10220_v49, %v10218_v44 }
 0x539   : > { %v1621_v11 = vpop.f32.mrf.mxu1 }
 0x53a   : > { %v1663_v58 = vpack.c.bf16 %v1621_v11, %v10237_v10  ;;  %v7146_v10 = vor.u32 %v8507_v4, %v7145_v3  ;;  %v7157_v11 = vld [vmem:[#allocation19 + $0x20] sm:$0xf] }
 0x53b   : > { %2287 = vmatmul.bf16.gmra.mxu3 %v7166_v8  ;;  %v8530_v8 = vld [vmem:[#allocation19 + $0xc8] sm:$0xf0]  ;;  %v7158_v44 = vor.u32 %v8510_v15, %v7157_v11 }
 0x53c   : > { %v7234_v0 = vor.u32 %v8530_v8, %v7233_v14  ;;  %v8519_v14 = vld [vmem:[#allocation19 + $0x70] sm:$0xf0]  ;;  %v8541_v8 = vld [vmem:[#allocation19 + $0x124] sm:$0xf] }
 0x541   : > { %v1624_v55 = vpop.f32.mrf.mxu1  ;;  %2198 = vmatmul.bf16.gmra.mxu2 %v7162_v17  ;;  %v7247_v17 = vld [vmem:[#allocation19 + $0xe4] sm:$0xf0] }
 0x542   : > { %v7250_v49 = vor.u32 %v8532_v16, %v7247_v17  ;;  %v7281_v16 = vld [vmem:[#allocation19 + $0x120] sm:$0xf]  ;;  %v8542_v17 = vld [vmem:[#allocation19 + $0x128] sm:$0xf0] }
 0x549   : > { %v1626_v21 = vpop.f32.mrf.mxu1 }
 0x54a   : > { %v1664_v56 = vpack.c.bf16 %v1626_v21, %v1624_v55  ;;  %v8533_v21 = vld [vmem:[#allocation19 + $0xe0] sm:$0xf0] }
 0x54b   : > { %2292 = vmatmul.bf16.gmra.mxu3 %v7178_v20  ;;  %v7245_v20 = vld [vmem:[#allocation19 + $0xd8] sm:$0xf] }
 0x551   : > { %v1629_v25 = vpop.f32.mrf.mxu1  ;;  %2203 = vmatmul.bf16.gmra.mxu2 %v7174_v2 }
 0x559   : > { %v1631_v29 = vpop.f32.mrf.mxu1 }
 0x55a   : > { %v1665_v51 = vpack.c.bf16 %v1631_v29, %v1629_v25  ;;  %v7246_v25 = vor.u32 %v8533_v21, %v7245_v20  ;;  %v1777_v29 = vpop.permute.xlu2 %1776 }
 0x55b   : > { %2297 = vmatmul.bf16.gmra.mxu3 %v7190_v28  ;;  %v7169_v28 = vld [vmem:[#allocation19 + $0x38] sm:$0xf] }
 0x561   : > { %v1634_v32 = vpop.f32.mrf.mxu1  ;;  %2208 = vmatmul.bf16.gmra.mxu2 %v7186_v31  ;;  %v8535_v31 = vld [vmem:[#allocation19 + $0xf4] sm:$0xf] }
 0x569   : > { %v1636_v36 = vpop.f32.mrf.mxu1 }
 0x56a   : > { %v1666_v50 = vpack.c.bf16 %v1636_v36, %v1634_v32  ;;  %v7259_v32 = vld [vmem:[#allocation19 + $0xfc] sm:$0xf0]  ;;  %v7170_v36 = vor.u32 %v8513_v13, %v7169_v28  ;;  %v7295_v28 = vld [vmem:[#allocation19 + $0x144] sm:$0xf0] }
 0x56b   : > { %2302 = vmatmul.bf16.gmra.mxu3 %v7202_v24  ;;  %v7262_v37 = vor.u32 %v8535_v31, %v7259_v32 }
 0x571   : > { %v1639_v39 = vpop.f32.mrf.mxu1  ;;  %2213 = vmatmul.bf16.gmra.mxu2 %v7198_v35  ;;  %v8536_v35 = vld [vmem:[#allocation19 + $0xf8] sm:$0xf0] }
 0x579   : > { %v1641_v43 = vpop.f32.mrf.mxu1 }
 0x57a   : > { %v1667_v45 = vpack.c.bf16 %v1641_v43, %v1639_v39  ;;  %v1782_v39 = vpop.permute.xlu0 %1781 }
 0x57b   : > { %2307 = vmatmul.bf16.gmra.mxu3 %v7214_v42  ;;  %v7258_v42 = vor.u32 %v8536_v35, %v7257_v38 }
 0x57c   : > { %2358 = vmatpush.bf16.msra.mxu0 %v1667_v45 }
 0x580   : > { %2359 = vmatpush.bf16.msra.mxu0 %v1666_v50  ;;  %v8516_v50 = vld [vmem:[#allocation19 + $0x58] sm:$0xf0] }
 0x581   : > { %2218 = vmatmul.bf16.gmra.mxu2 %v7210_v48 }
 0x584   : > { %2360 = vmatpush.bf16.msra.mxu0 %v1665_v51  ;;  %v8538_v51 = vld [vmem:[#allocation19 + $0x10c] sm:$0xf] }
 0x585   : > { %v7274_v60 = vor.u32 %v8538_v51, %v7271_v53 }
 0x588   : > { %2361 = vmatpush.bf16.msra.mxu0 %v1664_v56 }
 0x58b   : > { %2312 = vmatmul.bf16.gmra.mxu3 %v7226_v57 }
 0x58c   : > { %2362 = vmatpush.bf16.msra.mxu0 %v1663_v58  ;;  %v7182_v58 = vor.u32 %v8516_v50, %v7181_v46  ;;  %v7307_v50 = vld [vmem:[#allocation19 + $0x15c] sm:$0xf0] }
 0x590   : > { %2363 = vmatpush.bf16.msra.mxu0 %v1662_v63  ;;  %v1792_v63 = vpop.permute.xlu2 %1791 }
 0x591   : > { %2223 = vmatmul.bf16.gmra.mxu2 %v7222_v62  ;;  %v8539_v62 = vld [vmem:[#allocation19 + $0x110] sm:$0xf0] }
 0x592   : > { %v7270_v4 = vor.u32 %v8539_v62, %v7269_v61  ;;  %v8564_v61 = vld [vmem:[#allocation22 + $0x58] sm:$0xff]  ;;  %v7305_v62 = vld [vmem:[#allocation19 + $0x150] sm:$0xf] }
 0x593   : > { %2888 = vmatpush.bf16.msra.mxu3 %v8564_v61 }
 0x594   : > { %2364 = vmatpush.bf16.msra.mxu0 %v1661_v1 }
 0x598   : > { %2365 = vmatpush.bf16.msra.mxu0 %v1660_v9  ;;  %v7193_v9 = vld [vmem:[#allocation19 + $0x68] sm:$0xf] }
 0x59b   : > { %2366 = vmatmul.bf16.vlgmr.msra.gmra.mxu0 %v7146_v10  ;;  %2317 = vmatmul.bf16.gmra.mxu3 %v7238_v12  ;;  %v1797_v10 = vpop.permute.xlu0 %1796 }
 0x59e   : > { %v2278_v5 = vpop.f32.mrf.mxu3 }
 0x5a1   : > { %2228 = vmatmul.bf16.gmra.mxu2 %v7234_v0  ;;  %v7283_v0 = vld [vmem:[#allocation19 + $0x12c] sm:$0xf0] }
 0x5a2   : > { %v7286_v15 = vor.u32 %v8541_v8, %v7283_v0  ;;  %v8554_v0 = vld [vmem:[#allocation22 + $0x8] sm:$0xff] }
 0x5a4   : > { %v2189_v59 = vpop.f32.mrf.mxu2 }
 0x5a5   : > { %v2190_v55 = vadd.f32 %v2189_v59, %v1767_v52  ;;  %v7194_v59 = vor.u32 %v8519_v14, %v7193_v9 }
 0x5a6   : > { %v2280_v18 = vpop.f32.mrf.mxu3 }
 0x5a7   : > { %v10246_v19 = vadd.f32 %v2278_v5, %v2190_v55  ;;  %v1802_v55 = vpop.permute.xlu1 %1801 }
 0x5ab   : > { %2371 = vmatmul.bf16.gmra.mxu0 %v7158_v44  ;;  %2322 = vmatmul.bf16.gmra.mxu3 %v7250_v49  ;;  %v7282_v49 = vor.u32 %v8542_v17, %v7281_v16  ;;  %v8557_v16 = vld [vmem:[#allocation22 + $0x20] sm:$0xff] }
 0x5ac   : > { %v2191_v23 = vpop.f32.mrf.mxu2  ;;  %v8561_v17 = vld [vmem:[#allocation22 + $0x40] sm:$0xff] }
 0x5ad   : > { %v2192_v2 = vadd.f32 %v2191_v23, %v1772_v22  ;;  %v7205_v22 = vld [vmem:[#allocation19 + $0x80] sm:$0xf]  ;;  %v1807_v23 = vpop.permute.xlu2 %1806 }
 0x5ae   : > { %v2283_v26 = vpop.f32.mrf.mxu3 }
 0x5af   : > { %v10248_v27 = vadd.f32 %v2280_v18, %v2192_v2 }
 0x5b1   : > { %2233 = vmatmul.bf16.gmra.mxu2 %v7246_v25  ;;  %v8522_v25 = vld [vmem:[#allocation19 + $0x88] sm:$0xf0] }
 0x5b2   : > { %v7206_v31 = vor.u32 %v8522_v25, %v7205_v22 }
 0x5b4   : > { %v2194_v30 = vpop.f32.mrf.mxu2 }
 0x5b5   : > { %v2195_v33 = vadd.f32 %v2194_v30, %v1777_v29 }
 0x5b6   : > { %v2285_v34 = vpop.f32.mrf.mxu3 }
 0x5b7   : > { %v10250_v24 = vadd.f32 %v2283_v26, %v2195_v33  ;;  %v8544_v26 = vld [vmem:[#allocation19 + $0x13c] sm:$0xf]  ;;  %v7293_v33 = vld [vmem:[#allocation19 + $0x138] sm:$0xf] }
 0x5b8   : > { %v7298_v32 = vor.u32 %v8544_v26, %v7295_v28  ;;  %v7317_v28 = vld [vmem:[#allocation19 + $0x168] sm:$0xf] }
 0x5bb   : > { %2376 = vmatmul.bf16.gmra.mxu0 %v7170_v36  ;;  %2327 = vmatmul.bf16.gmra.mxu3 %v7262_v37  ;;  %v1812_v36 = vpop.permute.xlu0 %1811 }
 0x5bc   : > { %v2196_v40 = vpop.f32.mrf.mxu2 }
 0x5bd   : > { %v2197_v41 = vadd.f32 %v2196_v40, %v1782_v39  ;;  %v8560_v39 = vld [vmem:[#allocation22 + $0x38] sm:$0xff] }
 0x5be   : > { %v2288_v43 = vpop.f32.mrf.mxu3  ;;  %2766 = vmatpush.bf16.msra.mxu2 %v8560_v39  ;;  %v8531_v39 = vld [vmem:[#allocation19 + $0xd0] sm:$0xf0] }
 0x5bf   : > { %v10252_v45 = vadd.f32 %v2285_v34, %v2197_v41  ;;  %v8545_v34 = vld [vmem:[#allocation19 + $0x140] sm:$0xf0] }
 0x5c0   : > { %v7294_v35 = vor.u32 %v8545_v34, %v7293_v33 }
 0x5c1   : > { %2238 = vmatmul.bf16.gmra.mxu2 %v7258_v42  ;;  %v7217_v42 = vld [vmem:[#allocation19 + $0x98] sm:$0xf] }
 0x5c4   : > { %v2199_v48 = vpop.f32.mrf.mxu2 }
 0x5c5   : > { %v2200_v54 = vadd.f32 %v2199_v48, %v1787_v47  ;;  %v8525_v47 = vld [vmem:[#allocation19 + $0xa0] sm:$0xf0]  ;;  %v8547_v48 = vld [vmem:[#allocation19 + $0x154] sm:$0xf] }
 0x5c6   : > { %v2290_v56 = vpop.f32.mrf.mxu3 }
 0x5c7   : > { %v10254_v57 = vadd.f32 %v2288_v43, %v2200_v54  ;;  %v1817_v43 = vpop.permute.xlu1 %1816 }
 0x5cb   : > { %2381 = vmatmul.bf16.gmra.mxu0 %v7182_v58  ;;  %2332 = vmatmul.bf16.gmra.mxu3 %v7274_v60  ;;  %v7310_v58 = vor.u32 %v8547_v48, %v7307_v50  ;;  %v8556_v60 = vld [vmem:[#allocation22 + $0x18] sm:$0xff] }
 0x5cc   : > { %v2201_v1 = vpop.f32.mrf.mxu2  ;;  %2644 = vmatpush.bf16.msrb.mxu1 %v8556_v60 }
 0x5cd   : > { %v2202_v3 = vadd.f32 %v2201_v1, %v1792_v63  ;;  %v8548_v63 = vld [vmem:[#allocation19 + $0x158] sm:$0xf0]  ;;  %v8555_v1 = vld [vmem:[#allocation22 + $0x10] sm:$0xff] }
 0x5ce   : > { %v2293_v6 = vpop.f32.mrf.mxu3 }
 0x5cf   : > { %v10256_v7 = vadd.f32 %v2290_v56, %v2202_v3  ;;  %v7218_v56 = vor.u32 %v8525_v47, %v7217_v42  ;;  %v8559_v3 = vld [vmem:[#allocation22 + $0x30] sm:$0xff] }
 0x5d0   : > { %2645 = vmatpush.bf16.msrb.mxu1 %v8555_v1  ;;  %2767 = vmatpush.bf16.msra.mxu2 %v8559_v3 }
 0x5d1   : > { %2243 = vmatmul.bf16.gmra.mxu2 %v7270_v4  ;;  %v8563_v4 = vld [vmem:[#allocation22 + $0x50] sm:$0xff] }
 0x5d2   : > { %2889 = vmatpush.bf16.msra.mxu3 %v8563_v4  ;;  %v7253_v4 = vld [vmem:[#allocation19 + $0xe0] sm:$0xf] }
 0x5d4   : > { %v2204_v12 = vpop.f32.mrf.mxu2  ;;  %2646 = vmatpush.bf16.msrb.mxu1 %v8554_v0 }
 0x5d5   : > { %v2205_v5 = vadd.f32 %v2204_v12, %v1797_v10  ;;  %v7306_v12 = vor.u32 %v8548_v63, %v7305_v62 }
 0x5d6   : > { %v2295_v11 = vpop.f32.mrf.mxu3 }
 0x5d7   : > { %v10258_v52 = vadd.f32 %v2293_v6, %v2205_v5  ;;  %v1822_v6 = vpop.permute.xlu2 %1821  ;;  %v8558_v5 = vld [vmem:[#allocation22 + $0x28] sm:$0xff] }
 0x5d8   : > { %2768 = vmatpush.bf16.msra.mxu2 %v8558_v5 }
 0x5db   : > { %2386 = vmatmul.bf16.gmra.mxu0 %v7194_v59  ;;  %2337 = vmatmul.bf16.gmra.mxu3 %v7286_v15  ;;  %v7229_v59 = vld [vmem:[#allocation19 + $0xb0] sm:$0xf]  ;;  %v8553_v15 = vld [vmem:[#allocation22] sm:$0xff] }
 0x5dc   : > { %v2206_v18 = vpop.f32.mrf.mxu2  ;;  %2647 = vmatpush.bf16.msrb.mxu1 %v8553_v15  ;;  %2769 = vmatpush.bf16.msra.mxu2 %v8557_v16 }
 0x5dd   : > { %v2207_v44 = vadd.f32 %v2206_v18, %v1802_v55  ;;  %v1827_v55 = vpop.permute.xlu0 %1826 }
 0x5de   : > { %v2298_v20 = vpop.f32.mrf.mxu3 }
 0x5df   : > { %v10260_v21 = vadd.f32 %v2295_v11, %v2207_v44  ;;  %v8562_v11 = vld [vmem:[#allocation22 + $0x48] sm:$0xff]  ;;  %v8528_v44 = vld [vmem:[#allocation19 + $0xb8] sm:$0xf0] }
 0x5e0   : > { %2890 = vmatpush.bf16.msra.mxu3 %v8562_v11  ;;  %v7230_v25 = vor.u32 %v8528_v44, %v7229_v59 }
 0x5e1   : > { %2248 = vmatmul.bf16.gmra.mxu2 %v7282_v49  ;;  %v8550_v49 = vld [vmem:[#allocation19 + $0x16c] sm:$0xf] }
 0x5e4   : > { %v2209_v2 = vpop.f32.mrf.mxu2  ;;  %2891 = vmatpush.bf16.msra.mxu3 %v8561_v17 }
 0x5e5   : > { %v2210_v29 = vadd.f32 %v2209_v2, %v1807_v23  ;;  %v1842_v48 = vpop.permute.xlu0 %1841 }
 0x5e6   : > { %v2300_v30 = vpop.f32.mrf.mxu3 }
 0x5e7   : > { %v10262_v13 = vadd.f32 %v2298_v20, %v2210_v29  ;;  %v7319_v20 = vld [vmem:[#allocation19 + $0x174] sm:$0xf0]  ;;  %v8551_v29 = vld [vmem:[#allocation19 + $0x170] sm:$0xf0] }
 0x5e8   : > { %v7322_v26 = vor.u32 %v8550_v49, %v7319_v20  ;;  %v7318_v33 = vor.u32 %v8551_v29, %v7317_v28 }
 0x5eb   : > { %2391 = vmatmul.bf16.gmra.mxu0 %v7206_v31  ;;  %2342 = vmatmul.bf16.gmra.mxu3 %v7298_v32 }
 0x5ec   : > { %v2211_v37 = vpop.f32.mrf.mxu2 }
 0x5ed   : > { %v2212_v38 = vadd.f32 %v2211_v37, %v1812_v36  ;;  %v1837_v37 = vpop.permute.xlu2 %1836 }
 0x5ee   : > { %v2303_v40 = vpop.f32.mrf.mxu3 }
 0x5ef   : > { %v10264_v41 = vadd.f32 %v2300_v30, %v2212_v38  ;;  %v1832_v30 = vpop.permute.xlu1 %1831 }
 0x5f1   : > { %2253 = vmatmul.bf16.gmra.mxu2 %v7294_v35  ;;  %v7241_v35 = vld [vmem:[#allocation19 + $0xc8] sm:$0xf] }
 0x5f4   : > { %v2214_v46 = vpop.f32.mrf.mxu2 }
 0x5f5   : > { %v2215_v51 = vadd.f32 %v2214_v46, %v1817_v43  ;;  %v7242_v46 = vor.u32 %v8531_v39, %v7241_v35 }
 0x5f6   : > { %v2305_v53 = vpop.f32.mrf.mxu3 }
 0x5f7   : > { %v10266_v54 = vadd.f32 %v2303_v40, %v2215_v51  ;;  %v1847_v1 = vpop.permute.xlu1 %1846 }
 0x5fb   : > { %2396 = vmatmul.bf16.gmra.mxu0 %v7218_v56  ;;  %2347 = vmatmul.bf16.gmra.mxu3 %v7310_v58 }
 0x5fc   : > { %v2216_v9 = vpop.f32.mrf.mxu2 }
 0x5fd   : > { %v2217_v10 = vadd.f32 %v2216_v9, %v1822_v6  ;;  %v8534_v6 = vld [vmem:[#allocation19 + $0xe8] sm:$0xf0] }
 0x5fe   : > { %v2308_v14 = vpop.f32.mrf.mxu3  ;;  %v7254_v5 = vor.u32 %v8534_v6, %v7253_v4 }
 0x5ff   : > { %v10268_v8 = vadd.f32 %v2305_v53, %v2217_v10 }
 0x601   : > { %2258 = vmatmul.bf16.gmra.mxu2 %v7306_v12 }
 0x604   : > { %v2219_v18 = vpop.f32.mrf.mxu2 }
 0x605   : > { %v2220_v22 = vadd.f32 %v2219_v18, %v1827_v55 }
 0x606   : > { %v2310_v23 = vpop.f32.mrf.mxu3 }
 0x607   : > { %v10270_v2 = vadd.f32 %v2308_v14, %v2220_v22  ;;  %v1857_v22 = vpop.permute.xlu0 %1856 }
 0x60b   : > { %2401 = vmatmul.bf16.gmra.mxu0 %v7230_v25  ;;  %2352 = vmatmul.bf16.gmra.mxu3 %v7322_v26  ;;  %v7265_v25 = vld [vmem:[#allocation19 + $0xf8] sm:$0xf]  ;;  %v8537_v26 = vld [vmem:[#allocation19 + $0x100] sm:$0xf0] }
 0x60c   : > { %v2221_v31 = vpop.f32.mrf.mxu2 }
 0x60d   : > { %v2222_v32 = vadd.f32 %v2221_v31, %v1832_v30 }
 0x60e   : > { %v2313_v34 = vpop.f32.mrf.mxu3 }
 0x60f   : > { %v10272_v36 = vadd.f32 %v2310_v23, %v2222_v32 }
 0x611   : > { %2263 = vmatmul.bf16.gmra.mxu2 %v7318_v33  ;;  %v7266_v33 = vor.u32 %v8537_v26, %v7265_v25 }
 0x614   : > { %v2224_v38 = vpop.f32.mrf.mxu2 }
 0x615   : > { %v2225_v40 = vadd.f32 %v2224_v38, %v1837_v37 }
 0x616   : > { %v2315_v42 = vpop.f32.mrf.mxu3 }
 0x617   : > { %v10274_v43 = vadd.f32 %v2313_v34, %v2225_v40 }
 0x618   : > { %v2367_v47 = vpop.f32.mrf.mxu0 }
 0x619   : > { %v2368_v51 = vadd.f32 %v2367_v47, %v10246_v19 }
 0x61b   : > { %2406 = vmatmul.bf16.gmra.mxu0 %v7242_v46  ;;  %v2479_v61 = vmul.f32 0.05, %v2368_v51  ;;  %vm2447_vm15 = vcmp.ge.f32.partialorder %v2368_v51, 0.0 }
 0x61c   : > { %v2226_v50 = vpop.f32.mrf.mxu2 }
 0x61d   : > { %v2227_v53 = vadd.f32 %v2226_v50, %v1842_v48  ;;  %v2511_v9 = vsel %vm2447_vm15, %v2368_v51, %v2479_v61 }
 0x61e   : > { %v2318_v56 = vpop.f32.mrf.mxu3 }
 0x61f   : > { %v10277_v58 = vadd.f32 %v2315_v42, %v2227_v53  ;;  %v7277_v53 = vld [vmem:[#allocation19 + $0x110] sm:$0xf] }
 0x620   : > { %v2369_v60 = vpop.f32.mrf.mxu0 }
 0x621   : > { %v2370_v62 = vadd.f32 %v2369_v60, %v10248_v27  ;;  %v1852_v27 = vpop.permute.xlu2 %1851 }
 0x623   : > { %vm2448_vm0 = vcmp.ge.f32.partialorder %v2370_v62, 0.0  ;;  %v2480_v63 = vmul.f32 0.05, %v2370_v62 }
 0x624   : > { %v2229_v3 = vpop.f32.mrf.mxu2 }
 0x625   : > { %v2512_v10 = vsel %vm2448_vm0, %v2370_v62, %v2480_v63  ;;  %v2230_v12 = vadd.f32 %v2229_v3, %v1847_v1 }
 0x626   : > { %v10280_v19 = vpack.c.bf16 %v2512_v10, %v2511_v9  ;;  %v2320_v14 = vpop.f32.mrf.mxu3 }
 0x627   : > { %v10282_v0 = vadd.f32 %v2318_v56, %v2230_v12  ;;  %v8540_v56 = vld [vmem:[#allocation19 + $0x118] sm:$0xf0] }
 0x628   : > { %v2372_v11 = vpop.f32.mrf.mxu0  ;;  %7343 = vmatmul.msk.bf16.vlgmr.msrb.gmra.mxu1 %vm2591_vm1, %v10280_v19  ;;  %7375 = vmatmul.msk.bf16.vlgmr.msra.gmra.mxu2 %vm2591_vm1, %v10280_v19  ;;  %v7278_v3 = vor.u32 %v8540_v56, %v7277_v53 }
 0x629   : > { %7407 = vmatmul.msk.bf16.vlgmr.msra.gmra.mxu3 %vm2591_vm1, %v10280_v19  ;;  %v2373_v15 = vadd.f32 %v2372_v11, %v10250_v24  ;;  %v1867_v50 = vpop.permute.xlu2 %1866 }
 0x62b   : > { %2411 = vmatmul.bf16.gmra.mxu0 %v7254_v5  ;;  %v2481_v44 = vmul.f32 0.05, %v2373_v15  ;;  %vm2449_vm2 = vcmp.ge.f32.partialorder %v2373_v15, 0.0 }
 0x62c   : > { %v2231_v59 = vpop.f32.mrf.mxu2 }
 0x62d   : > { %v2232_v16 = vadd.f32 %v2231_v59, %v1852_v27  ;;  %v2513_v28 = vsel %vm2449_vm2, %v2373_v15, %v2481_v44 }
 0x62e   : > { %v2323_v17 = vpop.f32.mrf.mxu3 }
 0x62f   : > { %v10291_v55 = vadd.f32 %v2320_v14, %v2232_v16 }
 0x630   : > { %v2374_v18 = vpop.f32.mrf.mxu0 }
 0x631   : > { %v2375_v49 = vadd.f32 %v2374_v18, %v10252_v45  ;;  %v1862_v45 = vpop.permute.xlu1 %1861  ;;  %v8543_v18 = vld [vmem:[#allocation19 + $0x130] sm:$0xf0] }
 0x633   : > { %vm2450_vm3 = vcmp.ge.f32.partialorder %v2375_v49, 0.0  ;;  %v2482_v20 = vmul.f32 0.05, %v2375_v49 }
 0x634   : > { %v2234_v23 = vpop.f32.mrf.mxu2 }
 0x635   : > { %v2514_v29 = vsel %vm2450_vm3, %v2375_v49, %v2482_v20  ;;  %v2235_v30 = vadd.f32 %v2234_v23, %v1857_v22 }
 0x636   : > { %v10294_v31 = vpack.c.bf16 %v2514_v29, %v2513_v28  ;;  %v2325_v24 = vpop.f32.mrf.mxu3 }
 0x637   : > { %v10296_v32 = vadd.f32 %v2323_v17, %v2235_v30  ;;  %v7289_v17 = vld [vmem:[#allocation19 + $0x128] sm:$0xf] }
 0x638   : > { %v2377_v34 = vpop.f32.mrf.mxu0  ;;  %7344 = vmatmul.msk.bf16.gmra.mxu1 %vm2591_vm1, %v10294_v31  ;;  %7376 = vmatmul.msk.bf16.gmra.mxu2 %vm2591_vm1, %v10294_v31  ;;  %v7290_v25 = vor.u32 %v8543_v18, %v7289_v17 }
 0x639   : > { %7408 = vmatmul.msk.bf16.gmra.mxu3 %vm2591_vm1, %v10294_v31  ;;  %v2378_v38 = vadd.f32 %v2377_v34, %v10254_v57  ;;  %v1877_v15 = vpop.permute.xlu1 %1876 }
 0x63b   : > { %2416 = vmatmul.bf16.gmra.mxu0 %v7266_v33  ;;  %v2483_v46 = vmul.f32 0.05, %v2378_v38  ;;  %vm2451_vm4 = vcmp.ge.f32.partialorder %v2378_v38, 0.0 }
 0x63c   : > { %v2236_v37 = vpop.f32.mrf.mxu2 }
 0x63d   : > { %v2237_v35 = vadd.f32 %v2236_v37, %v1862_v45  ;;  %v2515_v60 = vsel %vm2451_vm4, %v2378_v38, %v2483_v46  ;;  %v8546_v46 = vld [vmem:[#allocation19 + $0x148] sm:$0xf0] }
 0x63e   : > { %v2328_v39 = vpop.f32.mrf.mxu3 }
 0x63f   : > { %v10305_v40 = vadd.f32 %v2325_v24, %v2237_v35 }
 0x640   : > { %v2379_v42 = vpop.f32.mrf.mxu0 }
 0x641   : > { %v2380_v47 = vadd.f32 %v2379_v42, %v10256_v7  ;;  %v1872_v7 = vpop.permute.xlu0 %1871  ;;  %v7301_v42 = vld [vmem:[#allocation19 + $0x140] sm:$0xf] }
 0x642   : > { %v7302_v56 = vor.u32 %v8546_v46, %v7301_v42  ;;  %v7325_v42 = vld [vmem:[#allocation19 + $0x170] sm:$0xf]  ;;  %v8552_v46 = vld [vmem:[#allocation19 + $0x178] sm:$0xf0] }
 0x643   : > { %vm2452_vm5 = vcmp.ge.f32.partialorder %v2380_v47, 0.0  ;;  %v2484_v48 = vmul.f32 0.05, %v2380_v47 }
 0x644   : > { %v2239_v51 = vpop.f32.mrf.mxu2 }
 0x645   : > { %v2516_v61 = vsel %vm2452_vm5, %v2380_v47, %v2484_v48  ;;  %v2240_v62 = vadd.f32 %v2239_v51, %v1867_v50 }
 0x646   : > { %v10308_v63 = vpack.c.bf16 %v2516_v61, %v2515_v60  ;;  %v2330_v57 = vpop.f32.mrf.mxu3  ;;  %v1892_v61 = vpop.permute.xlu1 %1891 }
 0x647   : > { %v10310_v1 = vadd.f32 %v2328_v39, %v2240_v62 }
 0x648   : > { %v2382_v4 = vpop.f32.mrf.mxu0  ;;  %7345 = vmatmul.msk.bf16.gmra.mxu1 %vm2591_vm1, %v10308_v63  ;;  %7377 = vmatmul.msk.bf16.gmra.mxu2 %vm2591_vm1, %v10308_v63 }
 0x649   : > { %7409 = vmatmul.msk.bf16.gmra.mxu3 %vm2591_vm1, %v10308_v63  ;;  %v2383_v9 = vadd.f32 %v2382_v4, %v10258_v52  ;;  %v1887_v35 = vpop.permute.xlu0 %1886 }
 0x64b   : > { %2421 = vmatmul.bf16.gmra.mxu0 %v7278_v3  ;;  %v2485_v11 = vmul.f32 0.05, %v2383_v9  ;;  %vm2453_vm6 = vcmp.ge.f32.partialorder %v2383_v9, 0.0 }
 0x64c   : > { %v2241_v6 = vpop.f32.mrf.mxu2 }
 0x64d   : > { %v2242_v10 = vadd.f32 %v2241_v6, %v1872_v7  ;;  %v2517_v44 = vsel %vm2453_vm6, %v2383_v9, %v2485_v11  ;;  %v8567_v6 = vld [vmem:[#allocation22 + $0x70] sm:$0xff]  ;;  %v8566_v11 = vld [vmem:[#allocation22 + $0x68] sm:$0xff] }
 0x64e   : > { %v2333_v12 = vpop.f32.mrf.mxu3 }
 0x64f   : > { %v10319_v14 = vadd.f32 %v2330_v57, %v2242_v10 }
 0x650   : > { %v2384_v5 = vpop.f32.mrf.mxu0 }
 0x651   : > { %v2385_v27 = vadd.f32 %v2384_v5, %v10260_v21  ;;  %v1882_v21 = vpop.permute.xlu2 %1881 }
 0x653   : > { %vm2454_vm7 = vcmp.ge.f32.partialorder %v2385_v27, 0.0  ;;  %v2486_v59 = vmul.f32 0.05, %v2385_v27 }
 0x654   : > { %v2244_v16 = vpop.f32.mrf.mxu2 }
 0x655   : > { %v2518_v49 = vsel %vm2454_vm7, %v2385_v27, %v2486_v59  ;;  %v2245_v20 = vadd.f32 %v2244_v16, %v1877_v15  ;;  %v7313_v15 = vld [vmem:[#allocation19 + $0x158] sm:$0xf]  ;;  %v8549_v16 = vld [vmem:[#allocation19 + $0x160] sm:$0xf0] }
 0x656   : > { %v10322_v22 = vpack.c.bf16 %v2518_v49, %v2517_v44  ;;  %v2335_v52 = vpop.f32.mrf.mxu3 }
 0x657   : > { %v10324_v23 = vadd.f32 %v2333_v12, %v2245_v20 }
 0x658   : > { %v2387_v26 = vpop.f32.mrf.mxu0  ;;  %7346 = vmatmul.msk.bf16.gmra.mxu1 %vm2591_vm1, %v10322_v22  ;;  %7378 = vmatmul.msk.bf16.gmra.mxu2 %vm2591_vm1, %v10322_v22 }
 0x659   : > { %7410 = vmatmul.msk.bf16.gmra.mxu3 %vm2591_vm1, %v10322_v22  ;;  %v2388_v29 = vadd.f32 %v2387_v26, %v10262_v13  ;;  %v1897_v27 = vpop.permute.xlu2 %1896  ;;  %v1902_v26 = vpop.permute.xlu0 %1901 }
 0x65b   : > { %2426 = vmatmul.bf16.gmra.mxu0 %v7290_v25  ;;  %v2487_v45 = vmul.f32 0.05, %v2388_v29  ;;  %vm2455_vm8 = vcmp.ge.f32.partialorder %v2388_v29, 0.0 }
 0x65c   : > { %v2246_v28 = vpop.f32.mrf.mxu2 }
 0x65d   : > { %v2247_v30 = vadd.f32 %v2246_v28, %v1882_v21  ;;  %v2519_v47 = vsel %vm2455_vm8, %v2388_v29, %v2487_v45 }
 0x65e   : > { %v2338_v24 = vpop.f32.mrf.mxu3 }
 0x65f   : > { %v10333_v33 = vadd.f32 %v2335_v52, %v2247_v30  ;;  %v7314_v52 = vor.u32 %v8549_v16, %v7313_v15 }
 0x660   : > { %v2389_v34 = vpop.f32.mrf.mxu0 }
 0x661   : > { %v2390_v37 = vadd.f32 %v2389_v34, %v10264_v41  ;;  %v8568_v41 = vld [vmem:[#allocation22 + $0x78] sm:$0xff] }
 0x662   : > { %3010 = vmatpush.bf16.msrb.mxu0 %v8568_v41  ;;  %v1912_v41 = vpop.permute.xlu2 %1911 }
 0x663   : > { %vm2456_vm9 = vcmp.ge.f32.partialorder %v2390_v37, 0.0  ;;  %v2488_v38 = vmul.f32 0.05, %v2390_v37 }
 0x664   : > { %v2249_v39 = vpop.f32.mrf.mxu2 }
 0x665   : > { %v2520_v48 = vsel %vm2456_vm9, %v2390_v37, %v2488_v38  ;;  %v2250_v50 = vadd.f32 %v2249_v39, %v1887_v35  ;;  %v1907_v35 = vpop.permute.xlu1 %1906 }
 0x666   : > { %v10336_v51 = vpack.c.bf16 %v2520_v48, %v2519_v47  ;;  %v2340_v13 = vpop.f32.mrf.mxu3  ;;  %3011 = vmatpush.bf16.msrb.mxu0 %v8567_v6 }
 0x667   : > { %v10338_v53 = vadd.f32 %v2338_v24, %v2250_v50 }
 0x668   : > { %v2392_v60 = vpop.f32.mrf.mxu0  ;;  %7347 = vmatmul.msk.bf16.gmra.mxu1 %vm2591_vm1, %v10336_v51  ;;  %7379 = vmatmul.msk.bf16.gmra.mxu2 %vm2591_vm1, %v10336_v51 }
 0x669   : > { %7411 = vmatmul.msk.bf16.gmra.mxu3 %vm2591_vm1, %v10336_v51  ;;  %v2393_v57 = vadd.f32 %v2392_v60, %v10266_v54 }
 0x66a   : > { %3012 = vmatpush.bf16.msrb.mxu0 %v8566_v11 }
 0x66b   : > { %2431 = vmatmul.bf16.gmra.mxu0 %v7302_v56  ;;  %v2489_v10 = vmul.f32 0.05, %v2393_v57  ;;  %vm2457_vm10 = vcmp.ge.f32.partialorder %v2393_v57, 0.0  ;;  %v7326_v56 = vor.u32 %v8552_v46, %v7325_v42 }
 0x66c   : > { %v2251_v62 = vpop.f32.mrf.mxu2 }
 0x66d   : > { %v2252_v3 = vadd.f32 %v2251_v62, %v1892_v61  ;;  %v2521_v54 = vsel %vm2457_vm10, %v2393_v57, %v2489_v10 }
 0x66e   : > { %v2343_v4 = vpop.f32.mrf.mxu3 }
 0x66f   : > { %v10347_v7 = vadd.f32 %v2340_v13, %v2252_v3 }
 0x670   : > { %v2394_v9 = vpop.f32.mrf.mxu0 }
 0x671   : > { %v2395_v12 = vadd.f32 %v2394_v9, %v10268_v8  ;;  %v8565_v8 = vld [vmem:[#allocation22 + $0x60] sm:$0xff] }
 0x672   : > { %3013 = vmatpush.bf16.msrb.mxu0 %v8565_v8 }
 0x673   : > { %vm2458_vm11 = vcmp.ge.f32.partialorder %v2395_v12, 0.0  ;;  %v2490_v5 = vmul.f32 0.05, %v2395_v12 }
 0x674   : > { %v2254_v59 = vpop.f32.mrf.mxu2 }
 0x675   : > { %v2522_v17 = vsel %vm2458_vm11, %v2395_v12, %v2490_v5  ;;  %v2255_v18 = vadd.f32 %v2254_v59, %v1897_v27  ;;  %v1917_v5 = vpop.permute.xlu0 %1916 }
 0x676   : > { %v10350_v44 = vpack.c.bf16 %v2522_v17, %v2521_v54  ;;  %v2345_v49 = vpop.f32.mrf.mxu3 }
 0x677   : > { %v10352_v20 = vadd.f32 %v2343_v4, %v2255_v18 }
 0x678   : > { %v2397_v25 = vpop.f32.mrf.mxu0  ;;  %7348 = vmatmul.msk.bf16.gmra.mxu1 %vm2591_vm1, %v10350_v44  ;;  %7380 = vmatmul.msk.bf16.gmra.mxu2 %vm2591_vm1, %v10350_v44 }
 0x679   : > { %7412 = vmatmul.msk.bf16.gmra.mxu3 %vm2591_vm1, %v10350_v44  ;;  %v2398_v28 = vadd.f32 %v2397_v25, %v10270_v2 }
 0x67b   : > { %2436 = vmatmul.bf16.gmra.mxu0 %v7314_v52  ;;  %v2491_v45 = vmul.f32 0.05, %v2398_v28  ;;  %vm2459_vm12 = vcmp.ge.f32.partialorder %v2398_v28, 0.0 }
 0x67c   : > { %v2256_v21 = vpop.f32.mrf.mxu2 }
 0x67d   : > { %v2257_v29 = vadd.f32 %v2256_v21, %v1902_v26  ;;  %v2523_v47 = vsel %vm2459_vm12, %v2398_v28, %v2491_v45 }
 0x67e   : > { %v2348_v30 = vpop.f32.mrf.mxu3 }
 0x67f   : > { %v10361_v24 = vadd.f32 %v2345_v49, %v2257_v29 }
 0x680   : > { %v2399_v34 = vpop.f32.mrf.mxu0 }
 0x681   : > { %v2400_v37 = vadd.f32 %v2399_v34, %v10272_v36 }
 0x683   : > { %vm2460_vm13 = vcmp.ge.f32.partialorder %v2400_v37, 0.0  ;;  %v2492_v38 = vmul.f32 0.05, %v2400_v37 }
 0x684   : > { %v2259_v39 = vpop.f32.mrf.mxu2 }
 0x685   : > { %v2524_v48 = vsel %vm2460_vm13, %v2400_v37, %v2492_v38  ;;  %v2260_v50 = vadd.f32 %v2259_v39, %v1907_v35 }
 0x686   : > { %v10364_v13 = vpack.c.bf16 %v2524_v48, %v2523_v47  ;;  %v2350_v36 = vpop.f32.mrf.mxu3 }
 0x687   : > { %v10366_v2 = vadd.f32 %v2348_v30, %v2260_v50 }
 0x688   : > { %v2402_v60 = vpop.f32.mrf.mxu0  ;;  %7349 = vmatmul.msk.bf16.gmra.mxu1 %vm2591_vm1, %v10364_v13  ;;  %7381 = vmatmul.msk.bf16.gmra.mxu2 %vm2591_vm1, %v10364_v13 }
 0x689   : > { %7413 = vmatmul.msk.bf16.gmra.mxu3 %vm2591_vm1, %v10364_v13  ;;  %v2403_v62 = vadd.f32 %v2402_v60, %v10274_v43 }
 0x68b   : > { %2441 = vmatmul.bf16.gmra.mxu0 %v7326_v56  ;;  %v2493_v6 = vmul.f32 0.05, %v2403_v62  ;;  %vm2461_vm14 = vcmp.ge.f32.partialorder %v2403_v62, 0.0 }
 0x68c   : > { %v2261_v61 = vpop.f32.mrf.mxu2 }
 0x68d   : > { %v2262_v57 = vadd.f32 %v2261_v61, %v1912_v41  ;;  %v2525_v27 = vsel %vm2461_vm14, %v2403_v62, %v2493_v6 }
 0x68e   : > { %v2353_v10 = vpop.f32.mrf.mxu3 }
 0x68f   : > { %v10375_v3 = vadd.f32 %v2350_v36, %v2262_v57 }
 0x690   : > { %v2404_v4 = vpop.f32.mrf.mxu0 }
 0x691   : > { %v2405_v9 = vadd.f32 %v2404_v4, %v10277_v58  ;;  %v1922_v58 = vpop.permute.xlu1 %1921 }
 0x693   : > { %vm2462_vm15 = vcmp.ge.f32.partialorder %v2405_v9, 0.0  ;;  %v2494_v12 = vmul.f32 0.05, %v2405_v9 }
 0x694   : > { %v2264_v11 = vpop.f32.mrf.mxu2 }
 0x695   : > { %v2526_v59 = vsel %vm2462_vm15, %v2405_v9, %v2494_v12  ;;  %v2265_v15 = vadd.f32 %v2264_v11, %v1917_v5 }
 0x696   : > { %v10378_v16 = vpack.c.bf16 %v2526_v59, %v2525_v27  ;;  %v2355_v18 = vpop.f32.mrf.mxu3 }
 0x697   : > { %v10380_v54 = vadd.f32 %v2353_v10, %v2265_v15 }
 0x698   : > { %v2407_v43 = vpop.f32.mrf.mxu0  ;;  %7350 = vmatmul.msk.bf16.gmra.mxu1 %vm2591_vm1, %v10378_v16  ;;  %7382 = vmatmul.msk.bf16.gmra.mxu2 %vm2591_vm1, %v10378_v16 }
 0x699   : > { %7414 = vmatmul.msk.bf16.gmra.mxu3 %vm2591_vm1, %v10378_v16  ;;  %v2408_v49 = vadd.f32 %v2407_v43, %v10282_v0 }
 0x69b   : > { %7439 = vmatmul.msk.bf16.vlgmr.msrb.gmra.mxu0 %vm2591_vm1, %v10280_v19  ;;  %v2495_v26 = vmul.f32 0.05, %v2408_v49  ;;  %vm2463_vm0 = vcmp.ge.f32.partialorder %v2408_v49, 0.0 }
 0x69c   : > { %v2266_v17 = vpop.f32.mrf.mxu2 }
 0x69d   : > { %v2267_v52 = vadd.f32 %v2266_v17, %v1922_v58  ;;  %v2527_v29 = vsel %vm2463_vm0, %v2408_v49, %v2495_v26 }
 0x69f   : > { %v10391_v8 = vadd.f32 %v2355_v18, %v2267_v52 }
 0x6a0   : > { %v2409_v25 = vpop.f32.mrf.mxu0 }
 0x6a1   : > { %v2410_v21 = vadd.f32 %v2409_v25, %v10291_v55 }
 0x6a3   : > { %vm2464_vm2 = vcmp.ge.f32.partialorder %v2410_v21, 0.0  ;;  %v2496_v28 = vmul.f32 0.05, %v2410_v21 }
 0x6a5   : > { %v2528_v30 = vsel %vm2464_vm2, %v2410_v21, %v2496_v28  ;;  %v10394_v34 = vpop.f32.mrf.mxu1 }
 0x6a6   : > { %v10396_v45 = vpack.c.bf16 %v2528_v30, %v2527_v29 }
 0x6a8   : > { %v2412_v19 = vpop.f32.mrf.mxu0  ;;  %7351 = vmatmul.msk.bf16.gmra.mxu1 %vm2591_vm1, %v10396_v45  ;;  %7383 = vmatmul.msk.bf16.gmra.mxu2 %vm2591_vm1, %v10396_v45 }
 0x6a9   : > { %7415 = vmatmul.msk.bf16.gmra.mxu3 %vm2591_vm1, %v10396_v45  ;;  %v2413_v37 = vadd.f32 %v2412_v19, %v10296_v32 }
 0x6ab   : > { %v10404_v0 = vpop.f32.mrf.mxu2  ;;  %7440 = vmatmul.msk.bf16.gmra.mxu0 %vm2591_vm1, %v10294_v31  ;;  %v2497_v42 = vmul.f32 0.05, %v2413_v37  ;;  %vm2465_vm3 = vcmp.ge.f32.partialorder %v2413_v37, 0.0 }
 0x6ac   : > { %v10408_v55 = vpop.f32.mrf.mxu3 }
 0x6ad   : > { %v10411_v38 = vpop.f32.mrf.mxu1  ;;  %v2529_v32 = vsel %vm2465_vm3, %v2413_v37, %v2497_v42 }
 0x6b0   : > { %v2414_v39 = vpop.f32.mrf.mxu0 }
 0x6b1   : > { %v2415_v46 = vadd.f32 %v2414_v39, %v10305_v40 }
 0x6b3   : > { %vm2466_vm4 = vcmp.ge.f32.partialorder %v2415_v46, 0.0  ;;  %v2498_v47 = vmul.f32 0.05, %v2415_v46  ;;  %v10416_v48 = vpop.f32.mrf.mxu2 }
 0x6b4   : > { %v10420_v50 = vpop.f32.mrf.mxu3 }
 0x6b5   : > { %v2530_v56 = vsel %vm2466_vm4, %v2415_v46, %v2498_v47  ;;  %v10424_v36 = vpop.f32.mrf.mxu1 }
 0x6b6   : > { %v10426_v41 = vpack.c.bf16 %v2530_v56, %v2529_v32 }
 0x6b8   : > { %v2417_v40 = vpop.f32.mrf.mxu0  ;;  %7352 = vmatmul.msk.bf16.gmra.mxu1 %vm2591_vm1, %v10426_v41  ;;  %7384 = vmatmul.msk.bf16.gmra.mxu2 %vm2591_vm1, %v10426_v41 }
 0x6b9   : > { %7416 = vmatmul.msk.bf16.gmra.mxu3 %vm2591_vm1, %v10426_v41  ;;  %v2418_v57 = vadd.f32 %v2417_v40, %v10310_v1 }
 0x6bb   : > { %v10434_v61 = vpop.f32.mrf.mxu2  ;;  %7441 = vmatmul.msk.bf16.gmra.mxu0 %vm2591_vm1, %v10308_v63  ;;  %v2499_v10 = vmul.f32 0.05, %v2418_v57  ;;  %vm2467_vm5 = vcmp.ge.f32.partialorder %v2418_v57, 0.0 }
 0x6bc   : > { %v10438_v62 = vpop.f32.mrf.mxu3 }
 0x6bd   : > { %v10441_v4 = vpop.f32.mrf.mxu1  ;;  %v2531_v1 = vsel %vm2467_vm5, %v2418_v57, %v2499_v10 }
 0x6c0   : > { %v2419_v9 = vpop.f32.mrf.mxu0 }
 0x6c1   : > { %v2420_v12 = vadd.f32 %v2419_v9, %v10319_v14 }
 0x6c3   : > { %vm2468_vm6 = vcmp.ge.f32.partialorder %v2420_v12, 0.0  ;;  %v2500_v5 = vmul.f32 0.05, %v2420_v12  ;;  %v10446_v11 = vpop.f32.mrf.mxu2 }
 0x6c4   : > { %v10450_v27 = vpop.f32.mrf.mxu3 }
 0x6c5   : > { %v2532_v59 = vsel %vm2468_vm6, %v2420_v12, %v2500_v5  ;;  %v10454_v43 = vpop.f32.mrf.mxu1 }
 0x6c6   : > { %v10456_v58 = vpack.c.bf16 %v2532_v59, %v2531_v1 }
 0x6c8   : > { %v2422_v14 = vpop.f32.mrf.mxu0  ;;  %7353 = vmatmul.msk.bf16.gmra.mxu1 %vm2591_vm1, %v10456_v58  ;;  %7385 = vmatmul.msk.bf16.gmra.mxu2 %vm2591_vm1, %v10456_v58 }
 0x6c9   : > { %7417 = vmatmul.msk.bf16.gmra.mxu3 %vm2591_vm1, %v10456_v58  ;;  %v2423_v49 = vadd.f32 %v2422_v14, %v10324_v23 }
 0x6cb   : > { %v10464_v17 = vpop.f32.mrf.mxu2  ;;  %7442 = vmatmul.msk.bf16.gmra.mxu0 %vm2591_vm1, %v10322_v22  ;;  %v2501_v21 = vmul.f32 0.05, %v2423_v49  ;;  %vm2469_vm7 = vcmp.ge.f32.partialorder %v2423_v49, 0.0 }
 0x6cc   : > { %v10468_v18 = vpop.f32.mrf.mxu3 }
 0x6cd   : > { %v10471_v52 = vpop.f32.mrf.mxu1  ;;  %v2533_v23 = vsel %vm2469_vm7, %v2423_v49, %v2501_v21 }
 0x6d0   : > { %v2424_v26 = vpop.f32.mrf.mxu0 }
 0x6d1   : > { %v2425_v28 = vadd.f32 %v2424_v26, %v10333_v33 }
 0x6d3   : > { %vm2470_vm8 = vcmp.ge.f32.partialorder %v2425_v28, 0.0  ;;  %v2502_v29 = vmul.f32 0.05, %v2425_v28  ;;  %v10476_v30 = vpop.f32.mrf.mxu2 }
 0x6d4   : > { %v10480_v19 = vpop.f32.mrf.mxu3 }
 0x6d5   : > { %v2534_v37 = vsel %vm2470_vm8, %v2425_v28, %v2502_v29  ;;  %v10484_v42 = vpop.f32.mrf.mxu1 }
 0x6d6   : > { %v10486_v46 = vpack.c.bf16 %v2534_v37, %v2533_v23 }
 0x6d8   : > { %v2427_v33 = vpop.f32.mrf.mxu0  ;;  %7354 = vmatmul.msk.bf16.gmra.mxu1 %vm2591_vm1, %v10486_v46  ;;  %7386 = vmatmul.msk.bf16.gmra.mxu2 %vm2591_vm1, %v10486_v46 }
 0x6d9   : > { %7418 = vmatmul.msk.bf16.gmra.mxu3 %vm2591_vm1, %v10486_v46  ;;  %v2428_v56 = vadd.f32 %v2427_v33, %v10338_v53 }
 0x6db   : > { %v10494_v47 = vpop.f32.mrf.mxu2  ;;  %7443 = vmatmul.msk.bf16.gmra.mxu0 %vm2591_vm1, %v10336_v51  ;;  %v2503_v10 = vmul.f32 0.05, %v2428_v56  ;;  %vm2471_vm9 = vcmp.ge.f32.partialorder %v2428_v56, 0.0 }
 0x6dc   : > { %v10498_v32 = vpop.f32.mrf.mxu3 }
 0x6dd   : > { %v10501_v40 = vpop.f32.mrf.mxu1  ;;  %v2535_v53 = vsel %vm2471_vm9, %v2428_v56, %v2503_v10 }
 0x6e0   : > { %v2429_v9 = vpop.f32.mrf.mxu0 }
 0x6e1   : > { %v2430_v12 = vadd.f32 %v2429_v9, %v10347_v7 }
 0x6e3   : > { %vm2472_vm10 = vcmp.ge.f32.partialorder %v2430_v12, 0.0  ;;  %v2504_v5 = vmul.f32 0.05, %v2430_v12  ;;  %v10506_v1 = vpop.f32.mrf.mxu2 }
 0x6e4   : > { %v10510_v59 = vpop.f32.mrf.mxu3 }
 0x6e5   : > { %v2536_v14 = vsel %vm2472_vm10, %v2430_v12, %v2504_v5  ;;  %v10514_v26 = vpop.f32.mrf.mxu1 }
 0x6e6   : > { %v10516_v21 = vpack.c.bf16 %v2536_v14, %v2535_v53 }
 0x6e8   : > { %v2432_v7 = vpop.f32.mrf.mxu0  ;;  %7355 = vmatmul.msk.bf16.gmra.mxu1 %vm2591_vm1, %v10516_v21  ;;  %7387 = vmatmul.msk.bf16.gmra.mxu2 %vm2591_vm1, %v10516_v21 }
 0x6e9   : > { %7419 = vmatmul.msk.bf16.gmra.mxu3 %vm2591_vm1, %v10516_v21  ;;  %v2433_v23 = vadd.f32 %v2432_v7, %v10352_v20 }
 0x6eb   : > { %v10524_v28 = vpop.f32.mrf.mxu2  ;;  %7444 = vmatmul.msk.bf16.gmra.mxu0 %vm2591_vm1, %v10350_v44  ;;  %v2505_v56 = vmul.f32 0.05, %v2433_v23  ;;  %vm2473_vm11 = vcmp.ge.f32.partialorder %v2433_v23, 0.0 }
 0x6ec   : > { %v10528_v29 = vpop.f32.mrf.mxu3 }
 0x6ed   : > { %v10531_v37 = vpop.f32.mrf.mxu1  ;;  %v2537_v53 = vsel %vm2473_vm11, %v2433_v23, %v2505_v56 }
 0x6f0   : > { %v2434_v33 = vpop.f32.mrf.mxu0 }
 0x6f1   : > { %v2435_v9 = vadd.f32 %v2434_v33, %v10361_v24 }
 0x6f3   : > { %vm2474_vm12 = vcmp.ge.f32.partialorder %v2435_v9, 0.0  ;;  %v2506_v10 = vmul.f32 0.05, %v2435_v9  ;;  %v10534_v12 = vpop.f32.mrf.mxu2 }
 0x6f4   : > { %v10536_v5 = vpop.f32.mrf.mxu3 }
 0x6f5   : > { %v2538_v14 = vsel %vm2474_vm12, %v2435_v9, %v2506_v10  ;;  %v10538_v44 = vpop.f32.mrf.mxu1 }
 0x6f6   : > { %v10540_v60 = vpack.c.bf16 %v2538_v14, %v2537_v53 }
 0x6f8   : > { %v2437_v20 = vpop.f32.mrf.mxu0  ;;  %7356 = vmatmul.msk.bf16.gmra.mxu1 %vm2591_vm1, %v10540_v60  ;;  %7388 = vmatmul.msk.bf16.gmra.mxu2 %vm2591_vm1, %v10540_v60 }
 0x6f9   : > { %7420 = vmatmul.msk.bf16.gmra.mxu3 %vm2591_vm1, %v10540_v60  ;;  %v2438_v23 = vadd.f32 %v2437_v20, %v10366_v2 }
 0x6fb   : > { %v10548_v24 = vpop.f32.mrf.mxu2  ;;  %7445 = vmatmul.msk.bf16.gmra.mxu0 %vm2591_vm1, %v10364_v13  ;;  %v2507_v9 = vmul.f32 0.05, %v2438_v23  ;;  %vm2475_vm13 = vcmp.ge.f32.partialorder %v2438_v23, 0.0 }
 0x6fc   : > { %v10552_v7 = vpop.f32.mrf.mxu3 }
 0x6fd   : > { %v2676_v33 = vpop.f32.mrf.mxu1  ;;  %v2539_v39 = vsel %vm2475_vm13, %v2438_v23, %v2507_v9 }
 0x6fe   : > { %v3100_v57 = vpack.c.bf16 %v2676_v33, %v10538_v44 }
 0x700   : > { %v2439_v56 = vpop.f32.mrf.mxu0 }
 0x701   : > { %v2440_v10 = vadd.f32 %v2439_v56, %v10375_v3 }
 0x703   : > { %vm2476_vm14 = vcmp.ge.f32.partialorder %v2440_v10, 0.0  ;;  %v2508_v53 = vmul.f32 0.05, %v2440_v10  ;;  %v2798_v14 = vpop.f32.mrf.mxu2 }
 0x704   : > { %v10556_v15 = vpop.f32.mrf.mxu3 }
 0x705   : > { %v2540_v49 = vsel %vm2476_vm14, %v2440_v10, %v2508_v53  ;;  %v2679_v31 = vpop.f32.mrf.mxu1 }
 0x706   : > { %v10558_v63 = vpack.c.bf16 %v2540_v49, %v2539_v39 }
 0x708   : > { %v2442_v13 = vpop.f32.mrf.mxu0  ;;  %7357 = vmatmul.msk.bf16.gmra.mxu1 %vm2591_vm1, %v10558_v63  ;;  %7389 = vmatmul.msk.bf16.gmra.mxu2 %vm2591_vm1, %v10558_v63 }
 0x709   : > { %7421 = vmatmul.msk.bf16.gmra.mxu3 %vm2591_vm1, %v10558_v63  ;;  %v2443_v20 = vadd.f32 %v2442_v13, %v10380_v54 }
 0x70b   : > { %v2801_v2 = vpop.f32.mrf.mxu2  ;;  %7446 = vmatmul.msk.bf16.gmra.mxu0 %vm2591_vm1, %v10378_v16  ;;  %v2509_v23 = vmul.f32 0.05, %v2443_v20  ;;  %vm2477_vm15 = vcmp.ge.f32.partialorder %v2443_v20, 0.0 }
 0x70c   : > { %v10568_v3 = vpop.f32.mrf.mxu3 }
 0x70d   : > { %v2681_v39 = vpop.f32.mrf.mxu1  ;;  %v2541_v35 = vsel %vm2477_vm15, %v2443_v20, %v2509_v23 }
 0x710   : > { %v2444_v49 = vpop.f32.mrf.mxu0 }
 0x711   : > { %v2445_v56 = vadd.f32 %v2444_v49, %v10391_v8  ;;  %v3101_v49 = vpack.c.bf16 %v2681_v39, %v2679_v31  ;;  %v3116_v31 = vpack.c.bf16 %v2798_v14, %v10548_v24  ;;  %v11799_v14 = vpack.c.bf16 %v10471_v52, %v10454_v43 }
 0x713   : > { %vm2478_vm0 = vcmp.ge.f32.partialorder %v2445_v56, 0.0  ;;  %v2510_v9 = vmul.f32 0.05, %v2445_v56  ;;  %v2803_v10 = vpop.f32.mrf.mxu2 }
 0x714   : > { %v10572_v53 = vpop.f32.mrf.mxu3 }
 0x715   : > { %v2542_v22 = vsel %vm2478_vm0, %v2445_v56, %v2510_v9  ;;  %v2684_v6 = vpop.f32.mrf.mxu1 }
 0x716   : > { %v10574_v51 = vpack.c.bf16 %v2542_v22, %v2541_v35 }
 0x718   : > { %11795 = vst [vmem:[#allocation37_spill] sm:$0xff] %v10574_v51  ;;  %7358 = vmatmul.msk.bf16.gmra.mxu1 %vm2591_vm1, %v10574_v51  ;;  %7390 = vmatmul.msk.bf16.gmra.mxu2 %vm2591_vm1, %v10574_v51  ;;  %v10580_v16 = vpop.f32.mrf.mxu0 }
 0x719   : > { %7422 = vmatmul.msk.bf16.gmra.mxu3 %vm2591_vm1, %v10574_v51 }
 0x71b   : > { %v2806_v54 = vpop.f32.mrf.mxu2  ;;  %7447 = vmatmul.msk.bf16.gmra.mxu0 %vm2591_vm1, %v10396_v45  ;;  %v3117_v45 = vpack.c.bf16 %v2803_v10, %v2801_v2  ;;  %v8573_v10 = vld [vmem:[#allocation24 + $0x1c] sm:$0xf0] }
 0x71c   : > { %v2928_v8 = vpop.f32.mrf.mxu3 }
 0x71d   : > { %v2686_v13 = vpop.f32.mrf.mxu1 }
 0x71e   : > { %v3102_v20 = vpack.c.bf16 %v2686_v13, %v2684_v6  ;;  %v3099_v6 = vpack.c.bf16 %v10531_v37, %v10514_v26  ;;  %v11797_v26 = vpack.c.bf16 %v10501_v40, %v10484_v42  ;;  %v11801_v40 = vpack.c.bf16 %v10441_v4, %v10424_v36 }
 0x71f   : > { %v11805_v4 = vpack.c.bf16 %v10446_v11, %v10434_v61 }
 0x720   : > { %v10586_v35 = vpop.f32.mrf.mxu0  ;;  %5079 = vmatpush.bf16.msra.mxu1 %v3102_v20  ;;  %v11804_v20 = vpack.c.bf16 %v10411_v38, %v10394_v34  ;;  %v11806_v34 = vpack.c.bf16 %v10416_v48, %v10404_v0  ;;  %v3132_v38 = vpack.c.bf16 %v10556_v15, %v10552_v7 }
 0x723   : > { %v2808_v23 = vpop.f32.mrf.mxu2 }
 0x724   : > { %v3118_v56 = vpack.c.bf16 %v2808_v23, %v2806_v54  ;;  %v2930_v9 = vpop.f32.mrf.mxu3  ;;  %5080 = vmatpush.bf16.msra.mxu1 %v3101_v49  ;;  %v11802_v54 = vpack.c.bf16 %v10476_v30, %v10464_v17  ;;  %v3133_v17 = vpack.c.bf16 %v10572_v53, %v10568_v3  ;;  %v3131_v3 = vpack.c.bf16 %v10536_v5, %v10528_v29  ;;  %v7489_v49 = vld [vmem:[#allocation24 + $0x40] sm:$0xf]  ;;  %v7465_v5 = vld [vmem:[#allocation24 + $0x8] sm:$0xf] }
 0x725   : > { %v10590_v25 = vpop.f32.mrf.mxu1  ;;  %v3134_v43 = vpack.c.bf16 %v2930_v9, %v2928_v8  ;;  %v8581_v23 = vld [vmem:[#allocation24 + $0x5c] sm:$0xf0]  ;;  %v11809_v9 = vpack.c.bf16 %v10480_v19, %v10468_v18 }
 0x726   : > { %5417 = vmatpush.bf16.msrb.mxu3 %v3118_v56  ;;  %v7490_v48 = vor.u32 %v8581_v23, %v7489_v49  ;;  %v11808_v56 = vpack.c.bf16 %v10510_v59, %v10498_v32  ;;  %v11811_v32 = vpack.c.bf16 %v10450_v27, %v10438_v62 }
 0x728   : > { %v10593_v51 = vpop.f32.mrf.mxu0  ;;  %5081 = vmatpush.bf16.msra.mxu1 %v3100_v57  ;;  %v3115_v57 = vpack.c.bf16 %v10534_v12, %v10524_v28  ;;  %v11800_v28 = vpack.c.bf16 %v10506_v1, %v10494_v47  ;;  %v7457_v12 = vld [vmem:[#allocation24] sm:$0xf] }
 0x729   : > { %v7458_v47 = vor.u32 %v8573_v10, %v7457_v12  ;;  %v8597_v10 = vld [vmem:[#allocation24 + $0xdc] sm:$0xf0] }
 0x72a   : > { %5418 = vmatpush.bf16.msrb.mxu3 %v3117_v45 }
 0x72b   : > { %v10597_v13 = vpop.f32.mrf.mxu2  ;;  %7448 = vmatmul.msk.bf16.gmra.mxu0 %vm2591_vm1, %v10426_v41 }
 0x72c   : > { %v10602_v39 = vpop.f32.mrf.mxu3  ;;  %5082 = vmatpush.bf16.msra.mxu1 %v3099_v6 }
 0x72d   : > { %11796 = vst [vmem:[#allocation38_spill] sm:$0xff] %v10602_v39  ;;  %v10604_v44 = vpop.f32.mrf.mxu1 }
 0x72e   : > { %5419 = vmatpush.bf16.msrb.mxu3 %v3116_v31  ;;  %v7521_v31 = vld [vmem:[#allocation24 + $0x80] sm:$0xf] }
 0x730   : > { %v10608_v33 = vpop.f32.mrf.mxu0  ;;  %5083 = vmatpush.bf16.msra.mxu1 %v11797_v26  ;;  %v11812_v26 = vpack.c.bf16 %v10420_v50, %v10408_v55  ;;  %v7553_v50 = vld [vmem:[#allocation24 + $0xc0] sm:$0xf] }
 0x732   : > { %5420 = vmatpush.bf16.msrb.mxu3 %v3115_v57  ;;  %v8589_v57 = vld [vmem:[#allocation24 + $0x9c] sm:$0xf0] }
 0x733   : > { %v10615_v37 = vpop.f32.mrf.mxu2  ;;  %v7522_v19 = vor.u32 %v8589_v57, %v7521_v31 }
 0x734   : > { %v10617_v24 = vpop.f32.mrf.mxu3  ;;  %5084 = vmatpush.bf16.msra.mxu1 %v11799_v14 }
 0x735   : > { %11798 = vst [vmem:[#allocation39_spill] sm:$0xff] %v10617_v24  ;;  %v10622_v2 = vpop.f32.mrf.mxu1  ;;  %v8574_v24 = vld [vmem:[#allocation24 + $0x24] sm:$0xf0] }
 0x736   : > { %5421 = vmatpush.bf16.msrb.mxu3 %v11800_v28 }
 0x738   : > { %v10627_v42 = vpop.f32.mrf.mxu0  ;;  %5085 = vmatpush.bf16.msra.mxu1 %v11801_v40 }
 0x73a   : > { %5422 = vmatpush.bf16.msrb.mxu3 %v11802_v54 }
 0x73b   : > { %v10635_v52 = vpop.f32.mrf.mxu2  ;;  %7449 = vmatmul.msk.bf16.gmra.mxu0 %vm2591_vm1, %v10456_v58 }
 0x73c   : > { %v10639_v1 = vpop.f32.mrf.mxu3  ;;  %5086 = vmatpush.bf16.msra.mxu1 %v11804_v20 }
 0x73d   : > { %11803 = vst [vmem:[#allocation40_spill] sm:$0xff] %v10639_v1  ;;  %v10644_v36 = vpop.f32.mrf.mxu1  ;;  %v8621_v1 = vld [vmem:[#allocation24 + $0x19c] sm:$0xf0] }
 0x73e   : > { %5423 = vmatpush.bf16.msrb.mxu3 %v11805_v4 }
 0x73f   : > { %5087 = vmatmul.bf16.vlgmr.msra.gmra.mxu1 %v7458_v47 }
 0x740   : > { %5755 = vmatpush.bf16.msrb.mxu1 %v3134_v43  ;;  %v10651_v30 = vpop.f32.mrf.mxu0 }
 0x742   : > { %5424 = vmatpush.bf16.msrb.mxu3 %v11806_v34 }
 0x743   : > { %v10660_v8 = vpop.f32.mrf.mxu2 }
 0x744   : > { %5756 = vmatpush.bf16.msrb.mxu1 %v3133_v17  ;;  %v10662_v61 = vpop.f32.mrf.mxu3 }
 0x745   : > { %11807 = vst [vmem:[#allocation41_spill] sm:$0xff] %v10662_v61  ;;  %v10664_v11 = vpop.f32.mrf.mxu1  ;;  %v7649_v61 = vld [vmem:[#allocation24 + $0x180] sm:$0xf] }
 0x748   : > { %5757 = vmatpush.bf16.msrb.mxu1 %v3132_v38  ;;  %v10668_v53 = vpop.f32.mrf.mxu0  ;;  %v7585_v38 = vld [vmem:[#allocation24 + $0x100] sm:$0xf] }
 0x74b   : > { %v10670_v0 = vpop.f32.mrf.mxu2  ;;  %7450 = vmatmul.msk.bf16.gmra.mxu0 %vm2591_vm1, %v10486_v46 }
 0x74c   : > { %5758 = vmatpush.bf16.msrb.mxu1 %v3131_v3  ;;  %v10674_v15 = vpop.f32.mrf.mxu3  ;;  %v8605_v3 = vld [vmem:[#allocation24 + $0x11c] sm:$0xf0] }
 0x74d   : > { %v10676_v7 = vpop.f32.mrf.mxu1  ;;  %v7586_v23 = vor.u32 %v8605_v3, %v7585_v38 }
 0x74f   : > { %5092 = vmatmul.bf16.gmra.mxu1 %v7490_v48 }
 0x750   : > { %5759 = vmatpush.bf16.msrb.mxu1 %v11808_v56  ;;  %v10681_v29 = vpop.f32.mrf.mxu0 }
 0x753   : > { %v10688_v46 = vpop.f32.mrf.mxu2 }
 0x754   : > { %5760 = vmatpush.bf16.msrb.mxu1 %v11809_v9  ;;  %v10690_v45 = vpop.f32.mrf.mxu3 }
 0x755   : > { %11810 = vst [vmem:[#allocation42_spill] sm:$0xff] %v10690_v45  ;;  %v10692_v6 = vpop.f32.mrf.mxu1  ;;  %v7466_v45 = vor.u32 %v8574_v24, %v7465_v5  ;;  %v11814_v24 = vpack.c.bf16 %v10681_v29, %v10668_v53 }
 0x757   : > { %5425 = vmatmul.bf16.vlgmr.msrb.gmra.mxu3 %v7466_v45 }
 0x758   : > { %5761 = vmatpush.bf16.msrb.mxu1 %v11811_v32  ;;  %v10697_v59 = vpop.f32.mrf.mxu0 }
 0x75b   : > { %v10702_v18 = vpop.f32.mrf.mxu2  ;;  %7451 = vmatmul.msk.bf16.gmra.mxu0 %vm2591_vm1, %v10516_v21  ;;  %v7554_v21 = vor.u32 %v8597_v10, %v7553_v50  ;;  %v11813_v10 = vld [vmem:[#allocation37_spill] sm:$0xff] }
 0x75c   : > { %5762 = vmatpush.bf16.msrb.mxu1 %v11812_v26  ;;  %v10708_v28 = vpop.f32.mrf.mxu3  ;;  %v7617_v26 = vld [vmem:[#allocation24 + $0x140] sm:$0xf] }
 0x75d   : > { %v10706_v14 = vpop.f32.mrf.mxu1 }
 0x75f   : > { %5097 = vmatmul.bf16.gmra.mxu1 %v7522_v19  ;;  %v8613_v19 = vld [vmem:[#allocation24 + $0x15c] sm:$0xf0] }
 0x760   : > { %v3037_v62 = vpop.f32.mrf.mxu0 }
 0x763   : > { %v10710_v27 = vpop.f32.mrf.mxu2 }
 0x764   : > { %v10714_v12 = vpop.f32.mrf.mxu3 }
 0x765   : > { %v10712_v40 = vpop.f32.mrf.mxu1 }
 0x768   : > { %v3040_v55 = vpop.f32.mrf.mxu0 }
 0x76b   : > { %v10716_v54 = vpop.f32.mrf.mxu2  ;;  %7452 = vmatmul.msk.bf16.gmra.mxu0 %vm2591_vm1, %v10540_v60 }
 0x76c   : > { %v10722_v20 = vpop.f32.mrf.mxu3 }
 0x76d   : > { %v10720_v43 = vpop.f32.mrf.mxu1 }
 0x76e   : > { %v3107_v29 = vpack.c.bf16 %v10720_v43, %v10712_v40  ;;  %v11817_v40 = vpack.c.bf16 %v10586_v35, %v10580_v16  ;;  %v7713_v16 = vld [vmem:[#allocation24 + $0x200] sm:$0xf]  ;;  %v7529_v35 = vld [vmem:[#allocation24 + $0x88] sm:$0xf] }
 0x76f   : > { %5102 = vmatmul.bf16.gmra.mxu1 %v7554_v21  ;;  %v7618_v21 = vor.u32 %v8613_v19, %v7617_v26 }
 0x770   : > { %v3042_v47 = vpop.f32.mrf.mxu0 }
 0x773   : > { %v10724_v4 = vpop.f32.mrf.mxu2 }
 0x774   : > { %v10730_v60 = vpop.f32.mrf.mxu3  ;;  %v3123_v43 = vpack.c.bf16 %v10724_v4, %v10716_v54  ;;  %v3121_v54 = vpack.c.bf16 %v10688_v46, %v10670_v0  ;;  %v8570_v46 = vld [vmem:[#allocation24 + $0xc] sm:$0xf] }
 0x775   : > { %v2714_v17 = vpop.f32.mrf.mxu1 }
 0x778   : > { %v3045_v34 = vpop.f32.mrf.mxu0 }
 0x77b   : > { %v10726_v49 = vpop.f32.mrf.mxu2  ;;  %7453 = vmatmul.msk.bf16.gmra.mxu0 %vm2591_vm1, %v10558_v63 }
 0x77c   : > { %v10734_v31 = vpop.f32.mrf.mxu3 }
 0x77d   : > { %v2716_v48 = vpop.f32.mrf.mxu1 }
 0x77f   : > { %5107 = vmatmul.bf16.gmra.mxu1 %v7586_v23 }
 0x780   : > { %v3047_v56 = vpop.f32.mrf.mxu0 }
 0x781   : > { %v3149_v41 = vpack.c.bf16 %v3047_v56, %v3045_v34 }
 0x783   : > { %v10732_v9 = vpop.f32.mrf.mxu2 }
 0x784   : > { %v10738_v38 = vpop.f32.mrf.mxu3 }
 0x785   : > { %v2719_v32 = vpop.f32.mrf.mxu1 }
 0x788   : > { %v3050_v57 = vpop.f32.mrf.mxu0 }
 0x78b   : > { %v2841_v50 = vpop.f32.mrf.mxu2  ;;  %7454 = vmatmul.msk.bf16.gmra.mxu0 %vm2591_vm1, %v11813_v10  ;;  %v3148_v10 = vpack.c.bf16 %v3042_v47, %v3040_v55  ;;  %v7681_v47 = vld [vmem:[#allocation24 + $0x1c0] sm:$0xf] }
 0x78c   : > { %v10742_v26 = vpop.f32.mrf.mxu3 }
 0x78d   : > { %v2721_v63 = vpop.f32.mrf.mxu1 }
 0x78e   : > { %v3109_v56 = vpack.c.bf16 %v2721_v63, %v2719_v32  ;;  %v8629_v32 = vld [vmem:[#allocation24 + $0x1dc] sm:$0xf0] }
 0x78f   : > { %5112 = vmatmul.bf16.gmra.mxu1 %v7618_v21  ;;  %v7650_v21 = vor.u32 %v8621_v1, %v7649_v61  ;;  %v3108_v1 = vpack.c.bf16 %v2716_v48, %v2714_v17  ;;  %v7497_v61 = vld [vmem:[#allocation24 + $0x48] sm:$0xf]  ;;  %v11816_v17 = vpack.c.bf16 %v10608_v33, %v10593_v51  ;;  %v3105_v33 = vpack.c.bf16 %v10676_v7, %v10664_v11  ;;  %v8637_v11 = vld [vmem:[#allocation24 + $0x21c] sm:$0xf0]  ;;  %v8569_v7 = vld [vmem:[#allocation24 + $0x4] sm:$0xf] }
 0x790   : > { %v3052_v3 = vpop.f32.mrf.mxu0 }
 0x791   : > { %v3150_v23 = vpack.c.bf16 %v3052_v3, %v3050_v57  ;;  %v3147_v57 = vpack.c.bf16 %v3037_v62, %v10697_v59  ;;  %v8582_v59 = vld [vmem:[#allocation24 + $0x64] sm:$0xf0] }
 0x792   : > { %v7498_v53 = vor.u32 %v8582_v59, %v7497_v61 }
 0x793   : > { %v2843_v22 = vpop.f32.mrf.mxu2  ;;  %6093 = vmatpush.bf16.msra.mxu3 %v3150_v23 }
 0x794   : > { %v10750_v5 = vpop.f32.mrf.mxu3  ;;  %v3125_v62 = vpack.c.bf16 %v2843_v22, %v2841_v50  ;;  %5430 = vmatmul.bf16.gmra.mxu3 %v7498_v53  ;;  %v3106_v22 = vpack.c.bf16 %v10706_v14, %v10692_v6  ;;  %v3122_v6 = vpack.c.bf16 %v10710_v27, %v10702_v18  ;;  %v3104_v14 = vpack.c.bf16 %v10644_v36, %v10622_v2  ;;  %v7459_v50 = vld [vmem:[#allocation24 + $0x20] sm:$0xf0] }
 0x795   : > { %v2724_v58 = vpop.f32.mrf.mxu1  ;;  %v3103_v18 = vpack.c.bf16 %v10604_v44, %v10590_v25  ;;  %v7714_v36 = vor.u32 %v8637_v11, %v7713_v16  ;;  %v7462_v27 = vor.u32 %v8569_v7, %v7459_v50  ;;  %v3119_v25 = vpack.c.bf16 %v10615_v37, %v10597_v13  ;;  %v8645_v13 = vld [vmem:[#allocation24 + $0x25c] sm:$0xf0]  ;;  %v8577_v37 = vld [vmem:[#allocation24 + $0x44] sm:$0xf]  ;;  %v7625_v50 = vld [vmem:[#allocation24 + $0x148] sm:$0xf] }
 0x796   : > { %v7809_v7 = vld [vmem:[#allocation24 + $0x2c0] sm:$0xf] }
 0x797   : > { %6094 = vmatpush.bf16.msra.mxu3 %v3149_v41 }
 0x798   : > { %v10740_v39 = vpop.f32.mrf.mxu0 }
 0x79b   : > { %v2846_v19 = vpop.f32.mrf.mxu2  ;;  %6095 = vmatpush.bf16.msra.mxu3 %v3148_v10  ;;  %v3120_v10 = vpack.c.bf16 %v10660_v8, %v10635_v52  ;;  %v3140_v52 = vpack.c.bf16 %v10738_v38, %v10734_v31  ;;  %v3138_v31 = vpack.c.bf16 %v10714_v12, %v10708_v28  ;;  %v11821_v12 = vld [vmem:[#allocation38_spill] sm:$0xff] }
 0x79c   : > { %v2968_v48 = vpop.f32.mrf.mxu3 }
 0x79d   : > { %v2726_v3 = vpop.f32.mrf.mxu1 }
 0x79e   : > { %v3110_v34 = vpack.c.bf16 %v2726_v3, %v2724_v58  ;;  %v11815_v58 = vpack.c.bf16 %v10651_v30, %v10627_v42  ;;  %v7682_v42 = vor.u32 %v8629_v32, %v7681_v47  ;;  %v3124_v30 = vpack.c.bf16 %v10732_v9, %v10726_v49  ;;  %v8590_v49 = vld [vmem:[#allocation24 + $0xa4] sm:$0xf0]  ;;  %v7745_v3 = vld [vmem:[#allocation24 + $0x240] sm:$0xf]  ;;  %v11819_v47 = vld [vmem:[#allocation40_spill] sm:$0xff] }
 0x79f   : > { %5117 = vmatmul.bf16.gmra.mxu1 %v7650_v21  ;;  %6096 = vmatpush.bf16.msra.mxu3 %v3147_v57  ;;  %v7530_v63 = vor.u32 %v8590_v49, %v7529_v35  ;;  %v3141_v21 = vpack.c.bf16 %v10750_v5, %v10742_v26  ;;  %v3139_v26 = vpack.c.bf16 %v10730_v60, %v10722_v20  ;;  %v8578_v20 = vld [vmem:[#allocation24 + $0x4c] sm:$0xf]  ;;  %v11820_v32 = vld [vmem:[#allocation41_spill] sm:$0xff] }
 0x7a0   : > { %v10745_v41 = vpop.f32.mrf.mxu0  ;;  %5248 = vmatpush.bf16.msrb.mxu2 %v3110_v34  ;;  %v7561_v34 = vld [vmem:[#allocation24 + $0xc8] sm:$0xf]  ;;  %v7746_v38 = vor.u32 %v8645_v13, %v7745_v3  ;;  %v7499_v60 = vld [vmem:[#allocation24 + $0x68] sm:$0xf0]  ;;  %v3136_v53 = vpack.c.bf16 %v11820_v32, %v11819_v47 }
 0x7a1   : > { %v8586_v35 = vld [vmem:[#allocation24 + $0x8c] sm:$0xf]  ;;  %v8622_v13 = vld [vmem:[#allocation24 + $0x1a4] sm:$0xf0] }
 0x7a2   : > { %v7531_v49 = vld [vmem:[#allocation24 + $0xa8] sm:$0xf0] }
 0x7a3   : > { %v2848_v23 = vpop.f32.mrf.mxu2  ;;  %6097 = vmatpush.bf16.msra.mxu3 %v11814_v24  ;;  %v7491_v24 = vld [vmem:[#allocation24 + $0x60] sm:$0xf0] }
 0x7a4   : > { %v3126_v45 = vpack.c.bf16 %v2848_v23, %v2846_v19  ;;  %5249 = vmatpush.bf16.msrb.mxu2 %v3109_v56  ;;  %v2970_v4 = vpop.f32.mrf.mxu3  ;;  %5435 = vmatmul.bf16.gmra.mxu3 %v7530_v63  ;;  %v7467_v19 = vld [vmem:[#allocation24 + $0x28] sm:$0xf0]  ;;  %v8598_v56 = vld [vmem:[#allocation24 + $0xe4] sm:$0xf0] }
 0x7a5   : > { %v3142_v2 = vpack.c.bf16 %v2970_v4, %v2968_v48  ;;  %v7470_v57 = vor.u32 %v8570_v46, %v7467_v19  ;;  %v7562_v5 = vor.u32 %v8598_v56, %v7561_v34  ;;  %v8653_v48 = vld [vmem:[#allocation24 + $0x29c] sm:$0xf0]  ;;  %v7534_v4 = vor.u32 %v8586_v35, %v7531_v49  ;;  %v8614_v63 = vld [vmem:[#allocation24 + $0x164] sm:$0xf0] }
 0x7a6   : > { %5586 = vmatpush.bf16.msra.mxu0 %v3126_v45  ;;  %v7494_v45 = vor.u32 %v8577_v37, %v7491_v24  ;;  %v7841_v34 = vld [vmem:[#allocation24 + $0x300] sm:$0xf]  ;;  %v7657_v56 = vld [vmem:[#allocation24 + $0x188] sm:$0xf] }
 0x7a7   : > { %6098 = vmatpush.bf16.msra.mxu3 %v11815_v58  ;;  %v11818_v58 = vld [vmem:[#allocation42_spill] sm:$0xff]  ;;  %v8669_v24 = vld [vmem:[#allocation24 + $0x31c] sm:$0xf0] }
 0x7a8   : > { %v10755_v55 = vpop.f32.mrf.mxu0  ;;  %5250 = vmatpush.bf16.msrb.mxu2 %v3108_v1  ;;  %v3137_v61 = vpack.c.bf16 %v11818_v58, %v10674_v15  ;;  %v8602_v58 = vld [vmem:[#allocation24 + $0x10c] sm:$0xf] }
 0x7aa   : > { %5587 = vmatpush.bf16.msra.mxu0 %v3125_v62  ;;  %v7502_v62 = vor.u32 %v8578_v20, %v7499_v60 }
 0x7ab   : > { %6099 = vmatpush.bf16.msra.mxu3 %v11816_v17 }
 0x7ac   : > { %5251 = vmatpush.bf16.msrb.mxu2 %v3107_v29  ;;  %v11822_v29 = vld [vmem:[#allocation39_spill] sm:$0xff] }
 0x7ad   : > { %v3135_v17 = vpack.c.bf16 %v11822_v29, %v11821_v12  ;;  %v7689_v12 = vld [vmem:[#allocation24 + $0x1c8] sm:$0xf] }
 0x7ae   : > { %5588 = vmatpush.bf16.msra.mxu0 %v3124_v30  ;;  %v7593_v30 = vld [vmem:[#allocation24 + $0x108] sm:$0xf] }
 0x7af   : > { %5122 = vmatmul.bf16.gmra.mxu1 %v7682_v42  ;;  %6100 = vmatpush.bf16.msra.mxu3 %v11817_v40  ;;  %v7777_v42 = vld [vmem:[#allocation24 + $0x280] sm:$0xf]  ;;  %v8585_v40 = vld [vmem:[#allocation24 + $0x84] sm:$0xf]  ;;  %v8630_v29 = vld [vmem:[#allocation24 + $0x1e4] sm:$0xf0] }
 0x7b0   : > { %v10771_v51 = vpop.f32.mrf.mxu0  ;;  %5252 = vmatpush.bf16.msrb.mxu2 %v3106_v22  ;;  %v8606_v22 = vld [vmem:[#allocation24 + $0x124] sm:$0xf0] }
 0x7b2   : > { %5589 = vmatpush.bf16.msra.mxu0 %v3123_v43  ;;  %v7523_v43 = vld [vmem:[#allocation24 + $0xa0] sm:$0xf0] }
 0x7b4   : > { %5253 = vmatpush.bf16.msrb.mxu2 %v3105_v33  ;;  %5440 = vmatmul.bf16.gmra.mxu3 %v7562_v5  ;;  %v7594_v33 = vor.u32 %v8606_v22, %v7593_v30  ;;  %v8601_v5 = vld [vmem:[#allocation24 + $0x104] sm:$0xf] }
 0x7b5   : > { %v8609_v30 = vld [vmem:[#allocation24 + $0x144] sm:$0xf] }
 0x7b6   : > { %5590 = vmatpush.bf16.msra.mxu0 %v3122_v6  ;;  %v7778_v6 = vor.u32 %v8653_v48, %v7777_v42  ;;  %v8677_v42 = vld [vmem:[#allocation24 + $0x35c] sm:$0xf0]  ;;  %v7619_v22 = vld [vmem:[#allocation24 + $0x160] sm:$0xf0]  ;;  %v7690_v48 = vor.u32 %v8630_v29, %v7689_v12  ;;  %v7691_v29 = vld [vmem:[#allocation24 + $0x1e8] sm:$0xf0] }
 0x7b8   : > { %v10781_v9 = vpop.f32.mrf.mxu0  ;;  %5254 = vmatpush.bf16.msrb.mxu2 %v3104_v14  ;;  %v7526_v14 = vor.u32 %v8585_v40, %v7523_v43  ;;  %v7622_v43 = vor.u32 %v8609_v30, %v7619_v22  ;;  %v7785_v30 = vld [vmem:[#allocation24 + $0x288] sm:$0xf] }
 0x7b9   : > { %v8654_v22 = vld [vmem:[#allocation24 + $0x2a4] sm:$0xf0] }
 0x7ba   : > { %5591 = vmatpush.bf16.msra.mxu0 %v3121_v54 }
 0x7bc   : > { %v10787_v0 = vpop.f32.mrf.mxu1  ;;  %5255 = vmatpush.bf16.msrb.mxu2 %v3103_v18 }
 0x7be   : > { %5592 = vmatpush.bf16.msra.mxu0 %v3120_v10  ;;  %v7626_v10 = vor.u32 %v8614_v63, %v7625_v50  ;;  %v7905_v63 = vld [vmem:[#allocation24 + $0x380] sm:$0xf] }
 0x7bf   : > { %5127 = vmatmul.bf16.gmra.mxu1 %v7714_v36  ;;  %5256 = vmatmul.bf16.vlgmr.msrb.gmra.mxu2 %v7462_v27  ;;  %v8593_v36 = vld [vmem:[#allocation24 + $0xc4] sm:$0xf] }
 0x7c0   : > { %5924 = vmatpush.bf16.msra.mxu2 %v3142_v2  ;;  %v10793_v44 = vpop.f32.mrf.mxu0  ;;  %v8661_v2 = vld [vmem:[#allocation24 + $0x2dc] sm:$0xf0]  ;;  %v7555_v27 = vld [vmem:[#allocation24 + $0xe0] sm:$0xf0] }
 0x7c1   : > { %v7810_v46 = vor.u32 %v8661_v2, %v7809_v7  ;;  %v7558_v19 = vor.u32 %v8593_v36, %v7555_v27  ;;  %v7721_v2 = vld [vmem:[#allocation24 + $0x208] sm:$0xf]  ;;  %v8685_v27 = vld [vmem:[#allocation24 + $0x39c] sm:$0xf0] }
 0x7c2   : > { %5593 = vmatpush.bf16.msra.mxu0 %v3119_v25  ;;  %v8594_v25 = vld [vmem:[#allocation24 + $0xcc] sm:$0xf]  ;;  %v8638_v36 = vld [vmem:[#allocation24 + $0x224] sm:$0xf0] }
 0x7c4   : > { %5925 = vmatpush.bf16.msra.mxu2 %v3141_v21  ;;  %v10797_v8 = vpop.f32.mrf.mxu1  ;;  %5445 = vmatmul.bf16.gmra.mxu3 %v7594_v33 }
 0x7c5   : > { %5594 = vmatmul.bf16.vlgmr.msra.gmra.mxu0 %v7470_v57  ;;  %v7563_v57 = vld [vmem:[#allocation24 + $0xe8] sm:$0xf0] }
 0x7c8   : > { %5926 = vmatpush.bf16.msra.mxu2 %v3140_v52  ;;  %v10801_v23 = vpop.f32.mrf.mxu0 }
 0x7cc   : > { %5927 = vmatpush.bf16.msra.mxu2 %v3139_v26  ;;  %v10805_v1 = vpop.f32.mrf.mxu1  ;;  %v7566_v26 = vor.u32 %v8594_v25, %v7563_v57  ;;  %v7906_v57 = vor.u32 %v8685_v27, %v7905_v63 }
 0x7cf   : > { %5132 = vmatmul.bf16.gmra.mxu1 %v7746_v38  ;;  %5261 = vmatmul.bf16.gmra.mxu2 %v7494_v45  ;;  %v7658_v38 = vor.u32 %v8622_v13, %v7657_v56  ;;  %v7842_v45 = vor.u32 %v8669_v24, %v7841_v34  ;;  %v7659_v24 = vld [vmem:[#allocation24 + $0x1a8] sm:$0xf0] }
 0x7d0   : > { %5928 = vmatpush.bf16.msra.mxu2 %v3138_v31  ;;  %v10809_v59 = vpop.f32.mrf.mxu0  ;;  %v7587_v31 = vld [vmem:[#allocation24 + $0x120] sm:$0xf0] }
 0x7d1   : > { %v7590_v20 = vor.u32 %v8601_v5, %v7587_v31  ;;  %v3154_v31 = vpack.c.bf16 %v10809_v59, %v10801_v23  ;;  %v3152_v23 = vpack.c.bf16 %v10771_v51, %v10755_v55  ;;  %v7969_v51 = vld [vmem:[#allocation24 + $0x400] sm:$0xf] }
 0x7d4   : > { %5929 = vmatpush.bf16.msra.mxu2 %v3137_v61  ;;  %v10813_v28 = vpop.f32.mrf.mxu1  ;;  %5450 = vmatmul.bf16.gmra.mxu3 %v7626_v10  ;;  %v7595_v61 = vld [vmem:[#allocation24 + $0x128] sm:$0xf0]  ;;  %v8617_v10 = vld [vmem:[#allocation24 + $0x184] sm:$0xf] }
 0x7d5   : > { %5599 = vmatmul.bf16.gmra.mxu0 %v7502_v62  ;;  %v7598_v47 = vor.u32 %v8602_v58, %v7595_v61  ;;  %v8625_v58 = vld [vmem:[#allocation24 + $0x1c4] sm:$0xf] }
 0x7d6   : > { %v7683_v61 = vld [vmem:[#allocation24 + $0x1e0] sm:$0xf0] }
 0x7d8   : > { %5930 = vmatpush.bf16.msra.mxu2 %v3136_v53  ;;  %v10817_v15 = vpop.f32.mrf.mxu0  ;;  %v7873_v53 = vld [vmem:[#allocation24 + $0x340] sm:$0xf] }
 0x7d9   : > { %v7874_v40 = vor.u32 %v8677_v42, %v7873_v53 }
 0x7da   : > { %v5426_v56 = vpop.f32.mrf.mxu3 }
 0x7dc   : > { %5931 = vmatpush.bf16.msra.mxu2 %v3135_v17  ;;  %v10819_v16 = vpop.f32.mrf.mxu1 }
 0x7df   : > { %5137 = vmatmul.bf16.gmra.mxu1 %v7778_v6  ;;  %5266 = vmatmul.bf16.gmra.mxu2 %v7526_v14  ;;  %v8610_v6 = vld [vmem:[#allocation24 + $0x14c] sm:$0xf] }
 0x7e0   : > { %v10821_v54 = vpop.f32.mrf.mxu0  ;;  %v7627_v14 = vld [vmem:[#allocation24 + $0x168] sm:$0xf0] }
 0x7e1   : > { %v3155_v13 = vpack.c.bf16 %v10821_v54, %v10817_v15  ;;  %v7753_v15 = vld [vmem:[#allocation24 + $0x248] sm:$0xf] }
 0x7e2   : > { %v8646_v54 = vld [vmem:[#allocation24 + $0x264] sm:$0xf0] }
 0x7e4   : > { %v10823_v11 = vpop.f32.mrf.mxu1  ;;  %5455 = vmatmul.bf16.gmra.mxu3 %v7658_v38  ;;  %v3153_v38 = vpack.c.bf16 %v10793_v44, %v10781_v9  ;;  %v3151_v9 = vpack.c.bf16 %v10745_v41, %v10740_v39  ;;  %v8626_v44 = vld [vmem:[#allocation24 + $0x1cc] sm:$0xf] }
 0x7e5   : > { %5604 = vmatmul.bf16.gmra.mxu0 %v7534_v4  ;;  %v7630_v4 = vor.u32 %v8610_v6, %v7627_v14  ;;  %v7786_v6 = vor.u32 %v8654_v22, %v7785_v30 }
 0x7e8   : > { %v10825_v18 = vpop.f32.mrf.mxu0 }
 0x7ec   : > { %v10827_v21 = vpop.f32.mrf.mxu1 }
 0x7ef   : > { %5142 = vmatmul.bf16.gmra.mxu1 %v7810_v46  ;;  %5271 = vmatmul.bf16.gmra.mxu2 %v7558_v19  ;;  %v7651_v46 = vld [vmem:[#allocation24 + $0x1a0] sm:$0xf0]  ;;  %v7722_v19 = vor.u32 %v8638_v36, %v7721_v2 }
 0x7f0   : > { %v3082_v52 = vpop.f32.mrf.mxu0 }
 0x7f1   : > { %v3156_v25 = vpack.c.bf16 %v3082_v52, %v10825_v18  ;;  %v10848_v52 = vpop.f32.mrf.mxu3 }
 0x7f4   : > { %v10829_v3 = vpop.f32.mrf.mxu1  ;;  %5460 = vmatmul.bf16.gmra.mxu3 %v7690_v48  ;;  %v8701_v48 = vld [vmem:[#allocation24 + $0x41c] sm:$0xf0] }
 0x7f5   : > { %5609 = vmatmul.bf16.gmra.mxu0 %v7566_v26  ;;  %v7654_v26 = vor.u32 %v8617_v10, %v7651_v46  ;;  %v7970_v39 = vor.u32 %v8701_v48, %v7969_v51 }
 0x7f8   : > { %v3085_v37 = vpop.f32.mrf.mxu0 }
 0x7fc   : > { %v10831_v60 = vpop.f32.mrf.mxu1 }
 0x7ff   : > { %5147 = vmatmul.bf16.gmra.mxu1 %v7842_v45  ;;  %5276 = vmatmul.bf16.gmra.mxu2 %v7590_v20  ;;  %v7937_v45 = vld [vmem:[#allocation24 + $0x3c0] sm:$0xf] }
 0x800   : > { %v3087_v62 = vpop.f32.mrf.mxu0  ;;  %v8693_v20 = vld [vmem:[#allocation24 + $0x3dc] sm:$0xf0] }
 0x801   : > { %v3157_v50 = vpack.c.bf16 %v3087_v62, %v3085_v37  ;;  %v8618_v37 = vld [vmem:[#allocation24 + $0x18c] sm:$0xf]  ;;  %v7754_v62 = vor.u32 %v8646_v54, %v7753_v15  ;;  %v7938_v59 = vor.u32 %v8693_v20, %v7937_v45 }
 0x802   : > { %v7662_v5 = vor.u32 %v8618_v37, %v7659_v24  ;;  %v8662_v37 = vld [vmem:[#allocation24 + $0x2e4] sm:$0xf0]  ;;  %v3487_v24 = vpop.permute.xlu0 %3486 }
 0x803   : > { %v5091_v45 = vadd.f32 %v10797_v8, %v3487_v24  ;;  %v7787_v24 = vld [vmem:[#allocation24 + $0x2a8] sm:$0xf0] }
 0x804   : > { %v10833_v32 = vpop.f32.mrf.mxu1  ;;  %5465 = vmatmul.bf16.gmra.mxu3 %v7722_v19 }
 0x805   : > { %5614 = vmatmul.bf16.gmra.mxu0 %v7598_v47  ;;  %v7686_v47 = vor.u32 %v8625_v58, %v7683_v61 }
 0x808   : > { %v3090_v17 = vpop.f32.mrf.mxu0 }
 0x80c   : > { %v10835_v33 = vpop.f32.mrf.mxu1 }
 0x80f   : > { %5152 = vmatmul.bf16.gmra.mxu1 %v7874_v40  ;;  %5281 = vmatmul.bf16.gmra.mxu2 %v7622_v43  ;;  %v8633_v40 = vld [vmem:[#allocation24 + $0x204] sm:$0xf] }
 0x810   : > { %v3092_v35 = vpop.f32.mrf.mxu0  ;;  %v7715_v43 = vld [vmem:[#allocation24 + $0x220] sm:$0xf0] }
 0x811   : > { %v3158_v49 = vpack.c.bf16 %v3092_v35, %v3090_v17  ;;  %v7694_v17 = vor.u32 %v8626_v44, %v7691_v29  ;;  %v7718_v41 = vor.u32 %v8633_v40, %v7715_v43  ;;  %v3492_v44 = vpop.permute.xlu1 %3491  ;;  %v8033_v43 = vld [vmem:[#allocation24 + $0x480] sm:$0xf] }
 0x812   : > { %v5094_v8 = vadd.f32 %v10805_v1, %v3492_v44  ;;  %v7779_v1 = vld [vmem:[#allocation24 + $0x2a0] sm:$0xf0]  ;;  %v8725_v44 = vld [vmem:[#allocation24 + $0x4dc] sm:$0xf0] }
 0x813   : > { %6262 = vmatpush.bf16.msrb.mxu0 %v3158_v49  ;;  %v8634_v49 = vld [vmem:[#allocation24 + $0x20c] sm:$0xf] }
 0x814   : > { %v10837_v7 = vpop.f32.mrf.mxu1  ;;  %5470 = vmatmul.bf16.gmra.mxu3 %v7754_v62 }
 0x815   : > { %5619 = vmatmul.bf16.gmra.mxu0 %v7630_v4  ;;  %v7723_v4 = vld [vmem:[#allocation24 + $0x228] sm:$0xf0] }
 0x816   : > { %v7726_v2 = vor.u32 %v8634_v49, %v7723_v4  ;;  %v8717_v49 = vld [vmem:[#allocation24 + $0x49c] sm:$0xf0]  ;;  %v8649_v4 = vld [vmem:[#allocation24 + $0x284] sm:$0xf] }
 0x817   : > { %6263 = vmatpush.bf16.msrb.mxu0 %v3157_v50  ;;  %v10856_v12 = vpop.f32.mrf.mxu3  ;;  %v3482_v50 = vpop.permute.xlu2 %3481 }
 0x818   : > { %v5089_v63 = vadd.f32 %v10787_v0, %v3482_v50 }
 0x81b   : > { %6264 = vmatpush.bf16.msrb.mxu0 %v3156_v25 }
 0x81c   : > { %v10840_v34 = vpop.f32.mrf.mxu1 }
 0x81f   : > { %5157 = vmatmul.bf16.gmra.mxu1 %v7906_v57  ;;  %5286 = vmatmul.bf16.gmra.mxu2 %v7654_v26  ;;  %v10862_v55 = vpop.f32.mrf.mxu3  ;;  %v8001_v26 = vld [vmem:[#allocation24 + $0x440] sm:$0xf] }
 0x820   : > { %6265 = vmatpush.bf16.msrb.mxu0 %v3155_v13  ;;  %v7817_v13 = vld [vmem:[#allocation24 + $0x2c8] sm:$0xf] }
 0x821   : > { %v7818_v0 = vor.u32 %v8662_v37, %v7817_v13  ;;  %v8650_v37 = vld [vmem:[#allocation24 + $0x28c] sm:$0xf] }
 0x824   : > { %6266 = vmatpush.bf16.msrb.mxu0 %v3154_v31  ;;  %v10846_v18 = vpop.f32.mrf.mxu1  ;;  %5475 = vmatmul.bf16.gmra.mxu3 %v7786_v6  ;;  %v8641_v31 = vld [vmem:[#allocation24 + $0x244] sm:$0xf]  ;;  %v7849_v6 = vld [vmem:[#allocation24 + $0x308] sm:$0xf] }
 0x825   : > { %5624 = vmatmul.bf16.gmra.mxu0 %v7662_v5  ;;  %v8709_v5 = vld [vmem:[#allocation24 + $0x45c] sm:$0xf0] }
 0x827   : > { %v10866_v35 = vpop.f32.mrf.mxu3 }
 0x828   : > { %6267 = vmatpush.bf16.msrb.mxu0 %v3153_v38  ;;  %v7747_v38 = vld [vmem:[#allocation24 + $0x260] sm:$0xf0] }
 0x829   : > { %v7750_v58 = vor.u32 %v8641_v31, %v7747_v38  ;;  %v3502_v31 = vpop.permute.xlu0 %3501  ;;  %v7790_v38 = vor.u32 %v8650_v37, %v7787_v24  ;;  %v8097_v37 = vld [vmem:[#allocation24 + $0x500] sm:$0xf]  ;;  %v7913_v24 = vld [vmem:[#allocation24 + $0x388] sm:$0xf] }
 0x82c   : > { %6268 = vmatpush.bf16.msrb.mxu0 %v3152_v23  ;;  %v10854_v53 = vpop.f32.mrf.mxu1 }
 0x82f   : > { %5162 = vmatmul.bf16.gmra.mxu1 %v7938_v59  ;;  %5291 = vmatmul.bf16.gmra.mxu2 %v7686_v47  ;;  %v10871_v25 = vpop.f32.mrf.mxu3  ;;  %v8642_v59 = vld [vmem:[#allocation24 + $0x24c] sm:$0xf] }
 0x830   : > { %6269 = vmatpush.bf16.msrb.mxu0 %v3151_v9  ;;  %v7755_v47 = vld [vmem:[#allocation24 + $0x268] sm:$0xf0] }
 0x831   : > { %v7758_v29 = vor.u32 %v8642_v59, %v7755_v47  ;;  %v8678_v59 = vld [vmem:[#allocation24 + $0x364] sm:$0xf0]  ;;  %v3507_v47 = vpop.permute.xlu1 %3506 }
 0x834   : > { %v10860_v42 = vpop.f32.mrf.mxu1  ;;  %5480 = vmatmul.bf16.gmra.mxu3 %v7818_v0 }
 0x835   : > { %5629 = vmatmul.bf16.gmra.mxu0 %v7694_v17 }
 0x837   : > { %v10879_v23 = vpop.f32.mrf.mxu3 }
 0x83c   : > { %v10864_v14 = vpop.f32.mrf.mxu1 }
 0x83f   : > { %5167 = vmatmul.bf16.gmra.mxu1 %v7970_v39  ;;  %5296 = vmatmul.bf16.gmra.mxu2 %v7718_v41  ;;  %v8670_v39 = vld [vmem:[#allocation24 + $0x324] sm:$0xf0]  ;;  %v3497_v41 = vpop.permute.xlu2 %3496 }
 0x840   : > { %v7850_v50 = vor.u32 %v8670_v39, %v7849_v6 }
 0x842   : > { %v5257_v36 = vpop.f32.mrf.mxu2  ;;  %v5595_v27 = vpop.f32.mrf.mxu0 }
 0x843   : > { %v5258_v10 = vadd.f32 %v5257_v36, %v5089_v63  ;;  %v5096_v63 = vadd.f32 %v10813_v28, %v3497_v41  ;;  %v5099_v28 = vadd.f32 %v10819_v16, %v3502_v31  ;;  %v7811_v16 = vld [vmem:[#allocation24 + $0x2e0] sm:$0xf0]  ;;  %v8686_v31 = vld [vmem:[#allocation24 + $0x3a4] sm:$0xf0] }
 0x844   : > { %v10869_v46 = vpop.f32.mrf.mxu1  ;;  %5485 = vmatmul.bf16.gmra.mxu3 %v7850_v50 }
 0x845   : > { %v5427_v19 = vadd.f32 %v5426_v56, %v5258_v10  ;;  %5634 = vmatmul.bf16.gmra.mxu0 %v7726_v2  ;;  %v8002_v56 = vor.u32 %v8709_v5, %v8001_v26  ;;  %v7782_v10 = vor.u32 %v8649_v4, %v7779_v1  ;;  %v7819_v4 = vld [vmem:[#allocation24 + $0x2e8] sm:$0xf0] }
 0x847   : > { %v10873_v57 = vadd.f32 %v5595_v27, %v5427_v19  ;;  %v3512_v50 = vpop.permute.xlu2 %3511 }
 0x84a   : > { %v5259_v15 = vpop.f32.mrf.mxu2  ;;  %v5597_v54 = vpop.f32.mrf.mxu0 }
 0x84b   : > { %v5260_v20 = vadd.f32 %v5259_v15, %v5091_v45 }
 0x84c   : > { %v10876_v61 = vpop.f32.mrf.mxu1 }
 0x84d   : > { %v5429_v62 = vadd.f32 %v10848_v52, %v5260_v20  ;;  %v10887_v52 = vpop.f32.mrf.mxu3 }
 0x84f   : > { %v10881_v9 = vadd.f32 %v5597_v54, %v5429_v62  ;;  %5172 = vmatmul.bf16.gmra.mxu1 %v8002_v56  ;;  %5301 = vmatmul.bf16.gmra.mxu2 %v7750_v58  ;;  %v8065_v58 = vld [vmem:[#allocation24 + $0x4c0] sm:$0xf]  ;;  %v7881_v62 = vld [vmem:[#allocation24 + $0x348] sm:$0xf] }
 0x852   : > { %v5262_v17 = vpop.f32.mrf.mxu2  ;;  %v5600_v51 = vpop.f32.mrf.mxu0 }
 0x853   : > { %v5263_v30 = vadd.f32 %v5262_v17, %v5094_v8  ;;  %v8657_v8 = vld [vmem:[#allocation24 + $0x2c4] sm:$0xf]  ;;  %v5101_v17 = vadd.f32 %v10823_v11, %v3507_v47  ;;  %v5104_v11 = vadd.f32 %v10827_v21, %v3512_v50  ;;  %v8129_v50 = vld [vmem:[#allocation24 + $0x540] sm:$0xf] }
 0x854   : > { %v10884_v22 = vpop.f32.mrf.mxu1  ;;  %v7843_v21 = vld [vmem:[#allocation24 + $0x320] sm:$0xf0] }
 0x855   : > { %v5432_v48 = vadd.f32 %v10856_v12, %v5263_v30  ;;  %5639 = vmatmul.bf16.gmra.mxu0 %v7758_v29  ;;  %v8034_v12 = vor.u32 %v8717_v49, %v8033_v43  ;;  %v10895_v13 = vpop.f32.mrf.mxu3  ;;  %v7882_v29 = vor.u32 %v8678_v59, %v7881_v62  ;;  %v7814_v43 = vor.u32 %v8657_v8, %v7811_v16  ;;  %v8658_v49 = vld [vmem:[#allocation24 + $0x2cc] sm:$0xf] }
 0x856   : > { %v8666_v16 = vld [vmem:[#allocation24 + $0x30c] sm:$0xf] }
 0x857   : > { %v10889_v40 = vadd.f32 %v5600_v51, %v5432_v48  ;;  %5490 = vmatmul.bf16.gmra.mxu3 %v7882_v29  ;;  %v7851_v29 = vld [vmem:[#allocation24 + $0x328] sm:$0xf0] }
 0x85a   : > { %v5264_v2 = vpop.f32.mrf.mxu2  ;;  %v5602_v36 = vpop.f32.mrf.mxu0 }
 0x85b   : > { %v5265_v27 = vadd.f32 %v5264_v2, %v5096_v63  ;;  %v7822_v63 = vor.u32 %v8658_v49, %v7819_v4 }
 0x85c   : > { %v10892_v19 = vpop.f32.mrf.mxu1 }
 0x85d   : > { %v5434_v26 = vadd.f32 %v10862_v55, %v5265_v27  ;;  %v10903_v55 = vpop.f32.mrf.mxu3 }
 0x85f   : > { %v10897_v5 = vadd.f32 %v5602_v36, %v5434_v26  ;;  %5177 = vmatmul.bf16.gmra.mxu1 %v8034_v12  ;;  %5306 = vmatmul.bf16.gmra.mxu2 %v7782_v10 }
 0x862   : > { %v5267_v0 = vpop.f32.mrf.mxu2  ;;  %v5605_v45 = vpop.f32.mrf.mxu0 }
 0x863   : > { %v5268_v15 = vadd.f32 %v5267_v0, %v5099_v28  ;;  %v3517_v28 = vpop.permute.xlu0 %3516  ;;  %v8665_v0 = vld [vmem:[#allocation24 + $0x304] sm:$0xf] }
 0x864   : > { %v10900_v54 = vpop.f32.mrf.mxu1  ;;  %v7846_v59 = vor.u32 %v8665_v0, %v7843_v21 }
 0x865   : > { %v5437_v20 = vadd.f32 %v10866_v35, %v5268_v15  ;;  %5644 = vmatmul.bf16.gmra.mxu0 %v7790_v38  ;;  %v8066_v35 = vor.u32 %v8725_v44, %v8065_v58  ;;  %v10911_v41 = vpop.f32.mrf.mxu3  ;;  %v8733_v38 = vld [vmem:[#allocation24 + $0x51c] sm:$0xf0]  ;;  %v5106_v15 = vadd.f32 %v10829_v3, %v3517_v28 }
 0x867   : > { %v10905_v56 = vadd.f32 %v5605_v45, %v5437_v20  ;;  %v7914_v45 = vor.u32 %v8686_v31, %v7913_v24 }
 0x869   : > { %5495 = vmatmul.bf16.gmra.mxu3 %v7914_v45 }
 0x86a   : > { %v5269_v51 = vpop.f32.mrf.mxu2  ;;  %v5607_v30 = vpop.f32.mrf.mxu0 }
 0x86b   : > { %v5270_v48 = vadd.f32 %v5269_v51, %v5101_v17  ;;  %v3522_v51 = vpop.permute.xlu1 %3521 }
 0x86c   : > { %v10908_v6 = vpop.f32.mrf.mxu1  ;;  %v5109_v3 = vadd.f32 %v10831_v60, %v3522_v51  ;;  %v7875_v60 = vld [vmem:[#allocation24 + $0x360] sm:$0xf0] }
 0x86d   : > { %v5439_v39 = vadd.f32 %v10871_v25, %v5270_v48  ;;  %v10919_v25 = vpop.f32.mrf.mxu3 }
 0x86f   : > { %v10913_v1 = vadd.f32 %v5607_v30, %v5439_v39  ;;  %5182 = vmatmul.bf16.gmra.mxu1 %v8066_v35  ;;  %5311 = vmatmul.bf16.gmra.mxu2 %v7814_v43  ;;  %v7854_v30 = vor.u32 %v8666_v16, %v7851_v29 }
 0x872   : > { %v5272_v2 = vpop.f32.mrf.mxu2  ;;  %v5610_v36 = vpop.f32.mrf.mxu0 }
 0x873   : > { %v5273_v27 = vadd.f32 %v5272_v2, %v5104_v11  ;;  %v7945_v11 = vld [vmem:[#allocation24 + $0x3c8] sm:$0xf]  ;;  %v3527_v2 = vpop.permute.xlu2 %3526 }
 0x874   : > { %v10916_v12 = vpop.f32.mrf.mxu1 }
 0x875   : > { %v5442_v10 = vadd.f32 %v10879_v23, %v5273_v27  ;;  %5649 = vmatmul.bf16.gmra.mxu0 %v7822_v63  ;;  %v8098_v23 = vor.u32 %v8733_v38, %v8097_v37  ;;  %v10927_v8 = vpop.f32.mrf.mxu3  ;;  %v8694_v63 = vld [vmem:[#allocation24 + $0x3e4] sm:$0xf0]  ;;  %v8673_v27 = vld [vmem:[#allocation24 + $0x344] sm:$0xf]  ;;  %v5111_v37 = vadd.f32 %v10833_v32, %v3527_v2 }
 0x876   : > { %v7878_v38 = vor.u32 %v8673_v27, %v7875_v60 }
 0x877   : > { %v10921_v26 = vadd.f32 %v5610_v36, %v5442_v10  ;;  %v8741_v36 = vld [vmem:[#allocation24 + $0x55c] sm:$0xf0]  ;;  %v7946_v10 = vor.u32 %v8694_v63, %v7945_v11 }
 0x879   : > { %5500 = vmatmul.bf16.gmra.mxu3 %v7946_v10 }
 0x87a   : > { %v5274_v20 = vpop.f32.mrf.mxu2  ;;  %v5612_v58 = vpop.f32.mrf.mxu0 }
 0x87b   : > { %v5275_v62 = vadd.f32 %v5274_v20, %v5106_v15  ;;  %v8674_v15 = vld [vmem:[#allocation24 + $0x34c] sm:$0xf] }
 0x87c   : > { %v10924_v47 = vpop.f32.mrf.mxu1  ;;  %v7883_v20 = vld [vmem:[#allocation24 + $0x368] sm:$0xf0] }
 0x87d   : > { %v5444_v44 = vadd.f32 %v10887_v52, %v5275_v62  ;;  %v10935_v52 = vpop.f32.mrf.mxu3  ;;  %v3532_v62 = vpop.permute.xlu0 %3531 }
 0x87e   : > { %v5114_v32 = vadd.f32 %v10835_v33, %v3532_v62  ;;  %v7907_v33 = vld [vmem:[#allocation24 + $0x3a0] sm:$0xf0] }
 0x87f   : > { %v10929_v17 = vadd.f32 %v5612_v58, %v5444_v44  ;;  %5187 = vmatmul.bf16.gmra.mxu1 %v8098_v23  ;;  %5316 = vmatmul.bf16.gmra.mxu2 %v7846_v59  ;;  %v7886_v23 = vor.u32 %v8674_v15, %v7883_v20 }
 0x882   : > { %v5277_v48 = vpop.f32.mrf.mxu2  ;;  %v5615_v35 = vpop.f32.mrf.mxu0 }
 0x883   : > { %v5278_v43 = vadd.f32 %v5277_v48, %v5109_v3  ;;  %v7977_v48 = vld [vmem:[#allocation24 + $0x408] sm:$0xf] }
 0x884   : > { %v10932_v39 = vpop.f32.mrf.mxu1 }
 0x885   : > { %v5447_v49 = vadd.f32 %v10895_v13, %v5278_v43  ;;  %5654 = vmatmul.bf16.gmra.mxu0 %v7854_v30  ;;  %v8130_v13 = vor.u32 %v8741_v36, %v8129_v50  ;;  %v10943_v45 = vpop.f32.mrf.mxu3  ;;  %v8161_v30 = vld [vmem:[#allocation24 + $0x580] sm:$0xf]  ;;  %v3537_v43 = vpop.permute.xlu1 %3536  ;;  %v8681_v50 = vld [vmem:[#allocation24 + $0x384] sm:$0xf] }
 0x886   : > { %v5116_v63 = vadd.f32 %v10837_v7, %v3537_v43  ;;  %v7910_v60 = vor.u32 %v8681_v50, %v7907_v33 }
 0x887   : > { %v10937_v4 = vadd.f32 %v5615_v35, %v5447_v49  ;;  %v8702_v35 = vld [vmem:[#allocation24 + $0x424] sm:$0xf0]  ;;  %v8749_v49 = vld [vmem:[#allocation24 + $0x59c] sm:$0xf0] }
 0x888   : > { %v7978_v11 = vor.u32 %v8702_v35, %v7977_v48  ;;  %v8757_v48 = vld [vmem:[#allocation24 + $0x5dc] sm:$0xf0]  ;;  %v8689_v35 = vld [vmem:[#allocation24 + $0x3c4] sm:$0xf] }
 0x88a   : > { %v5279_v24 = vpop.f32.mrf.mxu2  ;;  %v5617_v31 = vpop.f32.mrf.mxu0  ;;  %5505 = vmatmul.bf16.gmra.mxu3 %v7978_v11 }
 0x88b   : > { %v5280_v28 = vadd.f32 %v5279_v24, %v5111_v37 }
 0x88c   : > { %v10940_v0 = vpop.f32.mrf.mxu1 }
 0x88d   : > { %v5449_v21 = vadd.f32 %v10903_v55, %v5280_v28  ;;  %v10951_v55 = vpop.f32.mrf.mxu3  ;;  %v7915_v28 = vld [vmem:[#allocation24 + $0x3a8] sm:$0xf0] }
 0x88f   : > { %v10945_v58 = vadd.f32 %v5617_v31, %v5449_v21  ;;  %5192 = vmatmul.bf16.gmra.mxu1 %v8130_v13  ;;  %5321 = vmatmul.bf16.gmra.mxu2 %v7878_v38  ;;  %v8682_v31 = vld [vmem:[#allocation24 + $0x38c] sm:$0xf]  ;;  %v3542_v38 = vpop.permute.xlu2 %3541 }
 0x890   : > { %v5119_v7 = vadd.f32 %v10840_v34, %v3542_v38  ;;  %v7918_v21 = vor.u32 %v8682_v31, %v7915_v28  ;;  %v7939_v34 = vld [vmem:[#allocation24 + $0x3e0] sm:$0xf0]  ;;  %v3552_v31 = vpop.permute.xlu1 %3551 }
 0x892   : > { %v5282_v59 = vpop.f32.mrf.mxu2  ;;  %v5620_v44 = vpop.f32.mrf.mxu0 }
 0x893   : > { %v5283_v16 = vadd.f32 %v5282_v59, %v5114_v32 }
 0x894   : > { %v10948_v29 = vpop.f32.mrf.mxu1 }
 0x895   : > { %v5452_v51 = vadd.f32 %v10911_v41, %v5283_v16  ;;  %5659 = vmatmul.bf16.gmra.mxu0 %v7886_v23  ;;  %v8162_v41 = vor.u32 %v8749_v49, %v8161_v30  ;;  %v10959_v24 = vpop.f32.mrf.mxu3  ;;  %v8009_v16 = vld [vmem:[#allocation24 + $0x448] sm:$0xf]  ;;  %v3547_v30 = vpop.permute.xlu0 %3546 }
 0x896   : > { %v5121_v49 = vadd.f32 %v10846_v18, %v3547_v30  ;;  %v5124_v18 = vadd.f32 %v10854_v53, %v3552_v31  ;;  %v8765_v30 = vld [vmem:[#allocation24 + $0x61c] sm:$0xf0]  ;;  %v7971_v53 = vld [vmem:[#allocation24 + $0x420] sm:$0xf0] }
 0x897   : > { %v10953_v3 = vadd.f32 %v5620_v44, %v5452_v51  ;;  %v8193_v44 = vld [vmem:[#allocation24 + $0x5c0] sm:$0xf]  ;;  %v8710_v51 = vld [vmem:[#allocation24 + $0x464] sm:$0xf0] }
 0x898   : > { %v8010_v43 = vor.u32 %v8710_v51, %v8009_v16  ;;  %v8718_v16 = vld [vmem:[#allocation24 + $0x4a4] sm:$0xf0]  ;;  %v3557_v51 = vpop.permute.xlu2 %3556 }
 0x89a   : > { %v5284_v2 = vpop.f32.mrf.mxu2  ;;  %v5622_v36 = vpop.f32.mrf.mxu0  ;;  %5510 = vmatmul.bf16.gmra.mxu3 %v8010_v43 }
 0x89b   : > { %v5285_v27 = vadd.f32 %v5284_v2, %v5116_v63  ;;  %v7942_v63 = vor.u32 %v8689_v35, %v7939_v34  ;;  %v5126_v34 = vadd.f32 %v10860_v42, %v3557_v51  ;;  %v8726_v51 = vld [vmem:[#allocation24 + $0x4e4] sm:$0xf0] }
 0x89c   : > { %v10956_v10 = vpop.f32.mrf.mxu1 }
 0x89d   : > { %v5454_v37 = vadd.f32 %v10919_v25, %v5285_v27  ;;  %v10967_v25 = vpop.f32.mrf.mxu3  ;;  %v3562_v31 = vpop.permute.xlu0 %3561 }
 0x89e   : > { %v5129_v42 = vadd.f32 %v10864_v14, %v3562_v31  ;;  %v8003_v14 = vld [vmem:[#allocation24 + $0x460] sm:$0xf0]  ;;  %v8011_v31 = vld [vmem:[#allocation24 + $0x468] sm:$0xf0] }
 0x89f   : > { %v10961_v13 = vadd.f32 %v5622_v36, %v5454_v37  ;;  %5197 = vmatmul.bf16.gmra.mxu1 %v8162_v41  ;;  %5326 = vmatmul.bf16.gmra.mxu2 %v7910_v60  ;;  %v8690_v41 = vld [vmem:[#allocation24 + $0x3cc] sm:$0xf] }
 0x8a0   : > { %v7947_v60 = vld [vmem:[#allocation24 + $0x3e8] sm:$0xf0] }
 0x8a1   : > { %v7950_v28 = vor.u32 %v8690_v41, %v7947_v60  ;;  %v7979_v41 = vld [vmem:[#allocation24 + $0x428] sm:$0xf0] }
 0x8a2   : > { %v5287_v15 = vpop.f32.mrf.mxu2  ;;  %v5625_v20 = vpop.f32.mrf.mxu0 }
 0x8a3   : > { %v5288_v62 = vadd.f32 %v5287_v15, %v5119_v7 }
 0x8a4   : > { %v10964_v32 = vpop.f32.mrf.mxu1 }
 0x8a5   : > { %v5457_v23 = vadd.f32 %v10927_v8, %v5288_v62  ;;  %5664 = vmatmul.bf16.gmra.mxu0 %v7918_v21  ;;  %v8194_v8 = vor.u32 %v8757_v48, %v8193_v44  ;;  %v10975_v27 = vpop.f32.mrf.mxu3  ;;  %v8041_v44 = vld [vmem:[#allocation24 + $0x488] sm:$0xf]  ;;  %v8697_v48 = vld [vmem:[#allocation24 + $0x404] sm:$0xf] }
 0x8a6   : > { %v8042_v35 = vor.u32 %v8718_v16, %v8041_v44  ;;  %v8257_v44 = vld [vmem:[#allocation24 + $0x640] sm:$0xf]  ;;  %v8073_v16 = vld [vmem:[#allocation24 + $0x4c8] sm:$0xf] }
 0x8a7   : > { %v10969_v59 = vadd.f32 %v5625_v20, %v5457_v23  ;;  %v8225_v23 = vld [vmem:[#allocation24 + $0x600] sm:$0xf] }
 0x8aa   : > { %v5289_v50 = vpop.f32.mrf.mxu2  ;;  %v5627_v33 = vpop.f32.mrf.mxu0  ;;  %5515 = vmatmul.bf16.gmra.mxu3 %v8042_v35  ;;  %v8074_v35 = vor.u32 %v8726_v51, %v8073_v16 }
 0x8ab   : > { %v5290_v11 = vadd.f32 %v5289_v50, %v5121_v49 }
 0x8ac   : > { %v10972_v2 = vpop.f32.mrf.mxu1 }
 0x8ad   : > { %v5459_v36 = vadd.f32 %v10935_v52, %v5290_v11  ;;  %v10983_v52 = vpop.f32.mrf.mxu3 }
 0x8af   : > { %v10977_v37 = vadd.f32 %v5627_v33, %v5459_v36  ;;  %5202 = vmatmul.bf16.gmra.mxu1 %v8194_v8  ;;  %5331 = vmatmul.bf16.gmra.mxu2 %v7942_v63  ;;  %v7974_v33 = vor.u32 %v8697_v48, %v7971_v53  ;;  %v8698_v36 = vld [vmem:[#allocation24 + $0x40c] sm:$0xf]  ;;  %v8773_v48 = vld [vmem:[#allocation24 + $0x65c] sm:$0xf0]  ;;  %v8705_v53 = vld [vmem:[#allocation24 + $0x444] sm:$0xf] }
 0x8b2   : > { %v5292_v38 = vpop.f32.mrf.mxu2  ;;  %v5630_v7 = vpop.f32.mrf.mxu0 }
 0x8b3   : > { %v5293_v21 = vadd.f32 %v5292_v38, %v5124_v18  ;;  %v7982_v18 = vor.u32 %v8698_v36, %v7979_v41  ;;  %v8706_v41 = vld [vmem:[#allocation24 + $0x44c] sm:$0xf] }
 0x8b4   : > { %v10980_v15 = vpop.f32.mrf.mxu1 }
 0x8b5   : > { %v5462_v20 = vadd.f32 %v10943_v45, %v5293_v21  ;;  %5669 = vmatmul.bf16.gmra.mxu0 %v7950_v28  ;;  %v8226_v45 = vor.u32 %v8765_v30, %v8225_v23  ;;  %v10991_v63 = vpop.f32.mrf.mxu3  ;;  %v3567_v30 = vpop.permute.xlu1 %3566 }
 0x8b7   : > { %v10985_v62 = vadd.f32 %v5630_v7, %v5462_v20 }
 0x8ba   : > { %v5294_v43 = vpop.f32.mrf.mxu2  ;;  %v5632_v49 = vpop.f32.mrf.mxu0  ;;  %5520 = vmatmul.bf16.gmra.mxu3 %v8074_v35  ;;  %v8781_v35 = vld [vmem:[#allocation24 + $0x69c] sm:$0xf0] }
 0x8bb   : > { %v5295_v50 = vadd.f32 %v5294_v43, %v5126_v34  ;;  %v5131_v34 = vadd.f32 %v10869_v46, %v3567_v30  ;;  %v8289_v30 = vld [vmem:[#allocation24 + $0x680] sm:$0xf] }
 0x8bc   : > { %v10988_v11 = vpop.f32.mrf.mxu1 }
 0x8bd   : > { %v5464_v8 = vadd.f32 %v10951_v55, %v5295_v50  ;;  %v10999_v55 = vpop.f32.mrf.mxu3 }
 0x8bf   : > { %v10993_v60 = vadd.f32 %v5632_v49, %v5464_v8  ;;  %5207 = vmatmul.bf16.gmra.mxu1 %v8226_v45  ;;  %5336 = vmatmul.bf16.gmra.mxu2 %v7974_v33  ;;  %v8006_v45 = vor.u32 %v8705_v53, %v8003_v14  ;;  %v8734_v53 = vld [vmem:[#allocation24 + $0x524] sm:$0xf0]  ;;  %v3577_v14 = vpop.permute.xlu0 %3576 }
 0x8c2   : > { %v5297_v28 = vpop.f32.mrf.mxu2  ;;  %v5635_v38 = vpop.f32.mrf.mxu0 }
 0x8c3   : > { %v5298_v7 = vadd.f32 %v5297_v28, %v5129_v42  ;;  %v8014_v28 = vor.u32 %v8706_v41, %v8011_v31 }
 0x8c4   : > { %v10996_v21 = vpop.f32.mrf.mxu1 }
 0x8c5   : > { %v5467_v20 = vadd.f32 %v10959_v24, %v5298_v7  ;;  %5674 = vmatmul.bf16.gmra.mxu0 %v7982_v18  ;;  %v8258_v24 = vor.u32 %v8773_v48, %v8257_v44  ;;  %v11007_v36 = vpop.f32.mrf.mxu3  ;;  %v3572_v18 = vpop.permute.xlu2 %3571  ;;  %v8105_v48 = vld [vmem:[#allocation24 + $0x508] sm:$0xf] }
 0x8c6   : > { %v5134_v46 = vadd.f32 %v10876_v61, %v3572_v18  ;;  %v8035_v61 = vld [vmem:[#allocation24 + $0x4a0] sm:$0xf0] }
 0x8c7   : > { %v11001_v23 = vadd.f32 %v5635_v38, %v5467_v20 }
 0x8ca   : > { %v5299_v43 = vpop.f32.mrf.mxu2  ;;  %v5637_v49 = vpop.f32.mrf.mxu0 }
 0x8cb   : > { %v5300_v50 = vadd.f32 %v5299_v43, %v5131_v34  ;;  %v8713_v34 = vld [vmem:[#allocation24 + $0x484] sm:$0xf]  ;;  %v8106_v43 = vor.u32 %v8734_v53, %v8105_v48 }
 0x8cc   : > { %v11004_v33 = vpop.f32.mrf.mxu1 }
 0x8cd   : > { %v5469_v8 = vadd.f32 %v10967_v25, %v5300_v50  ;;  %v11015_v25 = vpop.f32.mrf.mxu3  ;;  %5525 = vmatmul.bf16.gmra.mxu3 %v8106_v43  ;;  %v8742_v43 = vld [vmem:[#allocation24 + $0x564] sm:$0xf0] }
 0x8cf   : > { %v11009_v42 = vadd.f32 %v5637_v49, %v5469_v8  ;;  %5212 = vmatmul.bf16.gmra.mxu1 %v8258_v24  ;;  %5341 = vmatmul.bf16.gmra.mxu2 %v8006_v45  ;;  %v5136_v49 = vadd.f32 %v10884_v22, %v3577_v14  ;;  %v8038_v8 = vor.u32 %v8713_v34, %v8035_v61  ;;  %v8321_v34 = vld [vmem:[#allocation24 + $0x6c0] sm:$0xf]  ;;  %v8137_v61 = vld [vmem:[#allocation24 + $0x548] sm:$0xf] }
 0x8d2   : > { %v5302_v38 = vpop.f32.mrf.mxu2  ;;  %v5640_v7 = vpop.f32.mrf.mxu0 }
 0x8d3   : > { %v5303_v20 = vadd.f32 %v5302_v38, %v5134_v46  ;;  %v8714_v46 = vld [vmem:[#allocation24 + $0x48c] sm:$0xf] }
 0x8d4   : > { %v11012_v44 = vpop.f32.mrf.mxu1 }
 0x8d5   : > { %v5472_v16 = vadd.f32 %v10975_v27, %v5303_v20  ;;  %5679 = vmatmul.bf16.gmra.mxu0 %v8014_v28  ;;  %v8290_v27 = vor.u32 %v8781_v35, %v8289_v30  ;;  %v11023_v18 = vpop.f32.mrf.mxu3  ;;  %v8043_v28 = vld [vmem:[#allocation24 + $0x4a8] sm:$0xf0] }
 0x8d6   : > { %v8046_v20 = vor.u32 %v8714_v46, %v8043_v28 }
 0x8d7   : > { %v11017_v51 = vadd.f32 %v5640_v7, %v5472_v16  ;;  %v3582_v7 = vpop.permute.xlu1 %3581 }
 0x8d8   : > { %v5139_v22 = vadd.f32 %v10892_v19, %v3582_v7  ;;  %v8067_v19 = vld [vmem:[#allocation24 + $0x4e0] sm:$0xf0] }
 0x8da   : > { %v5304_v50 = vpop.f32.mrf.mxu2  ;;  %v5642_v24 = vpop.f32.mrf.mxu0 }
 0x8db   : > { %v5305_v45 = vadd.f32 %v5304_v50, %v5136_v49  ;;  %v3587_v49 = vpop.permute.xlu2 %3586  ;;  %v8789_v50 = vld [vmem:[#allocation24 + $0x6dc] sm:$0xf0] }
 0x8dc   : > { %v11020_v41 = vpop.f32.mrf.mxu1 }
 0x8dd   : > { %v5474_v31 = vadd.f32 %v10983_v52, %v5305_v45  ;;  %v11031_v52 = vpop.f32.mrf.mxu3  ;;  %v8138_v45 = vor.u32 %v8742_v43, %v8137_v61 }
 0x8df   : > { %v11025_v38 = vadd.f32 %v5642_v24, %v5474_v31  ;;  %5217 = vmatmul.bf16.gmra.mxu1 %v8290_v27  ;;  %5346 = vmatmul.bf16.gmra.mxu2 %v8038_v8  ;;  %v8721_v24 = vld [vmem:[#allocation24 + $0x4c4] sm:$0xf]  ;;  %v5141_v27 = vadd.f32 %v10900_v54, %v3587_v49 }
 0x8e0   : > { %5530 = vmatmul.bf16.gmra.mxu3 %v8138_v45  ;;  %v8070_v28 = vor.u32 %v8721_v24, %v8067_v19  ;;  %v8353_v45 = vld [vmem:[#allocation24 + $0x700] sm:$0xf] }
 0x8e2   : > { %v5307_v16 = vpop.f32.mrf.mxu2  ;;  %v5645_v48 = vpop.f32.mrf.mxu0 }
 0x8e3   : > { %v5308_v30 = vadd.f32 %v5307_v16, %v5139_v22  ;;  %v8722_v16 = vld [vmem:[#allocation24 + $0x4cc] sm:$0xf] }
 0x8e4   : > { %v11028_v53 = vpop.f32.mrf.mxu1 }
 0x8e5   : > { %v5477_v14 = vadd.f32 %v10991_v63, %v5308_v30  ;;  %5684 = vmatmul.bf16.gmra.mxu0 %v8046_v20  ;;  %v8322_v63 = vor.u32 %v8789_v50, %v8321_v34  ;;  %v11039_v20 = vpop.f32.mrf.mxu3 }
 0x8e7   : > { %v11033_v35 = vadd.f32 %v5645_v48, %v5477_v14  ;;  %v8075_v48 = vld [vmem:[#allocation24 + $0x4e8] sm:$0xf0]  ;;  %v3592_v14 = vpop.permute.xlu0 %3591 }
 0x8e8   : > { %v5144_v54 = vadd.f32 %v10908_v6, %v3592_v14  ;;  %v8078_v61 = vor.u32 %v8722_v16, %v8075_v48  ;;  %v8099_v6 = vld [vmem:[#allocation24 + $0x520] sm:$0xf0] }
 0x8ea   : > { %v5309_v8 = vpop.f32.mrf.mxu2  ;;  %v5647_v31 = vpop.f32.mrf.mxu0 }
 0x8eb   : > { %v5310_v46 = vadd.f32 %v5309_v8, %v5141_v27  ;;  %v8169_v27 = vld [vmem:[#allocation24 + $0x588] sm:$0xf] }
 0x8ec   : > { %v11036_v7 = vpop.f32.mrf.mxu1  ;;  %v8750_v8 = vld [vmem:[#allocation24 + $0x5a4] sm:$0xf0] }
 0x8ed   : > { %v5479_v22 = vadd.f32 %v10999_v55, %v5310_v46  ;;  %v11047_v55 = vpop.f32.mrf.mxu3  ;;  %v8797_v46 = vld [vmem:[#allocation24 + $0x71c] sm:$0xf0] }
 0x8ef   : > { %v11041_v30 = vadd.f32 %v5647_v31, %v5479_v22  ;;  %5222 = vmatmul.bf16.gmra.mxu1 %v8322_v63  ;;  %5351 = vmatmul.bf16.gmra.mxu2 %v8070_v28  ;;  %v3597_v31 = vpop.permute.xlu1 %3596  ;;  %v8729_v63 = vld [vmem:[#allocation24 + $0x504] sm:$0xf]  ;;  %v8170_v28 = vor.u32 %v8750_v8, %v8169_v27  ;;  %v3602_v27 = vpop.permute.xlu2 %3601 }
 0x8f0   : > { %v5146_v22 = vadd.f32 %v10916_v12, %v3597_v31  ;;  %v5149_v12 = vadd.f32 %v10924_v47, %v3602_v27  ;;  %v8131_v47 = vld [vmem:[#allocation24 + $0x560] sm:$0xf0] }
 0x8f1   : > { %11823 = vst [vmem:[#allocation37_spill] sm:$0xff] %v11041_v30  ;;  %5535 = vmatmul.bf16.gmra.mxu3 %v8170_v28 }
 0x8f2   : > { %v5312_v43 = vpop.f32.mrf.mxu2  ;;  %v5650_v49 = vpop.f32.mrf.mxu0 }
 0x8f3   : > { %v5313_v34 = vadd.f32 %v5312_v43, %v5144_v54  ;;  %v8102_v54 = vor.u32 %v8729_v63, %v8099_v6 }
 0x8f4   : > { %v11044_v50 = vpop.f32.mrf.mxu1 }
 0x8f5   : > { %v5482_v24 = vadd.f32 %v11007_v36, %v5313_v34  ;;  %5689 = vmatmul.bf16.gmra.mxu0 %v8078_v61  ;;  %v8354_v36 = vor.u32 %v8797_v46, %v8353_v45  ;;  %v8730_v34 = vld [vmem:[#allocation24 + $0x50c] sm:$0xf] }
 0x8f7   : > { %v11049_v19 = vadd.f32 %v5650_v49, %v5482_v24  ;;  %v11055_v49 = vpop.f32.mrf.mxu3  ;;  %v8107_v24 = vld [vmem:[#allocation24 + $0x528] sm:$0xf0] }
 0x8f8   : > { %v8110_v8 = vor.u32 %v8730_v34, %v8107_v24 }
 0x8f9   : > { %11824 = vst [vmem:[#allocation42_spill] sm:$0xff] %v11049_v19 }
 0x8fa   : > { %v5314_v16 = vpop.f32.mrf.mxu2  ;;  %v5652_v48 = vpop.f32.mrf.mxu0 }
 0x8fb   : > { %v5315_v14 = vadd.f32 %v5314_v16, %v5146_v22  ;;  %v8385_v22 = vld [vmem:[#allocation24 + $0x740] sm:$0xf]  ;;  %v8201_v16 = vld [vmem:[#allocation24 + $0x5c8] sm:$0xf] }
 0x8fc   : > { %v11052_v61 = vpop.f32.mrf.mxu1 }
 0x8fd   : > { %v5484_v43 = vadd.f32 %v11015_v25, %v5315_v14  ;;  %v3607_v14 = vpop.permute.xlu0 %3606 }
 0x8fe   : > { %v5151_v34 = vadd.f32 %v10932_v39, %v3607_v14 }
 0x8ff   : > { %v11057_v19 = vadd.f32 %v5652_v48, %v5484_v43  ;;  %5227 = vmatmul.bf16.gmra.mxu1 %v8354_v36  ;;  %5356 = vmatmul.bf16.gmra.mxu2 %v8102_v54  ;;  %v11063_v25 = vpop.f32.mrf.mxu3  ;;  %v8758_v48 = vld [vmem:[#allocation24 + $0x5e4] sm:$0xf0]  ;;  %v8805_v36 = vld [vmem:[#allocation24 + $0x75c] sm:$0xf0]  ;;  %v8737_v54 = vld [vmem:[#allocation24 + $0x544] sm:$0xf] }
 0x900   : > { %v8202_v43 = vor.u32 %v8758_v48, %v8201_v16  ;;  %v3612_v16 = vpop.permute.xlu1 %3611 }
 0x901   : > { %11825 = vst [vmem:[#allocation40_spill] sm:$0xff] %v11057_v19  ;;  %v5154_v39 = vadd.f32 %v10940_v0, %v3612_v16  ;;  %v8163_v0 = vld [vmem:[#allocation24 + $0x5a0] sm:$0xf0] }
 0x902   : > { %v5317_v31 = vpop.f32.mrf.mxu2  ;;  %v5655_v28 = vpop.f32.mrf.mxu0  ;;  %5540 = vmatmul.bf16.gmra.mxu3 %v8202_v43 }
 0x903   : > { %v5318_v45 = vadd.f32 %v5317_v31, %v5149_v12 }
 0x904   : > { %v11060_v46 = vpop.f32.mrf.mxu1 }
 0x905   : > { %v5487_v63 = vadd.f32 %v11023_v18, %v5318_v45  ;;  %5694 = vmatmul.bf16.gmra.mxu0 %v8110_v8  ;;  %v8386_v18 = vor.u32 %v8805_v36, %v8385_v22  ;;  %v8134_v8 = vor.u32 %v8737_v54, %v8131_v47 }
 0x907   : > { %v11065_v6 = vadd.f32 %v5655_v28, %v5487_v63  ;;  %v11071_v45 = vpop.f32.mrf.mxu3  ;;  %v8738_v63 = vld [vmem:[#allocation24 + $0x54c] sm:$0xf] }
 0x909   : > { %11826 = vst [vmem:[#allocation41_spill] sm:$0xff] %v11065_v6  ;;  %v8139_v6 = vld [vmem:[#allocation24 + $0x568] sm:$0xf0] }
 0x90a   : > { %v5319_v24 = vpop.f32.mrf.mxu2  ;;  %v5657_v27 = vpop.f32.mrf.mxu0  ;;  %v8142_v48 = vor.u32 %v8738_v63, %v8139_v6 }
 0x90b   : > { %v5320_v12 = vadd.f32 %v5319_v24, %v5151_v34  ;;  %v8417_v34 = vld [vmem:[#allocation24 + $0x780] sm:$0xf]  ;;  %v8233_v24 = vld [vmem:[#allocation24 + $0x608] sm:$0xf] }
 0x90c   : > { %v11068_v31 = vpop.f32.mrf.mxu1 }
 0x90d   : > { %v5489_v28 = vadd.f32 %v11031_v52, %v5320_v12  ;;  %v3617_v12 = vpop.permute.xlu2 %3616 }
 0x90f   : > { %v11073_v19 = vadd.f32 %v5657_v27, %v5489_v28  ;;  %5232 = vmatmul.bf16.gmra.mxu1 %v8386_v18  ;;  %5361 = vmatmul.bf16.gmra.mxu2 %v8134_v8  ;;  %v11079_v52 = vpop.f32.mrf.mxu3  ;;  %v8766_v27 = vld [vmem:[#allocation24 + $0x624] sm:$0xf0]  ;;  %v8813_v18 = vld [vmem:[#allocation24 + $0x79c] sm:$0xf0]  ;;  %v8745_v8 = vld [vmem:[#allocation24 + $0x584] sm:$0xf]  ;;  %v5156_v28 = vadd.f32 %v10948_v29, %v3617_v12 }
 0x910   : > { %v8234_v6 = vor.u32 %v8766_v27, %v8233_v24  ;;  %v3622_v24 = vpop.permute.xlu0 %3621 }
 0x911   : > { %11827 = vst [vmem:[#allocation38_spill] sm:$0xff] %v11073_v19  ;;  %v5159_v29 = vadd.f32 %v10956_v10, %v3622_v24  ;;  %v8195_v10 = vld [vmem:[#allocation24 + $0x5e0] sm:$0xf0] }
 0x912   : > { %v5322_v14 = vpop.f32.mrf.mxu2  ;;  %v5660_v43 = vpop.f32.mrf.mxu0  ;;  %5545 = vmatmul.bf16.gmra.mxu3 %v8234_v6 }
 0x913   : > { %v5323_v22 = vadd.f32 %v5322_v14, %v5154_v39 }
 0x914   : > { %v11076_v36 = vpop.f32.mrf.mxu1 }
 0x915   : > { %v5492_v54 = vadd.f32 %v11039_v20, %v5323_v22  ;;  %5699 = vmatmul.bf16.gmra.mxu0 %v8142_v48  ;;  %v8418_v20 = vor.u32 %v8813_v18, %v8417_v34  ;;  %v8166_v48 = vor.u32 %v8745_v8, %v8163_v0 }
 0x917   : > { %v11081_v47 = vadd.f32 %v5660_v43, %v5492_v54  ;;  %v11087_v22 = vpop.f32.mrf.mxu3  ;;  %v8746_v54 = vld [vmem:[#allocation24 + $0x58c] sm:$0xf] }
 0x919   : > { %11828 = vst [vmem:[#allocation39_spill] sm:$0xff] %v11081_v47  ;;  %v8171_v47 = vld [vmem:[#allocation24 + $0x5a8] sm:$0xf0] }
 0x91a   : > { %v5324_v63 = vpop.f32.mrf.mxu2  ;;  %v5662_v16 = vpop.f32.mrf.mxu0  ;;  %v8174_v27 = vor.u32 %v8746_v54, %v8171_v47 }
 0x91b   : > { %v5325_v39 = vadd.f32 %v5324_v63, %v5156_v28  ;;  %v8449_v28 = vld [vmem:[#allocation24 + $0x7c0] sm:$0xf]  ;;  %v8265_v63 = vld [vmem:[#allocation24 + $0x648] sm:$0xf] }
 0x91c   : > { %v11084_v14 = vpop.f32.mrf.mxu1 }
 0x91d   : > { %v5494_v43 = vadd.f32 %v11047_v55, %v5325_v39  ;;  %v3627_v39 = vpop.permute.xlu1 %3626 }
 0x91f   : > { %v11089_v19 = vadd.f32 %v5662_v16, %v5494_v43  ;;  %5237 = vmatmul.bf16.gmra.mxu1 %v8418_v20  ;;  %5366 = vmatmul.bf16.gmra.mxu2 %v8166_v48  ;;  %v11095_v55 = vpop.f32.mrf.mxu3  ;;  %v8774_v16 = vld [vmem:[#allocation24 + $0x664] sm:$0xf0]  ;;  %v8821_v20 = vld [vmem:[#allocation24 + $0x7dc] sm:$0xf0]  ;;  %v8753_v48 = vld [vmem:[#allocation24 + $0x5c4] sm:$0xf]  ;;  %v5161_v43 = vadd.f32 %v10964_v32, %v3627_v39 }
 0x920   : > { %v8266_v47 = vor.u32 %v8774_v16, %v8265_v63  ;;  %v3632_v63 = vpop.permute.xlu2 %3631 }
 0x921   : > { %11829 = vst [vmem:[#allocation43_spill] sm:$0xff] %v11089_v19  ;;  %v5164_v32 = vadd.f32 %v10972_v2, %v3632_v63  ;;  %v8575_v2 = vld [vmem:[#allocation24 + $0x2c] sm:$0xf0] }
 0x922   : > { %v5327_v12 = vpop.f32.mrf.mxu2  ;;  %v5665_v6 = vpop.f32.mrf.mxu0  ;;  %5550 = vmatmul.bf16.gmra.mxu3 %v8266_v47 }
 0x923   : > { %v5328_v34 = vadd.f32 %v5327_v12, %v5159_v29 }
 0x924   : > { %v11092_v18 = vpop.f32.mrf.mxu1 }
 0x925   : > { %v5497_v8 = vadd.f32 %v11055_v49, %v5328_v34  ;;  %5704 = vmatmul.bf16.gmra.mxu0 %v8174_v27  ;;  %v8450_v49 = vor.u32 %v8821_v20, %v8449_v28  ;;  %v8198_v27 = vor.u32 %v8753_v48, %v8195_v10 }
 0x927   : > { %v11097_v0 = vadd.f32 %v5665_v6, %v5497_v8  ;;  %v11103_v34 = vpop.f32.mrf.mxu3  ;;  %v8754_v8 = vld [vmem:[#allocation24 + $0x5cc] sm:$0xf] }
 0x929   : > { %11830 = vst [vmem:[#allocation44_spill] sm:$0xff] %v11097_v0  ;;  %v8203_v0 = vld [vmem:[#allocation24 + $0x5e8] sm:$0xf0] }
 0x92a   : > { %v5329_v54 = vpop.f32.mrf.mxu2  ;;  %v5667_v24 = vpop.f32.mrf.mxu0  ;;  %v8206_v16 = vor.u32 %v8754_v8, %v8203_v0 }
 0x92b   : > { %v5330_v29 = vadd.f32 %v5329_v54, %v5161_v43  ;;  %v8761_v43 = vld [vmem:[#allocation24 + $0x604] sm:$0xf]  ;;  %v8297_v54 = vld [vmem:[#allocation24 + $0x688] sm:$0xf] }
 0x92c   : > { %v11100_v12 = vpop.f32.mrf.mxu1 }
 0x92d   : > { %v5499_v6 = vadd.f32 %v11063_v25, %v5330_v29  ;;  %v3637_v29 = vpop.permute.xlu0 %3636 }
 0x92f   : > { %v11105_v19 = vadd.f32 %v5667_v24, %v5499_v6  ;;  %5242 = vmatmul.bf16.gmra.mxu1 %v8450_v49  ;;  %5371 = vmatmul.bf16.gmra.mxu2 %v8198_v27  ;;  %v11111_v25 = vpop.f32.mrf.mxu3  ;;  %v8782_v24 = vld [vmem:[#allocation24 + $0x6a4] sm:$0xf0]  ;;  %v8227_v49 = vld [vmem:[#allocation24 + $0x620] sm:$0xf0]  ;;  %v7473_v27 = vld [vmem:[#allocation24 + $0x10] sm:$0xf]  ;;  %v5166_v6 = vadd.f32 %v10980_v15, %v3637_v29 }
 0x930   : > { %v8298_v0 = vor.u32 %v8782_v24, %v8297_v54  ;;  %v3642_v54 = vpop.permute.xlu1 %3641 }
 0x931   : > { %11831 = vst [vmem:[#allocation45_spill] sm:$0xff] %v11105_v19  ;;  %v5169_v15 = vadd.f32 %v10988_v11, %v3642_v54  ;;  %v8583_v11 = vld [vmem:[#allocation24 + $0x6c] sm:$0xf0] }
 0x932   : > { %v5332_v39 = vpop.f32.mrf.mxu2  ;;  %v5670_v47 = vpop.f32.mrf.mxu0  ;;  %5555 = vmatmul.bf16.gmra.mxu3 %v8298_v0 }
 0x933   : > { %v5333_v28 = vadd.f32 %v5332_v39, %v5164_v32 }
 0x934   : > { %v11108_v20 = vpop.f32.mrf.mxu1 }
 0x935   : > { %v5502_v48 = vadd.f32 %v11071_v45, %v5333_v28  ;;  %5709 = vmatmul.bf16.gmra.mxu0 %v8206_v16  ;;  %v8230_v45 = vor.u32 %v8761_v43, %v8227_v49  ;;  %v7474_v16 = vor.u32 %v8575_v2, %v7473_v27 }
 0x937   : > { %v11113_v10 = vadd.f32 %v5670_v47, %v5502_v48  ;;  %v11119_v28 = vpop.f32.mrf.mxu3  ;;  %v8762_v48 = vld [vmem:[#allocation24 + $0x60c] sm:$0xf] }
 0x939   : > { %11832 = vst [vmem:[#allocation46_spill] sm:$0xff] %v11113_v10  ;;  %v8235_v10 = vld [vmem:[#allocation24 + $0x628] sm:$0xf0] }
 0x93a   : > { %v5334_v8 = vpop.f32.mrf.mxu2  ;;  %v5672_v63 = vpop.f32.mrf.mxu0  ;;  %v8238_v24 = vor.u32 %v8762_v48, %v8235_v10 }
 0x93b   : > { %v5335_v32 = vadd.f32 %v5334_v8, %v5166_v6  ;;  %v8769_v6 = vld [vmem:[#allocation24 + $0x644] sm:$0xf]  ;;  %v8329_v8 = vld [vmem:[#allocation24 + $0x6c8] sm:$0xf] }
 0x93c   : > { %v11116_v39 = vpop.f32.mrf.mxu1 }
 0x93d   : > { %v5504_v47 = vadd.f32 %v11079_v52, %v5335_v32  ;;  %v3647_v32 = vpop.permute.xlu2 %3646 }
 0x93f   : > { %v11121_v19 = vadd.f32 %v5672_v63, %v5504_v47  ;;  %5376 = vmatmul.bf16.gmra.mxu2 %v8230_v45  ;;  %5763 = vmatmul.bf16.vlgmr.msrb.gmra.mxu1 %v7474_v16  ;;  %v11127_v52 = vpop.f32.mrf.mxu3  ;;  %v8790_v63 = vld [vmem:[#allocation24 + $0x6e4] sm:$0xf0]  ;;  %v8259_v45 = vld [vmem:[#allocation24 + $0x660] sm:$0xf0]  ;;  %v7505_v16 = vld [vmem:[#allocation24 + $0x50] sm:$0xf]  ;;  %v5171_v47 = vadd.f32 %v10996_v21, %v3647_v32 }
 0x940   : > { %v8330_v10 = vor.u32 %v8790_v63, %v8329_v8  ;;  %v3652_v8 = vpop.permute.xlu0 %3651 }
 0x941   : > { %11833 = vst [vmem:[#allocation47_spill] sm:$0xff] %v11121_v19  ;;  %v5174_v21 = vadd.f32 %v11004_v33, %v3652_v8  ;;  %v8591_v33 = vld [vmem:[#allocation24 + $0xac] sm:$0xf0] }
 0x942   : > { %v5337_v29 = vpop.f32.mrf.mxu2  ;;  %v5675_v0 = vpop.f32.mrf.mxu0  ;;  %5560 = vmatmul.bf16.gmra.mxu3 %v8330_v10 }
 0x943   : > { %v5338_v43 = vadd.f32 %v5337_v29, %v5169_v15 }
 0x944   : > { %v11124_v49 = vpop.f32.mrf.mxu1 }
 0x945   : > { %v5507_v27 = vadd.f32 %v11087_v22, %v5338_v43  ;;  %5714 = vmatmul.bf16.gmra.mxu0 %v8238_v24  ;;  %v8262_v22 = vor.u32 %v8769_v6, %v8259_v45  ;;  %v7506_v24 = vor.u32 %v8583_v11, %v7505_v16 }
 0x947   : > { %v11129_v2 = vadd.f32 %v5675_v0, %v5507_v27  ;;  %v11135_v43 = vpop.f32.mrf.mxu3  ;;  %v8770_v27 = vld [vmem:[#allocation24 + $0x64c] sm:$0xf] }
 0x949   : > { %11834 = vst [vmem:[#allocation48_spill] sm:$0xff] %v11129_v2  ;;  %v8267_v2 = vld [vmem:[#allocation24 + $0x668] sm:$0xf0] }
 0x94a   : > { %v5339_v48 = vpop.f32.mrf.mxu2  ;;  %v5677_v54 = vpop.f32.mrf.mxu0  ;;  %v8270_v63 = vor.u32 %v8770_v27, %v8267_v2 }
 0x94b   : > { %v5340_v15 = vadd.f32 %v5339_v48, %v5171_v47  ;;  %v8777_v47 = vld [vmem:[#allocation24 + $0x684] sm:$0xf]  ;;  %v8361_v48 = vld [vmem:[#allocation24 + $0x708] sm:$0xf] }
 0x94c   : > { %v11132_v29 = vpop.f32.mrf.mxu1 }
 0x94d   : > { %v5509_v0 = vadd.f32 %v11095_v55, %v5340_v15  ;;  %v3657_v15 = vpop.permute.xlu1 %3656 }
 0x94f   : > { %v11137_v19 = vadd.f32 %v5677_v54, %v5509_v0  ;;  %5381 = vmatmul.bf16.gmra.mxu2 %v8262_v22  ;;  %5768 = vmatmul.bf16.gmra.mxu1 %v7506_v24  ;;  %v11143_v55 = vpop.f32.mrf.mxu3  ;;  %v8798_v54 = vld [vmem:[#allocation24 + $0x724] sm:$0xf0]  ;;  %v8291_v22 = vld [vmem:[#allocation24 + $0x6a0] sm:$0xf0]  ;;  %v7537_v24 = vld [vmem:[#allocation24 + $0x90] sm:$0xf]  ;;  %v5176_v0 = vadd.f32 %v11012_v44, %v3657_v15 }
 0x950   : > { %v8362_v2 = vor.u32 %v8798_v54, %v8361_v48  ;;  %v3662_v48 = vpop.permute.xlu2 %3661 }
 0x951   : > { %11835 = vst [vmem:[#allocation49_spill] sm:$0xff] %v11137_v19  ;;  %v5179_v44 = vadd.f32 %v11020_v41, %v3662_v48  ;;  %v8599_v41 = vld [vmem:[#allocation24 + $0xec] sm:$0xf0] }
 0x952   : > { %v5342_v32 = vpop.f32.mrf.mxu2  ;;  %v5680_v10 = vpop.f32.mrf.mxu0  ;;  %5565 = vmatmul.bf16.gmra.mxu3 %v8362_v2 }
 0x953   : > { %v5343_v6 = vadd.f32 %v5342_v32, %v5174_v21 }
 0x954   : > { %v11140_v45 = vpop.f32.mrf.mxu1 }
 0x955   : > { %v5512_v16 = vadd.f32 %v11103_v34, %v5343_v6  ;;  %5719 = vmatmul.bf16.gmra.mxu0 %v8270_v63  ;;  %v8294_v34 = vor.u32 %v8777_v47, %v8291_v22  ;;  %v7538_v63 = vor.u32 %v8591_v33, %v7537_v24 }
 0x957   : > { %v11145_v11 = vadd.f32 %v5680_v10, %v5512_v16  ;;  %v11151_v6 = vpop.f32.mrf.mxu3  ;;  %v8778_v16 = vld [vmem:[#allocation24 + $0x68c] sm:$0xf] }
 0x959   : > { %11836 = vst [vmem:[#allocation50_spill] sm:$0xff] %v11145_v11  ;;  %v8299_v11 = vld [vmem:[#allocation24 + $0x6a8] sm:$0xf0] }
 0x95a   : > { %v5344_v27 = vpop.f32.mrf.mxu2  ;;  %v5682_v8 = vpop.f32.mrf.mxu0  ;;  %v8302_v54 = vor.u32 %v8778_v16, %v8299_v11 }
 0x95b   : > { %v5345_v21 = vadd.f32 %v5344_v27, %v5176_v0  ;;  %v8785_v0 = vld [vmem:[#allocation24 + $0x6c4] sm:$0xf]  ;;  %v8393_v27 = vld [vmem:[#allocation24 + $0x748] sm:$0xf] }
 0x95c   : > { %v11148_v32 = vpop.f32.mrf.mxu1 }
 0x95d   : > { %v5514_v10 = vadd.f32 %v11111_v25, %v5345_v21  ;;  %v3667_v21 = vpop.permute.xlu0 %3666 }
 0x95f   : > { %v11153_v19 = vadd.f32 %v5682_v8, %v5514_v10  ;;  %5386 = vmatmul.bf16.gmra.mxu2 %v8294_v34  ;;  %5773 = vmatmul.bf16.gmra.mxu1 %v7538_v63  ;;  %v11159_v25 = vpop.f32.mrf.mxu3  ;;  %v8806_v8 = vld [vmem:[#allocation24 + $0x764] sm:$0xf0]  ;;  %v8323_v34 = vld [vmem:[#allocation24 + $0x6e0] sm:$0xf0]  ;;  %v7569_v63 = vld [vmem:[#allocation24 + $0xd0] sm:$0xf]  ;;  %v5181_v10 = vadd.f32 %v11028_v53, %v3667_v21 }
 0x960   : > { %v8394_v11 = vor.u32 %v8806_v8, %v8393_v27  ;;  %v3672_v27 = vpop.permute.xlu1 %3671 }
 0x961   : > { %11837 = vst [vmem:[#allocation51_spill] sm:$0xff] %v11153_v19  ;;  %v5184_v53 = vadd.f32 %v11036_v7, %v3672_v27  ;;  %v8607_v7 = vld [vmem:[#allocation24 + $0x12c] sm:$0xf0] }
 0x962   : > { %v5347_v15 = vpop.f32.mrf.mxu2  ;;  %v5685_v2 = vpop.f32.mrf.mxu0  ;;  %5570 = vmatmul.bf16.gmra.mxu3 %v8394_v11 }
 0x963   : > { %v5348_v47 = vadd.f32 %v5347_v15, %v5179_v44 }
 0x964   : > { %v11156_v22 = vpop.f32.mrf.mxu1 }
 0x965   : > { %v5517_v24 = vadd.f32 %v11119_v28, %v5348_v47  ;;  %5724 = vmatmul.bf16.gmra.mxu0 %v8302_v54  ;;  %v8326_v28 = vor.u32 %v8785_v0, %v8323_v34  ;;  %v7570_v54 = vor.u32 %v8599_v41, %v7569_v63 }
 0x967   : > { %v11161_v33 = vadd.f32 %v5685_v2, %v5517_v24  ;;  %v11167_v47 = vpop.f32.mrf.mxu3  ;;  %v8786_v24 = vld [vmem:[#allocation24 + $0x6cc] sm:$0xf] }
 0x969   : > { %11838 = vst [vmem:[#allocation52_spill] sm:$0xff] %v11161_v33  ;;  %v8331_v33 = vld [vmem:[#allocation24 + $0x6e8] sm:$0xf0] }
 0x96a   : > { %v5349_v16 = vpop.f32.mrf.mxu2  ;;  %v5687_v48 = vpop.f32.mrf.mxu0  ;;  %v8334_v8 = vor.u32 %v8786_v24, %v8331_v33 }
 0x96b   : > { %v5350_v44 = vadd.f32 %v5349_v16, %v5181_v10  ;;  %v8793_v10 = vld [vmem:[#allocation24 + $0x704] sm:$0xf]  ;;  %v8425_v16 = vld [vmem:[#allocation24 + $0x788] sm:$0xf] }
 0x96c   : > { %v11164_v15 = vpop.f32.mrf.mxu1 }
 0x96d   : > { %v5519_v2 = vadd.f32 %v11127_v52, %v5350_v44  ;;  %v3677_v44 = vpop.permute.xlu2 %3676 }
 0x96f   : > { %v11169_v19 = vadd.f32 %v5687_v48, %v5519_v2  ;;  %5391 = vmatmul.bf16.gmra.mxu2 %v8326_v28  ;;  %5778 = vmatmul.bf16.gmra.mxu1 %v7570_v54  ;;  %v11175_v52 = vpop.f32.mrf.mxu3  ;;  %v8814_v48 = vld [vmem:[#allocation24 + $0x7a4] sm:$0xf0]  ;;  %v8355_v28 = vld [vmem:[#allocation24 + $0x720] sm:$0xf0]  ;;  %v7601_v54 = vld [vmem:[#allocation24 + $0x110] sm:$0xf]  ;;  %v5186_v2 = vadd.f32 %v11044_v50, %v3677_v44 }
 0x970   : > { %v8426_v33 = vor.u32 %v8814_v48, %v8425_v16  ;;  %v3682_v16 = vpop.permute.xlu0 %3681 }
 0x971   : > { %11839 = vst [vmem:[#allocation53_spill] sm:$0xff] %v11169_v19  ;;  %v5189_v50 = vadd.f32 %v11052_v61, %v3682_v16  ;;  %v8615_v61 = vld [vmem:[#allocation24 + $0x16c] sm:$0xf0] }
 0x972   : > { %v5352_v21 = vpop.f32.mrf.mxu2  ;;  %v5690_v11 = vpop.f32.mrf.mxu0  ;;  %5575 = vmatmul.bf16.gmra.mxu3 %v8426_v33 }
 0x973   : > { %v5353_v0 = vadd.f32 %v5352_v21, %v5184_v53 }
 0x974   : > { %v11172_v34 = vpop.f32.mrf.mxu1 }
 0x975   : > { %v5522_v63 = vadd.f32 %v11135_v43, %v5353_v0  ;;  %5729 = vmatmul.bf16.gmra.mxu0 %v8334_v8  ;;  %v8358_v43 = vor.u32 %v8793_v10, %v8355_v28  ;;  %v7602_v8 = vor.u32 %v8607_v7, %v7601_v54 }
 0x977   : > { %v11177_v41 = vadd.f32 %v5690_v11, %v5522_v63  ;;  %v11183_v0 = vpop.f32.mrf.mxu3  ;;  %v8794_v63 = vld [vmem:[#allocation24 + $0x70c] sm:$0xf] }
 0x979   : > { %11840 = vst [vmem:[#allocation54_spill] sm:$0xff] %v11177_v41  ;;  %v8363_v41 = vld [vmem:[#allocation24 + $0x728] sm:$0xf0] }
 0x97a   : > { %v5354_v24 = vpop.f32.mrf.mxu2  ;;  %v5692_v27 = vpop.f32.mrf.mxu0  ;;  %v8366_v48 = vor.u32 %v8794_v63, %v8363_v41 }
 0x97b   : > { %v5355_v53 = vadd.f32 %v5354_v24, %v5186_v2  ;;  %v8801_v2 = vld [vmem:[#allocation24 + $0x744] sm:$0xf]  ;;  %v8457_v24 = vld [vmem:[#allocation24 + $0x7c8] sm:$0xf] }
 0x97c   : > { %v11180_v21 = vpop.f32.mrf.mxu1 }
 0x97d   : > { %v5524_v11 = vadd.f32 %v11143_v55, %v5355_v53  ;;  %v3687_v53 = vpop.permute.xlu1 %3686 }
 0x97f   : > { %v11185_v19 = vadd.f32 %v5692_v27, %v5524_v11  ;;  %5396 = vmatmul.bf16.gmra.mxu2 %v8358_v43  ;;  %5783 = vmatmul.bf16.gmra.mxu1 %v7602_v8  ;;  %v11191_v55 = vpop.f32.mrf.mxu3  ;;  %v8822_v27 = vld [vmem:[#allocation24 + $0x7e4] sm:$0xf0]  ;;  %v8387_v43 = vld [vmem:[#allocation24 + $0x760] sm:$0xf0]  ;;  %v7633_v8 = vld [vmem:[#allocation24 + $0x150] sm:$0xf]  ;;  %v5191_v11 = vadd.f32 %v11060_v46, %v3687_v53 }
 0x980   : > { %v8458_v41 = vor.u32 %v8822_v27, %v8457_v24  ;;  %v3692_v24 = vpop.permute.xlu2 %3691 }
 0x981   : > { %11841 = vst [vmem:[#allocation55_spill] sm:$0xff] %v11185_v19  ;;  %v5194_v46 = vadd.f32 %v11068_v31, %v3692_v24  ;;  %v8623_v31 = vld [vmem:[#allocation24 + $0x1ac] sm:$0xf0] }
 0x982   : > { %v5357_v44 = vpop.f32.mrf.mxu2  ;;  %v5695_v33 = vpop.f32.mrf.mxu0  ;;  %5580 = vmatmul.bf16.gmra.mxu3 %v8458_v41 }
 0x983   : > { %v5358_v10 = vadd.f32 %v5357_v44, %v5189_v50 }
 0x984   : > { %v11188_v28 = vpop.f32.mrf.mxu1 }
 0x985   : > { %v5527_v54 = vadd.f32 %v11151_v6, %v5358_v10  ;;  %5734 = vmatmul.bf16.gmra.mxu0 %v8366_v48  ;;  %v8390_v6 = vor.u32 %v8801_v2, %v8387_v43  ;;  %v7634_v48 = vor.u32 %v8615_v61, %v7633_v8 }
 0x987   : > { %v11193_v7 = vadd.f32 %v5695_v33, %v5527_v54  ;;  %v11199_v10 = vpop.f32.mrf.mxu3  ;;  %v8802_v54 = vld [vmem:[#allocation24 + $0x74c] sm:$0xf] }
 0x989   : > { %11842 = vst [vmem:[#allocation56_spill] sm:$0xff] %v11193_v7  ;;  %v8395_v7 = vld [vmem:[#allocation24 + $0x768] sm:$0xf0] }
 0x98a   : > { %v5359_v63 = vpop.f32.mrf.mxu2  ;;  %v5697_v16 = vpop.f32.mrf.mxu0  ;;  %v8398_v27 = vor.u32 %v8802_v54, %v8395_v7 }
 0x98b   : > { %v5360_v50 = vadd.f32 %v5359_v63, %v5191_v11  ;;  %v8809_v11 = vld [vmem:[#allocation24 + $0x784] sm:$0xf]  ;;  %v7481_v63 = vld [vmem:[#allocation24 + $0x18] sm:$0xf] }
 0x98c   : > { %v11196_v44 = vpop.f32.mrf.mxu1 }
 0x98d   : > { %v5529_v33 = vadd.f32 %v11159_v25, %v5360_v50  ;;  %v3697_v50 = vpop.permute.xlu0 %3696 }
 0x98f   : > { %v11201_v19 = vadd.f32 %v5697_v16, %v5529_v33  ;;  %5401 = vmatmul.bf16.gmra.mxu2 %v8390_v6  ;;  %5788 = vmatmul.bf16.gmra.mxu1 %v7634_v48  ;;  %v11207_v25 = vpop.f32.mrf.mxu3  ;;  %v8576_v16 = vld [vmem:[#allocation24 + $0x34] sm:$0xf0]  ;;  %v8419_v6 = vld [vmem:[#allocation24 + $0x7a0] sm:$0xf0]  ;;  %v7665_v48 = vld [vmem:[#allocation24 + $0x190] sm:$0xf]  ;;  %v5196_v33 = vadd.f32 %v11076_v36, %v3697_v50 }
 0x990   : > { %v7482_v7 = vor.u32 %v8576_v16, %v7481_v63  ;;  %v3702_v63 = vpop.permute.xlu1 %3701 }
 0x991   : > { %11843 = vst [vmem:[#allocation57_spill] sm:$0xff] %v11201_v19  ;;  %v5199_v36 = vadd.f32 %v11084_v14, %v3702_v63  ;;  %v8631_v14 = vld [vmem:[#allocation24 + $0x1ec] sm:$0xf0] }
 0x992   : > { %v5362_v53 = vpop.f32.mrf.mxu2  ;;  %v5700_v41 = vpop.f32.mrf.mxu0  ;;  %6101 = vmatmul.bf16.vlgmr.msra.gmra.mxu3 %v7482_v7 }
 0x993   : > { %v5363_v2 = vadd.f32 %v5362_v53, %v5194_v46 }
 0x994   : > { %v11204_v43 = vpop.f32.mrf.mxu1 }
 0x995   : > { %v5532_v8 = vadd.f32 %v11167_v47, %v5363_v2  ;;  %5739 = vmatmul.bf16.gmra.mxu0 %v8398_v27  ;;  %v8422_v47 = vor.u32 %v8809_v11, %v8419_v6  ;;  %v7666_v27 = vor.u32 %v8623_v31, %v7665_v48 }
 0x997   : > { %v11209_v61 = vadd.f32 %v5700_v41, %v5532_v8  ;;  %v11215_v2 = vpop.f32.mrf.mxu3  ;;  %v8810_v8 = vld [vmem:[#allocation24 + $0x78c] sm:$0xf] }
 0x999   : > { %11844 = vst [vmem:[#allocation58_spill] sm:$0xff] %v11209_v61  ;;  %v8427_v61 = vld [vmem:[#allocation24 + $0x7a8] sm:$0xf0] }
 0x99a   : > { %v5364_v54 = vpop.f32.mrf.mxu2  ;;  %v5702_v24 = vpop.f32.mrf.mxu0  ;;  %v8430_v16 = vor.u32 %v8810_v8, %v8427_v61 }
 0x99b   : > { %v5365_v46 = vadd.f32 %v5364_v54, %v5196_v33  ;;  %v8817_v33 = vld [vmem:[#allocation24 + $0x7c4] sm:$0xf]  ;;  %v7513_v54 = vld [vmem:[#allocation24 + $0x58] sm:$0xf] }
 0x99c   : > { %v11212_v53 = vpop.f32.mrf.mxu1 }
 0x99d   : > { %v5534_v41 = vadd.f32 %v11175_v52, %v5365_v46  ;;  %v3707_v46 = vpop.permute.xlu2 %3706 }
 0x99f   : > { %v11217_v19 = vadd.f32 %v5702_v24, %v5534_v41  ;;  %5406 = vmatmul.bf16.gmra.mxu2 %v8422_v47  ;;  %5793 = vmatmul.bf16.gmra.mxu1 %v7666_v27  ;;  %v11223_v52 = vpop.f32.mrf.mxu3  ;;  %v8584_v24 = vld [vmem:[#allocation24 + $0x74] sm:$0xf0]  ;;  %v8451_v47 = vld [vmem:[#allocation24 + $0x7e0] sm:$0xf0]  ;;  %v7697_v27 = vld [vmem:[#allocation24 + $0x1d0] sm:$0xf]  ;;  %v5201_v41 = vadd.f32 %v11092_v18, %v3707_v46 }
 0x9a0   : > { %v7514_v61 = vor.u32 %v8584_v24, %v7513_v54  ;;  %v3712_v54 = vpop.permute.xlu0 %3711 }
 0x9a1   : > { %11845 = vst [vmem:[#allocation59_spill] sm:$0xff] %v11217_v19  ;;  %v5204_v18 = vadd.f32 %v11100_v12, %v3712_v54  ;;  %v7475_v12 = vld [vmem:[#allocation24 + $0x30] sm:$0xf0] }
 0x9a2   : > { %v5367_v50 = vpop.f32.mrf.mxu2  ;;  %v5705_v7 = vpop.f32.mrf.mxu0  ;;  %6106 = vmatmul.bf16.gmra.mxu3 %v7514_v61 }
 0x9a3   : > { %v5368_v11 = vadd.f32 %v5367_v50, %v5199_v36 }
 0x9a4   : > { %v11220_v6 = vpop.f32.mrf.mxu1 }
 0x9a5   : > { %v5537_v48 = vadd.f32 %v11183_v0, %v5368_v11  ;;  %5744 = vmatmul.bf16.gmra.mxu0 %v8430_v16  ;;  %v8454_v0 = vor.u32 %v8817_v33, %v8451_v47  ;;  %v7698_v16 = vor.u32 %v8631_v14, %v7697_v27 }
 0x9a7   : > { %v11225_v31 = vadd.f32 %v5705_v7, %v5537_v48  ;;  %v11231_v11 = vpop.f32.mrf.mxu3  ;;  %v8818_v48 = vld [vmem:[#allocation24 + $0x7cc] sm:$0xf] }
 0x9a9   : > { %11846 = vst [vmem:[#allocation60_spill] sm:$0xff] %v11225_v31  ;;  %v8459_v31 = vld [vmem:[#allocation24 + $0x7e8] sm:$0xf0] }
 0x9aa   : > { %v5369_v8 = vpop.f32.mrf.mxu2  ;;  %v5707_v63 = vpop.f32.mrf.mxu0  ;;  %v8462_v24 = vor.u32 %v8818_v48, %v8459_v31 }
 0x9ab   : > { %v5370_v36 = vadd.f32 %v5369_v8, %v5201_v41  ;;  %v7729_v41 = vld [vmem:[#allocation24 + $0x210] sm:$0xf]  ;;  %v7545_v8 = vld [vmem:[#allocation24 + $0x98] sm:$0xf] }
 0x9ac   : > { %v11228_v50 = vpop.f32.mrf.mxu1 }
 0x9ad   : > { %v5539_v7 = vadd.f32 %v11191_v55, %v5370_v36  ;;  %v3717_v36 = vpop.permute.xlu1 %3716 }
 0x9af   : > { %v11233_v19 = vadd.f32 %v5707_v63, %v5539_v7  ;;  %5411 = vmatmul.bf16.gmra.mxu2 %v8454_v0  ;;  %5798 = vmatmul.bf16.gmra.mxu1 %v7698_v16  ;;  %v11239_v55 = vpop.f32.mrf.mxu3  ;;  %v8592_v63 = vld [vmem:[#allocation24 + $0xb4] sm:$0xf0]  ;;  %v8639_v0 = vld [vmem:[#allocation24 + $0x22c] sm:$0xf0]  ;;  %v8571_v16 = vld [vmem:[#allocation24 + $0x14] sm:$0xf]  ;;  %v5206_v7 = vadd.f32 %v11108_v20, %v3717_v36  ;;  %v3722_v20 = vpop.permute.xlu2 %3721 }
 0x9b0   : > { %v7546_v31 = vor.u32 %v8592_v63, %v7545_v8  ;;  %v5209_v8 = vadd.f32 %v11116_v39, %v3722_v20  ;;  %v8647_v39 = vld [vmem:[#allocation24 + $0x26c] sm:$0xf0] }
 0x9b1   : > { %11847 = vst [vmem:[#allocation61_spill] sm:$0xff] %v11233_v19  ;;  %v7483_v19 = vld [vmem:[#allocation24 + $0x38] sm:$0xf0] }
 0x9b2   : > { %v5372_v46 = vpop.f32.mrf.mxu2  ;;  %v5710_v61 = vpop.f32.mrf.mxu0  ;;  %6111 = vmatmul.bf16.gmra.mxu3 %v7546_v31 }
 0x9b3   : > { %v5373_v33 = vadd.f32 %v5372_v46, %v5204_v18 }
 0x9b4   : > { %v11236_v47 = vpop.f32.mrf.mxu1 }
 0x9b5   : > { %v5542_v27 = vadd.f32 %v11199_v10, %v5373_v33  ;;  %5749 = vmatmul.bf16.gmra.mxu0 %v8462_v24  ;;  %v7730_v10 = vor.u32 %v8639_v0, %v7729_v41  ;;  %v7478_v24 = vor.u32 %v8571_v16, %v7475_v12 }
 0x9b7   : > { %v11241_v14 = vadd.f32 %v5710_v61, %v5542_v27  ;;  %v11248_v27 = vpop.f32.mrf.mxu3 }
 0x9b9   : > { %11848 = vst [vmem:[#allocation62_spill] sm:$0xff] %v11241_v14  ;;  %v8572_v14 = vld [vmem:[#allocation24 + $0x1c] sm:$0xf] }
 0x9ba   : > { %v5374_v48 = vpop.f32.mrf.mxu2  ;;  %v5712_v54 = vpop.f32.mrf.mxu0  ;;  %v7486_v63 = vor.u32 %v8572_v14, %v7483_v19  ;;  %v8579_v19 = vld [vmem:[#allocation24 + $0x54] sm:$0xf] }
 0x9bb   : > { %v5375_v18 = vadd.f32 %v5374_v48, %v5206_v7  ;;  %v7761_v7 = vld [vmem:[#allocation24 + $0x250] sm:$0xf]  ;;  %v7577_v48 = vld [vmem:[#allocation24 + $0xd8] sm:$0xf]  ;;  %v7507_v14 = vld [vmem:[#allocation24 + $0x70] sm:$0xf0] }
 0x9bc   : > { %v5764_v46 = vpop.f32.mrf.mxu1  ;;  %v7510_v20 = vor.u32 %v8579_v19, %v7507_v14 }
 0x9bd   : > { %v5544_v61 = vadd.f32 %v11207_v25, %v5375_v18  ;;  %v11246_v33 = vadd.f32 %v5764_v46, %v10873_v57  ;;  %v3727_v18 = vpop.permute.xlu0 %3726 }
 0x9bf   : > { %v11250_v30 = vadd.f32 %v5712_v54, %v5544_v61  ;;  %5803 = vmatmul.bf16.gmra.mxu1 %v7730_v10  ;;  %5932 = vmatmul.bf16.vlgmr.msra.gmra.mxu2 %v7478_v24  ;;  %v11257_v12 = vpop.f32.mrf.mxu3  ;;  %v8600_v54 = vld [vmem:[#allocation24 + $0xf4] sm:$0xf0]  ;;  %v5211_v24 = vadd.f32 %v11124_v49, %v3727_v18  ;;  %v7762_v61 = vor.u32 %v8647_v39, %v7761_v7  ;;  %v3732_v49 = vpop.permute.xlu1 %3731 }
 0x9c0   : > { %v7578_v10 = vor.u32 %v8600_v54, %v7577_v48  ;;  %v5214_v48 = vadd.f32 %v11132_v29, %v3732_v49  ;;  %v8655_v29 = vld [vmem:[#allocation24 + $0x2ac] sm:$0xf0] }
 0x9c2   : > { %v5377_v41 = vpop.f32.mrf.mxu2  ;;  %v5715_v36 = vpop.f32.mrf.mxu0  ;;  %6116 = vmatmul.bf16.gmra.mxu3 %v7578_v10 }
 0x9c3   : > { %v5378_v0 = vadd.f32 %v5377_v41, %v5209_v8 }
 0x9c4   : > { %v5766_v16 = vpop.f32.mrf.mxu1 }
 0x9c5   : > { %v5547_v25 = vadd.f32 %v11215_v2, %v5378_v0  ;;  %v11255_v57 = vadd.f32 %v5766_v16, %v10881_v9  ;;  %6270 = vmatmul.bf16.vlgmr.msrb.gmra.mxu0 %v7486_v63  ;;  %v8580_v0 = vld [vmem:[#allocation24 + $0x5c] sm:$0xf] }
 0x9c6   : > { %v7515_v16 = vld [vmem:[#allocation24 + $0x78] sm:$0xf0] }
 0x9c7   : > { %v11259_v31 = vadd.f32 %v5715_v36, %v5547_v25  ;;  %v11266_v36 = vpop.f32.mrf.mxu3  ;;  %v7518_v54 = vor.u32 %v8580_v0, %v7515_v16 }
 0x9ca   : > { %v5379_v46 = vpop.f32.mrf.mxu2  ;;  %v5717_v2 = vpop.f32.mrf.mxu0 }
 0x9cb   : > { %v5380_v9 = vadd.f32 %v5379_v46, %v5211_v24  ;;  %v7793_v24 = vld [vmem:[#allocation24 + $0x290] sm:$0xf]  ;;  %v7609_v46 = vld [vmem:[#allocation24 + $0x118] sm:$0xf] }
 0x9cc   : > { %v5769_v8 = vpop.f32.mrf.mxu1  ;;  %v7794_v16 = vor.u32 %v8655_v29, %v7793_v24 }
 0x9cd   : > { %v5549_v63 = vadd.f32 %v11223_v52, %v5380_v9  ;;  %v11264_v41 = vadd.f32 %v5769_v8, %v10889_v40  ;;  %v3737_v9 = vpop.permute.xlu2 %3736 }
 0x9cf   : > { %v11268_v25 = vadd.f32 %v5717_v2, %v5549_v63  ;;  %5808 = vmatmul.bf16.gmra.mxu1 %v7762_v61  ;;  %5937 = vmatmul.bf16.gmra.mxu2 %v7510_v20  ;;  %v11275_v14 = vpop.f32.mrf.mxu3  ;;  %v8608_v2 = vld [vmem:[#allocation24 + $0x134] sm:$0xf0]  ;;  %v8587_v61 = vld [vmem:[#allocation24 + $0x94] sm:$0xf]  ;;  %v5216_v63 = vadd.f32 %v11140_v45, %v3737_v9  ;;  %v3742_v45 = vpop.permute.xlu0 %3741 }
 0x9d0   : > { %v7539_v20 = vld [vmem:[#allocation24 + $0xb0] sm:$0xf0]  ;;  %v7610_v8 = vor.u32 %v8608_v2, %v7609_v46  ;;  %v5219_v46 = vadd.f32 %v11148_v32, %v3742_v45  ;;  %v8663_v32 = vld [vmem:[#allocation24 + $0x2ec] sm:$0xf0] }
 0x9d1   : > { %v7542_v49 = vor.u32 %v8587_v61, %v7539_v20 }
 0x9d2   : > { %v5382_v7 = vpop.f32.mrf.mxu2  ;;  %v5720_v18 = vpop.f32.mrf.mxu0  ;;  %6121 = vmatmul.bf16.gmra.mxu3 %v7610_v8 }
 0x9d3   : > { %v5383_v39 = vadd.f32 %v5382_v7, %v5214_v48 }
 0x9d4   : > { %v5771_v19 = vpop.f32.mrf.mxu1 }
 0x9d5   : > { %v5552_v52 = vadd.f32 %v11231_v11, %v5383_v39  ;;  %v11273_v40 = vadd.f32 %v5771_v19, %v10897_v5  ;;  %6275 = vmatmul.bf16.gmra.mxu0 %v7518_v54  ;;  %v8588_v39 = vld [vmem:[#allocation24 + $0x9c] sm:$0xf] }
 0x9d6   : > { %v7547_v19 = vld [vmem:[#allocation24 + $0xb8] sm:$0xf0] }
 0x9d7   : > { %v11277_v10 = vadd.f32 %v5720_v18, %v5552_v52  ;;  %v11284_v18 = vpop.f32.mrf.mxu3  ;;  %v7550_v2 = vor.u32 %v8588_v39, %v7547_v19 }
 0x9da   : > { %v5384_v0 = vpop.f32.mrf.mxu2  ;;  %v5722_v11 = vpop.f32.mrf.mxu0 }
 0x9db   : > { %v5385_v5 = vadd.f32 %v5384_v0, %v5216_v63  ;;  %v7825_v63 = vld [vmem:[#allocation24 + $0x2d0] sm:$0xf]  ;;  %v7641_v0 = vld [vmem:[#allocation24 + $0x158] sm:$0xf] }
 0x9dc   : > { %v5774_v48 = vpop.f32.mrf.mxu1  ;;  %v7826_v19 = vor.u32 %v8663_v32, %v7825_v63 }
 0x9dd   : > { %v5554_v54 = vadd.f32 %v11239_v55, %v5385_v5  ;;  %v11282_v7 = vadd.f32 %v5774_v48, %v10905_v56  ;;  %v3747_v5 = vpop.permute.xlu1 %3746 }
 0x9df   : > { %v11286_v52 = vadd.f32 %v5722_v11, %v5554_v54  ;;  %5813 = vmatmul.bf16.gmra.mxu1 %v7794_v16  ;;  %5942 = vmatmul.bf16.gmra.mxu2 %v7542_v49  ;;  %v11293_v20 = vpop.f32.mrf.mxu3  ;;  %v8616_v11 = vld [vmem:[#allocation24 + $0x174] sm:$0xf0]  ;;  %v8595_v16 = vld [vmem:[#allocation24 + $0xd4] sm:$0xf]  ;;  %v5221_v54 = vadd.f32 %v11156_v22, %v3747_v5  ;;  %v3752_v22 = vpop.permute.xlu2 %3751 }
 0x9e0   : > { %v7571_v49 = vld [vmem:[#allocation24 + $0xf0] sm:$0xf0]  ;;  %v7642_v48 = vor.u32 %v8616_v11, %v7641_v0  ;;  %v5224_v0 = vadd.f32 %v11164_v15, %v3752_v22  ;;  %v8671_v15 = vld [vmem:[#allocation24 + $0x32c] sm:$0xf0] }
 0x9e1   : > { %v7574_v45 = vor.u32 %v8595_v16, %v7571_v49 }
 0x9e2   : > { %v5387_v24 = vpop.f32.mrf.mxu2  ;;  %v5725_v9 = vpop.f32.mrf.mxu0  ;;  %6126 = vmatmul.bf16.gmra.mxu3 %v7642_v48 }
 0x9e3   : > { %v5388_v29 = vadd.f32 %v5387_v24, %v5219_v46 }
 0x9e4   : > { %v5776_v61 = vpop.f32.mrf.mxu1 }
 0x9e5   : > { %v5557_v55 = vadd.f32 %v11248_v27, %v5388_v29  ;;  %v11291_v56 = vadd.f32 %v5776_v61, %v10913_v1  ;;  %6280 = vmatmul.bf16.gmra.mxu0 %v7550_v2  ;;  %v8596_v29 = vld [vmem:[#allocation24 + $0xdc] sm:$0xf] }
 0x9e6   : > { %v7579_v61 = vld [vmem:[#allocation24 + $0xf8] sm:$0xf0] }
 0x9e7   : > { %v11295_v8 = vadd.f32 %v5725_v9, %v5557_v55  ;;  %v11302_v9 = vpop.f32.mrf.mxu3  ;;  %v7582_v11 = vor.u32 %v8596_v29, %v7579_v61 }
 0x9ea   : > { %v5389_v39 = vpop.f32.mrf.mxu2  ;;  %v5727_v27 = vpop.f32.mrf.mxu0 }
 0x9eb   : > { %v5390_v1 = vadd.f32 %v5389_v39, %v5221_v54  ;;  %v7857_v54 = vld [vmem:[#allocation24 + $0x310] sm:$0xf]  ;;  %v7673_v39 = vld [vmem:[#allocation24 + $0x198] sm:$0xf] }
 0x9ec   : > { %v5779_v46 = vpop.f32.mrf.mxu1  ;;  %v7858_v61 = vor.u32 %v8671_v15, %v7857_v54 }
 0x9ed   : > { %v5559_v2 = vadd.f32 %v11257_v12, %v5390_v1  ;;  %v11300_v24 = vadd.f32 %v5779_v46, %v10921_v26  ;;  %v3757_v1 = vpop.permute.xlu0 %3756 }
 0x9ef   : > { %v11304_v55 = vadd.f32 %v5727_v27, %v5559_v2  ;;  %5818 = vmatmul.bf16.gmra.mxu1 %v7826_v19  ;;  %5947 = vmatmul.bf16.gmra.mxu2 %v7574_v45  ;;  %v11311_v49 = vpop.f32.mrf.mxu3  ;;  %v8624_v27 = vld [vmem:[#allocation24 + $0x1b4] sm:$0xf0]  ;;  %v8603_v19 = vld [vmem:[#allocation24 + $0x114] sm:$0xf]  ;;  %v5226_v2 = vadd.f32 %v11172_v34, %v3757_v1  ;;  %v3762_v34 = vpop.permute.xlu1 %3761 }
 0x9f0   : > { %v7603_v45 = vld [vmem:[#allocation24 + $0x130] sm:$0xf0]  ;;  %v7674_v46 = vor.u32 %v8624_v27, %v7673_v39  ;;  %v5229_v39 = vadd.f32 %v11180_v21, %v3762_v34  ;;  %v8679_v21 = vld [vmem:[#allocation24 + $0x36c] sm:$0xf0] }
 0x9f1   : > { %v7606_v22 = vor.u32 %v8603_v19, %v7603_v45 }
 0x9f2   : > { %v5392_v63 = vpop.f32.mrf.mxu2  ;;  %v5730_v5 = vpop.f32.mrf.mxu0  ;;  %6131 = vmatmul.bf16.gmra.mxu3 %v7674_v46 }
 0x9f3   : > { %v5393_v32 = vadd.f32 %v5392_v63, %v5224_v0 }
 0x9f4   : > { %v5781_v16 = vpop.f32.mrf.mxu1 }
 0x9f5   : > { %v5562_v12 = vadd.f32 %v11266_v36, %v5393_v32  ;;  %v11309_v26 = vadd.f32 %v5781_v16, %v10929_v17  ;;  %6285 = vmatmul.bf16.gmra.mxu0 %v7582_v11  ;;  %v8604_v32 = vld [vmem:[#allocation24 + $0x11c] sm:$0xf] }
 0x9f6   : > { %v7611_v16 = vld [vmem:[#allocation24 + $0x138] sm:$0xf0] }
 0x9f7   : > { %v11313_v48 = vadd.f32 %v5730_v5, %v5562_v12  ;;  %v11320_v5 = vpop.f32.mrf.mxu3  ;;  %v7614_v27 = vor.u32 %v8604_v32, %v7611_v16 }
 0x9fa   : > { %v5394_v29 = vpop.f32.mrf.mxu2  ;;  %v5732_v36 = vpop.f32.mrf.mxu0 }
 0x9fb   : > { %v5395_v17 = vadd.f32 %v5394_v29, %v5226_v2  ;;  %v7889_v2 = vld [vmem:[#allocation24 + $0x350] sm:$0xf]  ;;  %v7705_v29 = vld [vmem:[#allocation24 + $0x1d8] sm:$0xf] }
 0x9fc   : > { %v5784_v0 = vpop.f32.mrf.mxu1  ;;  %v7890_v16 = vor.u32 %v8679_v21, %v7889_v2 }
 0x9fd   : > { %v5564_v11 = vadd.f32 %v11275_v14, %v5395_v17  ;;  %v11318_v63 = vadd.f32 %v5784_v0, %v10937_v4  ;;  %v3767_v17 = vpop.permute.xlu2 %3766 }
 0x9ff   : > { %v11322_v12 = vadd.f32 %v5732_v36, %v5564_v11  ;;  %5823 = vmatmul.bf16.gmra.mxu1 %v7858_v61  ;;  %5952 = vmatmul.bf16.gmra.mxu2 %v7606_v22  ;;  %v11329_v45 = vpop.f32.mrf.mxu3  ;;  %v8632_v36 = vld [vmem:[#allocation24 + $0x1f4] sm:$0xf0]  ;;  %v8611_v61 = vld [vmem:[#allocation24 + $0x154] sm:$0xf]  ;;  %v5231_v11 = vadd.f32 %v11188_v28, %v3767_v17  ;;  %v3772_v28 = vpop.permute.xlu0 %3771 }
 0xa00   : > { %v7635_v22 = vld [vmem:[#allocation24 + $0x170] sm:$0xf0]  ;;  %v7706_v0 = vor.u32 %v8632_v36, %v7705_v29  ;;  %v5234_v29 = vadd.f32 %v11196_v44, %v3772_v28  ;;  %v8687_v44 = vld [vmem:[#allocation24 + $0x3ac] sm:$0xf0] }
 0xa01   : > { %v7638_v34 = vor.u32 %v8611_v61, %v7635_v22 }
 0xa02   : > { %v5397_v54 = vpop.f32.mrf.mxu2  ;;  %v5735_v1 = vpop.f32.mrf.mxu0  ;;  %6136 = vmatmul.bf16.gmra.mxu3 %v7706_v0 }
 0xa03   : > { %v5398_v15 = vadd.f32 %v5397_v54, %v5229_v39 }
 0xa04   : > { %v5786_v19 = vpop.f32.mrf.mxu1 }
 0xa05   : > { %v5567_v14 = vadd.f32 %v11284_v18, %v5398_v15  ;;  %v11327_v4 = vadd.f32 %v5786_v19, %v10945_v58  ;;  %6290 = vmatmul.bf16.gmra.mxu0 %v7614_v27  ;;  %v8612_v15 = vld [vmem:[#allocation24 + $0x15c] sm:$0xf] }
 0xa06   : > { %v7643_v19 = vld [vmem:[#allocation24 + $0x178] sm:$0xf0] }
 0xa07   : > { %v11331_v46 = vadd.f32 %v5735_v1, %v5567_v14  ;;  %v11338_v1 = vpop.f32.mrf.mxu3  ;;  %v7646_v36 = vor.u32 %v8612_v15, %v7643_v19 }
 0xa0a   : > { %v5399_v32 = vpop.f32.mrf.mxu2  ;;  %v5737_v18 = vpop.f32.mrf.mxu0 }
 0xa0b   : > { %v5400_v58 = vadd.f32 %v5399_v32, %v5231_v11  ;;  %v7921_v11 = vld [vmem:[#allocation24 + $0x390] sm:$0xf]  ;;  %v7737_v32 = vld [vmem:[#allocation24 + $0x218] sm:$0xf] }
 0xa0c   : > { %v5789_v39 = vpop.f32.mrf.mxu1  ;;  %v7922_v19 = vor.u32 %v8687_v44, %v7921_v11 }
 0xa0d   : > { %v5569_v27 = vadd.f32 %v11293_v20, %v5400_v58  ;;  %v11336_v54 = vadd.f32 %v5789_v39, %v10953_v3  ;;  %v3777_v58 = vpop.permute.xlu1 %3776 }
 0xa0f   : > { %v11340_v14 = vadd.f32 %v5737_v18, %v5569_v27  ;;  %5828 = vmatmul.bf16.gmra.mxu1 %v7890_v16  ;;  %5957 = vmatmul.bf16.gmra.mxu2 %v7638_v34  ;;  %v11347_v22 = vpop.f32.mrf.mxu3  ;;  %v8640_v18 = vld [vmem:[#allocation24 + $0x234] sm:$0xf0]  ;;  %v8619_v16 = vld [vmem:[#allocation24 + $0x194] sm:$0xf]  ;;  %v5236_v27 = vadd.f32 %v11204_v43, %v3777_v58  ;;  %v3782_v43 = vpop.permute.xlu2 %3781 }
 0xa10   : > { %v7667_v34 = vld [vmem:[#allocation24 + $0x1b0] sm:$0xf0]  ;;  %v7738_v39 = vor.u32 %v8640_v18, %v7737_v32  ;;  %v5239_v32 = vadd.f32 %v11212_v53, %v3782_v43  ;;  %v8695_v53 = vld [vmem:[#allocation24 + $0x3ec] sm:$0xf0] }
 0xa11   : > { %v7670_v28 = vor.u32 %v8619_v16, %v7667_v34 }
 0xa12   : > { %v5402_v2 = vpop.f32.mrf.mxu2  ;;  %v5740_v17 = vpop.f32.mrf.mxu0  ;;  %6141 = vmatmul.bf16.gmra.mxu3 %v7738_v39 }
 0xa13   : > { %v5403_v21 = vadd.f32 %v5402_v2, %v5234_v29 }
 0xa14   : > { %v5791_v61 = vpop.f32.mrf.mxu1 }
 0xa15   : > { %v5572_v20 = vadd.f32 %v11302_v9, %v5403_v21  ;;  %v11345_v3 = vadd.f32 %v5791_v61, %v10961_v13  ;;  %6295 = vmatmul.bf16.gmra.mxu0 %v7646_v36  ;;  %v8620_v21 = vld [vmem:[#allocation24 + $0x19c] sm:$0xf] }
 0xa16   : > { %v7675_v61 = vld [vmem:[#allocation24 + $0x1b8] sm:$0xf0] }
 0xa17   : > { %v11349_v0 = vadd.f32 %v5740_v17, %v5572_v20  ;;  %v11356_v17 = vpop.f32.mrf.mxu3  ;;  %v7678_v18 = vor.u32 %v8620_v21, %v7675_v61 }
 0xa1a   : > { %v5404_v15 = vpop.f32.mrf.mxu2  ;;  %v5742_v9 = vpop.f32.mrf.mxu0 }
 0xa1b   : > { %v5405_v13 = vadd.f32 %v5404_v15, %v5236_v27  ;;  %v7953_v27 = vld [vmem:[#allocation24 + $0x3d0] sm:$0xf]  ;;  %v7769_v15 = vld [vmem:[#allocation24 + $0x258] sm:$0xf] }
 0xa1c   : > { %v5794_v29 = vpop.f32.mrf.mxu1  ;;  %v7954_v61 = vor.u32 %v8695_v53, %v7953_v27 }
 0xa1d   : > { %v5574_v36 = vadd.f32 %v11311_v49, %v5405_v13  ;;  %v11354_v2 = vadd.f32 %v5794_v29, %v10969_v59  ;;  %v3787_v13 = vpop.permute.xlu0 %3786 }
 0xa1f   : > { %v11358_v20 = vadd.f32 %v5742_v9, %v5574_v36  ;;  %5833 = vmatmul.bf16.gmra.mxu1 %v7922_v19  ;;  %5962 = vmatmul.bf16.gmra.mxu2 %v7670_v28  ;;  %v11365_v34 = vpop.f32.mrf.mxu3  ;;  %v8648_v9 = vld [vmem:[#allocation24 + $0x274] sm:$0xf0]  ;;  %v8627_v19 = vld [vmem:[#allocation24 + $0x1d4] sm:$0xf]  ;;  %v5241_v36 = vadd.f32 %v11220_v6, %v3787_v13  ;;  %v3792_v6 = vpop.permute.xlu1 %3791 }
 0xa20   : > { %v7699_v28 = vld [vmem:[#allocation24 + $0x1f0] sm:$0xf0]  ;;  %v7770_v29 = vor.u32 %v8648_v9, %v7769_v15  ;;  %v5244_v15 = vadd.f32 %v11228_v50, %v3792_v6  ;;  %v8703_v50 = vld [vmem:[#allocation24 + $0x42c] sm:$0xf0] }
 0xa21   : > { %v7702_v43 = vor.u32 %v8627_v19, %v7699_v28 }
 0xa22   : > { %v5407_v11 = vpop.f32.mrf.mxu2  ;;  %v5745_v58 = vpop.f32.mrf.mxu0  ;;  %6146 = vmatmul.bf16.gmra.mxu3 %v7770_v29 }
 0xa23   : > { %v5408_v44 = vadd.f32 %v5407_v11, %v5239_v32 }
 0xa24   : > { %v5796_v16 = vpop.f32.mrf.mxu1 }
 0xa25   : > { %v5577_v49 = vadd.f32 %v11320_v5, %v5408_v44  ;;  %v11363_v59 = vadd.f32 %v5796_v16, %v10977_v37  ;;  %6300 = vmatmul.bf16.gmra.mxu0 %v7678_v18  ;;  %v8628_v44 = vld [vmem:[#allocation24 + $0x1dc] sm:$0xf] }
 0xa26   : > { %v7707_v16 = vld [vmem:[#allocation24 + $0x1f8] sm:$0xf0] }
 0xa27   : > { %v11367_v39 = vadd.f32 %v5745_v58, %v5577_v49  ;;  %v11374_v58 = vpop.f32.mrf.mxu3  ;;  %v7710_v9 = vor.u32 %v8628_v44, %v7707_v16 }
 0xa2a   : > { %v5409_v21 = vpop.f32.mrf.mxu2  ;;  %v5747_v5 = vpop.f32.mrf.mxu0 }
 0xa2b   : > { %v5410_v37 = vadd.f32 %v5409_v21, %v5241_v36  ;;  %v7985_v36 = vld [vmem:[#allocation24 + $0x410] sm:$0xf]  ;;  %v7801_v21 = vld [vmem:[#allocation24 + $0x298] sm:$0xf] }
 0xa2c   : > { %v5799_v32 = vpop.f32.mrf.mxu1  ;;  %v7986_v16 = vor.u32 %v8703_v50, %v7985_v36 }
 0xa2d   : > { %v5579_v18 = vadd.f32 %v11329_v45, %v5410_v37  ;;  %v11372_v11 = vadd.f32 %v5799_v32, %v10985_v62  ;;  %v3797_v37 = vpop.permute.xlu2 %3796 }
 0xa2f   : > { %v11376_v49 = vadd.f32 %v5747_v5, %v5579_v18  ;;  %5838 = vmatmul.bf16.gmra.mxu1 %v7954_v61  ;;  %5967 = vmatmul.bf16.gmra.mxu2 %v7702_v43  ;;  %v11383_v28 = vpop.f32.mrf.mxu3  ;;  %v8656_v5 = vld [vmem:[#allocation24 + $0x2b4] sm:$0xf0]  ;;  %v8635_v61 = vld [vmem:[#allocation24 + $0x214] sm:$0xf]  ;;  %v5246_v18 = vadd.f32 %v11236_v47, %v3797_v37 }
 0xa30   : > { %v7731_v43 = vld [vmem:[#allocation24 + $0x230] sm:$0xf0]  ;;  %v7802_v32 = vor.u32 %v8656_v5, %v7801_v21 }
 0xa31   : > { %v7734_v6 = vor.u32 %v8635_v61, %v7731_v43  ;;  %v8017_v61 = vld [vmem:[#allocation24 + $0x450] sm:$0xf]  ;;  %v7833_v43 = vld [vmem:[#allocation24 + $0x2d8] sm:$0xf] }
 0xa32   : > { %v5412_v27 = vpop.f32.mrf.mxu2  ;;  %v5750_v13 = vpop.f32.mrf.mxu0  ;;  %6151 = vmatmul.bf16.gmra.mxu3 %v7802_v32  ;;  %v8664_v32 = vld [vmem:[#allocation24 + $0x2f4] sm:$0xf0] }
 0xa33   : > { %v5413_v53 = vadd.f32 %v5412_v27, %v5244_v15 }
 0xa34   : > { %v5801_v19 = vpop.f32.mrf.mxu1 }
 0xa35   : > { %v5582_v45 = vadd.f32 %v11338_v1, %v5413_v53  ;;  %v11381_v62 = vadd.f32 %v5801_v19, %v10993_v60  ;;  %6305 = vmatmul.bf16.gmra.mxu0 %v7710_v9  ;;  %v8636_v53 = vld [vmem:[#allocation24 + $0x21c] sm:$0xf] }
 0xa36   : > { %v7739_v19 = vld [vmem:[#allocation24 + $0x238] sm:$0xf0] }
 0xa37   : > { %v11385_v29 = vadd.f32 %v5750_v13, %v5582_v45  ;;  %v11392_v13 = vpop.f32.mrf.mxu3  ;;  %v7742_v47 = vor.u32 %v8636_v53, %v7739_v19 }
 0xa3a   : > { %v5414_v44 = vpop.f32.mrf.mxu2  ;;  %v5752_v1 = vpop.f32.mrf.mxu0 }
 0xa3b   : > { %v5415_v60 = vadd.f32 %v5414_v44, %v5246_v18  ;;  %v8711_v18 = vld [vmem:[#allocation24 + $0x46c] sm:$0xf0]  ;;  %v8643_v44 = vld [vmem:[#allocation24 + $0x254] sm:$0xf] }
 0xa3c   : > { %v5804_v15 = vpop.f32.mrf.mxu1 }
 0xa3d   : > { %v5584_v9 = vadd.f32 %v11347_v22, %v5415_v60  ;;  %v11390_v27 = vadd.f32 %v5804_v15, %v11001_v23  ;;  %v7834_v60 = vor.u32 %v8664_v32, %v7833_v43  ;;  %v8018_v15 = vor.u32 %v8711_v18, %v8017_v61 }
 0xa3f   : > { %v11394_v45 = vadd.f32 %v5752_v1, %v5584_v9  ;;  %5843 = vmatmul.bf16.gmra.mxu1 %v7986_v16  ;;  %5972 = vmatmul.bf16.gmra.mxu2 %v7734_v6  ;;  %v11402_v23 = vpop.f32.mrf.mxu3  ;;  %v7763_v1 = vld [vmem:[#allocation24 + $0x270] sm:$0xf0] }
 0xa40   : > { %v7766_v9 = vor.u32 %v8643_v44, %v7763_v1 }
 0xa42   : > { %v5933_v21 = vpop.f32.mrf.mxu2  ;;  %v6271_v5 = vpop.f32.mrf.mxu0  ;;  %6156 = vmatmul.bf16.gmra.mxu3 %v7834_v60 }
 0xa43   : > { %v5934_v36 = vadd.f32 %v5933_v21, %v11246_v33  ;;  %v8644_v21 = vld [vmem:[#allocation24 + $0x25c] sm:$0xf] }
 0xa44   : > { %v5806_v37 = vpop.f32.mrf.mxu1 }
 0xa45   : > { %v11400_v22 = vadd.f32 %v5806_v37, %v11009_v42  ;;  %6310 = vmatmul.bf16.gmra.mxu0 %v7742_v47  ;;  %v6103_v50 = vadd.f32 %v11356_v17, %v5934_v36  ;;  %v7771_v36 = vld [vmem:[#allocation24 + $0x278] sm:$0xf0] }
 0xa47   : > { %v6272_v6 = vadd.f32 %v6271_v5, %v6103_v50  ;;  %v11411_v47 = vpop.f32.mrf.mxu3  ;;  %v7774_v5 = vor.u32 %v8644_v21, %v7771_v36 }
 0xa49   : > { %v6495_v37 = vmul.f32 0.05, %v6272_v6  ;;  %vm6431_vm1 = vcmp.ge.f32.partialorder %v6272_v6, 0.0 }
 0xa4a   : > { %v5935_v33 = vpop.f32.mrf.mxu2  ;;  %v6273_v16 = vpop.f32.mrf.mxu0 }
 0xa4b   : > { %v5936_v42 = vadd.f32 %v5935_v33, %v11255_v57  ;;  %v6559_v32 = vsel %vm6431_vm1, %v6272_v6, %v6495_v37  ;;  %v7865_v6 = vld [vmem:[#allocation24 + $0x318] sm:$0xf] }
 0xa4c   : > { %v5809_v53 = vpop.f32.mrf.mxu1 }
 0xa4d   : > { %v11408_v17 = vadd.f32 %v5809_v53, %v11017_v51  ;;  %v6105_v19 = vadd.f32 %v11365_v34, %v5936_v42  ;;  %v8672_v42 = vld [vmem:[#allocation24 + $0x334] sm:$0xf0]  ;;  %v7795_v53 = vld [vmem:[#allocation24 + $0x2b0] sm:$0xf0] }
 0xa4f   : > { %v6274_v43 = vadd.f32 %v6273_v16, %v6105_v19  ;;  %5848 = vmatmul.bf16.gmra.mxu1 %v8018_v15  ;;  %5977 = vmatmul.bf16.gmra.mxu2 %v7766_v9  ;;  %v11422_v60 = vpop.f32.mrf.mxu3  ;;  %v8049_v16 = vld [vmem:[#allocation24 + $0x490] sm:$0xf]  ;;  %v8651_v9 = vld [vmem:[#allocation24 + $0x294] sm:$0xf]  ;;  %v7866_v19 = vor.u32 %v8672_v42, %v7865_v6 }
 0xa50   : > { %v8719_v15 = vld [vmem:[#allocation24 + $0x4ac] sm:$0xf0] }
 0xa51   : > { %vm6432_vm2 = vcmp.ge.f32.partialorder %v6274_v43, 0.0  ;;  %v6496_v57 = vmul.f32 0.05, %v6274_v43  ;;  %v8050_v37 = vor.u32 %v8719_v15, %v8049_v16  ;;  %v11851_v15 = vld [vmem:[#allocation37_spill] sm:$0xff] }
 0xa52   : > { %v5938_v50 = vpop.f32.mrf.mxu2  ;;  %v6276_v61 = vpop.f32.mrf.mxu0  ;;  %6161 = vmatmul.bf16.gmra.mxu3 %v7866_v19 }
 0xa53   : > { %v6560_v51 = vsel %vm6432_vm2, %v6274_v43, %v6496_v57  ;;  %v5939_v34 = vadd.f32 %v5938_v50, %v11264_v41  ;;  %v7798_v43 = vor.u32 %v8651_v9, %v7795_v53 }
 0xa54   : > { %v8828_v18 = vpack.c.bf16 %v6560_v51, %v6559_v32  ;;  %v5811_v44 = vpop.f32.mrf.mxu1  ;;  %v8652_v32 = vld [vmem:[#allocation24 + $0x29c] sm:$0xf] }
 0xa55   : > { %v11420_v1 = vadd.f32 %v5811_v44, %v11025_v38  ;;  %6315 = vmatmul.bf16.gmra.mxu0 %v7774_v5  ;;  %v6108_v33 = vadd.f32 %v11374_v58, %v5939_v34  ;;  %v7803_v51 = vld [vmem:[#allocation24 + $0x2b8] sm:$0xf0] }
 0xa56   : > { %8829 = vst [vmem:[%s11416_s28] sm:$0xff] %v8828_v18  }
 0xa57   : > { %v6277_v36 = vadd.f32 %v6276_v61, %v6108_v33  ;;  %v11431_v50 = vpop.f32.mrf.mxu3  ;;  %v7806_v61 = vor.u32 %v8652_v32, %v7803_v51 }
 0xa59   : > { %v6497_v34 = vmul.f32 0.05, %v6277_v36  ;;  %vm6433_vm3 = vcmp.ge.f32.partialorder %v6277_v36, 0.0 }
 0xa5a   : > { %v5940_v21 = vpop.f32.mrf.mxu2  ;;  %v6278_v41 = vpop.f32.mrf.mxu0 }
 0xa5b   : > { %v5941_v38 = vadd.f32 %v5940_v21, %v11273_v40  ;;  %v6561_v16 = vsel %vm6433_vm3, %v6277_v36, %v6497_v34  ;;  %v8081_v21 = vld [vmem:[#allocation24 + $0x4d0] sm:$0xf]  ;;  %v7827_v36 = vld [vmem:[#allocation24 + $0x2f0] sm:$0xf0] }
 0xa5c   : > { %v5814_v57 = vpop.f32.mrf.mxu1 }
 0xa5d   : > { %v11428_v5 = vadd.f32 %v5814_v57, %v11033_v35  ;;  %v6110_v58 = vadd.f32 %v11383_v28, %v5941_v38  ;;  %v8680_v38 = vld [vmem:[#allocation24 + $0x374] sm:$0xf0] }
 0xa5f   : > { %v6279_v18 = vadd.f32 %v6278_v41, %v6110_v58  ;;  %5853 = vmatmul.bf16.gmra.mxu1 %v8050_v37  ;;  %5982 = vmatmul.bf16.gmra.mxu2 %v7798_v43  ;;  %v11437_v53 = vpop.f32.mrf.mxu3  ;;  %v7897_v41 = vld [vmem:[#allocation24 + $0x358] sm:$0xf]  ;;  %v8727_v37 = vld [vmem:[#allocation24 + $0x4ec] sm:$0xf0]  ;;  %v8659_v43 = vld [vmem:[#allocation24 + $0x2d4] sm:$0xf] }
 0xa60   : > { %v7898_v57 = vor.u32 %v8680_v38, %v7897_v41  ;;  %v8082_v34 = vor.u32 %v8727_v37, %v8081_v21 }
 0xa61   : > { %vm6434_vm4 = vcmp.ge.f32.partialorder %v6279_v18, 0.0  ;;  %v6498_v40 = vmul.f32 0.05, %v6279_v18 }
 0xa62   : > { %v5943_v44 = vpop.f32.mrf.mxu2  ;;  %v6281_v33 = vpop.f32.mrf.mxu0  ;;  %6166 = vmatmul.bf16.gmra.mxu3 %v7898_v57 }
 0xa63   : > { %v6562_v35 = vsel %vm6434_vm4, %v6279_v18, %v6498_v40  ;;  %v5944_v6 = vadd.f32 %v5943_v44, %v11282_v7  ;;  %v7830_v18 = vor.u32 %v8659_v43, %v7827_v36  ;;  %v11853_v43 = vld [vmem:[#allocation40_spill] sm:$0xff] }
 0xa64   : > { %v8833_v28 = vpack.c.bf16 %v6562_v35, %v6561_v16  ;;  %v5816_v42 = vpop.f32.mrf.mxu1  ;;  %v8660_v35 = vld [vmem:[#allocation24 + $0x2dc] sm:$0xf] }
 0xa65   : > { %v11435_v9 = vadd.f32 %v5816_v42, %v11851_v15  ;;  %6320 = vmatmul.bf16.gmra.mxu0 %v7806_v61  ;;  %v6113_v19 = vadd.f32 %v11392_v13, %v5944_v6  ;;  %v11852_v61 = vld [vmem:[#allocation42_spill] sm:$0xff]  ;;  %v7835_v6 = vld [vmem:[#allocation24 + $0x2f8] sm:$0xf0] }
 0xa66   : > { %8985 = vst [vmem:[%s11416_s28 + $0x8] sm:$0xff] %v8833_v28  }
 0xa67   : > { %v6282_v32 = vadd.f32 %v6281_v33, %v6113_v19  ;;  %v11446_v16 = vpop.f32.mrf.mxu3  ;;  %v7838_v33 = vor.u32 %v8660_v35, %v7835_v6 }
 0xa69   : > { %v6499_v28 = vmul.f32 0.05, %v6282_v32  ;;  %vm6435_vm5 = vcmp.ge.f32.partialorder %v6282_v32, 0.0 }
 0xa6a   : > { %v5945_v58 = vpop.f32.mrf.mxu2  ;;  %v6283_v7 = vpop.f32.mrf.mxu0 }
 0xa6b   : > { %v5946_v51 = vadd.f32 %v5945_v58, %v11291_v56  ;;  %v6563_v21 = vsel %vm6435_vm5, %v6282_v32, %v6499_v28  ;;  %v7859_v32 = vld [vmem:[#allocation24 + $0x330] sm:$0xf0] }
 0xa6c   : > { %v5819_v40 = vpop.f32.mrf.mxu1 }
 0xa6d   : > { %v11443_v44 = vadd.f32 %v5819_v40, %v11852_v61  ;;  %v6115_v13 = vadd.f32 %v11402_v23, %v5946_v51  ;;  %v7929_v51 = vld [vmem:[#allocation24 + $0x398] sm:$0xf]  ;;  %v8667_v40 = vld [vmem:[#allocation24 + $0x314] sm:$0xf] }
 0xa6f   : > { %v6284_v42 = vadd.f32 %v6283_v7, %v6115_v13  ;;  %5858 = vmatmul.bf16.gmra.mxu1 %v8082_v34  ;;  %5987 = vmatmul.bf16.gmra.mxu2 %v7830_v18  ;;  %v11452_v57 = vpop.f32.mrf.mxu3  ;;  %v8113_v7 = vld [vmem:[#allocation24 + $0x510] sm:$0xf]  ;;  %v8688_v34 = vld [vmem:[#allocation24 + $0x3b4] sm:$0xf0] }
 0xa70   : > { %v8735_v18 = vld [vmem:[#allocation24 + $0x52c] sm:$0xf0]  ;;  %v7930_v61 = vor.u32 %v8688_v34, %v7929_v51 }
 0xa71   : > { %vm6436_vm6 = vcmp.ge.f32.partialorder %v6284_v42, 0.0  ;;  %v6500_v56 = vmul.f32 0.05, %v6284_v42  ;;  %v8114_v28 = vor.u32 %v8735_v18, %v8113_v7 }
 0xa72   : > { %v5948_v15 = vpop.f32.mrf.mxu2  ;;  %v6286_v19 = vpop.f32.mrf.mxu0  ;;  %6171 = vmatmul.bf16.gmra.mxu3 %v7930_v61 }
 0xa73   : > { %v6564_v41 = vsel %vm6436_vm6, %v6284_v42, %v6500_v56  ;;  %v5949_v38 = vadd.f32 %v5948_v15, %v11300_v24  ;;  %v7862_v42 = vor.u32 %v8667_v40, %v7859_v32  ;;  %v11855_v40 = vld [vmem:[#allocation38_spill] sm:$0xff] }
 0xa74   : > { %v8838_v23 = vpack.c.bf16 %v6564_v41, %v6563_v21  ;;  %v5821_v37 = vpop.f32.mrf.mxu1  ;;  %v8668_v41 = vld [vmem:[#allocation24 + $0x31c] sm:$0xf] }
 0xa75   : > { %v11450_v36 = vadd.f32 %v5821_v37, %v11853_v43  ;;  %6325 = vmatmul.bf16.gmra.mxu0 %v7838_v33  ;;  %v6118_v58 = vadd.f32 %v11411_v47, %v5949_v38  ;;  %v11854_v33 = vld [vmem:[#allocation41_spill] sm:$0xff]  ;;  %v7867_v38 = vld [vmem:[#allocation24 + $0x338] sm:$0xf0] }
 0xa76   : > { %8986 = vst [vmem:[%s11416_s28 + $0x10] sm:$0xff] %v8838_v23  }
 0xa77   : > { %v6287_v35 = vadd.f32 %v6286_v19, %v6118_v58  ;;  %v11461_v21 = vpop.f32.mrf.mxu3  ;;  %v7870_v19 = vor.u32 %v8668_v41, %v7867_v38 }
 0xa79   : > { %v6501_v23 = vmul.f32 0.05, %v6287_v35  ;;  %vm6437_vm7 = vcmp.ge.f32.partialorder %v6287_v35, 0.0 }
 0xa7a   : > { %v5950_v13 = vpop.f32.mrf.mxu2  ;;  %v6288_v24 = vpop.f32.mrf.mxu0 }
 0xa7b   : > { %v5951_v6 = vadd.f32 %v5950_v13, %v11309_v26  ;;  %v6565_v7 = vsel %vm6437_vm7, %v6287_v35, %v6501_v23  ;;  %v7891_v35 = vld [vmem:[#allocation24 + $0x370] sm:$0xf0] }
 0xa7c   : > { %v5824_v56 = vpop.f32.mrf.mxu1 }
 0xa7d   : > { %v11458_v15 = vadd.f32 %v5824_v56, %v11854_v33  ;;  %v6120_v47 = vadd.f32 %v11422_v60, %v5951_v6  ;;  %v7961_v6 = vld [vmem:[#allocation24 + $0x3d8] sm:$0xf]  ;;  %v8675_v56 = vld [vmem:[#allocation24 + $0x354] sm:$0xf] }
 0xa7f   : > { %v6289_v37 = vadd.f32 %v6288_v24, %v6120_v47  ;;  %5863 = vmatmul.bf16.gmra.mxu1 %v8114_v28  ;;  %5992 = vmatmul.bf16.gmra.mxu2 %v7862_v42  ;;  %v11467_v61 = vpop.f32.mrf.mxu3  ;;  %v8145_v24 = vld [vmem:[#allocation24 + $0x550] sm:$0xf]  ;;  %v8696_v28 = vld [vmem:[#allocation24 + $0x3f4] sm:$0xf0] }
 0xa80   : > { %v8743_v42 = vld [vmem:[#allocation24 + $0x56c] sm:$0xf0]  ;;  %v7962_v33 = vor.u32 %v8696_v28, %v7961_v6 }
 0xa81   : > { %vm6438_vm8 = vcmp.ge.f32.partialorder %v6289_v37, 0.0  ;;  %v6502_v26 = vmul.f32 0.05, %v6289_v37  ;;  %v8146_v23 = vor.u32 %v8743_v42, %v8145_v24 }
 0xa82   : > { %v5953_v43 = vpop.f32.mrf.mxu2  ;;  %v6291_v58 = vpop.f32.mrf.mxu0  ;;  %6176 = vmatmul.bf16.gmra.mxu3 %v7962_v33 }
 0xa83   : > { %v6566_v51 = vsel %vm6438_vm8, %v6289_v37, %v6502_v26  ;;  %v5954_v34 = vadd.f32 %v5953_v43, %v11318_v63  ;;  %v7894_v37 = vor.u32 %v8675_v56, %v7891_v35  ;;  %v11857_v56 = vld [vmem:[#allocation43_spill] sm:$0xff] }
 0xa84   : > { %v8843_v60 = vpack.c.bf16 %v6566_v51, %v6565_v7  ;;  %v5826_v18 = vpop.f32.mrf.mxu1  ;;  %v8676_v51 = vld [vmem:[#allocation24 + $0x35c] sm:$0xf] }
 0xa85   : > { %v11465_v32 = vadd.f32 %v5826_v18, %v11855_v40  ;;  %6330 = vmatmul.bf16.gmra.mxu0 %v7870_v19  ;;  %v6123_v13 = vadd.f32 %v11431_v50, %v5954_v34  ;;  %v11856_v19 = vld [vmem:[#allocation39_spill] sm:$0xff]  ;;  %v7899_v34 = vld [vmem:[#allocation24 + $0x378] sm:$0xf0] }
 0xa86   : > { %8987 = vst [vmem:[%s11416_s28 + $0x18] sm:$0xff] %v8843_v60  }
 0xa87   : > { %v6292_v41 = vadd.f32 %v6291_v58, %v6123_v13  ;;  %v11476_v7 = vpop.f32.mrf.mxu3  ;;  %v7902_v58 = vor.u32 %v8676_v51, %v7899_v34 }
 0xa89   : > { %v6503_v60 = vmul.f32 0.05, %v6292_v41  ;;  %vm6439_vm9 = vcmp.ge.f32.partialorder %v6292_v41, 0.0 }
 0xa8a   : > { %v5955_v47 = vpop.f32.mrf.mxu2  ;;  %v6293_v63 = vpop.f32.mrf.mxu0 }
 0xa8b   : > { %v5956_v38 = vadd.f32 %v5955_v47, %v11327_v4  ;;  %v6567_v24 = vsel %vm6439_vm9, %v6292_v41, %v6503_v60  ;;  %v7923_v41 = vld [vmem:[#allocation24 + $0x3b0] sm:$0xf0] }
 0xa8c   : > { %v5829_v26 = vpop.f32.mrf.mxu1 }
 0xa8d   : > { %v11473_v43 = vadd.f32 %v5829_v26, %v11856_v19  ;;  %v6125_v50 = vadd.f32 %v11437_v53, %v5956_v38  ;;  %v7993_v38 = vld [vmem:[#allocation24 + $0x418] sm:$0xf]  ;;  %v8683_v26 = vld [vmem:[#allocation24 + $0x394] sm:$0xf] }
 0xa8f   : > { %v6294_v18 = vadd.f32 %v6293_v63, %v6125_v50  ;;  %5868 = vmatmul.bf16.gmra.mxu1 %v8146_v23  ;;  %5997 = vmatmul.bf16.gmra.mxu2 %v7894_v37  ;;  %v11482_v33 = vpop.f32.mrf.mxu3  ;;  %v8177_v63 = vld [vmem:[#allocation24 + $0x590] sm:$0xf]  ;;  %v8704_v23 = vld [vmem:[#allocation24 + $0x434] sm:$0xf0] }
 0xa90   : > { %v8751_v37 = vld [vmem:[#allocation24 + $0x5ac] sm:$0xf0]  ;;  %v7994_v19 = vor.u32 %v8704_v23, %v7993_v38 }
 0xa91   : > { %vm6440_vm10 = vcmp.ge.f32.partialorder %v6294_v18, 0.0  ;;  %v6504_v4 = vmul.f32 0.05, %v6294_v18  ;;  %v8178_v60 = vor.u32 %v8751_v37, %v8177_v63 }
 0xa92   : > { %v5958_v40 = vpop.f32.mrf.mxu2  ;;  %v6296_v13 = vpop.f32.mrf.mxu0  ;;  %6181 = vmatmul.bf16.gmra.mxu3 %v7994_v19 }
 0xa93   : > { %v6568_v6 = vsel %vm6440_vm10, %v6294_v18, %v6504_v4  ;;  %v5959_v28 = vadd.f32 %v5958_v40, %v11336_v54  ;;  %v7926_v18 = vor.u32 %v8683_v26, %v7923_v41  ;;  %v11859_v26 = vld [vmem:[#allocation45_spill] sm:$0xff] }
 0xa94   : > { %v8848_v53 = vpack.c.bf16 %v6568_v6, %v6567_v24  ;;  %v5831_v42 = vpop.f32.mrf.mxu1  ;;  %v8684_v6 = vld [vmem:[#allocation24 + $0x39c] sm:$0xf] }
 0xa95   : > { %v11480_v35 = vadd.f32 %v5831_v42, %v11857_v56  ;;  %6335 = vmatmul.bf16.gmra.mxu0 %v7902_v58  ;;  %v6128_v47 = vadd.f32 %v11446_v16, %v5959_v28  ;;  %v11858_v58 = vld [vmem:[#allocation44_spill] sm:$0xff] }
 0xa96   : > { %8988 = vst [vmem:[%s11416_s28 + $0x20] sm:$0xff] %v8848_v53   ;;  %v7931_v28 = vld [vmem:[#allocation24 + $0x3b8] sm:$0xf0] }
 0xa97   : > { %v6297_v51 = vadd.f32 %v6296_v13, %v6128_v47  ;;  %v11491_v24 = vpop.f32.mrf.mxu3  ;;  %v7934_v13 = vor.u32 %v8684_v6, %v7931_v28 }
 0xa99   : > { %v6505_v53 = vmul.f32 0.05, %v6297_v51  ;;  %vm6441_vm11 = vcmp.ge.f32.partialorder %v6297_v51, 0.0 }
 0xa9a   : > { %v5960_v50 = vpop.f32.mrf.mxu2  ;;  %v6298_v54 = vpop.f32.mrf.mxu0 }
 0xa9b   : > { %v5961_v34 = vadd.f32 %v5960_v50, %v11345_v3  ;;  %v6569_v63 = vsel %vm6441_vm11, %v6297_v51, %v6505_v53  ;;  %v7955_v51 = vld [vmem:[#allocation24 + $0x3f0] sm:$0xf0] }
 0xa9c   : > { %v5834_v4 = vpop.f32.mrf.mxu1 }
 0xa9d   : > { %v11488_v40 = vadd.f32 %v5834_v4, %v11858_v58  ;;  %v6130_v16 = vadd.f32 %v11452_v57, %v5961_v34  ;;  %v8025_v34 = vld [vmem:[#allocation24 + $0x458] sm:$0xf]  ;;  %v8691_v4 = vld [vmem:[#allocation24 + $0x3d4] sm:$0xf] }
 0xa9f   : > { %v6299_v42 = vadd.f32 %v6298_v54, %v6130_v16  ;;  %5873 = vmatmul.bf16.gmra.mxu1 %v8178_v60  ;;  %6002 = vmatmul.bf16.gmra.mxu2 %v7926_v18  ;;  %v11497_v19 = vpop.f32.mrf.mxu3  ;;  %v8209_v54 = vld [vmem:[#allocation24 + $0x5d0] sm:$0xf]  ;;  %v8712_v60 = vld [vmem:[#allocation24 + $0x474] sm:$0xf0] }
 0xaa0   : > { %v8759_v18 = vld [vmem:[#allocation24 + $0x5ec] sm:$0xf0]  ;;  %v8026_v58 = vor.u32 %v8712_v60, %v8025_v34 }
 0xaa1   : > { %vm6442_vm12 = vcmp.ge.f32.partialorder %v6299_v42, 0.0  ;;  %v6506_v3 = vmul.f32 0.05, %v6299_v42  ;;  %v8210_v53 = vor.u32 %v8759_v18, %v8209_v54 }
 0xaa2   : > { %v5963_v56 = vpop.f32.mrf.mxu2  ;;  %v6301_v47 = vpop.f32.mrf.mxu0  ;;  %6186 = vmatmul.bf16.gmra.mxu3 %v8026_v58 }
 0xaa3   : > { %v6570_v38 = vsel %vm6442_vm12, %v6299_v42, %v6506_v3  ;;  %v5964_v23 = vadd.f32 %v5963_v56, %v11354_v2  ;;  %v7958_v42 = vor.u32 %v8691_v4, %v7955_v51  ;;  %v11861_v4 = vld [vmem:[#allocation47_spill] sm:$0xff] }
 0xaa4   : > { %v8853_v57 = vpack.c.bf16 %v6570_v38, %v6569_v63  ;;  %v5836_v37 = vpop.f32.mrf.mxu1  ;;  %v8692_v38 = vld [vmem:[#allocation24 + $0x3dc] sm:$0xf] }
 0xaa5   : > { %v11495_v41 = vadd.f32 %v5836_v37, %v11859_v26  ;;  %6340 = vmatmul.bf16.gmra.mxu0 %v7934_v13  ;;  %v6133_v50 = vadd.f32 %v11461_v21, %v5964_v23  ;;  %v11860_v13 = vld [vmem:[#allocation46_spill] sm:$0xff]  ;;  %v7963_v23 = vld [vmem:[#allocation24 + $0x3f8] sm:$0xf0] }
 0xaa6   : > { %8989 = vst [vmem:[%s11416_s28 + $0x28] sm:$0xff] %v8853_v57  }
 0xaa7   : > { %v6302_v6 = vadd.f32 %v6301_v47, %v6133_v50  ;;  %v11506_v63 = vpop.f32.mrf.mxu3  ;;  %v7966_v47 = vor.u32 %v8692_v38, %v7963_v23 }
 0xaa9   : > { %v6507_v57 = vmul.f32 0.05, %v6302_v6  ;;  %vm6443_vm13 = vcmp.ge.f32.partialorder %v6302_v6, 0.0 }
 0xaaa   : > { %v5965_v16 = vpop.f32.mrf.mxu2  ;;  %v6303_v2 = vpop.f32.mrf.mxu0 }
 0xaab   : > { %v5966_v28 = vadd.f32 %v5965_v16, %v11363_v59  ;;  %v6571_v54 = vsel %vm6443_vm13, %v6302_v6, %v6507_v57  ;;  %v7987_v6 = vld [vmem:[#allocation24 + $0x430] sm:$0xf0] }
 0xaac   : > { %v5839_v3 = vpop.f32.mrf.mxu1 }
 0xaad   : > { %v11503_v56 = vadd.f32 %v5839_v3, %v11860_v13  ;;  %v6135_v21 = vadd.f32 %v11467_v61, %v5966_v28  ;;  %v8057_v28 = vld [vmem:[#allocation24 + $0x498] sm:$0xf]  ;;  %v8699_v3 = vld [vmem:[#allocation24 + $0x414] sm:$0xf] }
 0xaaf   : > { %v6304_v37 = vadd.f32 %v6303_v2, %v6135_v21  ;;  %5878 = vmatmul.bf16.gmra.mxu1 %v8210_v53  ;;  %6007 = vmatmul.bf16.gmra.mxu2 %v7958_v42  ;;  %v11512_v58 = vpop.f32.mrf.mxu3  ;;  %v8241_v2 = vld [vmem:[#allocation24 + $0x610] sm:$0xf]  ;;  %v8720_v53 = vld [vmem:[#allocation24 + $0x4b4] sm:$0xf0] }
 0xab0   : > { %v8767_v42 = vld [vmem:[#allocation24 + $0x62c] sm:$0xf0]  ;;  %v8058_v13 = vor.u32 %v8720_v53, %v8057_v28 }
 0xab1   : > { %vm6444_vm14 = vcmp.ge.f32.partialorder %v6304_v37, 0.0  ;;  %v6508_v59 = vmul.f32 0.05, %v6304_v37  ;;  %v8242_v57 = vor.u32 %v8767_v42, %v8241_v2 }
 0xab2   : > { %v5968_v26 = vpop.f32.mrf.mxu2  ;;  %v6306_v50 = vpop.f32.mrf.mxu0  ;;  %6191 = vmatmul.bf16.gmra.mxu3 %v8058_v13 }
 0xab3   : > { %v6572_v34 = vsel %vm6444_vm14, %v6304_v37, %v6508_v59  ;;  %v5969_v60 = vadd.f32 %v5968_v26, %v11372_v11  ;;  %v7990_v37 = vor.u32 %v8699_v3, %v7987_v6  ;;  %v11863_v3 = vld [vmem:[#allocation49_spill] sm:$0xff] }
 0xab4   : > { %v8858_v61 = vpack.c.bf16 %v6572_v34, %v6571_v54  ;;  %v5841_v18 = vpop.f32.mrf.mxu1  ;;  %v8700_v34 = vld [vmem:[#allocation24 + $0x41c] sm:$0xf] }
 0xab5   : > { %v11510_v51 = vadd.f32 %v5841_v18, %v11861_v4  ;;  %6345 = vmatmul.bf16.gmra.mxu0 %v7966_v47  ;;  %v6138_v16 = vadd.f32 %v11476_v7, %v5969_v60  ;;  %v11862_v47 = vld [vmem:[#allocation48_spill] sm:$0xff] }
 0xab6   : > { %8990 = vst [vmem:[%s11416_s28 + $0x30] sm:$0xff] %v8858_v61   ;;  %v7995_v60 = vld [vmem:[#allocation24 + $0x438] sm:$0xf0] }
 0xab7   : > { %v6307_v38 = vadd.f32 %v6306_v50, %v6138_v16  ;;  %v11521_v54 = vpop.f32.mrf.mxu3  ;;  %v7998_v50 = vor.u32 %v8700_v34, %v7995_v60 }
 0xab9   : > { %v6509_v61 = vmul.f32 0.05, %v6307_v38  ;;  %vm6445_vm15 = vcmp.ge.f32.partialorder %v6307_v38, 0.0 }
 0xaba   : > { %v5970_v21 = vpop.f32.mrf.mxu2  ;;  %v6308_v11 = vpop.f32.mrf.mxu0 }
 0xabb   : > { %v5971_v23 = vadd.f32 %v5970_v21, %v11381_v62  ;;  %v6573_v2 = vsel %vm6445_vm15, %v6307_v38, %v6509_v61  ;;  %v8019_v38 = vld [vmem:[#allocation24 + $0x470] sm:$0xf0] }
 0xabc   : > { %v5844_v59 = vpop.f32.mrf.mxu1 }
 0xabd   : > { %v11518_v26 = vadd.f32 %v5844_v59, %v11862_v47  ;;  %v6140_v7 = vadd.f32 %v11482_v33, %v5971_v23  ;;  %v8089_v23 = vld [vmem:[#allocation24 + $0x4d8] sm:$0xf]  ;;  %v8707_v59 = vld [vmem:[#allocation24 + $0x454] sm:$0xf] }
 0xabf   : > { %v6309_v18 = vadd.f32 %v6308_v11, %v6140_v7  ;;  %5883 = vmatmul.bf16.gmra.mxu1 %v8242_v57  ;;  %6012 = vmatmul.bf16.gmra.mxu2 %v7990_v37  ;;  %v11527_v13 = vpop.f32.mrf.mxu3  ;;  %v8273_v11 = vld [vmem:[#allocation24 + $0x650] sm:$0xf]  ;;  %v8728_v57 = vld [vmem:[#allocation24 + $0x4f4] sm:$0xf0] }
 0xac0   : > { %v8775_v37 = vld [vmem:[#allocation24 + $0x66c] sm:$0xf0]  ;;  %v8090_v47 = vor.u32 %v8728_v57, %v8089_v23 }
 0xac1   : > { %vm6446_vm0 = vcmp.ge.f32.partialorder %v6309_v18, 0.0  ;;  %v6510_v62 = vmul.f32 0.05, %v6309_v18  ;;  %v8274_v61 = vor.u32 %v8775_v37, %v8273_v11 }
 0xac2   : > { %v5973_v4 = vpop.f32.mrf.mxu2  ;;  %v6311_v16 = vpop.f32.mrf.mxu0  ;;  %6196 = vmatmul.bf16.gmra.mxu3 %v8090_v47 }
 0xac3   : > { %v6574_v28 = vsel %vm6446_vm0, %v6309_v18, %v6510_v62  ;;  %v5974_v53 = vadd.f32 %v5973_v4, %v11390_v27  ;;  %v8022_v18 = vor.u32 %v8707_v59, %v8019_v38  ;;  %v11865_v59 = vld [vmem:[#allocation51_spill] sm:$0xff] }
 0xac4   : > { %v8863_v33 = vpack.c.bf16 %v6574_v28, %v6573_v2  ;;  %v5846_v42 = vpop.f32.mrf.mxu1  ;;  %v8708_v28 = vld [vmem:[#allocation24 + $0x45c] sm:$0xf] }
 0xac5   : > { %v11525_v6 = vadd.f32 %v5846_v42, %v11863_v3  ;;  %6350 = vmatmul.bf16.gmra.mxu0 %v7998_v50  ;;  %v6143_v21 = vadd.f32 %v11491_v24, %v5974_v53  ;;  %v11864_v50 = vld [vmem:[#allocation50_spill] sm:$0xff]  ;;  %v8027_v53 = vld [vmem:[#allocation24 + $0x478] sm:$0xf0] }
 0xac6   : > { %8991 = vst [vmem:[%s11416_s28 + $0x38] sm:$0xff] %v8863_v33  }
 0xac7   : > { %v6312_v34 = vadd.f32 %v6311_v16, %v6143_v21  ;;  %v11536_v2 = vpop.f32.mrf.mxu3  ;;  %v8030_v16 = vor.u32 %v8708_v28, %v8027_v53 }
 0xac9   : > { %v6511_v33 = vmul.f32 0.05, %v6312_v34  ;;  %vm6447_vm1 = vcmp.ge.f32.partialorder %v6312_v34, 0.0 }
 0xaca   : > { %v5975_v7 = vpop.f32.mrf.mxu2  ;;  %v6313_v27 = vpop.f32.mrf.mxu0 }
 0xacb   : > { %v5976_v60 = vadd.f32 %v5975_v7, %v11400_v22  ;;  %v6575_v11 = vsel %vm6447_vm1, %v6312_v34, %v6511_v33  ;;  %v8051_v34 = vld [vmem:[#allocation24 + $0x4b0] sm:$0xf0] }
 0xacc   : > { %v5849_v62 = vpop.f32.mrf.mxu1 }
 0xacd   : > { %v11533_v4 = vadd.f32 %v5849_v62, %v11864_v50  ;;  %v6145_v24 = vadd.f32 %v11497_v19, %v5976_v60  ;;  %v8121_v60 = vld [vmem:[#allocation24 + $0x518] sm:$0xf]  ;;  %v8715_v62 = vld [vmem:[#allocation24 + $0x494] sm:$0xf] }
 0xacf   : > { %v6314_v42 = vadd.f32 %v6313_v27, %v6145_v24  ;;  %5888 = vmatmul.bf16.gmra.mxu1 %v8274_v61  ;;  %6017 = vmatmul.bf16.gmra.mxu2 %v8022_v18  ;;  %v11542_v47 = vpop.f32.mrf.mxu3  ;;  %v8305_v27 = vld [vmem:[#allocation24 + $0x690] sm:$0xf]  ;;  %v8736_v61 = vld [vmem:[#allocation24 + $0x534] sm:$0xf0] }
 0xad0   : > { %v8783_v18 = vld [vmem:[#allocation24 + $0x6ac] sm:$0xf0]  ;;  %v8122_v50 = vor.u32 %v8736_v61, %v8121_v60 }
 0xad1   : > { %vm6448_vm2 = vcmp.ge.f32.partialorder %v6314_v42, 0.0  ;;  %v6512_v22 = vmul.f32 0.05, %v6314_v42  ;;  %v8306_v33 = vor.u32 %v8783_v18, %v8305_v27 }
 0xad2   : > { %v5978_v3 = vpop.f32.mrf.mxu2  ;;  %v6316_v21 = vpop.f32.mrf.mxu0  ;;  %6201 = vmatmul.bf16.gmra.mxu3 %v8122_v50 }
 0xad3   : > { %v6576_v23 = vsel %vm6448_vm2, %v6314_v42, %v6512_v22  ;;  %v5979_v57 = vadd.f32 %v5978_v3, %v11408_v17  ;;  %v8054_v42 = vor.u32 %v8715_v62, %v8051_v34  ;;  %v11867_v62 = vld [vmem:[#allocation53_spill] sm:$0xff] }
 0xad4   : > { %v8868_v19 = vpack.c.bf16 %v6576_v23, %v6575_v11  ;;  %v5851_v37 = vpop.f32.mrf.mxu1  ;;  %v8716_v23 = vld [vmem:[#allocation24 + $0x49c] sm:$0xf] }
 0xad5   : > { %v11540_v38 = vadd.f32 %v5851_v37, %v11865_v59  ;;  %6355 = vmatmul.bf16.gmra.mxu0 %v8030_v16  ;;  %v6148_v7 = vadd.f32 %v11506_v63, %v5979_v57  ;;  %v11866_v16 = vld [vmem:[#allocation52_spill] sm:$0xff] }
 0xad6   : > { %8992 = vst [vmem:[%s11416_s28 + $0x40] sm:$0xff] %v8868_v19   ;;  %v8059_v57 = vld [vmem:[#allocation24 + $0x4b8] sm:$0xf0] }
 0xad7   : > { %v6317_v28 = vadd.f32 %v6316_v21, %v6148_v7  ;;  %v11551_v11 = vpop.f32.mrf.mxu3  ;;  %v8062_v21 = vor.u32 %v8716_v23, %v8059_v57 }
 0xad9   : > { %v6513_v19 = vmul.f32 0.05, %v6317_v28  ;;  %vm6449_vm3 = vcmp.ge.f32.partialorder %v6317_v28, 0.0 }
 0xada   : > { %v5980_v24 = vpop.f32.mrf.mxu2  ;;  %v6318_v17 = vpop.f32.mrf.mxu0 }
 0xadb   : > { %v5981_v53 = vadd.f32 %v5980_v24, %v11420_v1  ;;  %v6577_v27 = vsel %vm6449_vm3, %v6317_v28, %v6513_v19  ;;  %v8083_v28 = vld [vmem:[#allocation24 + $0x4f0] sm:$0xf0] }
 0xadc   : > { %v5854_v22 = vpop.f32.mrf.mxu1 }
 0xadd   : > { %v11548_v3 = vadd.f32 %v5854_v22, %v11866_v16  ;;  %v6150_v63 = vadd.f32 %v11512_v58, %v5981_v53  ;;  %v8153_v53 = vld [vmem:[#allocation24 + $0x558] sm:$0xf]  ;;  %v8723_v22 = vld [vmem:[#allocation24 + $0x4d4] sm:$0xf] }
 0xadf   : > { %v6319_v37 = vadd.f32 %v6318_v17, %v6150_v63  ;;  %5893 = vmatmul.bf16.gmra.mxu1 %v8306_v33  ;;  %6022 = vmatmul.bf16.gmra.mxu2 %v8054_v42  ;;  %v11557_v50 = vpop.f32.mrf.mxu3  ;;  %v8337_v17 = vld [vmem:[#allocation24 + $0x6d0] sm:$0xf]  ;;  %v8744_v33 = vld [vmem:[#allocation24 + $0x574] sm:$0xf0] }
 0xae0   : > { %v8791_v42 = vld [vmem:[#allocation24 + $0x6ec] sm:$0xf0]  ;;  %v8154_v16 = vor.u32 %v8744_v33, %v8153_v53 }
 0xae1   : > { %vm6450_vm4 = vcmp.ge.f32.partialorder %v6319_v37, 0.0  ;;  %v6514_v1 = vmul.f32 0.05, %v6319_v37  ;;  %v8338_v19 = vor.u32 %v8791_v42, %v8337_v17 }
 0xae2   : > { %v5983_v59 = vpop.f32.mrf.mxu2  ;;  %v6321_v7 = vpop.f32.mrf.mxu0  ;;  %6206 = vmatmul.bf16.gmra.mxu3 %v8154_v16 }
 0xae3   : > { %v6578_v60 = vsel %vm6450_vm4, %v6319_v37, %v6514_v1  ;;  %v5984_v61 = vadd.f32 %v5983_v59, %v11428_v5  ;;  %v8086_v37 = vor.u32 %v8723_v22, %v8083_v28  ;;  %v11869_v22 = vld [vmem:[#allocation55_spill] sm:$0xff] }
 0xae4   : > { %v8873_v58 = vpack.c.bf16 %v6578_v60, %v6577_v27  ;;  %v5856_v18 = vpop.f32.mrf.mxu1  ;;  %v8724_v60 = vld [vmem:[#allocation24 + $0x4dc] sm:$0xf] }
 0xae5   : > { %v11555_v34 = vadd.f32 %v5856_v18, %v11867_v62  ;;  %6360 = vmatmul.bf16.gmra.mxu0 %v8062_v21  ;;  %v6153_v24 = vadd.f32 %v11521_v54, %v5984_v61  ;;  %v11868_v21 = vld [vmem:[#allocation54_spill] sm:$0xff]  ;;  %v8091_v61 = vld [vmem:[#allocation24 + $0x4f8] sm:$0xf0] }
 0xae6   : > { %8993 = vst [vmem:[%s11416_s28 + $0x48] sm:$0xff] %v8873_v58  }
 0xae7   : > { %v6322_v23 = vadd.f32 %v6321_v7, %v6153_v24  ;;  %v11566_v27 = vpop.f32.mrf.mxu3  ;;  %v8094_v7 = vor.u32 %v8724_v60, %v8091_v61 }
 0xae9   : > { %v6515_v58 = vmul.f32 0.05, %v6322_v23  ;;  %vm6451_vm5 = vcmp.ge.f32.partialorder %v6322_v23, 0.0 }
 0xaea   : > { %v5985_v63 = vpop.f32.mrf.mxu2  ;;  %v6323_v5 = vpop.f32.mrf.mxu0 }
 0xaeb   : > { %v5986_v57 = vadd.f32 %v5985_v63, %v11435_v9  ;;  %v6579_v17 = vsel %vm6451_vm5, %v6322_v23, %v6515_v58  ;;  %v8115_v23 = vld [vmem:[#allocation24 + $0x530] sm:$0xf0] }
 0xaec   : > { %v5859_v1 = vpop.f32.mrf.mxu1 }
 0xaed   : > { %v11563_v59 = vadd.f32 %v5859_v1, %v11868_v21  ;;  %v6155_v54 = vadd.f32 %v11527_v13, %v5986_v57  ;;  %v8185_v57 = vld [vmem:[#allocation24 + $0x598] sm:$0xf]  ;;  %v8731_v1 = vld [vmem:[#allocation24 + $0x514] sm:$0xf] }
 0xaef   : > { %v6324_v18 = vadd.f32 %v6323_v5, %v6155_v54  ;;  %5898 = vmatmul.bf16.gmra.mxu1 %v8338_v19  ;;  %6027 = vmatmul.bf16.gmra.mxu2 %v8086_v37  ;;  %v11572_v16 = vpop.f32.mrf.mxu3  ;;  %v8369_v5 = vld [vmem:[#allocation24 + $0x710] sm:$0xf]  ;;  %v8752_v19 = vld [vmem:[#allocation24 + $0x5b4] sm:$0xf0] }
 0xaf0   : > { %v8799_v37 = vld [vmem:[#allocation24 + $0x72c] sm:$0xf0]  ;;  %v8186_v21 = vor.u32 %v8752_v19, %v8185_v57 }
 0xaf1   : > { %vm6452_vm6 = vcmp.ge.f32.partialorder %v6324_v18, 0.0  ;;  %v6516_v9 = vmul.f32 0.05, %v6324_v18  ;;  %v8370_v58 = vor.u32 %v8799_v37, %v8369_v5  ;;  %v8401_v19 = vld [vmem:[#allocation24 + $0x750] sm:$0xf] }
 0xaf2   : > { %v5988_v62 = vpop.f32.mrf.mxu2  ;;  %v6326_v24 = vpop.f32.mrf.mxu0  ;;  %6211 = vmatmul.bf16.gmra.mxu3 %v8186_v21  ;;  %v8217_v37 = vld [vmem:[#allocation24 + $0x5d8] sm:$0xf]  ;;  %v8739_v21 = vld [vmem:[#allocation24 + $0x554] sm:$0xf] }
 0xaf3   : > { %v6580_v53 = vsel %vm6452_vm6, %v6324_v18, %v6516_v9  ;;  %v5989_v33 = vadd.f32 %v5988_v62, %v11443_v44  ;;  %v8118_v18 = vor.u32 %v8731_v1, %v8115_v23  ;;  %v8123_v62 = vld [vmem:[#allocation24 + $0x538] sm:$0xf0]  ;;  %v8760_v1 = vld [vmem:[#allocation24 + $0x5f4] sm:$0xf0]  ;;  %v8807_v23 = vld [vmem:[#allocation24 + $0x76c] sm:$0xf0] }
 0xaf4   : > { %v8878_v13 = vpack.c.bf16 %v6580_v53, %v6579_v17  ;;  %v5861_v42 = vpop.f32.mrf.mxu1 }
 0xaf5   : > { %v11570_v28 = vadd.f32 %v5861_v42, %v11869_v22  ;;  %6365 = vmatmul.bf16.gmra.mxu0 %v8094_v7  ;;  %v6158_v63 = vadd.f32 %v11536_v2, %v5989_v33  ;;  %v8732_v2 = vld [vmem:[#allocation24 + $0x51c] sm:$0xf] }
 0xaf6   : > { %8994 = vst [vmem:[%s11416_s28 + $0x50] sm:$0xff] %v8878_v13   ;;  %v8126_v13 = vor.u32 %v8732_v2, %v8123_v62 }
 0xaf7   : > { %v6327_v60 = vadd.f32 %v6326_v24, %v6158_v63  ;;  %v11578_v7 = vpop.f32.mrf.mxu3 }
 0xaf9   : > { %v6517_v17 = vmul.f32 0.05, %v6327_v60  ;;  %vm6453_vm7 = vcmp.ge.f32.partialorder %v6327_v60, 0.0 }
 0xafa   : > { %v5990_v54 = vpop.f32.mrf.mxu2  ;;  %v6328_v44 = vpop.f32.mrf.mxu0 }
 0xafb   : > { %v5991_v61 = vadd.f32 %v5990_v54, %v11450_v36  ;;  %v6581_v36 = vsel %vm6453_vm7, %v6327_v60, %v6517_v17  ;;  %v8147_v54 = vld [vmem:[#allocation24 + $0x570] sm:$0xf0]  ;;  %v8155_v17 = vld [vmem:[#allocation24 + $0x578] sm:$0xf0] }
 0xafd   : > { %v6160_v9 = vadd.f32 %v11542_v47, %v5991_v61 }
 0xaff   : > { %v6329_v53 = vadd.f32 %v6328_v44, %v6160_v9  ;;  %5903 = vmatmul.bf16.gmra.mxu1 %v8370_v58  ;;  %6032 = vmatmul.bf16.gmra.mxu2 %v8118_v18  ;;  %v11581_v5 = vpop.f32.mrf.mxu3  ;;  %v8218_v44 = vor.u32 %v8760_v1, %v8217_v37  ;;  %v8402_v18 = vor.u32 %v8807_v23, %v8401_v19  ;;  %v8433_v19 = vld [vmem:[#allocation24 + $0x790] sm:$0xf]  ;;  %v8249_v37 = vld [vmem:[#allocation24 + $0x618] sm:$0xf] }
 0xb00   : > { %v8150_v9 = vor.u32 %v8739_v21, %v8147_v54  ;;  %v8768_v1 = vld [vmem:[#allocation24 + $0x634] sm:$0xf0]  ;;  %v8815_v23 = vld [vmem:[#allocation24 + $0x7ac] sm:$0xf0]  ;;  %v8747_v21 = vld [vmem:[#allocation24 + $0x594] sm:$0xf] }
 0xb01   : > { %vm6454_vm8 = vcmp.ge.f32.partialorder %v6329_v53, 0.0  ;;  %v6518_v33 = vmul.f32 0.05, %v6329_v53  ;;  %v8179_v54 = vld [vmem:[#allocation24 + $0x5b0] sm:$0xf0] }
 0xb02   : > { %v5993_v24 = vpop.f32.mrf.mxu2  ;;  %v6331_v42 = vpop.f32.mrf.mxu0  ;;  %6216 = vmatmul.bf16.gmra.mxu3 %v8218_v44  ;;  %v8250_v44 = vor.u32 %v8768_v1, %v8249_v37  ;;  %v8823_v37 = vld [vmem:[#allocation24 + $0x7ec] sm:$0xf0]  ;;  %v8755_v1 = vld [vmem:[#allocation24 + $0x5d4] sm:$0xf] }
 0xb03   : > { %v6582_v22 = vsel %vm6454_vm8, %v6329_v53, %v6518_v33  ;;  %v5994_v63 = vadd.f32 %v5993_v24, %v11458_v15 }
 0xb04   : > { %v8883_v47 = vpack.c.bf16 %v6582_v22, %v6581_v36 }
 0xb05   : > { %6370 = vmatmul.bf16.gmra.mxu0 %v8126_v13  ;;  %v6163_v57 = vadd.f32 %v11551_v11, %v5994_v63  ;;  %v8740_v11 = vld [vmem:[#allocation24 + $0x55c] sm:$0xf] }
 0xb06   : > { %8995 = vst [vmem:[%s11416_s28 + $0x58] sm:$0xff] %v8883_v47   ;;  %v8158_v24 = vor.u32 %v8740_v11, %v8155_v17  ;;  %v8187_v11 = vld [vmem:[#allocation24 + $0x5b8] sm:$0xf0] }
 0xb07   : > { %v6332_v60 = vadd.f32 %v6331_v42, %v6163_v57  ;;  %v11587_v62 = vpop.f32.mrf.mxu3 }
 0xb09   : > { %v6519_v53 = vmul.f32 0.05, %v6332_v60  ;;  %vm6455_vm9 = vcmp.ge.f32.partialorder %v6332_v60, 0.0 }
 0xb0a   : > { %v5995_v61 = vpop.f32.mrf.mxu2  ;;  %v6333_v58 = vpop.f32.mrf.mxu0 }
 0xb0b   : > { %v5996_v15 = vadd.f32 %v5995_v61, %v11465_v32  ;;  %v6583_v32 = vsel %vm6455_vm9, %v6332_v60, %v6519_v53 }
 0xb0d   : > { %v6165_v2 = vadd.f32 %v11557_v50, %v5996_v15  ;;  %v8434_v15 = vor.u32 %v8815_v23, %v8433_v19  ;;  %v8776_v19 = vld [vmem:[#allocation24 + $0x674] sm:$0xf0]  ;;  %v8211_v23 = vld [vmem:[#allocation24 + $0x5f0] sm:$0xf0] }
 0xb0f   : > { %v6334_v33 = vadd.f32 %v6333_v58, %v6165_v2  ;;  %5908 = vmatmul.bf16.gmra.mxu1 %v8402_v18  ;;  %6037 = vmatmul.bf16.gmra.mxu2 %v8150_v9  ;;  %v11590_v47 = vpop.f32.mrf.mxu3  ;;  %v8182_v18 = vor.u32 %v8747_v21, %v8179_v54 }
 0xb11   : > { %vm6456_vm10 = vcmp.ge.f32.partialorder %v6334_v33, 0.0  ;;  %v6520_v13 = vmul.f32 0.05, %v6334_v33 }
 0xb12   : > { %v5998_v42 = vpop.f32.mrf.mxu2  ;;  %v6336_v36 = vpop.f32.mrf.mxu0  ;;  %6221 = vmatmul.bf16.gmra.mxu3 %v8250_v44 }
 0xb13   : > { %v6584_v22 = vsel %vm6456_vm10, %v6334_v33, %v6520_v13  ;;  %v5999_v63 = vadd.f32 %v5998_v42, %v11473_v43 }
 0xb14   : > { %v8888_v50 = vpack.c.bf16 %v6584_v22, %v6583_v32 }
 0xb15   : > { %6375 = vmatmul.bf16.gmra.mxu0 %v8158_v24  ;;  %v6168_v57 = vadd.f32 %v11566_v27, %v5999_v63  ;;  %v8748_v27 = vld [vmem:[#allocation24 + $0x59c] sm:$0xf] }
 0xb16   : > { %8996 = vst [vmem:[%s11416_s28 + $0x60] sm:$0xff] %v8888_v50   ;;  %v8190_v13 = vor.u32 %v8748_v27, %v8187_v11  ;;  %v8465_v50 = vld [vmem:[#allocation24 + $0x7d0] sm:$0xf] }
 0xb17   : > { %v6337_v60 = vadd.f32 %v6336_v36, %v6168_v57  ;;  %v11596_v2 = vpop.f32.mrf.mxu3  ;;  %v8281_v57 = vld [vmem:[#allocation24 + $0x658] sm:$0xf] }
 0xb18   : > { %v8282_v21 = vor.u32 %v8776_v19, %v8281_v57 }
 0xb19   : > { %v6521_v17 = vmul.f32 0.05, %v6337_v60  ;;  %vm6457_vm11 = vcmp.ge.f32.partialorder %v6337_v60, 0.0 }
 0xb1a   : > { %v6000_v61 = vpop.f32.mrf.mxu2  ;;  %v6338_v58 = vpop.f32.mrf.mxu0 }
 0xb1b   : > { %v6001_v43 = vadd.f32 %v6000_v61, %v11480_v35  ;;  %v6585_v35 = vsel %vm6457_vm11, %v6337_v60, %v6521_v17  ;;  %v8214_v60 = vor.u32 %v8755_v1, %v8211_v23 }
 0xb1d   : > { %v6170_v9 = vadd.f32 %v11572_v16, %v6001_v43 }
 0xb1f   : > { %v6339_v53 = vadd.f32 %v6338_v58, %v6170_v9  ;;  %5913 = vmatmul.bf16.gmra.mxu1 %v8434_v15  ;;  %6042 = vmatmul.bf16.gmra.mxu2 %v8182_v18  ;;  %v11599_v22 = vpop.f32.mrf.mxu3  ;;  %v8466_v58 = vor.u32 %v8823_v37, %v8465_v50  ;;  %v8219_v18 = vld [vmem:[#allocation24 + $0x5f8] sm:$0xf0] }
 0xb21   : > { %vm6458_vm12 = vcmp.ge.f32.partialorder %v6339_v53, 0.0  ;;  %v6522_v33 = vmul.f32 0.05, %v6339_v53 }
 0xb22   : > { %v6003_v24 = vpop.f32.mrf.mxu2  ;;  %v6341_v42 = vpop.f32.mrf.mxu0  ;;  %6226 = vmatmul.bf16.gmra.mxu3 %v8282_v21 }
 0xb23   : > { %v6586_v36 = vsel %vm6458_vm12, %v6339_v53, %v6522_v33  ;;  %v6004_v32 = vadd.f32 %v6003_v24, %v11488_v40 }
 0xb24   : > { %v8893_v16 = vpack.c.bf16 %v6586_v36, %v6585_v35  ;;  %v8313_v36 = vld [vmem:[#allocation24 + $0x698] sm:$0xf] }
 0xb25   : > { %6380 = vmatmul.bf16.gmra.mxu0 %v8190_v13  ;;  %v6173_v63 = vadd.f32 %v11578_v7, %v6004_v32  ;;  %v8756_v7 = vld [vmem:[#allocation24 + $0x5dc] sm:$0xf]  ;;  %v8784_v32 = vld [vmem:[#allocation24 + $0x6b4] sm:$0xf0] }
 0xb26   : > { %8997 = vst [vmem:[%s11416_s28 + $0x68] sm:$0xff] %v8893_v16   ;;  %v8222_v17 = vor.u32 %v8756_v7, %v8219_v18  ;;  %v8763_v16 = vld [vmem:[#allocation24 + $0x614] sm:$0xf]  ;;  %v8314_v50 = vor.u32 %v8784_v32, %v8313_v36 }
 0xb27   : > { %v6342_v61 = vadd.f32 %v6341_v42, %v6173_v63  ;;  %v11605_v15 = vpop.f32.mrf.mxu3  ;;  %v8243_v63 = vld [vmem:[#allocation24 + $0x630] sm:$0xf0] }
 0xb28   : > { %v8246_v23 = vor.u32 %v8763_v16, %v8243_v63  ;;  %v8772_v16 = vld [vmem:[#allocation24 + $0x65c] sm:$0xf] }
 0xb29   : > { %v6523_v9 = vmul.f32 0.05, %v6342_v61  ;;  %vm6459_vm13 = vcmp.ge.f32.partialorder %v6342_v61, 0.0  ;;  %v8283_v63 = vld [vmem:[#allocation24 + $0x678] sm:$0xf0] }
 0xb2a   : > { %v6005_v54 = vpop.f32.mrf.mxu2  ;;  %v6343_v44 = vpop.f32.mrf.mxu0 }
 0xb2b   : > { %v6006_v40 = vadd.f32 %v6005_v54, %v11495_v41  ;;  %v6587_v41 = vsel %vm6459_vm13, %v6342_v61, %v6523_v9  ;;  %v8764_v54 = vld [vmem:[#allocation24 + $0x61c] sm:$0xf] }
 0xb2d   : > { %v6175_v43 = vadd.f32 %v11581_v5, %v6006_v40 }
 0xb2f   : > { %v6344_v27 = vadd.f32 %v6343_v44, %v6175_v43  ;;  %5918 = vmatmul.bf16.gmra.mxu1 %v8466_v58  ;;  %6047 = vmatmul.bf16.gmra.mxu2 %v8214_v60  ;;  %v11608_v42 = vpop.f32.mrf.mxu3  ;;  %v8251_v44 = vld [vmem:[#allocation24 + $0x638] sm:$0xf0] }
 0xb30   : > { %v8254_v58 = vor.u32 %v8764_v54, %v8251_v44 }
 0xb31   : > { %vm6460_vm14 = vcmp.ge.f32.partialorder %v6344_v27, 0.0  ;;  %v6524_v11 = vmul.f32 0.05, %v6344_v27 }
 0xb32   : > { %v6008_v53 = vpop.f32.mrf.mxu2  ;;  %v6346_v33 = vpop.f32.mrf.mxu0  ;;  %6231 = vmatmul.bf16.gmra.mxu3 %v8314_v50 }
 0xb33   : > { %v6588_v13 = vsel %vm6460_vm14, %v6344_v27, %v6524_v11  ;;  %v6009_v24 = vadd.f32 %v6008_v53, %v11503_v56  ;;  %v8345_v11 = vld [vmem:[#allocation24 + $0x6d8] sm:$0xf]  ;;  %v8771_v53 = vld [vmem:[#allocation24 + $0x654] sm:$0xf]  ;;  %v11625_v50 = vpop.f32.mrf.mxu1 }
 0xb34   : > { %v8898_v5 = vpack.c.bf16 %v6588_v13, %v6587_v41 }
 0xb35   : > { %6385 = vmatmul.bf16.gmra.mxu0 %v8222_v17  ;;  %v6178_v35 = vadd.f32 %v11587_v62, %v6009_v24  ;;  %v8792_v17 = vld [vmem:[#allocation24 + $0x6f4] sm:$0xf0] }
 0xb36   : > { %8998 = vst [vmem:[%s11416_s28 + $0x70] sm:$0xff] %v8898_v5   ;;  %v8346_v41 = vor.u32 %v8792_v17, %v8345_v11 }
 0xb37   : > { %v6347_v37 = vadd.f32 %v6346_v33, %v6178_v35  ;;  %v11614_v21 = vpop.f32.mrf.mxu3  ;;  %v8275_v33 = vld [vmem:[#allocation24 + $0x670] sm:$0xf0] }
 0xb38   : > { %v8278_v36 = vor.u32 %v8771_v53, %v8275_v33  ;;  %v8780_v53 = vld [vmem:[#allocation24 + $0x69c] sm:$0xf] }
 0xb39   : > { %v6525_v62 = vmul.f32 0.05, %v6347_v37  ;;  %vm6461_vm15 = vcmp.ge.f32.partialorder %v6347_v37, 0.0 }
 0xb3a   : > { %v6010_v57 = vpop.f32.mrf.mxu2  ;;  %v6348_v19 = vpop.f32.mrf.mxu0 }
 0xb3b   : > { %v6011_v1 = vadd.f32 %v6010_v57, %v11510_v51  ;;  %v6589_v7 = vsel %vm6461_vm15, %v6347_v37, %v6525_v62  ;;  %v8286_v37 = vor.u32 %v8772_v16, %v8283_v63 }
 0xb3d   : > { %v6180_v56 = vadd.f32 %v11590_v47, %v6011_v1 }
 0xb3f   : > { %v6349_v61 = vadd.f32 %v6348_v19, %v6180_v56  ;;  %6052 = vmatmul.bf16.gmra.mxu2 %v8246_v23  ;;  %v11617_v47 = vpop.f32.mrf.mxu3 }
 0xb41   : > { %vm6462_vm0 = vcmp.ge.f32.partialorder %v6349_v61, 0.0  ;;  %v6526_v40 = vmul.f32 0.05, %v6349_v61 }
 0xb42   : > { %v6013_v60 = vpop.f32.mrf.mxu2  ;;  %v6351_v43 = vpop.f32.mrf.mxu0  ;;  %6236 = vmatmul.bf16.gmra.mxu3 %v8346_v41 }
 0xb43   : > { %v6590_v18 = vsel %vm6462_vm0, %v6349_v61, %v6526_v40  ;;  %v6014_v51 = vadd.f32 %v6013_v60, %v11518_v26  ;;  %v8377_v61 = vld [vmem:[#allocation24 + $0x718] sm:$0xf]  ;;  %v8307_v60 = vld [vmem:[#allocation24 + $0x6b0] sm:$0xf0] }
 0xb44   : > { %v8903_v9 = vpack.c.bf16 %v6590_v18, %v6589_v7  ;;  %v8800_v40 = vld [vmem:[#allocation24 + $0x734] sm:$0xf0]  ;;  %v11632_v7 = vpop.f32.mrf.mxu1 }
 0xb45   : > { %6390 = vmatmul.bf16.gmra.mxu0 %v8254_v58  ;;  %v6183_v27 = vadd.f32 %v11596_v2, %v6014_v51  ;;  %v8779_v58 = vld [vmem:[#allocation24 + $0x694] sm:$0xf] }
 0xb46   : > { %8999 = vst [vmem:[%s11416_s28 + $0x78] sm:$0xff] %v8903_v9  }
 0xb47   : > { %v6352_v5 = vadd.f32 %v6351_v43, %v6183_v27  ;;  %v11623_v32 = vpop.f32.mrf.mxu3  ;;  %v8378_v43 = vor.u32 %v8800_v40, %v8377_v61  ;;  %v8310_v27 = vor.u32 %v8779_v58, %v8307_v60  ;;  %v8788_v58 = vld [vmem:[#allocation24 + $0x6dc] sm:$0xf] }
 0xb49   : > { %v6527_v2 = vmul.f32 0.05, %v6352_v5  ;;  %vm6463_vm1 = vcmp.ge.f32.partialorder %v6352_v5, 0.0 }
 0xb4a   : > { %v6015_v13 = vpop.f32.mrf.mxu2  ;;  %v6353_v24 = vpop.f32.mrf.mxu0 }
 0xb4b   : > { %v6016_v35 = vadd.f32 %v6015_v13, %v11525_v6  ;;  %v6591_v6 = vsel %vm6463_vm1, %v6352_v5, %v6527_v2 }
 0xb4d   : > { %v6185_v26 = vadd.f32 %v11599_v22, %v6016_v35 }
 0xb4f   : > { %v6354_v57 = vadd.f32 %v6353_v24, %v6185_v26  ;;  %6057 = vmatmul.bf16.gmra.mxu2 %v8278_v36  ;;  %v11628_v44 = vpop.f32.mrf.mxu3  ;;  %v11638_v36 = vpop.f32.mrf.mxu1 }
 0xb51   : > { %vm6464_vm2 = vcmp.ge.f32.partialorder %v6354_v57, 0.0  ;;  %v6528_v19 = vmul.f32 0.05, %v6354_v57 }
 0xb52   : > { %v6018_v1 = vpop.f32.mrf.mxu2  ;;  %v6356_v23 = vpop.f32.mrf.mxu0  ;;  %6241 = vmatmul.bf16.gmra.mxu3 %v8378_v43 }
 0xb53   : > { %v6592_v56 = vsel %vm6464_vm2, %v6354_v57, %v6528_v19  ;;  %v6019_v22 = vadd.f32 %v6018_v1, %v11533_v4  ;;  %v8409_v57 = vld [vmem:[#allocation24 + $0x758] sm:$0xf]  ;;  %v8339_v1 = vld [vmem:[#allocation24 + $0x6f0] sm:$0xf0] }
 0xb54   : > { %v8908_v54 = vpack.c.bf16 %v6592_v56, %v6591_v6  ;;  %v8808_v19 = vld [vmem:[#allocation24 + $0x774] sm:$0xf0] }
 0xb55   : > { %6395 = vmatmul.bf16.gmra.mxu0 %v8286_v37  ;;  %v6188_v62 = vadd.f32 %v11605_v15, %v6019_v22  ;;  %v8315_v15 = vld [vmem:[#allocation24 + $0x6b8] sm:$0xf0]  ;;  %v8787_v37 = vld [vmem:[#allocation24 + $0x6d4] sm:$0xf] }
 0xb56   : > { %9000 = vst [vmem:[%s11416_s28 + $0x80] sm:$0xff] %v8908_v54   ;;  %v8318_v24 = vor.u32 %v8780_v53, %v8315_v15 }
 0xb57   : > { %v6357_v9 = vadd.f32 %v6356_v23, %v6188_v62  ;;  %v11636_v17 = vpop.f32.mrf.mxu3  ;;  %v8410_v23 = vor.u32 %v8808_v19, %v8409_v57  ;;  %v8342_v62 = vor.u32 %v8787_v37, %v8339_v1  ;;  %v8796_v19 = vld [vmem:[#allocation24 + $0x71c] sm:$0xf] }
 0xb58   : > { %v8379_v37 = vld [vmem:[#allocation24 + $0x738] sm:$0xf0] }
 0xb59   : > { %v6529_v33 = vmul.f32 0.05, %v6357_v9  ;;  %vm6465_vm3 = vcmp.ge.f32.partialorder %v6357_v9, 0.0 }
 0xb5a   : > { %v6020_v18 = vpop.f32.mrf.mxu2  ;;  %v6358_v51 = vpop.f32.mrf.mxu0 }
 0xb5b   : > { %v6021_v4 = vadd.f32 %v6020_v18, %v11540_v38  ;;  %v6593_v38 = vsel %vm6465_vm3, %v6357_v9, %v6529_v33 }
 0xb5d   : > { %v6190_v11 = vadd.f32 %v11608_v42, %v6021_v4 }
 0xb5f   : > { %v6359_v41 = vadd.f32 %v6358_v51, %v6190_v11  ;;  %6062 = vmatmul.bf16.gmra.mxu2 %v8310_v27  ;;  %v11641_v63 = vpop.f32.mrf.mxu3 }
 0xb61   : > { %vm6466_vm4 = vcmp.ge.f32.partialorder %v6359_v41, 0.0  ;;  %v6530_v13 = vmul.f32 0.05, %v6359_v41 }
 0xb62   : > { %v6023_v5 = vpop.f32.mrf.mxu2  ;;  %v6361_v35 = vpop.f32.mrf.mxu0  ;;  %6246 = vmatmul.bf16.gmra.mxu3 %v8410_v23  ;;  %v11870_v23 = vld [vmem:[#allocation56_spill] sm:$0xff] }
 0xb63   : > { %v6594_v26 = vsel %vm6466_vm4, %v6359_v41, %v6530_v13  ;;  %v6024_v42 = vadd.f32 %v6023_v5, %v11548_v3  ;;  %v11646_v3 = vpop.f32.mrf.mxu1  ;;  %v8441_v41 = vld [vmem:[#allocation24 + $0x798] sm:$0xf]  ;;  %v8371_v5 = vld [vmem:[#allocation24 + $0x730] sm:$0xf0] }
 0xb64   : > { %v8913_v16 = vpack.c.bf16 %v6594_v26, %v6593_v38  ;;  %v8816_v13 = vld [vmem:[#allocation24 + $0x7b4] sm:$0xf0] }
 0xb65   : > { %6400 = vmatmul.bf16.gmra.mxu0 %v8318_v24  ;;  %v6193_v2 = vadd.f32 %v11614_v21, %v6024_v42  ;;  %v8347_v21 = vld [vmem:[#allocation24 + $0x6f8] sm:$0xf0]  ;;  %v8795_v24 = vld [vmem:[#allocation24 + $0x714] sm:$0xf] }
 0xb66   : > { %9001 = vst [vmem:[%s11416_s28 + $0x88] sm:$0xff] %v8913_v16   ;;  %v8350_v51 = vor.u32 %v8788_v58, %v8347_v21  ;;  %v8374_v16 = vor.u32 %v8795_v24, %v8371_v5  ;;  %v8804_v5 = vld [vmem:[#allocation24 + $0x75c] sm:$0xf] }
 0xb67   : > { %v6362_v22 = vadd.f32 %v6361_v35, %v6193_v2  ;;  %v11649_v40 = vpop.f32.mrf.mxu3  ;;  %v8442_v35 = vor.u32 %v8816_v13, %v8441_v41 }
 0xb69   : > { %v6531_v60 = vmul.f32 0.05, %v6362_v22  ;;  %vm6467_vm5 = vcmp.ge.f32.partialorder %v6362_v22, 0.0 }
 0xb6a   : > { %v6025_v6 = vpop.f32.mrf.mxu2  ;;  %v6363_v56 = vpop.f32.mrf.mxu0 }
 0xb6b   : > { %v6026_v54 = vadd.f32 %v6025_v6, %v11555_v34  ;;  %v6595_v34 = vsel %vm6467_vm5, %v6362_v22, %v6531_v60  ;;  %v11655_v15 = vpop.f32.mrf.mxu1  ;;  %v5865_v6 = vadd.f32 %v11625_v50, %v11870_v23  ;;  %v8803_v50 = vld [vmem:[#allocation24 + $0x754] sm:$0xf] }
 0xb6d   : > { %v6195_v61 = vadd.f32 %v11617_v47, %v6026_v54 }
 0xb6f   : > { %v6364_v43 = vadd.f32 %v6363_v56, %v6195_v61  ;;  %6067 = vmatmul.bf16.gmra.mxu2 %v8342_v62  ;;  %v11652_v47 = vpop.f32.mrf.mxu3 }
 0xb71   : > { %vm6468_vm6 = vcmp.ge.f32.partialorder %v6364_v43, 0.0  ;;  %v6532_v18 = vmul.f32 0.05, %v6364_v43 }
 0xb72   : > { %v6028_v9 = vpop.f32.mrf.mxu2  ;;  %v6366_v4 = vpop.f32.mrf.mxu0  ;;  %6251 = vmatmul.bf16.gmra.mxu3 %v8442_v35  ;;  %v8411_v35 = vld [vmem:[#allocation24 + $0x778] sm:$0xf0] }
 0xb73   : > { %v6596_v27 = vsel %vm6468_vm6, %v6364_v43, %v6532_v18  ;;  %v6029_v11 = vadd.f32 %v6028_v9, %v11563_v59  ;;  %v11664_v56 = vpop.f32.mrf.mxu1  ;;  %v8473_v18 = vld [vmem:[#allocation24 + $0x7d8] sm:$0xf]  ;;  %v8403_v9 = vld [vmem:[#allocation24 + $0x770] sm:$0xf0] }
 0xb74   : > { %v8918_v53 = vpack.c.bf16 %v6596_v27, %v6595_v34  ;;  %v11871_v34 = vld [vmem:[#allocation57_spill] sm:$0xff]  ;;  %v8406_v24 = vor.u32 %v8803_v50, %v8403_v9  ;;  %v8812_v50 = vld [vmem:[#allocation24 + $0x79c] sm:$0xf] }
 0xb75   : > { %6405 = vmatmul.bf16.gmra.mxu0 %v8350_v51  ;;  %v6198_v33 = vadd.f32 %v11623_v32, %v6029_v11  ;;  %v8824_v51 = vld [vmem:[#allocation24 + $0x7f4] sm:$0xf0]  ;;  %v5867_v27 = vadd.f32 %v11632_v7, %v11871_v34  ;;  %v8443_v9 = vld [vmem:[#allocation24 + $0x7b8] sm:$0xf0] }
 0xb76   : > { %9002 = vst [vmem:[%s11416_s28 + $0x90] sm:$0xff] %v8918_v53  }
 0xb77   : > { %v6367_v42 = vadd.f32 %v6366_v4, %v6198_v33  ;;  %v11660_v57 = vpop.f32.mrf.mxu3  ;;  %v8474_v4 = vor.u32 %v8824_v51, %v8473_v18 }
 0xb79   : > { %v6533_v1 = vmul.f32 0.05, %v6367_v42  ;;  %vm6469_vm7 = vcmp.ge.f32.partialorder %v6367_v42, 0.0 }
 0xb7a   : > { %v6030_v38 = vpop.f32.mrf.mxu2  ;;  %v6368_v26 = vpop.f32.mrf.mxu0 }
 0xb7b   : > { %v6031_v59 = vadd.f32 %v6030_v38, %v11570_v28  ;;  %v8382_v28 = vor.u32 %v8796_v19, %v8379_v37  ;;  %v11672_v33 = vpop.f32.mrf.mxu1 }
 0xb7d   : > { %v6200_v2 = vadd.f32 %v11628_v44, %v6031_v59  ;;  %v6597_v44 = vsel %vm6469_vm7, %v6367_v42, %v6533_v1  ;;  %v11872_v42 = vld [vmem:[#allocation58_spill] sm:$0xff] }
 0xb7e   : > { %v5870_v7 = vadd.f32 %v11638_v36, %v11872_v42  ;;  %v11873_v36 = vld [vmem:[#allocation59_spill] sm:$0xff] }
 0xb7f   : > { %v6369_v32 = vadd.f32 %v6368_v26, %v6200_v2  ;;  %6072 = vmatmul.bf16.gmra.mxu2 %v8374_v16  ;;  %v11668_v43 = vpop.f32.mrf.mxu3  ;;  %v8414_v16 = vor.u32 %v8804_v5, %v8411_v35  ;;  %v8467_v42 = vld [vmem:[#allocation24 + $0x7f0] sm:$0xf0] }
 0xb81   : > { %vm6470_vm8 = vcmp.ge.f32.partialorder %v6369_v32, 0.0  ;;  %v6534_v22 = vmul.f32 0.05, %v6369_v32 }
 0xb82   : > { %v6033_v54 = vpop.f32.mrf.mxu2  ;;  %v6371_v62 = vpop.f32.mrf.mxu0  ;;  %6256 = vmatmul.bf16.gmra.mxu3 %v8474_v4 }
 0xb83   : > { %v6598_v61 = vsel %vm6470_vm8, %v6369_v32, %v6534_v22  ;;  %v6034_v58 = vadd.f32 %v6033_v54, %v5865_v6  ;;  %v11679_v6 = vpop.f32.mrf.mxu1  ;;  %v8435_v54 = vld [vmem:[#allocation24 + $0x7b0] sm:$0xf0] }
 0xb84   : > { %v8923_v21 = vpack.c.bf16 %v6598_v61, %v6597_v44 }
 0xb85   : > { %6410 = vmatmul.bf16.gmra.mxu0 %v8382_v28  ;;  %v6203_v60 = vadd.f32 %v11636_v17, %v6034_v58  ;;  %v8811_v28 = vld [vmem:[#allocation24 + $0x794] sm:$0xf] }
 0xb86   : > { %9003 = vst [vmem:[%s11416_s28 + $0x98] sm:$0xff] %v8923_v21  }
 0xb87   : > { %v6372_v41 = vadd.f32 %v6371_v62, %v6203_v60  ;;  %v11677_v2 = vpop.f32.mrf.mxu3  ;;  %v5872_v62 = vadd.f32 %v11646_v3, %v11873_v36  ;;  %v8438_v60 = vor.u32 %v8811_v28, %v8435_v54  ;;  %v11876_v36 = vld [vmem:[#allocation62_spill] sm:$0xff] }
 0xb89   : > { %v6535_v38 = vmul.f32 0.05, %v6372_v41  ;;  %vm6471_vm9 = vcmp.ge.f32.partialorder %v6372_v41, 0.0 }
 0xb8a   : > { %v6035_v11 = vpop.f32.mrf.mxu2  ;;  %v6373_v53 = vpop.f32.mrf.mxu0 }
 0xb8b   : > { %v6036_v13 = vadd.f32 %v6035_v11, %v5867_v27  ;;  %v6599_v1 = vsel %vm6471_vm9, %v6372_v41, %v6535_v38  ;;  %v5884_v4 = vpop.f32.mrf.mxu1 }
 0xb8d   : > { %v6205_v17 = vadd.f32 %v11641_v63, %v6036_v13 }
 0xb8f   : > { %v6374_v26 = vadd.f32 %v6373_v53, %v6205_v17  ;;  %6077 = vmatmul.bf16.gmra.mxu2 %v8406_v24  ;;  %v6219_v18 = vpop.f32.mrf.mxu3  ;;  %v8446_v53 = vor.u32 %v8812_v50, %v8443_v9 }
 0xb91   : > { %vm6472_vm10 = vcmp.ge.f32.partialorder %v6374_v26, 0.0  ;;  %v6536_v59 = vmul.f32 0.05, %v6374_v26 }
 0xb92   : > { %v6038_v19 = vpop.f32.mrf.mxu2  ;;  %v6376_v37 = vpop.f32.mrf.mxu0 }
 0xb93   : > { %v6600_v32 = vsel %vm6472_vm10, %v6374_v26, %v6536_v59  ;;  %v6039_v63 = vadd.f32 %v6038_v19, %v5870_v7  ;;  %v8819_v26 = vld [vmem:[#allocation24 + $0x7d4] sm:$0xf]  ;;  %v11875_v7 = vld [vmem:[#allocation61_spill] sm:$0xff] }
 0xb94   : > { %v8928_v23 = vpack.c.bf16 %v6600_v32, %v6599_v1  ;;  %v5877_v59 = vadd.f32 %v11664_v56, %v11875_v7  ;;  %v8470_v32 = vor.u32 %v8819_v26, %v8467_v42 }
 0xb95   : > { %6415 = vmatmul.bf16.gmra.mxu0 %v8414_v16  ;;  %v6208_v22 = vadd.f32 %v11649_v40, %v6039_v63  ;;  %v11874_v40 = vld [vmem:[#allocation60_spill] sm:$0xff] }
 0xb96   : > { %9004 = vst [vmem:[%s11416_s28 + $0xa0] sm:$0xff] %v8928_v23   ;;  %v5875_v11 = vadd.f32 %v11655_v15, %v11874_v40  ;;  %v5886_v15 = vpop.f32.mrf.mxu1  ;;  %v8820_v23 = vld [vmem:[#allocation24 + $0x7dc] sm:$0xf] }
 0xb97   : > { %v6377_v58 = vadd.f32 %v6376_v37, %v6208_v22  ;;  %v6222_v35 = vpop.f32.mrf.mxu3  ;;  %v8475_v22 = vld [vmem:[#allocation24 + $0x7f8] sm:$0xf0] }
 0xb99   : > { %v6537_v34 = vmul.f32 0.05, %v6377_v58  ;;  %vm6473_vm11 = vcmp.ge.f32.partialorder %v6377_v58, 0.0 }
 0xb9a   : > { %v6040_v44 = vpop.f32.mrf.mxu2  ;;  %v6378_v61 = vpop.f32.mrf.mxu0 }
 0xb9b   : > { %v6041_v21 = vadd.f32 %v6040_v44, %v5872_v62  ;;  %v6601_v24 = vsel %vm6473_vm11, %v6377_v58, %v6537_v34  ;;  %v5880_v62 = vadd.f32 %v11672_v33, %v11876_v36  ;;  %v8478_v44 = vor.u32 %v8820_v23, %v8475_v22 }
 0xb9c   : > { %v5882_v34 = vadd.f32 %v11679_v6, %v11250_v30 }
 0xb9d   : > { %v6210_v51 = vadd.f32 %v11652_v47, %v6041_v21 }
 0xb9e   : > { %v5889_v21 = vpop.f32.mrf.mxu1 }
 0xb9f   : > { %v6379_v27 = vadd.f32 %v6378_v61, %v6210_v51  ;;  %6082 = vmatmul.bf16.gmra.mxu2 %v8438_v60  ;;  %v5890_v23 = vadd.f32 %v5889_v21, %v11277_v10 }
 0xba1   : > { %vm6474_vm12 = vcmp.ge.f32.partialorder %v6379_v27, 0.0  ;;  %v6538_v3 = vmul.f32 0.05, %v6379_v27 }
 0xba2   : > { %v6043_v41 = vpop.f32.mrf.mxu2  ;;  %v6381_v13 = vpop.f32.mrf.mxu0 }
 0xba3   : > { %v6602_v17 = vsel %vm6474_vm12, %v6379_v27, %v6538_v3  ;;  %v6044_v5 = vadd.f32 %v6043_v41, %v5875_v11 }
 0xba4   : > { %v8933_v47 = vpack.c.bf16 %v6602_v17, %v6601_v24  ;;  %v5885_v17 = vadd.f32 %v5884_v4, %v11259_v31 }
 0xba5   : > { %6420 = vmatmul.bf16.gmra.mxu0 %v8446_v53  ;;  %v6213_v38 = vadd.f32 %v11660_v57, %v6044_v5  ;;  %v6224_v57 = vpop.f32.mrf.mxu3 }
 0xba6   : > { %9005 = vst [vmem:[%s11416_s28 + $0xa8] sm:$0xff] %v8933_v47   ;;  %v5891_v53 = vpop.f32.mrf.mxu1 }
 0xba7   : > { %v6382_v37 = vadd.f32 %v6381_v13, %v6213_v38 }
 0xba9   : > { %v6539_v28 = vmul.f32 0.05, %v6382_v37  ;;  %vm6475_vm13 = vcmp.ge.f32.partialorder %v6382_v37, 0.0 }
 0xbaa   : > { %v6045_v16 = vpop.f32.mrf.mxu2  ;;  %v6383_v19 = vpop.f32.mrf.mxu0 }
 0xbab   : > { %v6046_v1 = vadd.f32 %v6045_v16, %v5877_v59  ;;  %v6603_v60 = vsel %vm6475_vm13, %v6382_v37, %v6539_v28  ;;  %v5887_v16 = vadd.f32 %v5886_v15, %v11268_v25 }
 0xbad   : > { %v6215_v63 = vadd.f32 %v11668_v43, %v6046_v1  ;;  %v6227_v27 = vpop.f32.mrf.mxu3 }
 0xbae   : > { %v5894_v7 = vpop.f32.mrf.mxu1 }
 0xbaf   : > { %v6384_v54 = vadd.f32 %v6383_v19, %v6215_v63  ;;  %6087 = vmatmul.bf16.gmra.mxu2 %v8470_v32 }
 0xbb1   : > { %vm6476_vm14 = vcmp.ge.f32.partialorder %v6384_v54, 0.0  ;;  %v6540_v56 = vmul.f32 0.05, %v6384_v54 }
 0xbb2   : > { %v6048_v61 = vpop.f32.mrf.mxu2  ;;  %v6386_v58 = vpop.f32.mrf.mxu0 }
 0xbb3   : > { %v6604_v51 = vsel %vm6476_vm14, %v6384_v54, %v6540_v56  ;;  %v6049_v43 = vadd.f32 %v6048_v61, %v5880_v62 }
 0xbb4   : > { %v8938_v50 = vpack.c.bf16 %v6604_v51, %v6603_v60 }
 0xbb5   : > { %6425 = vmatmul.bf16.gmra.mxu0 %v8478_v44  ;;  %v6218_v9 = vadd.f32 %v11677_v2, %v6049_v43  ;;  %v6229_v6 = vpop.f32.mrf.mxu3 }
 0xbb6   : > { %9006 = vst [vmem:[%s11416_s28 + $0xb0] sm:$0xff] %v8938_v50   ;;  %v5896_v22 = vpop.f32.mrf.mxu1 }
 0xbb7   : > { %v6387_v11 = vadd.f32 %v6386_v58, %v6218_v9  ;;  %v5895_v9 = vadd.f32 %v5894_v7, %v11295_v8 }
 0xbb9   : > { %v6541_v13 = vmul.f32 0.05, %v6387_v11  ;;  %vm6477_vm15 = vcmp.ge.f32.partialorder %v6387_v11, 0.0 }
 0xbba   : > { %v6050_v40 = vpop.f32.mrf.mxu2  ;;  %v6388_v33 = vpop.f32.mrf.mxu0 }
 0xbbb   : > { %v6051_v3 = vadd.f32 %v6050_v40, %v5882_v34  ;;  %v6605_v38 = vsel %vm6477_vm15, %v6387_v11, %v6541_v13 }
 0xbbd   : > { %v6220_v41 = vadd.f32 %v6219_v18, %v6051_v3  ;;  %v6232_v4 = vpop.f32.mrf.mxu3 }
 0xbbe   : > { %v5899_v60 = vpop.f32.mrf.mxu1 }
 0xbbf   : > { %v6389_v24 = vadd.f32 %v6388_v33, %v6220_v41 }
 0xbc1   : > { %vm6478_vm0 = vcmp.ge.f32.partialorder %v6389_v24, 0.0  ;;  %v6542_v5 = vmul.f32 0.05, %v6389_v24 }
 0xbc2   : > { %v6053_v47 = vpop.f32.mrf.mxu2  ;;  %v6391_v2 = vpop.f32.mrf.mxu0 }
 0xbc3   : > { %v6606_v26 = vsel %vm6478_vm0, %v6389_v24, %v6542_v5  ;;  %v6054_v30 = vadd.f32 %v6053_v47, %v5885_v17  ;;  %v5897_v24 = vadd.f32 %v5896_v22, %v11304_v55 }
 0xbc4   : > { %v8943_v42 = vpack.c.bf16 %v6606_v26, %v6605_v38 }
 0xbc5   : > { %v6223_v59 = vadd.f32 %v6222_v35, %v6054_v30  ;;  %v6234_v44 = vpop.f32.mrf.mxu3 }
 0xbc6   : > { %9007 = vst [vmem:[%s11416_s28 + $0xb8] sm:$0xff] %v8943_v42   ;;  %v5901_v41 = vpop.f32.mrf.mxu1  ;;  %v5900_v42 = vadd.f32 %v5899_v60, %v11313_v48 }
 0xbc7   : > { %v6392_v37 = vadd.f32 %v6391_v2, %v6223_v59 }
 0xbc9   : > { %v6543_v32 = vmul.f32 0.05, %v6392_v37  ;;  %vm6479_vm1 = vcmp.ge.f32.partialorder %v6392_v37, 0.0 }
 0xbca   : > { %v6055_v18 = vpop.f32.mrf.mxu2  ;;  %v6393_v19 = vpop.f32.mrf.mxu0 }
 0xbcb   : > { %v6056_v1 = vadd.f32 %v6055_v18, %v5887_v16  ;;  %v6607_v35 = vsel %vm6479_vm1, %v6392_v37, %v6543_v32 }
 0xbcd   : > { %v6225_v31 = vadd.f32 %v6224_v57, %v6056_v1  ;;  %v5892_v57 = vadd.f32 %v5891_v53, %v11286_v52  ;;  %v6237_v40 = vpop.f32.mrf.mxu3 }
 0xbce   : > { %v5904_v26 = vpop.f32.mrf.mxu1 }
 0xbcf   : > { %v6394_v63 = vadd.f32 %v6393_v19, %v6225_v31 }
 0xbd1   : > { %vm6480_vm2 = vcmp.ge.f32.partialorder %v6394_v63, 0.0  ;;  %v6544_v28 = vmul.f32 0.05, %v6394_v63 }
 0xbd2   : > { %v6058_v54 = vpop.f32.mrf.mxu2  ;;  %v6396_v36 = vpop.f32.mrf.mxu0 }
 0xbd3   : > { %v6608_v62 = vsel %vm6480_vm2, %v6394_v63, %v6544_v28  ;;  %v6059_v25 = vadd.f32 %v6058_v54, %v5890_v23 }
 0xbd4   : > { %v8948_v15 = vpack.c.bf16 %v6608_v62, %v6607_v35  ;;  %v5905_v62 = vadd.f32 %v5904_v26, %v11331_v46 }
 0xbd5   : > { %v6228_v56 = vadd.f32 %v6227_v27, %v6059_v25  ;;  %v6239_v38 = vpop.f32.mrf.mxu3 }
 0xbd6   : > { %9008 = vst [vmem:[%s11416_s28 + $0xc0] sm:$0xff] %v8948_v15   ;;  %v5906_v32 = vpop.f32.mrf.mxu1 }
 0xbd7   : > { %v6397_v51 = vadd.f32 %v6396_v36, %v6228_v56 }
 0xbd9   : > { %v6545_v21 = vmul.f32 0.05, %v6397_v51  ;;  %vm6481_vm3 = vcmp.ge.f32.partialorder %v6397_v51, 0.0 }
 0xbda   : > { %v6060_v61 = vpop.f32.mrf.mxu2  ;;  %v6398_v58 = vpop.f32.mrf.mxu0 }
 0xbdb   : > { %v6061_v43 = vadd.f32 %v6060_v61, %v5892_v57  ;;  %v6609_v11 = vsel %vm6481_vm3, %v6397_v51, %v6545_v21  ;;  %v5907_v51 = vadd.f32 %v5906_v32, %v11340_v14 }
 0xbdd   : > { %v6230_v10 = vadd.f32 %v6229_v6, %v6061_v43  ;;  %v6242_v1 = vpop.f32.mrf.mxu3 }
 0xbdf   : > { %v6399_v50 = vadd.f32 %v6398_v58, %v6230_v10 }
 0xbe1   : > { %vm6482_vm4 = vcmp.ge.f32.partialorder %v6399_v50, 0.0  ;;  %v6546_v34 = vmul.f32 0.05, %v6399_v50 }
 0xbe2   : > { %v6063_v33 = vpop.f32.mrf.mxu2  ;;  %v6401_v27 = vpop.f32.mrf.mxu0 }
 0xbe3   : > { %v6610_v3 = vsel %vm6482_vm4, %v6399_v50, %v6546_v34  ;;  %v6064_v52 = vadd.f32 %v6063_v33, %v5895_v9 }
 0xbe4   : > { %v8953_v53 = vpack.c.bf16 %v6610_v3, %v6609_v11 }
 0xbe5   : > { %v6233_v13 = vadd.f32 %v6232_v4, %v6064_v52  ;;  %v5902_v4 = vadd.f32 %v5901_v41, %v11322_v12  ;;  %v6244_v35 = vpop.f32.mrf.mxu3 }
 0xbe6   : > { %9009 = vst [vmem:[%s11416_s28 + $0xc8] sm:$0xff] %v8953_v53  }
 0xbe7   : > { %v6402_v47 = vadd.f32 %v6401_v27, %v6233_v13 }
 0xbe9   : > { %v6547_v30 = vmul.f32 0.05, %v6402_v47  ;;  %vm6483_vm5 = vcmp.ge.f32.partialorder %v6402_v47, 0.0 }
 0xbea   : > { %v6065_v17 = vpop.f32.mrf.mxu2  ;;  %v6403_v5 = vpop.f32.mrf.mxu0 }
 0xbeb   : > { %v6066_v2 = vadd.f32 %v6065_v17, %v5897_v24  ;;  %v6611_v18 = vsel %vm6483_vm5, %v6402_v47, %v6547_v30 }
 0xbed   : > { %v6235_v8 = vadd.f32 %v6234_v44, %v6066_v2  ;;  %v5909_v44 = vpop.f32.mrf.mxu1  ;;  %v6247_v43 = vpop.f32.mrf.mxu3 }
 0xbee   : > { %v5910_v27 = vadd.f32 %v5909_v44, %v11349_v0 }
 0xbef   : > { %v6404_v6 = vadd.f32 %v6403_v5, %v6235_v8 }
 0xbf1   : > { %vm6484_vm6 = vcmp.ge.f32.partialorder %v6404_v6, 0.0  ;;  %v6548_v7 = vmul.f32 0.05, %v6404_v6 }
 0xbf2   : > { %v6068_v59 = vpop.f32.mrf.mxu2  ;;  %v6406_v16 = vpop.f32.mrf.mxu0 }
 0xbf3   : > { %v6612_v19 = vsel %vm6484_vm6, %v6404_v6, %v6548_v7  ;;  %v6069_v55 = vadd.f32 %v6068_v59, %v5900_v42 }
 0xbf4   : > { %v8958_v37 = vpack.c.bf16 %v6612_v19, %v6611_v18 }
 0xbf5   : > { %v6238_v31 = vadd.f32 %v6237_v40, %v6069_v55  ;;  %v5911_v46 = vpop.f32.mrf.mxu1  ;;  %v6249_v24 = vpop.f32.mrf.mxu3 }
 0xbf6   : > { %9010 = vst [vmem:[%s11416_s28 + $0xd0] sm:$0xff] %v8958_v37   ;;  %v5912_v47 = vadd.f32 %v5911_v46, %v11358_v20 }
 0xbf7   : > { %v6407_v22 = vadd.f32 %v6406_v16, %v6238_v31 }
 0xbf9   : > { %v6549_v54 = vmul.f32 0.05, %v6407_v22  ;;  %vm6485_vm7 = vcmp.ge.f32.partialorder %v6407_v22, 0.0 }
 0xbfa   : > { %v6070_v63 = vpop.f32.mrf.mxu2  ;;  %v6408_v23 = vpop.f32.mrf.mxu0 }
 0xbfb   : > { %v6071_v28 = vadd.f32 %v6070_v63, %v5902_v4  ;;  %v6613_v57 = vsel %vm6485_vm7, %v6407_v22, %v6549_v54 }
 0xbfd   : > { %v6240_v48 = vadd.f32 %v6239_v38, %v6071_v28  ;;  %v5914_v17 = vpop.f32.mrf.mxu1  ;;  %v6252_v30 = vpop.f32.mrf.mxu3 }
 0xbfe   : > { %v5915_v7 = vadd.f32 %v5914_v17, %v11367_v39 }
 0xbff   : > { %v6409_v36 = vadd.f32 %v6408_v23, %v6240_v48 }
 0xc01   : > { %vm6486_vm8 = vcmp.ge.f32.partialorder %v6409_v36, 0.0  ;;  %v6550_v25 = vmul.f32 0.05, %v6409_v36 }
 0xc02   : > { %v6073_v15 = vpop.f32.mrf.mxu2  ;;  %v6411_v56 = vpop.f32.mrf.mxu0 }
 0xc03   : > { %v6614_v12 = vsel %vm6486_vm8, %v6409_v36, %v6550_v25  ;;  %v6074_v61 = vadd.f32 %v6073_v15, %v5905_v62 }
 0xc04   : > { %v8963_v58 = vpack.c.bf16 %v6614_v12, %v6613_v57 }
 0xc05   : > { %v6243_v60 = vadd.f32 %v6242_v1, %v6074_v61  ;;  %v5916_v59 = vpop.f32.mrf.mxu1  ;;  %v6254_v4 = vpop.f32.mrf.mxu3 }
 0xc06   : > { %9011 = vst [vmem:[%s11416_s28 + $0xd8] sm:$0xff] %v8963_v58   ;;  %v5917_v32 = vadd.f32 %v5916_v59, %v11376_v49 }
 0xc07   : > { %v6412_v50 = vadd.f32 %v6411_v56, %v6243_v60 }
 0xc09   : > { %v6551_v40 = vmul.f32 0.05, %v6412_v50  ;;  %vm6487_vm9 = vcmp.ge.f32.partialorder %v6412_v50, 0.0 }
 0xc0a   : > { %v6075_v10 = vpop.f32.mrf.mxu2  ;;  %v6413_v21 = vpop.f32.mrf.mxu0 }
 0xc0b   : > { %v6076_v9 = vadd.f32 %v6075_v10, %v5907_v51  ;;  %v6615_v53 = vsel %vm6487_vm9, %v6412_v50, %v6551_v40 }
 0xc0d   : > { %v6245_v34 = vadd.f32 %v6244_v35, %v6076_v9  ;;  %v5919_v48 = vpop.f32.mrf.mxu1  ;;  %v6257_v15 = vpop.f32.mrf.mxu3 }
 0xc0e   : > { %v5920_v35 = vadd.f32 %v5919_v48, %v11385_v29 }
 0xc0f   : > { %v6414_v33 = vadd.f32 %v6413_v21, %v6245_v34 }
 0xc11   : > { %vm6488_vm10 = vcmp.ge.f32.partialorder %v6414_v33, 0.0  ;;  %v6552_v11 = vmul.f32 0.05, %v6414_v33 }
 0xc12   : > { %v6078_v3 = vpop.f32.mrf.mxu2  ;;  %v6416_v52 = vpop.f32.mrf.mxu0 }
 0xc13   : > { %v6616_v41 = vsel %vm6488_vm10, %v6414_v33, %v6552_v11  ;;  %v6079_v14 = vadd.f32 %v6078_v3, %v5910_v27 }
 0xc14   : > { %v8968_v13 = vpack.c.bf16 %v6616_v41, %v6615_v53 }
 0xc15   : > { %v6248_v5 = vadd.f32 %v6247_v43, %v6079_v14  ;;  %v5921_v61 = vpop.f32.mrf.mxu1  ;;  %v6259_v21 = vpop.f32.mrf.mxu3 }
 0xc16   : > { %9012 = vst [vmem:[%s11416_s28 + $0xe0] sm:$0xff] %v8968_v13   ;;  %v5922_v60 = vadd.f32 %v5921_v61, %v11394_v45 }
 0xc17   : > { %v6417_v8 = vadd.f32 %v6416_v52, %v6248_v5 }
 0xc19   : > { %v6553_v6 = vmul.f32 0.05, %v6417_v8  ;;  %vm6489_vm11 = vcmp.ge.f32.partialorder %v6417_v8, 0.0 }
 0xc1a   : > { %v6080_v2 = vpop.f32.mrf.mxu2  ;;  %v6418_v38 = vpop.f32.mrf.mxu0 }
 0xc1b   : > { %v6081_v26 = vadd.f32 %v6080_v2, %v5912_v47  ;;  %v6617_v55 = vsel %vm6489_vm11, %v6417_v8, %v6553_v6 }
 0xc1d   : > { %v6250_v0 = vadd.f32 %v6249_v24, %v6081_v26 }
 0xc1f   : > { %v6419_v42 = vadd.f32 %v6418_v38, %v6250_v0 }
 0xc21   : > { %vm6490_vm12 = vcmp.ge.f32.partialorder %v6419_v42, 0.0  ;;  %v6554_v16 = vmul.f32 0.05, %v6419_v42 }
 0xc22   : > { %v6083_v18 = vpop.f32.mrf.mxu2  ;;  %v6421_v19 = vpop.f32.mrf.mxu0 }
 0xc23   : > { %v6618_v37 = vsel %vm6490_vm12, %v6419_v42, %v6554_v16  ;;  %v6084_v20 = vadd.f32 %v6083_v18, %v5915_v7 }
 0xc24   : > { %v8973_v1 = vpack.c.bf16 %v6618_v37, %v6617_v55 }
 0xc25   : > { %v6253_v31 = vadd.f32 %v6252_v30, %v6084_v20 }
 0xc26   : > { %9013 = vst [vmem:[%s11416_s28 + $0xe8] sm:$0xff] %v8973_v1  }
 0xc27   : > { %v6422_v22 = vadd.f32 %v6421_v19, %v6253_v31 }
 0xc29   : > { %v6555_v54 = vmul.f32 0.05, %v6422_v22  ;;  %vm6491_vm13 = vcmp.ge.f32.partialorder %v6422_v22, 0.0 }
 0xc2a   : > { %v6085_v63 = vpop.f32.mrf.mxu2  ;;  %v6423_v23 = vpop.f32.mrf.mxu0 }
 0xc2b   : > { %v6086_v28 = vadd.f32 %v6085_v63, %v5917_v32  ;;  %v6619_v56 = vsel %vm6491_vm13, %v6422_v22, %v6555_v54 }
 0xc2d   : > { %v6255_v39 = vadd.f32 %v6254_v4, %v6086_v28 }
 0xc2f   : > { %v6424_v36 = vadd.f32 %v6423_v23, %v6255_v39 }
 0xc31   : > { %vm6492_vm14 = vcmp.ge.f32.partialorder %v6424_v36, 0.0  ;;  %v6556_v62 = vmul.f32 0.05, %v6424_v36 }
 0xc32   : > { %v6088_v25 = vpop.f32.mrf.mxu2  ;;  %v6426_v12 = vpop.f32.mrf.mxu0 }
 0xc33   : > { %v6620_v44 = vsel %vm6492_vm14, %v6424_v36, %v6556_v62  ;;  %v6089_v57 = vadd.f32 %v6088_v25, %v5920_v35 }
 0xc34   : > { %v8978_v49 = vpack.c.bf16 %v6620_v44, %v6619_v56 }
 0xc35   : > { %v6258_v58 = vadd.f32 %v6257_v15, %v6089_v57 }
 0xc36   : > { %9014 = vst [vmem:[%s11416_s28 + $0xf0] sm:$0xff] %v8978_v49  }
 0xc37   : > { %v6427_v43 = vadd.f32 %v6426_v12, %v6258_v58 }
 0xc39   : > { %v6557_v9 = vmul.f32 0.05, %v6427_v43  ;;  %vm6493_vm15 = vcmp.ge.f32.partialorder %v6427_v43, 0.0 }
 0xc3a   : > { %v6090_v51 = vpop.f32.mrf.mxu2  ;;  %v6428_v50 = vpop.f32.mrf.mxu0 }
 0xc3b   : > { %v6091_v10 = vadd.f32 %v6090_v51, %v5922_v60  ;;  %v6621_v40 = vsel %vm6493_vm15, %v6427_v43, %v6557_v9 }
 0xc3d   : > { %v6260_v29 = vadd.f32 %v6259_v21, %v6091_v10 }
 0xc3f   : > { %v6429_v46 = vadd.f32 %v6428_v50, %v6260_v29 }
 0xc41   : > { %vm6494_vm0 = vcmp.ge.f32.partialorder %v6429_v46, 0.0  ;;  %v6558_v34 = vmul.f32 0.05, %v6429_v46 }
 0xc43   : > { %v6622_v33 = vsel %vm6494_vm0, %v6429_v46, %v6558_v34 }
 0xc44   : > { %v8983_v27 = vpack.c.bf16 %v6622_v33, %v6621_v40 }
 0xc46   : > { %9015 = vst [vmem:[%s11416_s28 + $0xf8] sm:$0xff] %v8983_v27  }
 0xc47 PF: > { %p35_p3 = scmp.ge.s32.totalorder %s10045_s6, 4   ;;  %s11877_s24 = smov %s9767_s25 }
 0xc48   : > { %s11878_s25 = smov %s9771_s26  ;;  %s11879_s26 = smov %s10056_s17 }
 0xc49   : > { %s11880_s27 = smov %s10045_s6  ;;  %37 = sbr.rel (!%p35_p3) target bundleno = 21 (0x15), region = 194 }
 0xc4e   :  { %6775 = vsyncpa [#allocation3], 1 }
 0xc4f   :  { %6777 = vsyncpa [#allocation3 + $0x1], 1 }
 0xc50   :  { %6778 = vsyncpa [#allocation5], 1 }
 0xc51   :  { %6779 = vsyncpa [#allocation8], 1 }
 0xc52   :  { %6780 = vsyncpa [#allocation11], 1 }
 0xc53   :  { %6781 = vsyncpa [#allocation14], 1 }
 0xc54   :  { %6782 = vsyncpa [#allocation17], 1 }
 0xc55   :  { %6783 = vsyncpa [#allocation20], 1 }
 0xc56   :  { %6784 = vsyncpa [#allocation23], 1 }
 0xc57   :  { %6785 = vsyncpa [#allocation26], 1 }

</bundles_post_ra>
